<compile_context>
chip_gen: v5e
topology: v5e:2x2
jax: 0.10.0
libtpu: 0.0.40
codegen_flags: <defaults>
</compile_context>

<pallas_src>
import functools

import jax
import jax.numpy as jnp
from jax import lax
from jax.experimental import pallas as pl
from jax.experimental.pallas import tpu as pltpu

BN_EPS = 1e-5


# ----------------------------------------------------------------------------
# Fused decoder kernel (no grid — everything lives in VMEM for one invocation).
# ----------------------------------------------------------------------------
def _decoder_fused_kernel(*refs, L, T, N, H, Opad):
    (x_ref, h0_ref, c0_ref, enc_ref, gamma_ref, beta_ref,
     w_ref, bfc_ref) = refs[:8]
    lstm_refs = refs[8:8 + 3 * L]
    out_ref = refs[8 + 3 * L]
    xg_sc, hs_sc, cat_sc = refs[8 + 3 * L + 1:]

    C = 2 * H
    P = T * C

    # ---------------- LSTM stack (time-major, fully unrolled) ----------------
    for l in range(L):
        wih_ref = lstm_refs[3 * l + 0]                   # (D_in, 4H)
        whh_ref = lstm_refs[3 * l + 1]                   # (H, 4H)
        b_ref = lstm_refs[3 * l + 2]                     # (1, 4H)

        # NOTE: hs_sc (output of layer l-1) is fully consumed by this load/dot
        # before the t-loop below overwrites it (read-before-write ordering is
        # preserved on the ref).
        layer_in = x_ref[...] if l == 0 else hs_sc[...]  # (T*N, D_in)
        # Hoisted input projection (+ bias): one MXU matmul per layer.
        xg_sc[...] = (jnp.dot(layer_in, wih_ref[...],
                              preferred_element_type=jnp.float32)
                      + b_ref[...])                      # (T*N, 4H)

        whh = whh_ref[...]                               # (H, 4H)
        h = h0_ref[l]                                    # (N, H)
        c = c0_ref[l]                                    # (N, H)

        for t in range(T):                               # static, fully unrolled
            gates = (xg_sc[t * N:(t + 1) * N, :]
                     + jnp.dot(h, whh, preferred_element_type=jnp.float32))
            # Single full-width sigmoid pass over the whole (N, 4H) vreg,
            # tanh only on the g slice -> 3 EUP passes/step instead of 5.
            sig = jax.nn.sigmoid(gates)
            i_g = sig[:, 0:H]
            f_g = sig[:, H:2 * H]
            o_g = sig[:, 3 * H:4 * H]
            g_g = jnp.tanh(gates[:, 2 * H:3 * H])
            c = f_g * c + i_g * g_g
            h = o_g * jnp.tanh(c)
            # Last layer reuses hs_sc to stage decoder_hs for the attention.
            hs_sc[t * N:(t + 1) * N, :] = h

    # ---------------- Dot attention (hoisted off the recurrence) -------------
    enc = enc_ref[...]                                   # (N, Te, H)
    for t in range(T):
        h_t = hs_sc[t * N:(t + 1) * N, :]                          # (N, H)
        scores = jnp.sum(h_t[:, None, :] * enc, axis=-1)           # (N, Te)
        mx = jnp.max(scores, axis=-1, keepdims=True)
        p = jnp.exp(scores - mx)
        inv = pl.reciprocal(jnp.sum(p, axis=-1, keepdims=True), approx=False)
        attn = p * inv                                             # (N, Te)
        ctx = jnp.sum(attn[:, :, None] * enc, axis=1)              # (N, H)
        base = t * C
        cat_sc[:, base:base + H] = ctx
        cat_sc[:, base + H:base + C] = h_t

    # ---------------- BatchNorm1d over the reshape(N, 2H, T) view ------------
    # Channel c of the PyTorch reshape corresponds to flat positions
    # [c*T, (c+1)*T) of the per-sample (T*2H,) vector.  The 0/1 channel maps
    # are generated in-kernel (no HBM traffic) and turn the channel reduction /
    # broadcast-back into plain MXU matmuls.
    p_row = lax.broadcasted_iota(jnp.int32, (P, C), 0)
    c_col = lax.broadcasted_iota(jnp.int32, (P, C), 1)
    Mmap = jnp.where((p_row >= c_col * T) & (p_row < c_col * T + T),
                     1.0, 0.0)                                      # (P, C)
    c_row = lax.broadcasted_iota(jnp.int32, (C, P), 0)
    p_col = lax.broadcasted_iota(jnp.int32, (C, P), 1)
    Mt = jnp.where((p_col >= c_row * T) & (p_col < c_row * T + T),
                   1.0, 0.0)                                        # (C, P)

    cat = cat_sc[...]                                               # (N, P)
    cnt = float(N * T)

    colsum = jnp.sum(cat, axis=0, keepdims=True)                    # (1, P)
    mean_c = jnp.dot(colsum, Mmap,
                     preferred_element_type=jnp.float32) / cnt      # (1, C)
    mean_f = jnp.dot(mean_c, Mt,
                     preferred_element_type=jnp.float32)            # (1, P)
    d = cat - mean_f
    var_c = jnp.dot(jnp.sum(d * d, axis=0, keepdims=True), Mmap,
                    preferred_element_type=jnp.float32) / cnt       # (1, C)

    scale_c = gamma_ref[...] * lax.rsqrt(var_c + BN_EPS)            # (1, C)
    shift_c = beta_ref[...] - mean_c * scale_c                      # (1, C)
    scale_f = jnp.dot(scale_c, Mt, preferred_element_type=jnp.float32)  # (1, P)
    shift_f = jnp.dot(shift_c, Mt, preferred_element_type=jnp.float32)  # (1, P)
    bn = cat * scale_f + shift_f                                    # (N, P)

    # ---------------- Final Linear: T small per-step matmuls -----------------
    # (no block-diagonal Wbig; output is still one lane-dense (N, T*Opad) slab)
    w = w_ref[...]                                                  # (C, Opad)
    bfc = bfc_ref[...]                                              # (1, Opad)
    for t in range(T):
        blk = jnp.dot(bn[:, t * C:(t + 1) * C], w,
                      preferred_element_type=jnp.float32) + bfc     # (N, Opad)
        out_ref[:, t * Opad:(t + 1) * Opad] = blk


# ----------------------------------------------------------------------------
# Wrapper: minimal layout plumbing, one pallas_call for the whole forward.
# ----------------------------------------------------------------------------
def decoder_forward(params, x, h0, c0, encoder_hs):
    N, T, D = x.shape
    L, _, H = h0.shape
    O = params['fc_w_t'].shape[1]
    C = 2 * H
    Opad = max(O, -(-128 // T))          # pad so the final store is lane-dense

    # Time-major flatten of the decoder input (outside the kernel).
    x_tm = jnp.transpose(x, (1, 0, 2)).reshape(T * N, D)

    gamma = params['bn_gamma'].reshape(1, C)
    beta = params['bn_beta'].reshape(1, C)

    # Small padded fc weight / bias (Opad lanes); no block-diagonal expansion.
    w_pad = jnp.zeros((C, Opad), jnp.float32).at[:, :O].set(params['fc_w_t'])
    b_pad = jnp.zeros((1, Opad), jnp.float32).at[:, :O].set(params['fc_b'])

    lstm_inputs = []
    for l in range(L):
        p = params['lstm'][l]
        lstm_inputs += [p['wih_t'], p['whh_t'], p['b']]

    kernel = functools.partial(_decoder_fused_kernel,
                               L=L, T=T, N=N, H=H, Opad=Opad)
    out = pl.pallas_call(
        kernel,
        out_shape=jax.ShapeDtypeStruct((N, T * Opad), jnp.float32),
        scratch_shapes=[
            pltpu.VMEM((T * N, 4 * H), jnp.float32),   # hoisted input projection
            pltpu.VMEM((T * N, H), jnp.float32),       # per-layer hidden states
            pltpu.VMEM((N, T * C), jnp.float32),       # [context ; decoder_h] flat
        ],
    )(x_tm, h0, c0, encoder_hs, gamma, beta, w_pad, b_pad, *lstm_inputs)

    return out.reshape(N, T, Opad)[:, :, :O]


# ----------------------------------------------------------------------------
# Deterministic parameter init (mirrors PyTorch default init shapes).
# ----------------------------------------------------------------------------
def init_params(key, input_size, hidden_size, output_size, num_layers):
    params = {'lstm': []}
    k = key
    bound = 1.0 / float(jnp.sqrt(jnp.float32(hidden_size)))
    for l in range(num_layers):
        in_dim = input_size if l == 0 else hidden_size
        k, k1, k2, k3, k4 = jax.random.split(k, 5)
        wih = jax.random.uniform(k1, (4 * hidden_size, in_dim), jnp.float32, -bound, bound)
        whh = jax.random.uniform(k2, (4 * hidden_size, hidden_size), jnp.float32, -bound, bound)
        bih = jax.random.uniform(k3, (4 * hidden_size,), jnp.float32, -bound, bound)
        bhh = jax.random.uniform(k4, (4 * hidden_size,), jnp.float32, -bound, bound)
        params['lstm'].append({
            'wih_t': wih.T,                                    # (in_dim, 4H)
            'whh_t': whh.T,                                    # (H, 4H)
            'b': (bih + bhh).reshape(1, 4 * hidden_size),      # (1, 4H)
        })
    C = 2 * hidden_size
    k, kg, kb, kw, kfb = jax.random.split(k, 5)
    params['bn_gamma'] = jax.random.uniform(kg, (C, 1), jnp.float32, 0.5, 1.5)
    params['bn_beta'] = jax.random.uniform(kb, (C, 1), jnp.float32, -0.5, 0.5)
    fbound = 1.0 / float(jnp.sqrt(jnp.float32(C)))
    fw = jax.random.uniform(kw, (output_size, C), jnp.float32, -fbound, fbound)
    fb = jax.random.uniform(kfb, (output_size,), jnp.float32, -fbound, fbound)
    params['fc_w_t'] = fw.T                                    # (2H, O)
    params['fc_b'] = fb.reshape(1, output_size)
    return params


# ----------------------------------------------------------------------------
# Pure-JAX reference (mirrors the PyTorch forward) for correctness checking.
# ----------------------------------------------------------------------------
def reference_forward(params, x, h0, c0, encoder_hs):
    N, T, _ = x.shape
    H = h0.shape[-1]
    layer_in = x
    for l, p in enumerate(params['lstm']):
        wih_t, whh_t, b = p['wih_t'], p['whh_t'], p['b'][0]

        def step(carry, xt, wih_t=wih_t, whh_t=whh_t, b=b):
            h, c = carry
            gates = xt @ wih_t + h @ whh_t + b
            i = jax.nn.sigmoid(gates[:, 0:H])
            f = jax.nn.sigmoid(gates[:, H:2 * H])
            g = jnp.tanh(gates[:, 2 * H:3 * H])
            o = jax.nn.sigmoid(gates[:, 3 * H:4 * H])
            c_new = f * c + i * g
            h_new = o * jnp.tanh(c_new)
            return (h_new, c_new), h_new

        _, hs = lax.scan(step, (h0[l], c0[l]), jnp.transpose(layer_in, (1, 0, 2)))
        layer_in = jnp.transpose(hs, (1, 0, 2))
    decoder_hs = layer_in                                       # (N, T, H)

    scores = jnp.einsum('ntd,nsd->nts', decoder_hs, encoder_hs)
    attn = jax.nn.softmax(scores, axis=-1)
    ctx = jnp.einsum('nts,nsd->ntd', attn, encoder_hs)
    outputs = jnp.concatenate([ctx, decoder_hs], axis=-1)       # (N, T, 2H)

    outputs = outputs.reshape(N, 2 * H, T)
    mean = outputs.mean(axis=(0, 2), keepdims=True)
    var = ((outputs - mean) ** 2).mean(axis=(0, 2), keepdims=True)
    outputs = (outputs - mean) / jnp.sqrt(var + BN_EPS)
    outputs = outputs * params['bn_gamma'][None, :, :] + params['bn_beta'][None, :, :]
    outputs = outputs.reshape(N, T, 2 * H)

    return outputs @ params['fc_w_t'] + params['fc_b'][0]


if __name__ == "__main__":
    # Small shapes consistent with the module:
    #   input_size=8, hidden_size=32, output_size=2, num_layers=2, dropout=0.0
    # (batch chosen as 8 so every per-step sublane block is (8,128)-aligned)
    N, T, D, H, O, L = 8, 8, 8, 32, 2, 2
    Te = 10   # encoder sequence length (can differ from decoder T)

    key = jax.random.PRNGKey(0)
    kp, kx, kh, kc, ke = jax.random.split(key, 5)
    params = init_params(kp, D, H, O, L)
    x = jax.random.normal(kx, (N, T, D), jnp.float32)
    h0 = jax.random.normal(kh, (L, N, H), jnp.float32)
    c0 = jax.random.normal(kc, (L, N, H), jnp.float32)
    encoder_hs = jax.random.normal(ke, (N, Te, H), jnp.float32)

    pred = decoder_forward(params, x, h0, c0, encoder_hs)
    pred = jax.block_until_ready(pred)

    ref = reference_forward(params, x, h0, c0, encoder_hs)
    assert pred.shape == (N, T, O), pred.shape
    max_err = float(jnp.max(jnp.abs(pred - ref)))
    assert jnp.allclose(pred, ref, atol=1e-4, rtol=1e-4), f"max_err={max_err}"

    print("KERNEL_OK")
</pallas_src>

<mosaic_0001>
module attributes {stable_mosaic.version = 11 : i64} {
  func.func @_decoder_fused_kernel(%arg0: memref<64x8xf32, #tpu.memory_space<vmem>>, %arg1: memref<2x8x32xf32, #tpu.memory_space<vmem>>, %arg2: memref<2x8x32xf32, #tpu.memory_space<vmem>>, %arg3: memref<8x10x32xf32, #tpu.memory_space<vmem>>, %arg4: memref<1x64xf32, #tpu.memory_space<vmem>>, %arg5: memref<1x64xf32, #tpu.memory_space<vmem>>, %arg6: memref<64x16xf32, #tpu.memory_space<vmem>>, %arg7: memref<1x16xf32, #tpu.memory_space<vmem>>, %arg8: memref<8x128xf32, #tpu.memory_space<vmem>>, %arg9: memref<32x128xf32, #tpu.memory_space<vmem>>, %arg10: memref<1x128xf32, #tpu.memory_space<vmem>>, %arg11: memref<32x128xf32, #tpu.memory_space<vmem>>, %arg12: memref<32x128xf32, #tpu.memory_space<vmem>>, %arg13: memref<1x128xf32, #tpu.memory_space<vmem>>, %arg14: memref<8x128xf32, #tpu.memory_space<vmem>>, %arg15: memref<64x128xf32, #tpu.memory_space<vmem>>, %arg16: memref<64x32xf32, #tpu.memory_space<vmem>>, %arg17: memref<8x512xf32, #tpu.memory_space<vmem>>) attributes {dimension_semantics = [], scalar_prefetch = 0 : i64, scratch_operands = 3 : i64, tpu.core_type = #tpu.core_type<tc>} {
    %c0 = arith.constant 0 : index
    %c0_0 = arith.constant 0 : index
    %0 = vector.load %arg0[%c0, %c0_0] : memref<64x8xf32, #tpu.memory_space<vmem>>, vector<64x8xf32>
    %c0_1 = arith.constant 0 : index
    %c0_2 = arith.constant 0 : index
    %1 = vector.load %arg8[%c0_1, %c0_2] : memref<8x128xf32, #tpu.memory_space<vmem>>, vector<8x128xf32>
    %cst = arith.constant dense<0.000000e+00> : vector<64x128xf32>
    %2 = tpu.matmul %0, %1, %cst {dimension_numbers = #tpu.dot_dimension_numbers<[1], [0], [0], [1], [0, 0, 1, 1], [], []>} : vector<64x8xf32>, vector<8x128xf32>, vector<64x128xf32> -> vector<64x128xf32>
    %c0_3 = arith.constant 0 : index
    %c0_4 = arith.constant 0 : index
    %3 = vector.load %arg10[%c0_3, %c0_4] : memref<1x128xf32, #tpu.memory_space<vmem>>, vector<1x128xf32>
    %4 = vector.broadcast %3 : vector<1x128xf32> to vector<64x128xf32>
    %5 = arith.addf %2, %4 : vector<64x128xf32>
    %c0_5 = arith.constant 0 : index
    %c0_6 = arith.constant 0 : index
    %6 = vector.load %arg15[%c0_5, %c0_6] : memref<64x128xf32, #tpu.memory_space<vmem>>, vector<64x128xf32>
    tpu.vector_store %arg15[%c0_5, %c0_6], %5 {strides = array<i32>} : memref<64x128xf32, #tpu.memory_space<vmem>>, vector<64x128xf32>,
    %c0_7 = arith.constant 0 : index
    %c0_8 = arith.constant 0 : index
    %7 = vector.load %arg9[%c0_7, %c0_8] : memref<32x128xf32, #tpu.memory_space<vmem>>, vector<32x128xf32>
    %c0_9 = arith.constant 0 : index
    %c0_10 = arith.constant 0 : index
    %c0_11 = arith.constant 0 : index
    %8 = vector.load %arg1[%c0_9, %c0_10, %c0_11] : memref<2x8x32xf32, #tpu.memory_space<vmem>>, vector<1x8x32xf32>
    %9 = vector.shape_cast %8 : vector<1x8x32xf32> to vector<8x32xf32>
    %c0_12 = arith.constant 0 : index
    %c0_13 = arith.constant 0 : index
    %c0_14 = arith.constant 0 : index
    %10 = vector.load %arg2[%c0_12, %c0_13, %c0_14] : memref<2x8x32xf32, #tpu.memory_space<vmem>>, vector<1x8x32xf32>
    %11 = vector.shape_cast %10 : vector<1x8x32xf32> to vector<8x32xf32>
    %c0_15 = arith.constant 0 : index
    %c0_16 = arith.constant 0 : index
    %12 = vector.load %arg15[%c0_15, %c0_16] : memref<64x128xf32, #tpu.memory_space<vmem>>, vector<8x128xf32>
    %cst_17 = arith.constant dense<0.000000e+00> : vector<8x128xf32>
    %13 = tpu.matmul %9, %7, %cst_17 {dimension_numbers = #tpu.dot_dimension_numbers<[1], [0], [0], [1], [0, 0, 1, 1], [], []>} : vector<8x32xf32>, vector<32x128xf32>, vector<8x128xf32> -> vector<8x128xf32>
    %14 = arith.addf %12, %13 : vector<8x128xf32>
    %15 = arith.negf %14 : vector<8x128xf32>
    %16 = math.exp %15 : vector<8x128xf32>
    %cst_18 = arith.constant 1.000000e+00 : f32
    %17 = vector.broadcast %cst_18 : f32 to vector<8x128xf32>
    %18 = arith.addf %17, %16 : vector<8x128xf32>
    %19 = arith.divf %17, %18 : vector<8x128xf32>
    %20 = vector.extract_strided_slice %19 {offsets = [0, 0], sizes = [8, 32], strides = [1, 1]} : vector<8x128xf32> to vector<8x32xf32>
    %21 = vector.extract_strided_slice %19 {offsets = [0, 32], sizes = [8, 32], strides = [1, 1]} : vector<8x128xf32> to vector<8x32xf32>
    %22 = vector.extract_strided_slice %19 {offsets = [0, 96], sizes = [8, 32], strides = [1, 1]} : vector<8x128xf32> to vector<8x32xf32>
    %23 = vector.extract_strided_slice %14 {offsets = [0, 64], sizes = [8, 32], strides = [1, 1]} : vector<8x128xf32> to vector<8x32xf32>
    %24 = math.tanh %23 : vector<8x32xf32>
    %25 = arith.mulf %21, %11 : vector<8x32xf32>
    %26 = arith.mulf %20, %24 : vector<8x32xf32>
    %27 = arith.addf %25, %26 : vector<8x32xf32>
    %28 = math.tanh %27 : vector<8x32xf32>
    %29 = arith.mulf %22, %28 : vector<8x32xf32>
    %c0_19 = arith.constant 0 : index
    %c0_20 = arith.constant 0 : index
    %30 = vector.load %arg16[%c0_19, %c0_20] : memref<64x32xf32, #tpu.memory_space<vmem>>, vector<8x32xf32>
    tpu.vector_store %arg16[%c0_19, %c0_20], %29 {strides = array<i32>} : memref<64x32xf32, #tpu.memory_space<vmem>>, vector<8x32xf32>,
    %c8 = arith.constant 8 : index
    %c0_21 = arith.constant 0 : index
    %31 = vector.load %arg15[%c8, %c0_21] : memref<64x128xf32, #tpu.memory_space<vmem>>, vector<8x128xf32>
    %cst_22 = arith.constant dense<0.000000e+00> : vector<8x128xf32>
    %32 = tpu.matmul %29, %7, %cst_22 {dimension_numbers = #tpu.dot_dimension_numbers<[1], [0], [0], [1], [0, 0, 1, 1], [], []>} : vector<8x32xf32>, vector<32x128xf32>, vector<8x128xf32> -> vector<8x128xf32>
    %33 = arith.addf %31, %32 : vector<8x128xf32>
    %34 = arith.negf %33 : vector<8x128xf32>
    %35 = math.exp %34 : vector<8x128xf32>
    %cst_23 = arith.constant 1.000000e+00 : f32
    %36 = vector.broadcast %cst_23 : f32 to vector<8x128xf32>
    %37 = arith.addf %36, %35 : vector<8x128xf32>
    %38 = arith.divf %36, %37 : vector<8x128xf32>
    %39 = vector.extract_strided_slice %38 {offsets = [0, 0], sizes = [8, 32], strides = [1, 1]} : vector<8x128xf32> to vector<8x32xf32>
    %40 = vector.extract_strided_slice %38 {offsets = [0, 32], sizes = [8, 32], strides = [1, 1]} : vector<8x128xf32> to vector<8x32xf32>
    %41 = vector.extract_strided_slice %38 {offsets = [0, 96], sizes = [8, 32], strides = [1, 1]} : vector<8x128xf32> to vector<8x32xf32>
    %42 = vector.extract_strided_slice %33 {offsets = [0, 64], sizes = [8, 32], strides = [1, 1]} : vector<8x128xf32> to vector<8x32xf32>
    %43 = math.tanh %42 : vector<8x32xf32>
    %44 = arith.mulf %40, %27 : vector<8x32xf32>
    %45 = arith.mulf %39, %43 : vector<8x32xf32>
    %46 = arith.addf %44, %45 : vector<8x32xf32>
    %47 = math.tanh %46 : vector<8x32xf32>
    %48 = arith.mulf %41, %47 : vector<8x32xf32>
    %c8_24 = arith.constant 8 : index
    %c0_25 = arith.constant 0 : index
    %49 = vector.load %arg16[%c8_24, %c0_25] : memref<64x32xf32, #tpu.memory_space<vmem>>, vector<8x32xf32>
    tpu.vector_store %arg16[%c8_24, %c0_25], %48 {strides = array<i32>} : memref<64x32xf32, #tpu.memory_space<vmem>>, vector<8x32xf32>,
    %c16 = arith.constant 16 : index
    %c0_26 = arith.constant 0 : index
    %50 = vector.load %arg15[%c16, %c0_26] : memref<64x128xf32, #tpu.memory_space<vmem>>, vector<8x128xf32>
    %cst_27 = arith.constant dense<0.000000e+00> : vector<8x128xf32>
    %51 = tpu.matmul %48, %7, %cst_27 {dimension_numbers = #tpu.dot_dimension_numbers<[1], [0], [0], [1], [0, 0, 1, 1], [], []>} : vector<8x32xf32>, vector<32x128xf32>, vector<8x128xf32> -> vector<8x128xf32>
    %52 = arith.addf %50, %51 : vector<8x128xf32>
    %53 = arith.negf %52 : vector<8x128xf32>
    %54 = math.exp %53 : vector<8x128xf32>
    %cst_28 = arith.constant 1.000000e+00 : f32
    %55 = vector.broadcast %cst_28 : f32 to vector<8x128xf32>
    %56 = arith.addf %55, %54 : vector<8x128xf32>
    %57 = arith.divf %55, %56 : vector<8x128xf32>
    %58 = vector.extract_strided_slice %57 {offsets = [0, 0], sizes = [8, 32], strides = [1, 1]} : vector<8x128xf32> to vector<8x32xf32>
    %59 = vector.extract_strided_slice %57 {offsets = [0, 32], sizes = [8, 32], strides = [1, 1]} : vector<8x128xf32> to vector<8x32xf32>
    %60 = vector.extract_strided_slice %57 {offsets = [0, 96], sizes = [8, 32], strides = [1, 1]} : vector<8x128xf32> to vector<8x32xf32>
    %61 = vector.extract_strided_slice %52 {offsets = [0, 64], sizes = [8, 32], strides = [1, 1]} : vector<8x128xf32> to vector<8x32xf32>
    %62 = math.tanh %61 : vector<8x32xf32>
    %63 = arith.mulf %59, %46 : vector<8x32xf32>
    %64 = arith.mulf %58, %62 : vector<8x32xf32>
    %65 = arith.addf %63, %64 : vector<8x32xf32>
    %66 = math.tanh %65 : vector<8x32xf32>
    %67 = arith.mulf %60, %66 : vector<8x32xf32>
    %c16_29 = arith.constant 16 : index
    %c0_30 = arith.constant 0 : index
    %68 = vector.load %arg16[%c16_29, %c0_30] : memref<64x32xf32, #tpu.memory_space<vmem>>, vector<8x32xf32>
    tpu.vector_store %arg16[%c16_29, %c0_30], %67 {strides = array<i32>} : memref<64x32xf32, #tpu.memory_space<vmem>>, vector<8x32xf32>,
    %c24 = arith.constant 24 : index
    %c0_31 = arith.constant 0 : index
    %69 = vector.load %arg15[%c24, %c0_31] : memref<64x128xf32, #tpu.memory_space<vmem>>, vector<8x128xf32>
    %cst_32 = arith.constant dense<0.000000e+00> : vector<8x128xf32>
    %70 = tpu.matmul %67, %7, %cst_32 {dimension_numbers = #tpu.dot_dimension_numbers<[1], [0], [0], [1], [0, 0, 1, 1], [], []>} : vector<8x32xf32>, vector<32x128xf32>, vector<8x128xf32> -> vector<8x128xf32>
    %71 = arith.addf %69, %70 : vector<8x128xf32>
    %72 = arith.negf %71 : vector<8x128xf32>
    %73 = math.exp %72 : vector<8x128xf32>
    %cst_33 = arith.constant 1.000000e+00 : f32
    %74 = vector.broadcast %cst_33 : f32 to vector<8x128xf32>
    %75 = arith.addf %74, %73 : vector<8x128xf32>
    %76 = arith.divf %74, %75 : vector<8x128xf32>
    %77 = vector.extract_strided_slice %76 {offsets = [0, 0], sizes = [8, 32], strides = [1, 1]} : vector<8x128xf32> to vector<8x32xf32>
    %78 = vector.extract_strided_slice %76 {offsets = [0, 32], sizes = [8, 32], strides = [1, 1]} : vector<8x128xf32> to vector<8x32xf32>
    %79 = vector.extract_strided_slice %76 {offsets = [0, 96], sizes = [8, 32], strides = [1, 1]} : vector<8x128xf32> to vector<8x32xf32>
    %80 = vector.extract_strided_slice %71 {offsets = [0, 64], sizes = [8, 32], strides = [1, 1]} : vector<8x128xf32> to vector<8x32xf32>
    %81 = math.tanh %80 : vector<8x32xf32>
    %82 = arith.mulf %78, %65 : vector<8x32xf32>
    %83 = arith.mulf %77, %81 : vector<8x32xf32>
    %84 = arith.addf %82, %83 : vector<8x32xf32>
    %85 = math.tanh %84 : vector<8x32xf32>
    %86 = arith.mulf %79, %85 : vector<8x32xf32>
    %c24_34 = arith.constant 24 : index
    %c0_35 = arith.constant 0 : index
    %87 = vector.load %arg16[%c24_34, %c0_35] : memref<64x32xf32, #tpu.memory_space<vmem>>, vector<8x32xf32>
    tpu.vector_store %arg16[%c24_34, %c0_35], %86 {strides = array<i32>} : memref<64x32xf32, #tpu.memory_space<vmem>>, vector<8x32xf32>,
    %c32 = arith.constant 32 : index
    %c0_36 = arith.constant 0 : index
    %88 = vector.load %arg15[%c32, %c0_36] : memref<64x128xf32, #tpu.memory_space<vmem>>, vector<8x128xf32>
    %cst_37 = arith.constant dense<0.000000e+00> : vector<8x128xf32>
    %89 = tpu.matmul %86, %7, %cst_37 {dimension_numbers = #tpu.dot_dimension_numbers<[1], [0], [0], [1], [0, 0, 1, 1], [], []>} : vector<8x32xf32>, vector<32x128xf32>, vector<8x128xf32> -> vector<8x128xf32>
    %90 = arith.addf %88, %89 : vector<8x128xf32>
    %91 = arith.negf %90 : vector<8x128xf32>
    %92 = math.exp %91 : vector<8x128xf32>
    %cst_38 = arith.constant 1.000000e+00 : f32
    %93 = vector.broadcast %cst_38 : f32 to vector<8x128xf32>
    %94 = arith.addf %93, %92 : vector<8x128xf32>
    %95 = arith.divf %93, %94 : vector<8x128xf32>
    %96 = vector.extract_strided_slice %95 {offsets = [0, 0], sizes = [8, 32], strides = [1, 1]} : vector<8x128xf32> to vector<8x32xf32>
    %97 = vector.extract_strided_slice %95 {offsets = [0, 32], sizes = [8, 32], strides = [1, 1]} : vector<8x128xf32> to vector<8x32xf32>
    %98 = vector.extract_strided_slice %95 {offsets = [0, 96], sizes = [8, 32], strides = [1, 1]} : vector<8x128xf32> to vector<8x32xf32>
    %99 = vector.extract_strided_slice %90 {offsets = [0, 64], sizes = [8, 32], strides = [1, 1]} : vector<8x128xf32> to vector<8x32xf32>
    %100 = math.tanh %99 : vector<8x32xf32>
    %101 = arith.mulf %97, %84 : vector<8x32xf32>
    %102 = arith.mulf %96, %100 : vector<8x32xf32>
    %103 = arith.addf %101, %102 : vector<8x32xf32>
    %104 = math.tanh %103 : vector<8x32xf32>
    %105 = arith.mulf %98, %104 : vector<8x32xf32>
    %c32_39 = arith.constant 32 : index
    %c0_40 = arith.constant 0 : index
    %106 = vector.load %arg16[%c32_39, %c0_40] : memref<64x32xf32, #tpu.memory_space<vmem>>, vector<8x32xf32>
    tpu.vector_store %arg16[%c32_39, %c0_40], %105 {strides = array<i32>} : memref<64x32xf32, #tpu.memory_space<vmem>>, vector<8x32xf32>,
    %c40 = arith.constant 40 : index
    %c0_41 = arith.constant 0 : index
    %107 = vector.load %arg15[%c40, %c0_41] : memref<64x128xf32, #tpu.memory_space<vmem>>, vector<8x128xf32>
    %cst_42 = arith.constant dense<0.000000e+00> : vector<8x128xf32>
    %108 = tpu.matmul %105, %7, %cst_42 {dimension_numbers = #tpu.dot_dimension_numbers<[1], [0], [0], [1], [0, 0, 1, 1], [], []>} : vector<8x32xf32>, vector<32x128xf32>, vector<8x128xf32> -> vector<8x128xf32>
    %109 = arith.addf %107, %108 : vector<8x128xf32>
    %110 = arith.negf %109 : vector<8x128xf32>
    %111 = math.exp %110 : vector<8x128xf32>
    %cst_43 = arith.constant 1.000000e+00 : f32
    %112 = vector.broadcast %cst_43 : f32 to vector<8x128xf32>
    %113 = arith.addf %112, %111 : vector<8x128xf32>
    %114 = arith.divf %112, %113 : vector<8x128xf32>
    %115 = vector.extract_strided_slice %114 {offsets = [0, 0], sizes = [8, 32], strides = [1, 1]} : vector<8x128xf32> to vector<8x32xf32>
    %116 = vector.extract_strided_slice %114 {offsets = [0, 32], sizes = [8, 32], strides = [1, 1]} : vector<8x128xf32> to vector<8x32xf32>
    %117 = vector.extract_strided_slice %114 {offsets = [0, 96], sizes = [8, 32], strides = [1, 1]} : vector<8x128xf32> to vector<8x32xf32>
    %118 = vector.extract_strided_slice %109 {offsets = [0, 64], sizes = [8, 32], strides = [1, 1]} : vector<8x128xf32> to vector<8x32xf32>
    %119 = math.tanh %118 : vector<8x32xf32>
    %120 = arith.mulf %116, %103 : vector<8x32xf32>
    %121 = arith.mulf %115, %119 : vector<8x32xf32>
    %122 = arith.addf %120, %121 : vector<8x32xf32>
    %123 = math.tanh %122 : vector<8x32xf32>
    %124 = arith.mulf %117, %123 : vector<8x32xf32>
    %c40_44 = arith.constant 40 : index
    %c0_45 = arith.constant 0 : index
    %125 = vector.load %arg16[%c40_44, %c0_45] : memref<64x32xf32, #tpu.memory_space<vmem>>, vector<8x32xf32>
    tpu.vector_store %arg16[%c40_44, %c0_45], %124 {strides = array<i32>} : memref<64x32xf32, #tpu.memory_space<vmem>>, vector<8x32xf32>,
    %c48 = arith.constant 48 : index
    %c0_46 = arith.constant 0 : index
    %126 = vector.load %arg15[%c48, %c0_46] : memref<64x128xf32, #tpu.memory_space<vmem>>, vector<8x128xf32>
    %cst_47 = arith.constant dense<0.000000e+00> : vector<8x128xf32>
    %127 = tpu.matmul %124, %7, %cst_47 {dimension_numbers = #tpu.dot_dimension_numbers<[1], [0], [0], [1], [0, 0, 1, 1], [], []>} : vector<8x32xf32>, vector<32x128xf32>, vector<8x128xf32> -> vector<8x128xf32>
    %128 = arith.addf %126, %127 : vector<8x128xf32>
    %129 = arith.negf %128 : vector<8x128xf32>
    %130 = math.exp %129 : vector<8x128xf32>
    %cst_48 = arith.constant 1.000000e+00 : f32
    %131 = vector.broadcast %cst_48 : f32 to vector<8x128xf32>
    %132 = arith.addf %131, %130 : vector<8x128xf32>
    %133 = arith.divf %131, %132 : vector<8x128xf32>
    %134 = vector.extract_strided_slice %133 {offsets = [0, 0], sizes = [8, 32], strides = [1, 1]} : vector<8x128xf32> to vector<8x32xf32>
    %135 = vector.extract_strided_slice %133 {offsets = [0, 32], sizes = [8, 32], strides = [1, 1]} : vector<8x128xf32> to vector<8x32xf32>
    %136 = vector.extract_strided_slice %133 {offsets = [0, 96], sizes = [8, 32], strides = [1, 1]} : vector<8x128xf32> to vector<8x32xf32>
    %137 = vector.extract_strided_slice %128 {offsets = [0, 64], sizes = [8, 32], strides = [1, 1]} : vector<8x128xf32> to vector<8x32xf32>
    %138 = math.tanh %137 : vector<8x32xf32>
    %139 = arith.mulf %135, %122 : vector<8x32xf32>
    %140 = arith.mulf %134, %138 : vector<8x32xf32>
    %141 = arith.addf %139, %140 : vector<8x32xf32>
    %142 = math.tanh %141 : vector<8x32xf32>
    %143 = arith.mulf %136, %142 : vector<8x32xf32>
    %c48_49 = arith.constant 48 : index
    %c0_50 = arith.constant 0 : index
    %144 = vector.load %arg16[%c48_49, %c0_50] : memref<64x32xf32, #tpu.memory_space<vmem>>, vector<8x32xf32>
    tpu.vector_store %arg16[%c48_49, %c0_50], %143 {strides = array<i32>} : memref<64x32xf32, #tpu.memory_space<vmem>>, vector<8x32xf32>,
    %c56 = arith.constant 56 : index
    %c0_51 = arith.constant 0 : index
    %145 = vector.load %arg15[%c56, %c0_51] : memref<64x128xf32, #tpu.memory_space<vmem>>, vector<8x128xf32>
    %cst_52 = arith.constant dense<0.000000e+00> : vector<8x128xf32>
    %146 = tpu.matmul %143, %7, %cst_52 {dimension_numbers = #tpu.dot_dimension_numbers<[1], [0], [0], [1], [0, 0, 1, 1], [], []>} : vector<8x32xf32>, vector<32x128xf32>, vector<8x128xf32> -> vector<8x128xf32>
    %147 = arith.addf %145, %146 : vector<8x128xf32>
    %148 = arith.negf %147 : vector<8x128xf32>
    %149 = math.exp %148 : vector<8x128xf32>
    %cst_53 = arith.constant 1.000000e+00 : f32
    %150 = vector.broadcast %cst_53 : f32 to vector<8x128xf32>
    %151 = arith.addf %150, %149 : vector<8x128xf32>
    %152 = arith.divf %150, %151 : vector<8x128xf32>
    %153 = vector.extract_strided_slice %152 {offsets = [0, 0], sizes = [8, 32], strides = [1, 1]} : vector<8x128xf32> to vector<8x32xf32>
    %154 = vector.extract_strided_slice %152 {offsets = [0, 32], sizes = [8, 32], strides = [1, 1]} : vector<8x128xf32> to vector<8x32xf32>
    %155 = vector.extract_strided_slice %152 {offsets = [0, 96], sizes = [8, 32], strides = [1, 1]} : vector<8x128xf32> to vector<8x32xf32>
    %156 = vector.extract_strided_slice %147 {offsets = [0, 64], sizes = [8, 32], strides = [1, 1]} : vector<8x128xf32> to vector<8x32xf32>
    %157 = math.tanh %156 : vector<8x32xf32>
    %158 = arith.mulf %154, %141 : vector<8x32xf32>
    %159 = arith.mulf %153, %157 : vector<8x32xf32>
    %160 = arith.addf %158, %159 : vector<8x32xf32>
    %161 = math.tanh %160 : vector<8x32xf32>
    %162 = arith.mulf %155, %161 : vector<8x32xf32>
    %c56_54 = arith.constant 56 : index
    %c0_55 = arith.constant 0 : index
    %163 = vector.load %arg16[%c56_54, %c0_55] : memref<64x32xf32, #tpu.memory_space<vmem>>, vector<8x32xf32>
    tpu.vector_store %arg16[%c56_54, %c0_55], %162 {strides = array<i32>} : memref<64x32xf32, #tpu.memory_space<vmem>>, vector<8x32xf32>,
    %c0_56 = arith.constant 0 : index
    %c0_57 = arith.constant 0 : index
    %164 = vector.load %arg16[%c0_56, %c0_57] : memref<64x32xf32, #tpu.memory_space<vmem>>, vector<64x32xf32>
    %c0_58 = arith.constant 0 : index
    %c0_59 = arith.constant 0 : index
    %165 = vector.load %arg11[%c0_58, %c0_59] : memref<32x128xf32, #tpu.memory_space<vmem>>, vector<32x128xf32>
    %cst_60 = arith.constant dense<0.000000e+00> : vector<64x128xf32>
    %166 = tpu.matmul %164, %165, %cst_60 {dimension_numbers = #tpu.dot_dimension_numbers<[1], [0], [0], [1], [0, 0, 1, 1], [], []>} : vector<64x32xf32>, vector<32x128xf32>, vector<64x128xf32> -> vector<64x128xf32>
    %c0_61 = arith.constant 0 : index
    %c0_62 = arith.constant 0 : index
    %167 = vector.load %arg13[%c0_61, %c0_62] : memref<1x128xf32, #tpu.memory_space<vmem>>, vector<1x128xf32>
    %168 = vector.broadcast %167 : vector<1x128xf32> to vector<64x128xf32>
    %169 = arith.addf %166, %168 : vector<64x128xf32>
    %c0_63 = arith.constant 0 : index
    %c0_64 = arith.constant 0 : index
    %170 = vector.load %arg15[%c0_63, %c0_64] : memref<64x128xf32, #tpu.memory_space<vmem>>, vector<64x128xf32>
    tpu.vector_store %arg15[%c0_63, %c0_64], %169 {strides = array<i32>} : memref<64x128xf32, #tpu.memory_space<vmem>>, vector<64x128xf32>,
    %c0_65 = arith.constant 0 : index
    %c0_66 = arith.constant 0 : index
    %171 = vector.load %arg12[%c0_65, %c0_66] : memref<32x128xf32, #tpu.memory_space<vmem>>, vector<32x128xf32>
    %c1 = arith.constant 1 : index
    %c0_67 = arith.constant 0 : index
    %c0_68 = arith.constant 0 : index
    %172 = vector.load %arg1[%c1, %c0_67, %c0_68] : memref<2x8x32xf32, #tpu.memory_space<vmem>>, vector<1x8x32xf32>
    %173 = vector.shape_cast %172 : vector<1x8x32xf32> to vector<8x32xf32>
    %c1_69 = arith.constant 1 : index
    %c0_70 = arith.constant 0 : index
    %c0_71 = arith.constant 0 : index
    %174 = vector.load %arg2[%c1_69, %c0_70, %c0_71] : memref<2x8x32xf32, #tpu.memory_space<vmem>>, vector<1x8x32xf32>
    %175 = vector.shape_cast %174 : vector<1x8x32xf32> to vector<8x32xf32>
    %c0_72 = arith.constant 0 : index
    %c0_73 = arith.constant 0 : index
    %176 = vector.load %arg15[%c0_72, %c0_73] : memref<64x128xf32, #tpu.memory_space<vmem>>, vector<8x128xf32>
    %cst_74 = arith.constant dense<0.000000e+00> : vector<8x128xf32>
    %177 = tpu.matmul %173, %171, %cst_74 {dimension_numbers = #tpu.dot_dimension_numbers<[1], [0], [0], [1], [0, 0, 1, 1], [], []>} : vector<8x32xf32>, vector<32x128xf32>, vector<8x128xf32> -> vector<8x128xf32>
    %178 = arith.addf %176, %177 : vector<8x128xf32>
    %179 = arith.negf %178 : vector<8x128xf32>
    %180 = math.exp %179 : vector<8x128xf32>
    %cst_75 = arith.constant 1.000000e+00 : f32
    %181 = vector.broadcast %cst_75 : f32 to vector<8x128xf32>
    %182 = arith.addf %181, %180 : vector<8x128xf32>
    %183 = arith.divf %181, %182 : vector<8x128xf32>
    %184 = vector.extract_strided_slice %183 {offsets = [0, 0], sizes = [8, 32], strides = [1, 1]} : vector<8x128xf32> to vector<8x32xf32>
    %185 = vector.extract_strided_slice %183 {offsets = [0, 32], sizes = [8, 32], strides = [1, 1]} : vector<8x128xf32> to vector<8x32xf32>
    %186 = vector.extract_strided_slice %183 {offsets = [0, 96], sizes = [8, 32], strides = [1, 1]} : vector<8x128xf32> to vector<8x32xf32>
    %187 = vector.extract_strided_slice %178 {offsets = [0, 64], sizes = [8, 32], strides = [1, 1]} : vector<8x128xf32> to vector<8x32xf32>
    %188 = math.tanh %187 : vector<8x32xf32>
    %189 = arith.mulf %185, %175 : vector<8x32xf32>
    %190 = arith.mulf %184, %188 : vector<8x32xf32>
    %191 = arith.addf %189, %190 : vector<8x32xf32>
    %192 = math.tanh %191 : vector<8x32xf32>
    %193 = arith.mulf %186, %192 : vector<8x32xf32>
    %c0_76 = arith.constant 0 : index
    %c0_77 = arith.constant 0 : index
    %194 = vector.load %arg16[%c0_76, %c0_77] : memref<64x32xf32, #tpu.memory_space<vmem>>, vector<8x32xf32>
    tpu.vector_store %arg16[%c0_76, %c0_77], %193 {strides = array<i32>} : memref<64x32xf32, #tpu.memory_space<vmem>>, vector<8x32xf32>,
    %c8_78 = arith.constant 8 : index
    %c0_79 = arith.constant 0 : index
    %195 = vector.load %arg15[%c8_78, %c0_79] : memref<64x128xf32, #tpu.memory_space<vmem>>, vector<8x128xf32>
    %cst_80 = arith.constant dense<0.000000e+00> : vector<8x128xf32>
    %196 = tpu.matmul %193, %171, %cst_80 {dimension_numbers = #tpu.dot_dimension_numbers<[1], [0], [0], [1], [0, 0, 1, 1], [], []>} : vector<8x32xf32>, vector<32x128xf32>, vector<8x128xf32> -> vector<8x128xf32>
    %197 = arith.addf %195, %196 : vector<8x128xf32>
    %198 = arith.negf %197 : vector<8x128xf32>
    %199 = math.exp %198 : vector<8x128xf32>
    %cst_81 = arith.constant 1.000000e+00 : f32
    %200 = vector.broadcast %cst_81 : f32 to vector<8x128xf32>
    %201 = arith.addf %200, %199 : vector<8x128xf32>
    %202 = arith.divf %200, %201 : vector<8x128xf32>
    %203 = vector.extract_strided_slice %202 {offsets = [0, 0], sizes = [8, 32], strides = [1, 1]} : vector<8x128xf32> to vector<8x32xf32>
    %204 = vector.extract_strided_slice %202 {offsets = [0, 32], sizes = [8, 32], strides = [1, 1]} : vector<8x128xf32> to vector<8x32xf32>
    %205 = vector.extract_strided_slice %202 {offsets = [0, 96], sizes = [8, 32], strides = [1, 1]} : vector<8x128xf32> to vector<8x32xf32>
    %206 = vector.extract_strided_slice %197 {offsets = [0, 64], sizes = [8, 32], strides = [1, 1]} : vector<8x128xf32> to vector<8x32xf32>
    %207 = math.tanh %206 : vector<8x32xf32>
    %208 = arith.mulf %204, %191 : vector<8x32xf32>
    %209 = arith.mulf %203, %207 : vector<8x32xf32>
    %210 = arith.addf %208, %209 : vector<8x32xf32>
    %211 = math.tanh %210 : vector<8x32xf32>
    %212 = arith.mulf %205, %211 : vector<8x32xf32>
    %c8_82 = arith.constant 8 : index
    %c0_83 = arith.constant 0 : index
    %213 = vector.load %arg16[%c8_82, %c0_83] : memref<64x32xf32, #tpu.memory_space<vmem>>, vector<8x32xf32>
    tpu.vector_store %arg16[%c8_82, %c0_83], %212 {strides = array<i32>} : memref<64x32xf32, #tpu.memory_space<vmem>>, vector<8x32xf32>,
    %c16_84 = arith.constant 16 : index
    %c0_85 = arith.constant 0 : index
    %214 = vector.load %arg15[%c16_84, %c0_85] : memref<64x128xf32, #tpu.memory_space<vmem>>, vector<8x128xf32>
    %cst_86 = arith.constant dense<0.000000e+00> : vector<8x128xf32>
    %215 = tpu.matmul %212, %171, %cst_86 {dimension_numbers = #tpu.dot_dimension_numbers<[1], [0], [0], [1], [0, 0, 1, 1], [], []>} : vector<8x32xf32>, vector<32x128xf32>, vector<8x128xf32> -> vector<8x128xf32>
    %216 = arith.addf %214, %215 : vector<8x128xf32>
    %217 = arith.negf %216 : vector<8x128xf32>
    %218 = math.exp %217 : vector<8x128xf32>
    %cst_87 = arith.constant 1.000000e+00 : f32
    %219 = vector.broadcast %cst_87 : f32 to vector<8x128xf32>
    %220 = arith.addf %219, %218 : vector<8x128xf32>
    %221 = arith.divf %219, %220 : vector<8x128xf32>
    %222 = vector.extract_strided_slice %221 {offsets = [0, 0], sizes = [8, 32], strides = [1, 1]} : vector<8x128xf32> to vector<8x32xf32>
    %223 = vector.extract_strided_slice %221 {offsets = [0, 32], sizes = [8, 32], strides = [1, 1]} : vector<8x128xf32> to vector<8x32xf32>
    %224 = vector.extract_strided_slice %221 {offsets = [0, 96], sizes = [8, 32], strides = [1, 1]} : vector<8x128xf32> to vector<8x32xf32>
    %225 = vector.extract_strided_slice %216 {offsets = [0, 64], sizes = [8, 32], strides = [1, 1]} : vector<8x128xf32> to vector<8x32xf32>
    %226 = math.tanh %225 : vector<8x32xf32>
    %227 = arith.mulf %223, %210 : vector<8x32xf32>
    %228 = arith.mulf %222, %226 : vector<8x32xf32>
    %229 = arith.addf %227, %228 : vector<8x32xf32>
    %230 = math.tanh %229 : vector<8x32xf32>
    %231 = arith.mulf %224, %230 : vector<8x32xf32>
    %c16_88 = arith.constant 16 : index
    %c0_89 = arith.constant 0 : index
    %232 = vector.load %arg16[%c16_88, %c0_89] : memref<64x32xf32, #tpu.memory_space<vmem>>, vector<8x32xf32>
    tpu.vector_store %arg16[%c16_88, %c0_89], %231 {strides = array<i32>} : memref<64x32xf32, #tpu.memory_space<vmem>>, vector<8x32xf32>,
    %c24_90 = arith.constant 24 : index
    %c0_91 = arith.constant 0 : index
    %233 = vector.load %arg15[%c24_90, %c0_91] : memref<64x128xf32, #tpu.memory_space<vmem>>, vector<8x128xf32>
    %cst_92 = arith.constant dense<0.000000e+00> : vector<8x128xf32>
    %234 = tpu.matmul %231, %171, %cst_92 {dimension_numbers = #tpu.dot_dimension_numbers<[1], [0], [0], [1], [0, 0, 1, 1], [], []>} : vector<8x32xf32>, vector<32x128xf32>, vector<8x128xf32> -> vector<8x128xf32>
    %235 = arith.addf %233, %234 : vector<8x128xf32>
    %236 = arith.negf %235 : vector<8x128xf32>
    %237 = math.exp %236 : vector<8x128xf32>
    %cst_93 = arith.constant 1.000000e+00 : f32
    %238 = vector.broadcast %cst_93 : f32 to vector<8x128xf32>
    %239 = arith.addf %238, %237 : vector<8x128xf32>
    %240 = arith.divf %238, %239 : vector<8x128xf32>
    %241 = vector.extract_strided_slice %240 {offsets = [0, 0], sizes = [8, 32], strides = [1, 1]} : vector<8x128xf32> to vector<8x32xf32>
    %242 = vector.extract_strided_slice %240 {offsets = [0, 32], sizes = [8, 32], strides = [1, 1]} : vector<8x128xf32> to vector<8x32xf32>
    %243 = vector.extract_strided_slice %240 {offsets = [0, 96], sizes = [8, 32], strides = [1, 1]} : vector<8x128xf32> to vector<8x32xf32>
    %244 = vector.extract_strided_slice %235 {offsets = [0, 64], sizes = [8, 32], strides = [1, 1]} : vector<8x128xf32> to vector<8x32xf32>
    %245 = math.tanh %244 : vector<8x32xf32>
    %246 = arith.mulf %242, %229 : vector<8x32xf32>
    %247 = arith.mulf %241, %245 : vector<8x32xf32>
    %248 = arith.addf %246, %247 : vector<8x32xf32>
    %249 = math.tanh %248 : vector<8x32xf32>
    %250 = arith.mulf %243, %249 : vector<8x32xf32>
    %c24_94 = arith.constant 24 : index
    %c0_95 = arith.constant 0 : index
    %251 = vector.load %arg16[%c24_94, %c0_95] : memref<64x32xf32, #tpu.memory_space<vmem>>, vector<8x32xf32>
    tpu.vector_store %arg16[%c24_94, %c0_95], %250 {strides = array<i32>} : memref<64x32xf32, #tpu.memory_space<vmem>>, vector<8x32xf32>,
    %c32_96 = arith.constant 32 : index
    %c0_97 = arith.constant 0 : index
    %252 = vector.load %arg15[%c32_96, %c0_97] : memref<64x128xf32, #tpu.memory_space<vmem>>, vector<8x128xf32>
    %cst_98 = arith.constant dense<0.000000e+00> : vector<8x128xf32>
    %253 = tpu.matmul %250, %171, %cst_98 {dimension_numbers = #tpu.dot_dimension_numbers<[1], [0], [0], [1], [0, 0, 1, 1], [], []>} : vector<8x32xf32>, vector<32x128xf32>, vector<8x128xf32> -> vector<8x128xf32>
    %254 = arith.addf %252, %253 : vector<8x128xf32>
    %255 = arith.negf %254 : vector<8x128xf32>
    %256 = math.exp %255 : vector<8x128xf32>
    %cst_99 = arith.constant 1.000000e+00 : f32
    %257 = vector.broadcast %cst_99 : f32 to vector<8x128xf32>
    %258 = arith.addf %257, %256 : vector<8x128xf32>
    %259 = arith.divf %257, %258 : vector<8x128xf32>
    %260 = vector.extract_strided_slice %259 {offsets = [0, 0], sizes = [8, 32], strides = [1, 1]} : vector<8x128xf32> to vector<8x32xf32>
    %261 = vector.extract_strided_slice %259 {offsets = [0, 32], sizes = [8, 32], strides = [1, 1]} : vector<8x128xf32> to vector<8x32xf32>
    %262 = vector.extract_strided_slice %259 {offsets = [0, 96], sizes = [8, 32], strides = [1, 1]} : vector<8x128xf32> to vector<8x32xf32>
    %263 = vector.extract_strided_slice %254 {offsets = [0, 64], sizes = [8, 32], strides = [1, 1]} : vector<8x128xf32> to vector<8x32xf32>
    %264 = math.tanh %263 : vector<8x32xf32>
    %265 = arith.mulf %261, %248 : vector<8x32xf32>
    %266 = arith.mulf %260, %264 : vector<8x32xf32>
    %267 = arith.addf %265, %266 : vector<8x32xf32>
    %268 = math.tanh %267 : vector<8x32xf32>
    %269 = arith.mulf %262, %268 : vector<8x32xf32>
    %c32_100 = arith.constant 32 : index
    %c0_101 = arith.constant 0 : index
    %270 = vector.load %arg16[%c32_100, %c0_101] : memref<64x32xf32, #tpu.memory_space<vmem>>, vector<8x32xf32>
    tpu.vector_store %arg16[%c32_100, %c0_101], %269 {strides = array<i32>} : memref<64x32xf32, #tpu.memory_space<vmem>>, vector<8x32xf32>,
    %c40_102 = arith.constant 40 : index
    %c0_103 = arith.constant 0 : index
    %271 = vector.load %arg15[%c40_102, %c0_103] : memref<64x128xf32, #tpu.memory_space<vmem>>, vector<8x128xf32>
    %cst_104 = arith.constant dense<0.000000e+00> : vector<8x128xf32>
    %272 = tpu.matmul %269, %171, %cst_104 {dimension_numbers = #tpu.dot_dimension_numbers<[1], [0], [0], [1], [0, 0, 1, 1], [], []>} : vector<8x32xf32>, vector<32x128xf32>, vector<8x128xf32> -> vector<8x128xf32>
    %273 = arith.addf %271, %272 : vector<8x128xf32>
    %274 = arith.negf %273 : vector<8x128xf32>
    %275 = math.exp %274 : vector<8x128xf32>
    %cst_105 = arith.constant 1.000000e+00 : f32
    %276 = vector.broadcast %cst_105 : f32 to vector<8x128xf32>
    %277 = arith.addf %276, %275 : vector<8x128xf32>
    %278 = arith.divf %276, %277 : vector<8x128xf32>
    %279 = vector.extract_strided_slice %278 {offsets = [0, 0], sizes = [8, 32], strides = [1, 1]} : vector<8x128xf32> to vector<8x32xf32>
    %280 = vector.extract_strided_slice %278 {offsets = [0, 32], sizes = [8, 32], strides = [1, 1]} : vector<8x128xf32> to vector<8x32xf32>
    %281 = vector.extract_strided_slice %278 {offsets = [0, 96], sizes = [8, 32], strides = [1, 1]} : vector<8x128xf32> to vector<8x32xf32>
    %282 = vector.extract_strided_slice %273 {offsets = [0, 64], sizes = [8, 32], strides = [1, 1]} : vector<8x128xf32> to vector<8x32xf32>
    %283 = math.tanh %282 : vector<8x32xf32>
    %284 = arith.mulf %280, %267 : vector<8x32xf32>
    %285 = arith.mulf %279, %283 : vector<8x32xf32>
    %286 = arith.addf %284, %285 : vector<8x32xf32>
    %287 = math.tanh %286 : vector<8x32xf32>
    %288 = arith.mulf %281, %287 : vector<8x32xf32>
    %c40_106 = arith.constant 40 : index
    %c0_107 = arith.constant 0 : index
    %289 = vector.load %arg16[%c40_106, %c0_107] : memref<64x32xf32, #tpu.memory_space<vmem>>, vector<8x32xf32>
    tpu.vector_store %arg16[%c40_106, %c0_107], %288 {strides = array<i32>} : memref<64x32xf32, #tpu.memory_space<vmem>>, vector<8x32xf32>,
    %c48_108 = arith.constant 48 : index
    %c0_109 = arith.constant 0 : index
    %290 = vector.load %arg15[%c48_108, %c0_109] : memref<64x128xf32, #tpu.memory_space<vmem>>, vector<8x128xf32>
    %cst_110 = arith.constant dense<0.000000e+00> : vector<8x128xf32>
    %291 = tpu.matmul %288, %171, %cst_110 {dimension_numbers = #tpu.dot_dimension_numbers<[1], [0], [0], [1], [0, 0, 1, 1], [], []>} : vector<8x32xf32>, vector<32x128xf32>, vector<8x128xf32> -> vector<8x128xf32>
    %292 = arith.addf %290, %291 : vector<8x128xf32>
    %293 = arith.negf %292 : vector<8x128xf32>
    %294 = math.exp %293 : vector<8x128xf32>
    %cst_111 = arith.constant 1.000000e+00 : f32
    %295 = vector.broadcast %cst_111 : f32 to vector<8x128xf32>
    %296 = arith.addf %295, %294 : vector<8x128xf32>
    %297 = arith.divf %295, %296 : vector<8x128xf32>
    %298 = vector.extract_strided_slice %297 {offsets = [0, 0], sizes = [8, 32], strides = [1, 1]} : vector<8x128xf32> to vector<8x32xf32>
    %299 = vector.extract_strided_slice %297 {offsets = [0, 32], sizes = [8, 32], strides = [1, 1]} : vector<8x128xf32> to vector<8x32xf32>
    %300 = vector.extract_strided_slice %297 {offsets = [0, 96], sizes = [8, 32], strides = [1, 1]} : vector<8x128xf32> to vector<8x32xf32>
    %301 = vector.extract_strided_slice %292 {offsets = [0, 64], sizes = [8, 32], strides = [1, 1]} : vector<8x128xf32> to vector<8x32xf32>
    %302 = math.tanh %301 : vector<8x32xf32>
    %303 = arith.mulf %299, %286 : vector<8x32xf32>
    %304 = arith.mulf %298, %302 : vector<8x32xf32>
    %305 = arith.addf %303, %304 : vector<8x32xf32>
    %306 = math.tanh %305 : vector<8x32xf32>
    %307 = arith.mulf %300, %306 : vector<8x32xf32>
    %c48_112 = arith.constant 48 : index
    %c0_113 = arith.constant 0 : index
    %308 = vector.load %arg16[%c48_112, %c0_113] : memref<64x32xf32, #tpu.memory_space<vmem>>, vector<8x32xf32>
    tpu.vector_store %arg16[%c48_112, %c0_113], %307 {strides = array<i32>} : memref<64x32xf32, #tpu.memory_space<vmem>>, vector<8x32xf32>,
    %c56_114 = arith.constant 56 : index
    %c0_115 = arith.constant 0 : index
    %309 = vector.load %arg15[%c56_114, %c0_115] : memref<64x128xf32, #tpu.memory_space<vmem>>, vector<8x128xf32>
    %cst_116 = arith.constant dense<0.000000e+00> : vector<8x128xf32>
    %310 = tpu.matmul %307, %171, %cst_116 {dimension_numbers = #tpu.dot_dimension_numbers<[1], [0], [0], [1], [0, 0, 1, 1], [], []>} : vector<8x32xf32>, vector<32x128xf32>, vector<8x128xf32> -> vector<8x128xf32>
    %311 = arith.addf %309, %310 : vector<8x128xf32>
    %312 = arith.negf %311 : vector<8x128xf32>
    %313 = math.exp %312 : vector<8x128xf32>
    %cst_117 = arith.constant 1.000000e+00 : f32
    %314 = vector.broadcast %cst_117 : f32 to vector<8x128xf32>
    %315 = arith.addf %314, %313 : vector<8x128xf32>
    %316 = arith.divf %314, %315 : vector<8x128xf32>
    %317 = vector.extract_strided_slice %316 {offsets = [0, 0], sizes = [8, 32], strides = [1, 1]} : vector<8x128xf32> to vector<8x32xf32>
    %318 = vector.extract_strided_slice %316 {offsets = [0, 32], sizes = [8, 32], strides = [1, 1]} : vector<8x128xf32> to vector<8x32xf32>
    %319 = vector.extract_strided_slice %316 {offsets = [0, 96], sizes = [8, 32], strides = [1, 1]} : vector<8x128xf32> to vector<8x32xf32>
    %320 = vector.extract_strided_slice %311 {offsets = [0, 64], sizes = [8, 32], strides = [1, 1]} : vector<8x128xf32> to vector<8x32xf32>
    %321 = math.tanh %320 : vector<8x32xf32>
    %322 = arith.mulf %318, %305 : vector<8x32xf32>
    %323 = arith.mulf %317, %321 : vector<8x32xf32>
    %324 = arith.addf %322, %323 : vector<8x32xf32>
    %325 = math.tanh %324 : vector<8x32xf32>
    %326 = arith.mulf %319, %325 : vector<8x32xf32>
    %c56_118 = arith.constant 56 : index
    %c0_119 = arith.constant 0 : index
    %327 = vector.load %arg16[%c56_118, %c0_119] : memref<64x32xf32, #tpu.memory_space<vmem>>, vector<8x32xf32>
    tpu.vector_store %arg16[%c56_118, %c0_119], %326 {strides = array<i32>} : memref<64x32xf32, #tpu.memory_space<vmem>>, vector<8x32xf32>,
    %c0_120 = arith.constant 0 : index
    %c0_121 = arith.constant 0 : index
    %c0_122 = arith.constant 0 : index
    %328 = vector.load %arg3[%c0_120, %c0_121, %c0_122] : memref<8x10x32xf32, #tpu.memory_space<vmem>>, vector<8x10x32xf32>
    %c0_123 = arith.constant 0 : index
    %c0_124 = arith.constant 0 : index
    %329 = vector.load %arg16[%c0_123, %c0_124] : memref<64x32xf32, #tpu.memory_space<vmem>>, vector<8x32xf32>
    %330 = vector.shape_cast %329 : vector<8x32xf32> to vector<8x1x32xf32>
    %331 = vector.broadcast %330 : vector<8x1x32xf32> to vector<8x10x32xf32>
    %332 = arith.mulf %331, %328 : vector<8x10x32xf32>
    %cst_125 = arith.constant dense<0.000000e+00> : vector<8x10xf32>
    %333 = vector.multi_reduction <add>, %332, %cst_125 [2] : vector<8x10x32xf32> to vector<8x10xf32>
    %cst_126 = arith.constant dense<0xFF800000> : vector<8xf32>
    %334 = vector.multi_reduction <maximumf>, %333, %cst_126 [1] : vector<8x10xf32> to vector<8xf32>
    %335 = vector.shape_cast %334 : vector<8xf32> to vector<8x1xf32>
    %336 = vector.broadcast %335 : vector<8x1xf32> to vector<8x10xf32>
    %337 = arith.subf %333, %336 : vector<8x10xf32>
    %338 = math.exp %337 : vector<8x10xf32>
    %cst_127 = arith.constant dense<0.000000e+00> : vector<8xf32>
    %339 = vector.multi_reduction <add>, %338, %cst_127 [1] : vector<8x10xf32> to vector<8xf32>
    %340 = vector.shape_cast %339 : vector<8xf32> to vector<8x1xf32>
    %341 = tpu.reciprocal %340 : vector<8x1xf32> -> vector<8x1xf32>
    %342 = vector.broadcast %341 : vector<8x1xf32> to vector<8x10xf32>
    %343 = arith.mulf %338, %342 : vector<8x10xf32>
    %344 = vector.shape_cast %343 : vector<8x10xf32> to vector<8x10x1xf32>
    %345 = vector.broadcast %344 : vector<8x10x1xf32> to vector<8x10x32xf32>
    %346 = arith.mulf %345, %328 : vector<8x10x32xf32>
    %cst_128 = arith.constant dense<0.000000e+00> : vector<8x32xf32>
    %347 = vector.multi_reduction <add>, %346, %cst_128 [1] : vector<8x10x32xf32> to vector<8x32xf32>
    %c0_129 = arith.constant 0 : index
    %c0_130 = arith.constant 0 : index
    %348 = vector.load %arg17[%c0_129, %c0_130] : memref<8x512xf32, #tpu.memory_space<vmem>>, vector<8x32xf32>
    tpu.vector_store %arg17[%c0_129, %c0_130], %347 {strides = array<i32>} : memref<8x512xf32, #tpu.memory_space<vmem>>, vector<8x32xf32>,
    %c0_131 = arith.constant 0 : index
    %c32_132 = arith.constant 32 : index
    %349 = vector.load %arg17[%c0_131, %c32_132] : memref<8x512xf32, #tpu.memory_space<vmem>>, vector<8x32xf32>
    tpu.vector_store %arg17[%c0_131, %c32_132], %329 {strides = array<i32>} : memref<8x512xf32, #tpu.memory_space<vmem>>, vector<8x32xf32>,
    %c8_133 = arith.constant 8 : index
    %c0_134 = arith.constant 0 : index
    %350 = vector.load %arg16[%c8_133, %c0_134] : memref<64x32xf32, #tpu.memory_space<vmem>>, vector<8x32xf32>
    %351 = vector.shape_cast %350 : vector<8x32xf32> to vector<8x1x32xf32>
    %352 = vector.broadcast %351 : vector<8x1x32xf32> to vector<8x10x32xf32>
    %353 = arith.mulf %352, %328 : vector<8x10x32xf32>
    %cst_135 = arith.constant dense<0.000000e+00> : vector<8x10xf32>
    %354 = vector.multi_reduction <add>, %353, %cst_135 [2] : vector<8x10x32xf32> to vector<8x10xf32>
    %cst_136 = arith.constant dense<0xFF800000> : vector<8xf32>
    %355 = vector.multi_reduction <maximumf>, %354, %cst_136 [1] : vector<8x10xf32> to vector<8xf32>
    %356 = vector.shape_cast %355 : vector<8xf32> to vector<8x1xf32>
    %357 = vector.broadcast %356 : vector<8x1xf32> to vector<8x10xf32>
    %358 = arith.subf %354, %357 : vector<8x10xf32>
    %359 = math.exp %358 : vector<8x10xf32>
    %cst_137 = arith.constant dense<0.000000e+00> : vector<8xf32>
    %360 = vector.multi_reduction <add>, %359, %cst_137 [1] : vector<8x10xf32> to vector<8xf32>
    %361 = vector.shape_cast %360 : vector<8xf32> to vector<8x1xf32>
    %362 = tpu.reciprocal %361 : vector<8x1xf32> -> vector<8x1xf32>
    %363 = vector.broadcast %362 : vector<8x1xf32> to vector<8x10xf32>
    %364 = arith.mulf %359, %363 : vector<8x10xf32>
    %365 = vector.shape_cast %364 : vector<8x10xf32> to vector<8x10x1xf32>
    %366 = vector.broadcast %365 : vector<8x10x1xf32> to vector<8x10x32xf32>
    %367 = arith.mulf %366, %328 : vector<8x10x32xf32>
    %cst_138 = arith.constant dense<0.000000e+00> : vector<8x32xf32>
    %368 = vector.multi_reduction <add>, %367, %cst_138 [1] : vector<8x10x32xf32> to vector<8x32xf32>
    %c0_139 = arith.constant 0 : index
    %c64 = arith.constant 64 : index
    %369 = vector.load %arg17[%c0_139, %c64] : memref<8x512xf32, #tpu.memory_space<vmem>>, vector<8x32xf32>
    tpu.vector_store %arg17[%c0_139, %c64], %368 {strides = array<i32>} : memref<8x512xf32, #tpu.memory_space<vmem>>, vector<8x32xf32>,
    %c0_140 = arith.constant 0 : index
    %c96 = arith.constant 96 : index
    %370 = vector.load %arg17[%c0_140, %c96] : memref<8x512xf32, #tpu.memory_space<vmem>>, vector<8x32xf32>
    tpu.vector_store %arg17[%c0_140, %c96], %350 {strides = array<i32>} : memref<8x512xf32, #tpu.memory_space<vmem>>, vector<8x32xf32>,
    %c16_141 = arith.constant 16 : index
    %c0_142 = arith.constant 0 : index
    %371 = vector.load %arg16[%c16_141, %c0_142] : memref<64x32xf32, #tpu.memory_space<vmem>>, vector<8x32xf32>
    %372 = vector.shape_cast %371 : vector<8x32xf32> to vector<8x1x32xf32>
    %373 = vector.broadcast %372 : vector<8x1x32xf32> to vector<8x10x32xf32>
    %374 = arith.mulf %373, %328 : vector<8x10x32xf32>
    %cst_143 = arith.constant dense<0.000000e+00> : vector<8x10xf32>
    %375 = vector.multi_reduction <add>, %374, %cst_143 [2] : vector<8x10x32xf32> to vector<8x10xf32>
    %cst_144 = arith.constant dense<0xFF800000> : vector<8xf32>
    %376 = vector.multi_reduction <maximumf>, %375, %cst_144 [1] : vector<8x10xf32> to vector<8xf32>
    %377 = vector.shape_cast %376 : vector<8xf32> to vector<8x1xf32>
    %378 = vector.broadcast %377 : vector<8x1xf32> to vector<8x10xf32>
    %379 = arith.subf %375, %378 : vector<8x10xf32>
    %380 = math.exp %379 : vector<8x10xf32>
    %cst_145 = arith.constant dense<0.000000e+00> : vector<8xf32>
    %381 = vector.multi_reduction <add>, %380, %cst_145 [1] : vector<8x10xf32> to vector<8xf32>
    %382 = vector.shape_cast %381 : vector<8xf32> to vector<8x1xf32>
    %383 = tpu.reciprocal %382 : vector<8x1xf32> -> vector<8x1xf32>
    %384 = vector.broadcast %383 : vector<8x1xf32> to vector<8x10xf32>
    %385 = arith.mulf %380, %384 : vector<8x10xf32>
    %386 = vector.shape_cast %385 : vector<8x10xf32> to vector<8x10x1xf32>
    %387 = vector.broadcast %386 : vector<8x10x1xf32> to vector<8x10x32xf32>
    %388 = arith.mulf %387, %328 : vector<8x10x32xf32>
    %cst_146 = arith.constant dense<0.000000e+00> : vector<8x32xf32>
    %389 = vector.multi_reduction <add>, %388, %cst_146 [1] : vector<8x10x32xf32> to vector<8x32xf32>
    %c0_147 = arith.constant 0 : index
    %c128 = arith.constant 128 : index
    %390 = vector.load %arg17[%c0_147, %c128] : memref<8x512xf32, #tpu.memory_space<vmem>>, vector<8x32xf32>
    tpu.vector_store %arg17[%c0_147, %c128], %389 {strides = array<i32>} : memref<8x512xf32, #tpu.memory_space<vmem>>, vector<8x32xf32>,
    %c0_148 = arith.constant 0 : index
    %c160 = arith.constant 160 : index
    %391 = vector.load %arg17[%c0_148, %c160] : memref<8x512xf32, #tpu.memory_space<vmem>>, vector<8x32xf32>
    tpu.vector_store %arg17[%c0_148, %c160], %371 {strides = array<i32>} : memref<8x512xf32, #tpu.memory_space<vmem>>, vector<8x32xf32>,
    %c24_149 = arith.constant 24 : index
    %c0_150 = arith.constant 0 : index
    %392 = vector.load %arg16[%c24_149, %c0_150] : memref<64x32xf32, #tpu.memory_space<vmem>>, vector<8x32xf32>
    %393 = vector.shape_cast %392 : vector<8x32xf32> to vector<8x1x32xf32>
    %394 = vector.broadcast %393 : vector<8x1x32xf32> to vector<8x10x32xf32>
    %395 = arith.mulf %394, %328 : vector<8x10x32xf32>
    %cst_151 = arith.constant dense<0.000000e+00> : vector<8x10xf32>
    %396 = vector.multi_reduction <add>, %395, %cst_151 [2] : vector<8x10x32xf32> to vector<8x10xf32>
    %cst_152 = arith.constant dense<0xFF800000> : vector<8xf32>
    %397 = vector.multi_reduction <maximumf>, %396, %cst_152 [1] : vector<8x10xf32> to vector<8xf32>
    %398 = vector.shape_cast %397 : vector<8xf32> to vector<8x1xf32>
    %399 = vector.broadcast %398 : vector<8x1xf32> to vector<8x10xf32>
    %400 = arith.subf %396, %399 : vector<8x10xf32>
    %401 = math.exp %400 : vector<8x10xf32>
    %cst_153 = arith.constant dense<0.000000e+00> : vector<8xf32>
    %402 = vector.multi_reduction <add>, %401, %cst_153 [1] : vector<8x10xf32> to vector<8xf32>
    %403 = vector.shape_cast %402 : vector<8xf32> to vector<8x1xf32>
    %404 = tpu.reciprocal %403 : vector<8x1xf32> -> vector<8x1xf32>
    %405 = vector.broadcast %404 : vector<8x1xf32> to vector<8x10xf32>
    %406 = arith.mulf %401, %405 : vector<8x10xf32>
    %407 = vector.shape_cast %406 : vector<8x10xf32> to vector<8x10x1xf32>
    %408 = vector.broadcast %407 : vector<8x10x1xf32> to vector<8x10x32xf32>
    %409 = arith.mulf %408, %328 : vector<8x10x32xf32>
    %cst_154 = arith.constant dense<0.000000e+00> : vector<8x32xf32>
    %410 = vector.multi_reduction <add>, %409, %cst_154 [1] : vector<8x10x32xf32> to vector<8x32xf32>
    %c0_155 = arith.constant 0 : index
    %c192 = arith.constant 192 : index
    %411 = vector.load %arg17[%c0_155, %c192] : memref<8x512xf32, #tpu.memory_space<vmem>>, vector<8x32xf32>
    tpu.vector_store %arg17[%c0_155, %c192], %410 {strides = array<i32>} : memref<8x512xf32, #tpu.memory_space<vmem>>, vector<8x32xf32>,
    %c0_156 = arith.constant 0 : index
    %c224 = arith.constant 224 : index
    %412 = vector.load %arg17[%c0_156, %c224] : memref<8x512xf32, #tpu.memory_space<vmem>>, vector<8x32xf32>
    tpu.vector_store %arg17[%c0_156, %c224], %392 {strides = array<i32>} : memref<8x512xf32, #tpu.memory_space<vmem>>, vector<8x32xf32>,
    %c32_157 = arith.constant 32 : index
    %c0_158 = arith.constant 0 : index
    %413 = vector.load %arg16[%c32_157, %c0_158] : memref<64x32xf32, #tpu.memory_space<vmem>>, vector<8x32xf32>
    %414 = vector.shape_cast %413 : vector<8x32xf32> to vector<8x1x32xf32>
    %415 = vector.broadcast %414 : vector<8x1x32xf32> to vector<8x10x32xf32>
    %416 = arith.mulf %415, %328 : vector<8x10x32xf32>
    %cst_159 = arith.constant dense<0.000000e+00> : vector<8x10xf32>
    %417 = vector.multi_reduction <add>, %416, %cst_159 [2] : vector<8x10x32xf32> to vector<8x10xf32>
    %cst_160 = arith.constant dense<0xFF800000> : vector<8xf32>
    %418 = vector.multi_reduction <maximumf>, %417, %cst_160 [1] : vector<8x10xf32> to vector<8xf32>
    %419 = vector.shape_cast %418 : vector<8xf32> to vector<8x1xf32>
    %420 = vector.broadcast %419 : vector<8x1xf32> to vector<8x10xf32>
    %421 = arith.subf %417, %420 : vector<8x10xf32>
    %422 = math.exp %421 : vector<8x10xf32>
    %cst_161 = arith.constant dense<0.000000e+00> : vector<8xf32>
    %423 = vector.multi_reduction <add>, %422, %cst_161 [1] : vector<8x10xf32> to vector<8xf32>
    %424 = vector.shape_cast %423 : vector<8xf32> to vector<8x1xf32>
    %425 = tpu.reciprocal %424 : vector<8x1xf32> -> vector<8x1xf32>
    %426 = vector.broadcast %425 : vector<8x1xf32> to vector<8x10xf32>
    %427 = arith.mulf %422, %426 : vector<8x10xf32>
    %428 = vector.shape_cast %427 : vector<8x10xf32> to vector<8x10x1xf32>
    %429 = vector.broadcast %428 : vector<8x10x1xf32> to vector<8x10x32xf32>
    %430 = arith.mulf %429, %328 : vector<8x10x32xf32>
    %cst_162 = arith.constant dense<0.000000e+00> : vector<8x32xf32>
    %431 = vector.multi_reduction <add>, %430, %cst_162 [1] : vector<8x10x32xf32> to vector<8x32xf32>
    %c0_163 = arith.constant 0 : index
    %c256 = arith.constant 256 : index
    %432 = vector.load %arg17[%c0_163, %c256] : memref<8x512xf32, #tpu.memory_space<vmem>>, vector<8x32xf32>
    tpu.vector_store %arg17[%c0_163, %c256], %431 {strides = array<i32>} : memref<8x512xf32, #tpu.memory_space<vmem>>, vector<8x32xf32>,
    %c0_164 = arith.constant 0 : index
    %c288 = arith.constant 288 : index
    %433 = vector.load %arg17[%c0_164, %c288] : memref<8x512xf32, #tpu.memory_space<vmem>>, vector<8x32xf32>
    tpu.vector_store %arg17[%c0_164, %c288], %413 {strides = array<i32>} : memref<8x512xf32, #tpu.memory_space<vmem>>, vector<8x32xf32>,
    %c40_165 = arith.constant 40 : index
    %c0_166 = arith.constant 0 : index
    %434 = vector.load %arg16[%c40_165, %c0_166] : memref<64x32xf32, #tpu.memory_space<vmem>>, vector<8x32xf32>
    %435 = vector.shape_cast %434 : vector<8x32xf32> to vector<8x1x32xf32>
    %436 = vector.broadcast %435 : vector<8x1x32xf32> to vector<8x10x32xf32>
    %437 = arith.mulf %436, %328 : vector<8x10x32xf32>
    %cst_167 = arith.constant dense<0.000000e+00> : vector<8x10xf32>
    %438 = vector.multi_reduction <add>, %437, %cst_167 [2] : vector<8x10x32xf32> to vector<8x10xf32>
    %cst_168 = arith.constant dense<0xFF800000> : vector<8xf32>
    %439 = vector.multi_reduction <maximumf>, %438, %cst_168 [1] : vector<8x10xf32> to vector<8xf32>
    %440 = vector.shape_cast %439 : vector<8xf32> to vector<8x1xf32>
    %441 = vector.broadcast %440 : vector<8x1xf32> to vector<8x10xf32>
    %442 = arith.subf %438, %441 : vector<8x10xf32>
    %443 = math.exp %442 : vector<8x10xf32>
    %cst_169 = arith.constant dense<0.000000e+00> : vector<8xf32>
    %444 = vector.multi_reduction <add>, %443, %cst_169 [1] : vector<8x10xf32> to vector<8xf32>
    %445 = vector.shape_cast %444 : vector<8xf32> to vector<8x1xf32>
    %446 = tpu.reciprocal %445 : vector<8x1xf32> -> vector<8x1xf32>
    %447 = vector.broadcast %446 : vector<8x1xf32> to vector<8x10xf32>
    %448 = arith.mulf %443, %447 : vector<8x10xf32>
    %449 = vector.shape_cast %448 : vector<8x10xf32> to vector<8x10x1xf32>
    %450 = vector.broadcast %449 : vector<8x10x1xf32> to vector<8x10x32xf32>
    %451 = arith.mulf %450, %328 : vector<8x10x32xf32>
    %cst_170 = arith.constant dense<0.000000e+00> : vector<8x32xf32>
    %452 = vector.multi_reduction <add>, %451, %cst_170 [1] : vector<8x10x32xf32> to vector<8x32xf32>
    %c0_171 = arith.constant 0 : index
    %c320 = arith.constant 320 : index
    %453 = vector.load %arg17[%c0_171, %c320] : memref<8x512xf32, #tpu.memory_space<vmem>>, vector<8x32xf32>
    tpu.vector_store %arg17[%c0_171, %c320], %452 {strides = array<i32>} : memref<8x512xf32, #tpu.memory_space<vmem>>, vector<8x32xf32>,
    %c0_172 = arith.constant 0 : index
    %c352 = arith.constant 352 : index
    %454 = vector.load %arg17[%c0_172, %c352] : memref<8x512xf32, #tpu.memory_space<vmem>>, vector<8x32xf32>
    tpu.vector_store %arg17[%c0_172, %c352], %434 {strides = array<i32>} : memref<8x512xf32, #tpu.memory_space<vmem>>, vector<8x32xf32>,
    %c48_173 = arith.constant 48 : index
    %c0_174 = arith.constant 0 : index
    %455 = vector.load %arg16[%c48_173, %c0_174] : memref<64x32xf32, #tpu.memory_space<vmem>>, vector<8x32xf32>
    %456 = vector.shape_cast %455 : vector<8x32xf32> to vector<8x1x32xf32>
    %457 = vector.broadcast %456 : vector<8x1x32xf32> to vector<8x10x32xf32>
    %458 = arith.mulf %457, %328 : vector<8x10x32xf32>
    %cst_175 = arith.constant dense<0.000000e+00> : vector<8x10xf32>
    %459 = vector.multi_reduction <add>, %458, %cst_175 [2] : vector<8x10x32xf32> to vector<8x10xf32>
    %cst_176 = arith.constant dense<0xFF800000> : vector<8xf32>
    %460 = vector.multi_reduction <maximumf>, %459, %cst_176 [1] : vector<8x10xf32> to vector<8xf32>
    %461 = vector.shape_cast %460 : vector<8xf32> to vector<8x1xf32>
    %462 = vector.broadcast %461 : vector<8x1xf32> to vector<8x10xf32>
    %463 = arith.subf %459, %462 : vector<8x10xf32>
    %464 = math.exp %463 : vector<8x10xf32>
    %cst_177 = arith.constant dense<0.000000e+00> : vector<8xf32>
    %465 = vector.multi_reduction <add>, %464, %cst_177 [1] : vector<8x10xf32> to vector<8xf32>
    %466 = vector.shape_cast %465 : vector<8xf32> to vector<8x1xf32>
    %467 = tpu.reciprocal %466 : vector<8x1xf32> -> vector<8x1xf32>
    %468 = vector.broadcast %467 : vector<8x1xf32> to vector<8x10xf32>
    %469 = arith.mulf %464, %468 : vector<8x10xf32>
    %470 = vector.shape_cast %469 : vector<8x10xf32> to vector<8x10x1xf32>
    %471 = vector.broadcast %470 : vector<8x10x1xf32> to vector<8x10x32xf32>
    %472 = arith.mulf %471, %328 : vector<8x10x32xf32>
    %cst_178 = arith.constant dense<0.000000e+00> : vector<8x32xf32>
    %473 = vector.multi_reduction <add>, %472, %cst_178 [1] : vector<8x10x32xf32> to vector<8x32xf32>
    %c0_179 = arith.constant 0 : index
    %c384 = arith.constant 384 : index
    %474 = vector.load %arg17[%c0_179, %c384] : memref<8x512xf32, #tpu.memory_space<vmem>>, vector<8x32xf32>
    tpu.vector_store %arg17[%c0_179, %c384], %473 {strides = array<i32>} : memref<8x512xf32, #tpu.memory_space<vmem>>, vector<8x32xf32>,
    %c0_180 = arith.constant 0 : index
    %c416 = arith.constant 416 : index
    %475 = vector.load %arg17[%c0_180, %c416] : memref<8x512xf32, #tpu.memory_space<vmem>>, vector<8x32xf32>
    tpu.vector_store %arg17[%c0_180, %c416], %455 {strides = array<i32>} : memref<8x512xf32, #tpu.memory_space<vmem>>, vector<8x32xf32>,
    %c56_181 = arith.constant 56 : index
    %c0_182 = arith.constant 0 : index
    %476 = vector.load %arg16[%c56_181, %c0_182] : memref<64x32xf32, #tpu.memory_space<vmem>>, vector<8x32xf32>
    %477 = vector.shape_cast %476 : vector<8x32xf32> to vector<8x1x32xf32>
    %478 = vector.broadcast %477 : vector<8x1x32xf32> to vector<8x10x32xf32>
    %479 = arith.mulf %478, %328 : vector<8x10x32xf32>
    %cst_183 = arith.constant dense<0.000000e+00> : vector<8x10xf32>
    %480 = vector.multi_reduction <add>, %479, %cst_183 [2] : vector<8x10x32xf32> to vector<8x10xf32>
    %cst_184 = arith.constant dense<0xFF800000> : vector<8xf32>
    %481 = vector.multi_reduction <maximumf>, %480, %cst_184 [1] : vector<8x10xf32> to vector<8xf32>
    %482 = vector.shape_cast %481 : vector<8xf32> to vector<8x1xf32>
    %483 = vector.broadcast %482 : vector<8x1xf32> to vector<8x10xf32>
    %484 = arith.subf %480, %483 : vector<8x10xf32>
    %485 = math.exp %484 : vector<8x10xf32>
    %cst_185 = arith.constant dense<0.000000e+00> : vector<8xf32>
    %486 = vector.multi_reduction <add>, %485, %cst_185 [1] : vector<8x10xf32> to vector<8xf32>
    %487 = vector.shape_cast %486 : vector<8xf32> to vector<8x1xf32>
    %488 = tpu.reciprocal %487 : vector<8x1xf32> -> vector<8x1xf32>
    %489 = vector.broadcast %488 : vector<8x1xf32> to vector<8x10xf32>
    %490 = arith.mulf %485, %489 : vector<8x10xf32>
    %491 = vector.shape_cast %490 : vector<8x10xf32> to vector<8x10x1xf32>
    %492 = vector.broadcast %491 : vector<8x10x1xf32> to vector<8x10x32xf32>
    %493 = arith.mulf %492, %328 : vector<8x10x32xf32>
    %cst_186 = arith.constant dense<0.000000e+00> : vector<8x32xf32>
    %494 = vector.multi_reduction <add>, %493, %cst_186 [1] : vector<8x10x32xf32> to vector<8x32xf32>
    %c0_187 = arith.constant 0 : index
    %c448 = arith.constant 448 : index
    %495 = vector.load %arg17[%c0_187, %c448] : memref<8x512xf32, #tpu.memory_space<vmem>>, vector<8x32xf32>
    tpu.vector_store %arg17[%c0_187, %c448], %494 {strides = array<i32>} : memref<8x512xf32, #tpu.memory_space<vmem>>, vector<8x32xf32>,
    %c0_188 = arith.constant 0 : index
    %c480 = arith.constant 480 : index
    %496 = vector.load %arg17[%c0_188, %c480] : memref<8x512xf32, #tpu.memory_space<vmem>>, vector<8x32xf32>
    tpu.vector_store %arg17[%c0_188, %c480], %476 {strides = array<i32>} : memref<8x512xf32, #tpu.memory_space<vmem>>, vector<8x32xf32>,
    %497 = tpu.iota {dimensions = array<i32: 0>} : vector<512x64xi32>
    %498 = tpu.iota {dimensions = array<i32: 1>} : vector<512x64xi32>
    %c8_i32 = arith.constant 8 : i32
    %499 = vector.broadcast %c8_i32 : i32 to vector<512x64xi32>
    %500 = arith.muli %498, %499 : vector<512x64xi32>
    %501 = arith.cmpi sge, %497, %500 : vector<512x64xi32>
    %c8_i32_189 = arith.constant 8 : i32
    %502 = vector.broadcast %c8_i32_189 : i32 to vector<512x64xi32>
    %503 = arith.muli %498, %502 : vector<512x64xi32>
    %c8_i32_190 = arith.constant 8 : i32
    %504 = vector.broadcast %c8_i32_190 : i32 to vector<512x64xi32>
    %505 = arith.addi %503, %504 : vector<512x64xi32>
    %506 = arith.cmpi slt, %497, %505 : vector<512x64xi32>
    %507 = arith.andi %501, %506 : vector<512x64xi1>
    %cst_191 = arith.constant 1.000000e+00 : f32
    %cst_192 = arith.constant 0.000000e+00 : f32
    %508 = vector.broadcast %cst_191 : f32 to vector<512x64xf32>
    %509 = vector.broadcast %cst_192 : f32 to vector<512x64xf32>
    %510 = arith.select %507, %508, %509 : vector<512x64xi1>, vector<512x64xf32>
    %511 = tpu.iota {dimensions = array<i32: 0>} : vector<64x512xi32>
    %512 = tpu.iota {dimensions = array<i32: 1>} : vector<64x512xi32>
    %c8_i32_193 = arith.constant 8 : i32
    %513 = vector.broadcast %c8_i32_193 : i32 to vector<64x512xi32>
    %514 = arith.muli %511, %513 : vector<64x512xi32>
    %515 = arith.cmpi sge, %512, %514 : vector<64x512xi32>
    %c8_i32_194 = arith.constant 8 : i32
    %516 = vector.broadcast %c8_i32_194 : i32 to vector<64x512xi32>
    %517 = arith.muli %511, %516 : vector<64x512xi32>
    %c8_i32_195 = arith.constant 8 : i32
    %518 = vector.broadcast %c8_i32_195 : i32 to vector<64x512xi32>
    %519 = arith.addi %517, %518 : vector<64x512xi32>
    %520 = arith.cmpi slt, %512, %519 : vector<64x512xi32>
    %521 = arith.andi %515, %520 : vector<64x512xi1>
    %cst_196 = arith.constant 1.000000e+00 : f32
    %cst_197 = arith.constant 0.000000e+00 : f32
    %522 = vector.broadcast %cst_196 : f32 to vector<64x512xf32>
    %523 = vector.broadcast %cst_197 : f32 to vector<64x512xf32>
    %524 = arith.select %521, %522, %523 : vector<64x512xi1>, vector<64x512xf32>
    %c0_198 = arith.constant 0 : index
    %c0_199 = arith.constant 0 : index
    %525 = vector.load %arg17[%c0_198, %c0_199] : memref<8x512xf32, #tpu.memory_space<vmem>>, vector<8x512xf32>
    %cst_200 = arith.constant dense<0.000000e+00> : vector<512xf32>
    %526 = vector.multi_reduction <add>, %525, %cst_200 [0] : vector<8x512xf32> to vector<512xf32>
    %527 = vector.shape_cast %526 : vector<512xf32> to vector<1x512xf32>
    %cst_201 = arith.constant dense<0.000000e+00> : vector<1x64xf32>
    %528 = tpu.matmul %527, %510, %cst_201 {dimension_numbers = #tpu.dot_dimension_numbers<[1], [0], [0], [1], [0, 0, 1, 1], [], []>} : vector<1x512xf32>, vector<512x64xf32>, vector<1x64xf32> -> vector<1x64xf32>
    %cst_202 = arith.constant 6.400000e+01 : f32
    %529 = vector.broadcast %cst_202 : f32 to vector<1x64xf32>
    %530 = arith.divf %528, %529 : vector<1x64xf32>
    %cst_203 = arith.constant dense<0.000000e+00> : vector<1x512xf32>
    %531 = tpu.matmul %530, %524, %cst_203 {dimension_numbers = #tpu.dot_dimension_numbers<[1], [0], [0], [1], [0, 0, 1, 1], [], []>} : vector<1x64xf32>, vector<64x512xf32>, vector<1x512xf32> -> vector<1x512xf32>
    %532 = vector.broadcast %531 : vector<1x512xf32> to vector<8x512xf32>
    %533 = arith.subf %525, %532 : vector<8x512xf32>
    %534 = arith.mulf %533, %533 : vector<8x512xf32>
    %cst_204 = arith.constant dense<0.000000e+00> : vector<512xf32>
    %535 = vector.multi_reduction <add>, %534, %cst_204 [0] : vector<8x512xf32> to vector<512xf32>
    %536 = vector.shape_cast %535 : vector<512xf32> to vector<1x512xf32>
    %cst_205 = arith.constant dense<0.000000e+00> : vector<1x64xf32>
    %537 = tpu.matmul %536, %510, %cst_205 {dimension_numbers = #tpu.dot_dimension_numbers<[1], [0], [0], [1], [0, 0, 1, 1], [], []>} : vector<1x512xf32>, vector<512x64xf32>, vector<1x64xf32> -> vector<1x64xf32>
    %cst_206 = arith.constant 6.400000e+01 : f32
    %538 = vector.broadcast %cst_206 : f32 to vector<1x64xf32>
    %539 = arith.divf %537, %538 : vector<1x64xf32>
    %c0_207 = arith.constant 0 : index
    %c0_208 = arith.constant 0 : index
    %540 = vector.load %arg4[%c0_207, %c0_208] : memref<1x64xf32, #tpu.memory_space<vmem>>, vector<1x64xf32>
    %cst_209 = arith.constant 9.99999974E-6 : f32
    %541 = vector.broadcast %cst_209 : f32 to vector<1x64xf32>
    %542 = arith.addf %539, %541 : vector<1x64xf32>
    %543 = math.rsqrt %542 : vector<1x64xf32>
    %544 = arith.mulf %540, %543 : vector<1x64xf32>
    %c0_210 = arith.constant 0 : index
    %c0_211 = arith.constant 0 : index
    %545 = vector.load %arg5[%c0_210, %c0_211] : memref<1x64xf32, #tpu.memory_space<vmem>>, vector<1x64xf32>
    %546 = arith.mulf %530, %544 : vector<1x64xf32>
    %547 = arith.subf %545, %546 : vector<1x64xf32>
    %cst_212 = arith.constant dense<0.000000e+00> : vector<1x512xf32>
    %548 = tpu.matmul %544, %524, %cst_212 {dimension_numbers = #tpu.dot_dimension_numbers<[1], [0], [0], [1], [0, 0, 1, 1], [], []>} : vector<1x64xf32>, vector<64x512xf32>, vector<1x512xf32> -> vector<1x512xf32>
    %cst_213 = arith.constant dense<0.000000e+00> : vector<1x512xf32>
    %549 = tpu.matmul %547, %524, %cst_213 {dimension_numbers = #tpu.dot_dimension_numbers<[1], [0], [0], [1], [0, 0, 1, 1], [], []>} : vector<1x64xf32>, vector<64x512xf32>, vector<1x512xf32> -> vector<1x512xf32>
    %550 = vector.broadcast %548 : vector<1x512xf32> to vector<8x512xf32>
    %551 = arith.mulf %525, %550 : vector<8x512xf32>
    %552 = vector.broadcast %549 : vector<1x512xf32> to vector<8x512xf32>
    %553 = arith.addf %551, %552 : vector<8x512xf32>
    %c0_214 = arith.constant 0 : index
    %c0_215 = arith.constant 0 : index
    %554 = vector.load %arg6[%c0_214, %c0_215] : memref<64x16xf32, #tpu.memory_space<vmem>>, vector<64x16xf32>
    %c0_216 = arith.constant 0 : index
    %c0_217 = arith.constant 0 : index
    %555 = vector.load %arg7[%c0_216, %c0_217] : memref<1x16xf32, #tpu.memory_space<vmem>>, vector<1x16xf32>
    %556 = vector.extract_strided_slice %553 {offsets = [0, 0], sizes = [8, 64], strides = [1, 1]} : vector<8x512xf32> to vector<8x64xf32>
    %cst_218 = arith.constant dense<0.000000e+00> : vector<8x16xf32>
    %557 = tpu.matmul %556, %554, %cst_218 {dimension_numbers = #tpu.dot_dimension_numbers<[1], [0], [0], [1], [0, 0, 1, 1], [], []>} : vector<8x64xf32>, vector<64x16xf32>, vector<8x16xf32> -> vector<8x16xf32>
    %558 = vector.broadcast %555 : vector<1x16xf32> to vector<8x16xf32>
    %559 = arith.addf %557, %558 : vector<8x16xf32>
    %c0_219 = arith.constant 0 : index
    %c0_220 = arith.constant 0 : index
    %560 = vector.load %arg14[%c0_219, %c0_220] : memref<8x128xf32, #tpu.memory_space<vmem>>, vector<8x16xf32>
    tpu.vector_store %arg14[%c0_219, %c0_220], %559 {strides = array<i32>} : memref<8x128xf32, #tpu.memory_space<vmem>>, vector<8x16xf32>,
    %561 = vector.extract_strided_slice %553 {offsets = [0, 64], sizes = [8, 64], strides = [1, 1]} : vector<8x512xf32> to vector<8x64xf32>
    %cst_221 = arith.constant dense<0.000000e+00> : vector<8x16xf32>
    %562 = tpu.matmul %561, %554, %cst_221 {dimension_numbers = #tpu.dot_dimension_numbers<[1], [0], [0], [1], [0, 0, 1, 1], [], []>} : vector<8x64xf32>, vector<64x16xf32>, vector<8x16xf32> -> vector<8x16xf32>
    %563 = vector.broadcast %555 : vector<1x16xf32> to vector<8x16xf32>
    %564 = arith.addf %562, %563 : vector<8x16xf32>
    %c0_222 = arith.constant 0 : index
    %c16_223 = arith.constant 16 : index
    %565 = vector.load %arg14[%c0_222, %c16_223] : memref<8x128xf32, #tpu.memory_space<vmem>>, vector<8x16xf32>
    tpu.vector_store %arg14[%c0_222, %c16_223], %564 {strides = array<i32>} : memref<8x128xf32, #tpu.memory_space<vmem>>, vector<8x16xf32>,
    %566 = vector.extract_strided_slice %553 {offsets = [0, 128], sizes = [8, 64], strides = [1, 1]} : vector<8x512xf32> to vector<8x64xf32>
    %cst_224 = arith.constant dense<0.000000e+00> : vector<8x16xf32>
    %567 = tpu.matmul %566, %554, %cst_224 {dimension_numbers = #tpu.dot_dimension_numbers<[1], [0], [0], [1], [0, 0, 1, 1], [], []>} : vector<8x64xf32>, vector<64x16xf32>, vector<8x16xf32> -> vector<8x16xf32>
    %568 = vector.broadcast %555 : vector<1x16xf32> to vector<8x16xf32>
    %569 = arith.addf %567, %568 : vector<8x16xf32>
    %c0_225 = arith.constant 0 : index
    %c32_226 = arith.constant 32 : index
    %570 = vector.load %arg14[%c0_225, %c32_226] : memref<8x128xf32, #tpu.memory_space<vmem>>, vector<8x16xf32>
    tpu.vector_store %arg14[%c0_225, %c32_226], %569 {strides = array<i32>} : memref<8x128xf32, #tpu.memory_space<vmem>>, vector<8x16xf32>,
    %571 = vector.extract_strided_slice %553 {offsets = [0, 192], sizes = [8, 64], strides = [1, 1]} : vector<8x512xf32> to vector<8x64xf32>
    %cst_227 = arith.constant dense<0.000000e+00> : vector<8x16xf32>
    %572 = tpu.matmul %571, %554, %cst_227 {dimension_numbers = #tpu.dot_dimension_numbers<[1], [0], [0], [1], [0, 0, 1, 1], [], []>} : vector<8x64xf32>, vector<64x16xf32>, vector<8x16xf32> -> vector<8x16xf32>
    %573 = vector.broadcast %555 : vector<1x16xf32> to vector<8x16xf32>
    %574 = arith.addf %572, %573 : vector<8x16xf32>
    %c0_228 = arith.constant 0 : index
    %c48_229 = arith.constant 48 : index
    %575 = vector.load %arg14[%c0_228, %c48_229] : memref<8x128xf32, #tpu.memory_space<vmem>>, vector<8x16xf32>
    tpu.vector_store %arg14[%c0_228, %c48_229], %574 {strides = array<i32>} : memref<8x128xf32, #tpu.memory_space<vmem>>, vector<8x16xf32>,
    %576 = vector.extract_strided_slice %553 {offsets = [0, 256], sizes = [8, 64], strides = [1, 1]} : vector<8x512xf32> to vector<8x64xf32>
    %cst_230 = arith.constant dense<0.000000e+00> : vector<8x16xf32>
    %577 = tpu.matmul %576, %554, %cst_230 {dimension_numbers = #tpu.dot_dimension_numbers<[1], [0], [0], [1], [0, 0, 1, 1], [], []>} : vector<8x64xf32>, vector<64x16xf32>, vector<8x16xf32> -> vector<8x16xf32>
    %578 = vector.broadcast %555 : vector<1x16xf32> to vector<8x16xf32>
    %579 = arith.addf %577, %578 : vector<8x16xf32>
    %c0_231 = arith.constant 0 : index
    %c64_232 = arith.constant 64 : index
    %580 = vector.load %arg14[%c0_231, %c64_232] : memref<8x128xf32, #tpu.memory_space<vmem>>, vector<8x16xf32>
    tpu.vector_store %arg14[%c0_231, %c64_232], %579 {strides = array<i32>} : memref<8x128xf32, #tpu.memory_space<vmem>>, vector<8x16xf32>,
    %581 = vector.extract_strided_slice %553 {offsets = [0, 320], sizes = [8, 64], strides = [1, 1]} : vector<8x512xf32> to vector<8x64xf32>
    %cst_233 = arith.constant dense<0.000000e+00> : vector<8x16xf32>
    %582 = tpu.matmul %581, %554, %cst_233 {dimension_numbers = #tpu.dot_dimension_numbers<[1], [0], [0], [1], [0, 0, 1, 1], [], []>} : vector<8x64xf32>, vector<64x16xf32>, vector<8x16xf32> -> vector<8x16xf32>
    %583 = vector.broadcast %555 : vector<1x16xf32> to vector<8x16xf32>
    %584 = arith.addf %582, %583 : vector<8x16xf32>
    %c0_234 = arith.constant 0 : index
    %c80 = arith.constant 80 : index
    %585 = vector.load %arg14[%c0_234, %c80] : memref<8x128xf32, #tpu.memory_space<vmem>>, vector<8x16xf32>
    tpu.vector_store %arg14[%c0_234, %c80], %584 {strides = array<i32>} : memref<8x128xf32, #tpu.memory_space<vmem>>, vector<8x16xf32>,
    %586 = vector.extract_strided_slice %553 {offsets = [0, 384], sizes = [8, 64], strides = [1, 1]} : vector<8x512xf32> to vector<8x64xf32>
    %cst_235 = arith.constant dense<0.000000e+00> : vector<8x16xf32>
    %587 = tpu.matmul %586, %554, %cst_235 {dimension_numbers = #tpu.dot_dimension_numbers<[1], [0], [0], [1], [0, 0, 1, 1], [], []>} : vector<8x64xf32>, vector<64x16xf32>, vector<8x16xf32> -> vector<8x16xf32>
    %588 = vector.broadcast %555 : vector<1x16xf32> to vector<8x16xf32>
    %589 = arith.addf %587, %588 : vector<8x16xf32>
    %c0_236 = arith.constant 0 : index
    %c96_237 = arith.constant 96 : index
    %590 = vector.load %arg14[%c0_236, %c96_237] : memref<8x128xf32, #tpu.memory_space<vmem>>, vector<8x16xf32>
    tpu.vector_store %arg14[%c0_236, %c96_237], %589 {strides = array<i32>} : memref<8x128xf32, #tpu.memory_space<vmem>>, vector<8x16xf32>,
    %591 = vector.extract_strided_slice %553 {offsets = [0, 448], sizes = [8, 64], strides = [1, 1]} : vector<8x512xf32> to vector<8x64xf32>
    %cst_238 = arith.constant dense<0.000000e+00> : vector<8x16xf32>
    %592 = tpu.matmul %591, %554, %cst_238 {dimension_numbers = #tpu.dot_dimension_numbers<[1], [0], [0], [1], [0, 0, 1, 1], [], []>} : vector<8x64xf32>, vector<64x16xf32>, vector<8x16xf32> -> vector<8x16xf32>
    %593 = vector.broadcast %555 : vector<1x16xf32> to vector<8x16xf32>
    %594 = arith.addf %592, %593 : vector<8x16xf32>
    %c0_239 = arith.constant 0 : index
    %c112 = arith.constant 112 : index
    %595 = vector.load %arg14[%c0_239, %c112] : memref<8x128xf32, #tpu.memory_space<vmem>>, vector<8x16xf32>
    tpu.vector_store %arg14[%c0_239, %c112], %594 {strides = array<i32>} : memref<8x128xf32, #tpu.memory_space<vmem>>, vector<8x16xf32>,
    return
  }
}

</mosaic_0001>

<bundles_post_ra>
// kernel: tpu_custom_call.1
= control target key start
LH: loop header
LB: loop body
LE: loop exit
PB: predicated region body
PF: predicated region fallthrough
CT: control target
= control target key end

     0   :  { %vm61_vm0 = vcmask 64512   ;;  %s13052_s0 = inlined_call_operand.vmem [shape: f32[64,8], index: 0, kind: input, shape index: {}]   ;;  %s13053_s1 = inlined_call_operand.vmem [shape: f32[2,8,32], index: 1, kind: input, shape index: {}]   ;;  %s13054_s2 = inlined_call_operand.vmem [shape: f32[2,8,32], index: 2, kind: input, shape index: {}]   ;;  %s13055_s3 = inlined_call_operand.vmem [shape: f32[8,10,32], index: 3, kind: input, shape index: {}]   ;;  %s13056_s4 = inlined_call_operand.vmem [shape: f32[1,64], index: 4, kind: input, shape index: {}]   ;;  %s13057_s5 = inlined_call_operand.vmem [shape: f32[1,64], index: 5, kind: input, shape index: {}]   ;;  %s13058_s6 = inlined_call_operand.vmem [shape: f32[64,16], index: 6, kind: input, shape index: {}]   ;;  %s13059_s7 = inlined_call_operand.vmem [shape: f32[1,16], index: 7, kind: input, shape index: {}]   ;;  %s13060_s8 = inlined_call_operand.vmem [shape: f32[8,128], index: 8, kind: input, shape index: {}]   ;;  %s13061_s9 = inlined_call_operand.vmem [shape: f32[32,128], index: 9, kind: input, shape index: {}]   ;;  %s13062_s10 = inlined_call_operand.vmem [shape: f32[1,128], index: 10, kind: input, shape index: {}]   ;;  %s13063_s11 = inlined_call_operand.vmem [shape: f32[32,128], index: 11, kind: input, shape index: {}]   ;;  %s13064_s12 = inlined_call_operand.vmem [shape: f32[32,128], index: 12, kind: input, shape index: {}]   ;;  %s13065_s13 = inlined_call_operand.vmem [shape: f32[1,128], index: 13, kind: input, shape index: {}]   ;;  %s13066_s14 = inlined_call_operand.hbm [shape: f32[8,128], index: 14, kind: output, shape index: {}]  }
   0x1   :  { %v7841_v0 = vld [vmem:[%s13061_s9 + $0x18] sm:$0xff]  ;;  %v7846_v1 = vld [vmem:[%s13061_s9 + $0x10] sm:$0xff]  ;;  %v56_v2 = vld [vmem:[%s13060_s8] sm:$0xff] }
   0x2   :  { %158 = vmatpush.msra.mxu3 %v7841_v0  ;;  %228 = vmatpush.msra.mxu2 %v7841_v0  ;;  %v7856_v3 = vld [vmem:[%s13061_s9 + $0x8] sm:$0xff]  ;;  %v48_v4 = vld [vmem:[%s13052_s0] sm:$0xff] }
   0x3   :  { %101 = vmatpush.msra.mxu0 %v56_v2  ;;  %360 = vmatpush.msra.mxu1 %v7841_v0 }
   0x4   :  { %159 = vmatpush.msra.mxu3 %v7846_v1  ;;  %6910 = vmatmul.msk.f32.vlgmr.msra.gmra.mxu0 %vm61_vm0, %v48_v4 }
   0x5   :  { %19 = vsyncpa [#allocation6], 0  ;;  %v7867_v5 = vld [vmem:[%s13061_s9] sm:$0xff]  ;;  %229 = vmatpush.msra.mxu2 %v7846_v1  ;;  %361 = vmatpush.msra.mxu1 %v7846_v1  ;;  %vm13099_vm1 = vcmask 261120   ;;  %s7752_s27 = smov 64   ;;  %s7753_s30 = smov 32  }
   0x6   :  { %160 = vmatpush.msra.mxu3 %v7856_v3  ;;  %v139_v6 = vld [vmem:[%s13053_s1] sm:$0xff]  ;;  %v49_v36 = vld [vmem:[%s13052_s0 + $0x8] sm:$0xff]  ;;  %s7761_s28 = smov 112  }
   0x7   :  { %230 = vmatpush.msra.mxu2 %v7856_v3  ;;  %362 = vmatpush.msra.mxu1 %v7856_v3  ;;  %v7900_v7 = vld [vmem:[%s13062_s10] ss:$0 sm:$0xff] }
   0x8   :  { %161 = vmatpush.msra.mxu3 %v7867_v5  ;;  %v140_v13 = vld [vmem:[%s13054_s2] sm:$0xff] }
   0x9   :  { %6918 = vmatmul.msk.f32.vlgmr.msra.gmra.mxu3 %vm13099_vm1, %v139_v6  ;;  %231 = vmatpush.msra.mxu2 %v7867_v5 }
   0xa   :  { %294 = vmatpush.msrb.mxu3 %v7841_v0  ;;  %363 = vmatpush.msra.mxu1 %v7867_v5 }
   0xb   :  { %426 = vmatpush.msrb.mxu2 %v7841_v0 }
   0xc   :  { %558 = vmatpush.msrb.mxu1 %v7841_v0  ;;  %295 = vmatpush.msrb.mxu3 %v7846_v1 }
   0xd   :  { %427 = vmatpush.msrb.mxu2 %v7846_v1  ;;  %6911 = vmatmul.msk.f32.gmra.mxu0 %vm61_vm0, %v49_v36 }
   0xe   :  { %559 = vmatpush.msrb.mxu1 %v7846_v1  ;;  %296 = vmatpush.msrb.mxu3 %v7856_v3 }
   0xf   :  { %428 = vmatpush.msrb.mxu2 %v7856_v3 }
  0x10   :  { %560 = vmatpush.msrb.mxu1 %v7856_v3  ;;  %297 = vmatpush.msrb.mxu3 %v7867_v5 }
  0x11   :  { %429 = vmatpush.msrb.mxu2 %v7867_v5 }
  0x12   :  { %492 = vmatpush.msra.mxu3 %v7841_v0  ;;  %561 = vmatpush.msrb.mxu1 %v7867_v5 }
  0x14   :  { %493 = vmatpush.msra.mxu3 %v7846_v1 }
  0x16   :  { %494 = vmatpush.msra.mxu3 %v7856_v3 }
  0x18   :  { %495 = vmatpush.msra.mxu3 %v7867_v5 }
  0x81   :  { %v103_v8 = vpop.f32.mrf.mxu0 }
  0x82   :  { %v104_v9 = vadd.f32 %v7900_v7, %v103_v8 }
  0x8a   :  { %v106_v38 = vpop.f32.mrf.mxu0 }
  0x8b   :  { %v107_v39 = vadd.f32 %v7900_v7, %v106_v38 }
  0x8c   :  { %v163_v10 = vpop.f32.mrf.mxu3 }
  0x8d   :  { %v166_v11 = vadd.f32 %v163_v10, %v104_v9 }
  0x8f   :  { %7221 = vtanh.f32 %v166_v11  ;;  %v6919_v14 = vmul.f32 -1.442695, %v166_v11 }
  0x91   :  { %7223 = vpow2.f32 %v6919_v14 }
  0x95   :  { %v7222_v12 = vpop.eup %7221 }
  0x96   :  { %193 = vrot.lane.b32.xlu0 %v7222_v12, %s7752_s27 }
  0x97   :  { %v7224_v15 = vpop.eup %7223 }
  0x98   :  { %v170_v16 = vadd.f32 1.0, %v7224_v15 }
  0x9a   :  { %7225 = vrcp.f32 %v170_v16  ;;  %v182_v22 = vand.u32 2147483648, %v170_v16  ;;  %vm176_vm3 = vweird.f32 %v170_v16  ;;  %v180_v23 = vand.u32 2147483647, %v170_v16 }
  0x9c   :  { %v183_v25 = vor.u32 1.1754944e-38, %v182_v22  ;;  %vm181_vm5 = vcmp.eq.f32.partialorder %v180_v23, 8.507059e+37 }
  0x9e   :  { %188 = vrot.lane.b32.xlu0 %v140_v13, %s7753_s30 }
  0xa0   :  { %v7226_v17 = vpop.eup %7225 }
  0xa1   :  { %v172_v18 = vmul.f32 %v7226_v17, %v170_v16  ;;  %vm177_vm2 = vweird.f32 %v7226_v17 }
  0xa2   :  { %vm178_vm4 = vmor %vm176_vm3, %vm177_vm2 }
  0xa3   :  { %v173_v19 = vsub.f32 1.0, %v172_v18 }
  0xa5   :  { %v174_v20 = vmul.f32 %v7226_v17, %v173_v19 }
  0xa7   :  { %v175_v21 = vadd.f32 %v7226_v17, %v174_v20 }
  0xa9   :  { %v179_v24 = vsel %vm178_vm4, %v7226_v17, %v175_v21 }
  0xaa   :  { %v184_v27 = vsel %vm181_vm5, %v183_v25, %v179_v24 }
 0x108   :  { %v194_v26 = vpop.permute.xlu0 %193 }
 0x109   :  { %v196_v28 = vmul.f32 %v194_v26, %v184_v27 }
 0x10b   :  { %198 = vrot.lane.b32.xlu1 %v196_v28, %s7753_s30 }
 0x110   :  { %v189_v29 = vpop.permute.xlu0 %188 }
 0x111   :  { %v191_v30 = vmul.f32 %v189_v29, %v184_v27 }
 0x17d   :  { %v199_v31 = vpop.permute.xlu1 %198 }
 0x17e   :  { %v201_v32 = vadd.f32 %v199_v31, %v191_v30 }
 0x180   :  { %7227 = vtanh.f32 %v201_v32 }
 0x186   :  { %v7228_v33 = vpop.eup %7227 }
 0x187   :  { %204 = vrot.lane.b32.xlu1 %v7228_v33, %s7752_s27 }
 0x1f9   :  { %v205_v34 = vpop.permute.xlu1 %204 }
 0x1fa   :  { %v207_v35 = vmul.f32 %v205_v34, %v184_v27  ;;  %v51_v27 = vld [vmem:[%s13052_s0 + $0x18] sm:$0xff] }
 0x1fc   :  { %209 = vrot.lane.b32.xlu2 %v207_v35, %s7753_s30 }
 0x256   :  { %v210_v37 = vpop.permute.xlu2 %209 }
 0x257   :  { %212 = vst.msk [vmem:[#allocation3] sm:$0xff] %vm13099_vm1, %v210_v37  ;;  %6920 = vmatmul.msk.f32.vlgmr.msra.gmra.mxu2 %vm13099_vm1, %v210_v37 }
 0x258   :  { %624 = vmatpush.msra.mxu2 %v7841_v0  ;;  %v50_v0 = vld [vmem:[%s13052_s0 + $0x10] sm:$0xff] }
 0x259   :  { %6912 = vmatmul.msk.f32.gmra.mxu0 %vm61_vm0, %v50_v0 }
 0x25a   :  { %625 = vmatpush.msra.mxu2 %v7846_v1 }
 0x25c   :  { %626 = vmatpush.msra.mxu2 %v7856_v3 }
 0x25e   :  { %627 = vmatpush.msra.mxu2 %v7867_v5 }
 0x261   :  { %6913 = vmatmul.msk.f32.gmra.mxu0 %vm61_vm0, %v51_v27 }
 0x2d6   :  { %v109_v2 = vpop.f32.mrf.mxu0 }
 0x2d7   :  { %v110_v3 = vadd.f32 %v7900_v7, %v109_v2 }
 0x2da   :  { %v233_v40 = vpop.f32.mrf.mxu2 }
 0x2db   :  { %v236_v41 = vadd.f32 %v233_v40, %v107_v39 }
 0x2dd   :  { %7229 = vtanh.f32 %v236_v41  ;;  %v6921_v43 = vmul.f32 -1.442695, %v236_v41 }
 0x2de   :  { %v112_v31 = vpop.f32.mrf.mxu0 }
 0x2df   :  { %7231 = vpow2.f32 %v6921_v43 }
 0x2e3   :  { %v7230_v42 = vpop.eup %7229 }
 0x2e4   :  { %259 = vrot.lane.b32.xlu2 %v7230_v42, %s7752_s27 }
 0x2e5   :  { %v7232_v44 = vpop.eup %7231 }
 0x2e6   :  { %v240_v45 = vadd.f32 1.0, %v7232_v44 }
 0x2e8   :  { %7233 = vrcp.f32 %v240_v45  ;;  %v252_v51 = vand.u32 2147483648, %v240_v45  ;;  %vm246_vm7 = vweird.f32 %v240_v45  ;;  %v250_v52 = vand.u32 2147483647, %v240_v45 }
 0x2ea   :  { %v253_v54 = vor.u32 1.1754944e-38, %v252_v51  ;;  %vm251_vm9 = vcmp.eq.f32.partialorder %v250_v52, 8.507059e+37 }
 0x2ee   :  { %v7234_v46 = vpop.eup %7233 }
 0x2ef   :  { %v242_v47 = vmul.f32 %v7234_v46, %v240_v45  ;;  %vm247_vm6 = vweird.f32 %v7234_v46 }
 0x2f0   :  { %vm248_vm8 = vmor %vm246_vm7, %vm247_vm6 }
 0x2f1   :  { %v243_v48 = vsub.f32 1.0, %v242_v47 }
 0x2f3   :  { %v244_v49 = vmul.f32 %v7234_v46, %v243_v48 }
 0x2f5   :  { %v245_v50 = vadd.f32 %v7234_v46, %v244_v49 }
 0x2f7   :  { %v249_v53 = vsel %vm248_vm8, %v7234_v46, %v245_v50 }
 0x2f8   :  { %v254_v56 = vsel %vm251_vm9, %v253_v54, %v249_v53 }
 0x2f9   :  { %v257_v58 = vmul.f32 %v254_v56, %v201_v32  ;;  %v113_v32 = vadd.f32 %v7900_v7, %v112_v31 }
 0x33e   :  { %v260_v55 = vpop.permute.xlu2 %259 }
 0x33f   :  { %v262_v57 = vmul.f32 %v260_v55, %v254_v56 }
 0x341   :  { %264 = vrot.lane.b32.xlu0 %v262_v57, %s7753_s30  ;;  %v52_v57 = vld [vmem:[%s13052_s0 + $0x20] sm:$0xff] }
 0x342   :  { %6914 = vmatmul.msk.f32.gmra.mxu0 %vm61_vm0, %v52_v57  ;;  %v54_v57 = vld [vmem:[%s13052_s0 + $0x30] sm:$0xff] }
 0x3b3   :  { %v265_v59 = vpop.permute.xlu0 %264 }
 0x3b4   :  { %v267_v60 = vadd.f32 %v265_v59, %v257_v58 }
 0x3b6   :  { %7235 = vtanh.f32 %v267_v60 }
 0x3bc   :  { %v7236_v61 = vpop.eup %7235 }
 0x3bd   :  { %270 = vrot.lane.b32.xlu1 %v7236_v61, %s7752_s27 }
 0x3bf   :  { %v115_v59 = vpop.f32.mrf.mxu0 }
 0x42f   :  { %v271_v62 = vpop.permute.xlu1 %270 }
 0x430   :  { %v273_v63 = vmul.f32 %v271_v62, %v254_v56 }
 0x432   :  { %275 = vrot.lane.b32.xlu2 %v273_v63, %s7753_s30 }
 0x48c   :  { %v276_v1 = vpop.permute.xlu2 %275 }
 0x48d   :  { %278 = vst.msk [vmem:[#allocation3 + $0x8] sm:$0xff] %vm13099_vm1, %v276_v1  ;;  %6922 = vmatmul.msk.f32.vlgmr.msrb.gmra.mxu3 %vm13099_vm1, %v276_v1 }
 0x510   :  { %v299_v4 = vpop.f32.mrf.mxu3 }
 0x511   :  { %v302_v5 = vadd.f32 %v299_v4, %v110_v3 }
 0x513   :  { %7237 = vtanh.f32 %v302_v5  ;;  %v6923_v8 = vmul.f32 -1.442695, %v302_v5 }
 0x515   :  { %7239 = vpow2.f32 %v6923_v8 }
 0x519   :  { %v7238_v6 = vpop.eup %7237 }
 0x51a   :  { %325 = vrot.lane.b32.xlu0 %v7238_v6, %s7752_s27 }
 0x51b   :  { %v7240_v9 = vpop.eup %7239 }
 0x51c   :  { %v306_v10 = vadd.f32 1.0, %v7240_v9 }
 0x51e   :  { %7241 = vrcp.f32 %v306_v10  ;;  %v318_v16 = vand.u32 2147483648, %v306_v10  ;;  %vm312_vm11 = vweird.f32 %v306_v10  ;;  %v316_v17 = vand.u32 2147483647, %v306_v10 }
 0x520   :  { %v319_v19 = vor.u32 1.1754944e-38, %v318_v16  ;;  %vm317_vm13 = vcmp.eq.f32.partialorder %v316_v17, 8.507059e+37 }
 0x524   :  { %v7242_v11 = vpop.eup %7241 }
 0x525   :  { %v308_v12 = vmul.f32 %v7242_v11, %v306_v10  ;;  %vm313_vm10 = vweird.f32 %v7242_v11 }
 0x526   :  { %vm314_vm12 = vmor %vm312_vm11, %vm313_vm10 }
 0x527   :  { %v309_v13 = vsub.f32 1.0, %v308_v12 }
 0x529   :  { %v310_v14 = vmul.f32 %v7242_v11, %v309_v13 }
 0x52b   :  { %v311_v15 = vadd.f32 %v7242_v11, %v310_v14 }
 0x52d   :  { %v315_v18 = vsel %vm314_vm12, %v7242_v11, %v311_v15 }
 0x52e   :  { %v320_v21 = vsel %vm317_vm13, %v319_v19, %v315_v18 }
 0x52f   :  { %v323_v23 = vmul.f32 %v320_v21, %v267_v60  ;;  %v116_v60 = vadd.f32 %v7900_v7, %v115_v59 }
 0x58c   :  { %v326_v20 = vpop.permute.xlu0 %325 }
 0x58d   :  { %v328_v22 = vmul.f32 %v326_v20, %v320_v21 }
 0x58f   :  { %330 = vrot.lane.b32.xlu1 %v328_v22, %s7753_s30  ;;  %v686_v22 = vld [vmem:[%s13063_s11 + $0x18] sm:$0xff] }
 0x590   :  { %727 = vmatpush.msrb.mxu3 %v686_v22 }
 0x601   :  { %v331_v24 = vpop.permute.xlu1 %330 }
 0x602   :  { %v333_v25 = vadd.f32 %v331_v24, %v323_v23  ;;  %v685_v23 = vld [vmem:[%s13063_s11 + $0x10] sm:$0xff]  ;;  %v53_v24 = vld [vmem:[%s13052_s0 + $0x28] sm:$0xff] }
 0x603   :  { %6915 = vmatmul.msk.f32.gmra.mxu0 %vm61_vm0, %v53_v24  ;;  %728 = vmatpush.msrb.mxu3 %v685_v23 }
 0x604   :  { %7243 = vtanh.f32 %v333_v25 }
 0x60a   :  { %v7244_v26 = vpop.eup %7243 }
 0x60b   :  { %336 = vrot.lane.b32.xlu2 %v7244_v26, %s7752_s27  ;;  %v683_v26 = vld [vmem:[%s13063_s11] sm:$0xff]  ;;  %6916 = vmatmul.msk.f32.gmra.mxu0 %vm61_vm0, %v54_v57 }
 0x665   :  { %v337_v28 = vpop.permute.xlu2 %336 }
 0x666   :  { %v339_v29 = vmul.f32 %v337_v28, %v320_v21  ;;  %v675_v28 = vld [vmem:[#allocation3] sm:$0xff] }
 0x668   :  { %341 = vrot.lane.b32.xlu0 %v339_v29, %s7753_s30  ;;  %v676_v29 = vld [vmem:[#allocation3 + $0x8] sm:$0xff] }
 0x6da   :  { %v342_v30 = vpop.permute.xlu0 %341 }
 0x6db   :  { %344 = vst.msk [vmem:[#allocation3 + $0x10] sm:$0xff] %vm13099_vm1, %v342_v30  ;;  %6924 = vmatmul.msk.f32.vlgmr.msra.gmra.mxu1 %vm13099_vm1, %v342_v30 }
 0x6e2   :  { %v677_v30 = vld [vmem:[#allocation3 + $0x10] sm:$0xff] }
 0x758   :  { %v365_v33 = vpop.f32.mrf.mxu1 }
 0x759   :  { %v368_v34 = vadd.f32 %v365_v33, %v113_v32  ;;  %v118_v33 = vpop.f32.mrf.mxu0 }
 0x75b   :  { %7245 = vtanh.f32 %v368_v34  ;;  %v6925_v36 = vmul.f32 -1.442695, %v368_v34  ;;  %v119_v34 = vadd.f32 %v7900_v7, %v118_v33 }
 0x75d   :  { %7247 = vpow2.f32 %v6925_v36 }
 0x761   :  { %v7246_v35 = vpop.eup %7245 }
 0x762   :  { %391 = vrot.lane.b32.xlu1 %v7246_v35, %s7752_s27 }
 0x763   :  { %v7248_v37 = vpop.eup %7247 }
 0x764   :  { %v372_v38 = vadd.f32 1.0, %v7248_v37 }
 0x766   :  { %7249 = vrcp.f32 %v372_v38  ;;  %v384_v44 = vand.u32 2147483648, %v372_v38  ;;  %vm378_vm15 = vweird.f32 %v372_v38  ;;  %v382_v45 = vand.u32 2147483647, %v372_v38 }
 0x768   :  { %v385_v47 = vor.u32 1.1754944e-38, %v384_v44  ;;  %vm383_vm3 = vcmp.eq.f32.partialorder %v382_v45, 8.507059e+37 }
 0x76c   :  { %v7250_v39 = vpop.eup %7249 }
 0x76d   :  { %v374_v40 = vmul.f32 %v7250_v39, %v372_v38  ;;  %vm379_vm14 = vweird.f32 %v7250_v39 }
 0x76e   :  { %vm380_vm2 = vmor %vm378_vm15, %vm379_vm14 }
 0x76f   :  { %v375_v41 = vsub.f32 1.0, %v374_v40 }
 0x771   :  { %v376_v42 = vmul.f32 %v7250_v39, %v375_v41 }
 0x773   :  { %v377_v43 = vadd.f32 %v7250_v39, %v376_v42 }
 0x775   :  { %v381_v46 = vsel %vm380_vm2, %v7250_v39, %v377_v43 }
 0x776   :  { %v386_v49 = vsel %vm383_vm3, %v385_v47, %v381_v46 }
 0x777   :  { %v389_v51 = vmul.f32 %v386_v49, %v333_v25  ;;  %v684_v25 = vld [vmem:[%s13063_s11 + $0x8] sm:$0xff] }
 0x778   :  { %729 = vmatpush.msrb.mxu3 %v684_v25 }
 0x77a   :  { %730 = vmatpush.msrb.mxu3 %v683_v26 }
 0x7d4   :  { %v392_v48 = vpop.permute.xlu1 %391 }
 0x7d5   :  { %v394_v50 = vmul.f32 %v392_v48, %v386_v49 }
 0x7d7   :  { %396 = vrot.lane.b32.xlu2 %v394_v50, %s7753_s30 }
 0x831   :  { %v397_v52 = vpop.permute.xlu2 %396 }
 0x832   :  { %v399_v53 = vadd.f32 %v397_v52, %v389_v51 }
 0x834   :  { %7251 = vtanh.f32 %v399_v53 }
 0x83a   :  { %v7252_v54 = vpop.eup %7251 }
 0x83b   :  { %402 = vrot.lane.b32.xlu0 %v7252_v54, %s7752_s27 }
 0x8ad   :  { %v403_v55 = vpop.permute.xlu0 %402 }
 0x8ae   :  { %v405_v56 = vmul.f32 %v403_v55, %v386_v49 }
 0x8b0   :  { %407 = vrot.lane.b32.xlu1 %v405_v56, %s7753_s30 }
 0x922   :  { %v408_v58 = vpop.permute.xlu1 %407 }
 0x923   :  { %410 = vst.msk [vmem:[#allocation3 + $0x18] sm:$0xff] %vm13099_vm1, %v408_v58  ;;  %6926 = vmatmul.msk.f32.vlgmr.msrb.gmra.mxu2 %vm13099_vm1, %v408_v58 }
 0x92a   :  { %v678_v31 = vld [vmem:[#allocation3 + $0x18] sm:$0xff] }
 0x9a6   :  { %v431_v61 = vpop.f32.mrf.mxu2 }
 0x9a7   :  { %v434_v62 = vadd.f32 %v431_v61, %v116_v60  ;;  %v7997_v60 = vld [vmem:[%s13064_s12 + $0x18] sm:$0xff]  ;;  %v8002_v61 = vld [vmem:[%s13064_s12 + $0x10] sm:$0xff] }
 0x9a8   :  { %788 = vmatpush.msra.mxu1 %v7997_v60  ;;  %858 = vmatpush.msrb.mxu2 %v7997_v60 }
 0x9a9   :  { %7253 = vtanh.f32 %v434_v62  ;;  %v6927_v0 = vmul.f32 -1.442695, %v434_v62  ;;  %v8009_v62 = vld [vmem:[%s13064_s12 + $0x8] sm:$0xff] }
 0x9aa   :  { %789 = vmatpush.msra.mxu1 %v8002_v61  ;;  %859 = vmatpush.msrb.mxu2 %v8002_v61 }
 0x9ab   :  { %7255 = vpow2.f32 %v6927_v0 }
 0x9ac   :  { %790 = vmatpush.msra.mxu1 %v8009_v62  ;;  %860 = vmatpush.msrb.mxu2 %v8009_v62 }
 0x9af   :  { %v7254_v63 = vpop.eup %7253 }
 0x9b0   :  { %457 = vrot.lane.b32.xlu2 %v7254_v63, %s7752_s27  ;;  %v8016_v63 = vld [vmem:[%s13064_s12] sm:$0xff] }
 0x9b1   :  { %v7256_v1 = vpop.eup %7255  ;;  %791 = vmatpush.msra.mxu1 %v8016_v63  ;;  %861 = vmatpush.msrb.mxu2 %v8016_v63 }
 0x9b2   :  { %v438_v2 = vadd.f32 1.0, %v7256_v1  ;;  %v6942_v1 = vld [vmem:[%s13053_s1 + $0x8] sm:$0xff] }
 0x9b4   :  { %7257 = vrcp.f32 %v438_v2  ;;  %v450_v9 = vand.u32 2147483648, %v438_v2  ;;  %vm444_vm5 = vweird.f32 %v438_v2  ;;  %v448_v10 = vand.u32 2147483647, %v438_v2 }
 0x9b6   :  { %v451_v12 = vor.u32 1.1754944e-38, %v450_v9  ;;  %vm449_vm7 = vcmp.eq.f32.partialorder %v448_v10, 8.507059e+37 }
 0x9ba   :  { %v7258_v3 = vpop.eup %7257 }
 0x9bb   :  { %v440_v4 = vmul.f32 %v7258_v3, %v438_v2  ;;  %vm445_vm4 = vweird.f32 %v7258_v3 }
 0x9bc   :  { %vm446_vm6 = vmor %vm444_vm5, %vm445_vm4 }
 0x9bd   :  { %v441_v5 = vsub.f32 1.0, %v440_v4 }
 0x9bf   :  { %v442_v6 = vmul.f32 %v7258_v3, %v441_v5 }
 0x9c1   :  { %v443_v8 = vadd.f32 %v7258_v3, %v442_v6 }
 0x9c3   :  { %v447_v11 = vsel %vm446_vm6, %v7258_v3, %v443_v8  ;;  %v121_v3 = vpop.f32.mrf.mxu0  ;;  %v8041_v8 = vld [vmem:[%s13065_s13] ss:$0 sm:$0xff] }
 0x9c4   :  { %v452_v14 = vsel %vm449_vm7, %v451_v12, %v447_v11  ;;  %v122_v4 = vadd.f32 %v7900_v7, %v121_v3  ;;  %v6943_v7 = vld [vmem:[%s13054_s2 + $0x8] sm:$0xff] }
 0x9c5   :  { %v455_v16 = vmul.f32 %v452_v14, %v399_v53 }
 0xa0a   :  { %v458_v13 = vpop.permute.xlu2 %457 }
 0xa0b   :  { %v460_v15 = vmul.f32 %v458_v13, %v452_v14 }
 0xa0d   :  { %462 = vrot.lane.b32.xlu0 %v460_v15, %s7753_s30 }
 0xa7f   :  { %v463_v17 = vpop.permute.xlu0 %462 }
 0xa80   :  { %v465_v18 = vadd.f32 %v463_v17, %v455_v16 }
 0xa82   :  { %7259 = vtanh.f32 %v465_v18 }
 0xa88   :  { %v7260_v19 = vpop.eup %7259 }
 0xa89   :  { %468 = vrot.lane.b32.xlu1 %v7260_v19, %s7752_s27 }
 0xafb   :  { %v469_v20 = vpop.permute.xlu1 %468 }
 0xafc   :  { %v471_v21 = vmul.f32 %v469_v20, %v452_v14 }
 0xafe   :  { %473 = vrot.lane.b32.xlu2 %v471_v21, %s7753_s30 }
 0xb58   :  { %v474_v27 = vpop.permute.xlu2 %473 }
 0xb59   :  { %476 = vst.msk [vmem:[#allocation3 + $0x20] sm:$0xff] %vm13099_vm1, %v474_v27  ;;  %6928 = vmatmul.msk.f32.vlgmr.msra.gmra.mxu3 %vm13099_vm1, %v474_v27 }
 0xb60   :  { %v679_v32 = vld [vmem:[#allocation3 + $0x20] sm:$0xff] }
 0xb61   :  { %6934 = vmatmul.msk.f32.vlgmr.msrb.gmra.mxu3 %vm13099_vm1, %v675_v28 }
 0xb69   :  { %6935 = vmatmul.msk.f32.gmra.mxu3 %vm13099_vm1, %v676_v29 }
 0xb71   :  { %6936 = vmatmul.msk.f32.gmra.mxu3 %vm13099_vm1, %v677_v30 }
 0xb79   :  { %6937 = vmatmul.msk.f32.gmra.mxu3 %vm13099_vm1, %v678_v31 }
 0xb81   :  { %6938 = vmatmul.msk.f32.gmra.mxu3 %vm13099_vm1, %v679_v32 }
 0xbdc   :  { %v497_v35 = vpop.f32.mrf.mxu3 }
 0xbdd   :  { %v500_v36 = vadd.f32 %v497_v35, %v119_v34 }
 0xbdf   :  { %7261 = vtanh.f32 %v500_v36  ;;  %v6929_v38 = vmul.f32 -1.442695, %v500_v36 }
 0xbe1   :  { %7263 = vpow2.f32 %v6929_v38 }
 0xbe4   :  { %v732_v9 = vpop.f32.mrf.mxu3 }
 0xbe5   :  { %v7262_v37 = vpop.eup %7261  ;;  %v733_v10 = vadd.f32 %v8041_v8, %v732_v9 }
 0xbe6   :  { %523 = vrot.lane.b32.xlu0 %v7262_v37, %s7752_s27 }
 0xbe7   :  { %v7264_v39 = vpop.eup %7263 }
 0xbe8   :  { %v504_v40 = vadd.f32 1.0, %v7264_v39 }
 0xbea   :  { %7265 = vrcp.f32 %v504_v40  ;;  %v516_v46 = vand.u32 2147483648, %v504_v40  ;;  %vm510_vm9 = vweird.f32 %v504_v40  ;;  %v514_v47 = vand.u32 2147483647, %v504_v40 }
 0xbec   :  { %v517_v49 = vor.u32 1.1754944e-38, %v516_v46  ;;  %vm515_vm11 = vcmp.eq.f32.partialorder %v514_v47, 8.507059e+37  ;;  %v735_v3 = vpop.f32.mrf.mxu3 }
 0xbf0   :  { %v7266_v41 = vpop.eup %7265 }
 0xbf1   :  { %v506_v42 = vmul.f32 %v7266_v41, %v504_v40  ;;  %vm511_vm8 = vweird.f32 %v7266_v41 }
 0xbf2   :  { %vm512_vm10 = vmor %vm510_vm9, %vm511_vm8 }
 0xbf3   :  { %v507_v43 = vsub.f32 1.0, %v506_v42 }
 0xbf5   :  { %v508_v44 = vmul.f32 %v7266_v41, %v507_v43 }
 0xbf7   :  { %v509_v45 = vadd.f32 %v7266_v41, %v508_v44 }
 0xbf9   :  { %v513_v48 = vsel %vm512_vm10, %v7266_v41, %v509_v45 }
 0xbfa   :  { %v518_v51 = vsel %vm515_vm11, %v517_v49, %v513_v48 }
 0xbfb   :  { %v521_v53 = vmul.f32 %v518_v51, %v465_v18 }
 0xc58   :  { %v524_v50 = vpop.permute.xlu0 %523 }
 0xc59   :  { %v526_v52 = vmul.f32 %v524_v50, %v518_v51 }
 0xc5b   :  { %528 = vrot.lane.b32.xlu1 %v526_v52, %s7753_s30 }
 0xccd   :  { %v529_v54 = vpop.permute.xlu1 %528 }
 0xcce   :  { %v7985_v55 = vadd.f32 %v529_v54, %v521_v53 }
 0xcd0   :  { %7267 = vtanh.f32 %v7985_v55 }
 0xcd6   :  { %v7268_v56 = vpop.eup %7267 }
 0xcd7   :  { %534 = vrot.lane.b32.xlu2 %v7268_v56, %s7752_s27 }
 0xd31   :  { %v535_v58 = vpop.permute.xlu2 %534 }
 0xd32   :  { %v537_v59 = vmul.f32 %v535_v58, %v518_v51 }
 0xd34   :  { %539 = vrot.lane.b32.xlu0 %v537_v59, %s7753_s30 }
 0xda6   :  { %v540_v0 = vpop.permute.xlu0 %539 }
 0xda7   :  { %542 = vst.msk [vmem:[#allocation3 + $0x28] sm:$0xff] %vm13099_vm1, %v540_v0  ;;  %6930 = vmatmul.msk.f32.vlgmr.msrb.gmra.mxu1 %vm13099_vm1, %v540_v0 }
 0xda8   :  { %924 = vmatpush.msrb.mxu1 %v7997_v60 }
 0xdaa   :  { %925 = vmatpush.msrb.mxu1 %v8002_v61 }
 0xdac   :  { %926 = vmatpush.msrb.mxu1 %v8009_v62 }
 0xdae   :  { %v680_v2 = vld [vmem:[#allocation3 + $0x28] sm:$0xff]  ;;  %927 = vmatpush.msrb.mxu1 %v8016_v63 }
 0xdaf   :  { %6939 = vmatmul.msk.f32.gmra.mxu3 %vm13099_vm1, %v680_v2  ;;  %6944 = vmatmul.msk.f32.vlgmr.msra.gmra.mxu1 %vm13099_vm1, %v6942_v1 }
 0xdb0   :  { %1056 = vmatpush.msra.mxu1 %v7997_v60 }
 0xdb2   :  { %1057 = vmatpush.msra.mxu1 %v8002_v61 }
 0xdb4   :  { %1058 = vmatpush.msra.mxu1 %v8009_v62 }
 0xdb6   :  { %1059 = vmatpush.msra.mxu1 %v8016_v63 }
 0xe24   :  { %v563_v5 = vpop.f32.mrf.mxu1 }
 0xe25   :  { %v566_v6 = vadd.f32 %v563_v5, %v122_v4  ;;  %v736_v4 = vadd.f32 %v8041_v8, %v735_v3 }
 0xe27   :  { %7269 = vtanh.f32 %v566_v6  ;;  %v6931_v18 = vmul.f32 -1.442695, %v566_v6 }
 0xe2c   :  { %v793_v11 = vpop.f32.mrf.mxu1 }
 0xe2d   :  { %v7270_v12 = vpop.eup %7269  ;;  %v796_v13 = vadd.f32 %v793_v11, %v733_v10 }
 0xe2e   :  { %589 = vrot.lane.b32.xlu1 %v7270_v12, %s7752_s27 }
 0xe2f   :  { %7271 = vtanh.f32 %v796_v13  ;;  %v6945_v15 = vmul.f32 -1.442695, %v796_v13 }
 0xe31   :  { %7273 = vpow2.f32 %v6945_v15 }
 0xe35   :  { %v7272_v14 = vpop.eup %7271 }
 0xe36   :  { %818 = vrot.lane.b32.xlu1 %v6943_v7, %s7753_s30  ;;  %823 = vrot.lane.b32.xlu2 %v7272_v14, %s7752_s27 }
 0xe37   :  { %v7274_v16 = vpop.eup %7273 }
 0xe38   :  { %v800_v17 = vadd.f32 1.0, %v7274_v16 }
 0xe3a   :  { %7275 = vrcp.f32 %v800_v17  ;;  %v812_v27 = vand.u32 2147483648, %v800_v17  ;;  %vm806_vm13 = vweird.f32 %v800_v17  ;;  %v810_v28 = vand.u32 2147483647, %v800_v17 }
 0xe3b   :  { %7277 = vpow2.f32 %v6931_v18 }
 0xe3c   :  { %v813_v31 = vor.u32 1.1754944e-38, %v812_v27  ;;  %vm811_vm15 = vcmp.eq.f32.partialorder %v810_v28, 8.507059e+37 }
 0xe40   :  { %v7276_v19 = vpop.eup %7275 }
 0xe41   :  { %v7278_v20 = vpop.eup %7277  ;;  %v802_v21 = vmul.f32 %v7276_v19, %v800_v17  ;;  %vm807_vm12 = vweird.f32 %v7276_v19 }
 0xe42   :  { %v570_v22 = vadd.f32 1.0, %v7278_v20  ;;  %vm808_vm14 = vmor %vm806_vm13, %vm807_vm12 }
 0xe43   :  { %v803_v23 = vsub.f32 1.0, %v802_v21 }
 0xe44   :  { %7279 = vrcp.f32 %v570_v22  ;;  %v582_v38 = vand.u32 2147483648, %v570_v22  ;;  %vm576_vm3 = vweird.f32 %v570_v22  ;;  %v580_v39 = vand.u32 2147483647, %v570_v22 }
 0xe45   :  { %v804_v24 = vmul.f32 %v7276_v19, %v803_v23 }
 0xe46   :  { %v583_v41 = vor.u32 1.1754944e-38, %v582_v38  ;;  %vm581_vm5 = vcmp.eq.f32.partialorder %v580_v39, 8.507059e+37 }
 0xe47   :  { %v805_v25 = vadd.f32 %v7276_v19, %v804_v24 }
 0xe49   :  { %v809_v29 = vsel %vm808_vm14, %v7276_v19, %v805_v25 }
 0xe4a   :  { %v7280_v26 = vpop.eup %7279  ;;  %v814_v33 = vsel %vm811_vm15, %v813_v31, %v809_v29  ;;  %v738_v31 = vpop.f32.mrf.mxu3 }
 0xe4b   :  { %v572_v30 = vmul.f32 %v7280_v26, %v570_v22  ;;  %vm577_vm2 = vweird.f32 %v7280_v26 }
 0xe4c   :  { %vm578_vm4 = vmor %vm576_vm3, %vm577_vm2 }
 0xe4d   :  { %v573_v35 = vsub.f32 1.0, %v572_v30 }
 0xe4f   :  { %v574_v36 = vmul.f32 %v7280_v26, %v573_v35 }
 0xe51   :  { %v575_v37 = vadd.f32 %v7280_v26, %v574_v36 }
 0xe53   :  { %v579_v40 = vsel %vm578_vm4, %v7280_v26, %v575_v37 }
 0xe54   :  { %v584_v43 = vsel %vm581_vm5, %v583_v41, %v579_v40 }
 0xe55   :  { %v587_v50 = vmul.f32 %v584_v43, %v7985_v55  ;;  %v55_v55 = vld [vmem:[%s13052_s0 + $0x38] sm:$0xff] }
 0xe56   :  { %6917 = vmatmul.msk.f32.gmra.mxu0 %vm61_vm0, %v55_v55 }
 0xe90   :  { %v824_v32 = vpop.permute.xlu2 %823 }
 0xe91   :  { %v826_v34 = vmul.f32 %v824_v32, %v814_v33  ;;  %v739_v32 = vadd.f32 %v8041_v8, %v738_v31 }
 0xe93   :  { %828 = vrot.lane.b32.xlu2 %v826_v34, %s7753_s30 }
 0xea0   :  { %v590_v42 = vpop.permute.xlu1 %589 }
 0xea1   :  { %v592_v44 = vmul.f32 %v590_v42, %v584_v43 }
 0xea3   :  { %594 = vrot.lane.b32.xlu0 %v592_v44, %s7753_s30 }
 0xea8   :  { %v819_v45 = vpop.permute.xlu1 %818 }
 0xea9   :  { %v821_v46 = vmul.f32 %v819_v45, %v814_v33 }
 0xeed   :  { %v829_v47 = vpop.permute.xlu2 %828 }
 0xeee   :  { %v8052_v48 = vadd.f32 %v829_v47, %v821_v46 }
 0xef0   :  { %7281 = vtanh.f32 %v8052_v48 }
 0xef6   :  { %v7282_v49 = vpop.eup %7281 }
 0xef7   :  { %834 = vrot.lane.b32.xlu1 %v7282_v49, %s7752_s27 }
 0xf15   :  { %v595_v51 = vpop.permute.xlu0 %594 }
 0xf16   :  { %v8057_v52 = vadd.f32 %v595_v51, %v587_v50 }
 0xf18   :  { %7283 = vtanh.f32 %v8057_v52 }
 0xf1e   :  { %v7284_v53 = vpop.eup %7283 }
 0xf1f   :  { %600 = vrot.lane.b32.xlu0 %v7284_v53, %s7752_s27 }
 0xf69   :  { %v835_v54 = vpop.permute.xlu1 %834 }
 0xf6a   :  { %v837_v56 = vmul.f32 %v835_v54, %v814_v33 }
 0xf6c   :  { %839 = vrot.lane.b32.xlu0 %v837_v56, %s7753_s30 }
 0xf91   :  { %v601_v57 = vpop.permute.xlu0 %600 }
 0xf92   :  { %v603_v58 = vmul.f32 %v601_v57, %v584_v43 }
 0xf94   :  { %605 = vrot.lane.b32.xlu2 %v603_v58, %s7753_s30 }
 0xfde   :  { %v840_v59 = vpop.permute.xlu0 %839 }
 0xfdf   :  { %842 = vst.msk [vmem:[#allocation3] sm:$0xff] %vm13099_vm1, %v840_v59 }
 0xfee   :  { %v606_v0 = vpop.permute.xlu2 %605 }
 0xfef   :  { %608 = vst.msk [vmem:[#allocation3 + $0x30] sm:$0xff] %vm13099_vm1, %v606_v0  ;;  %6932 = vmatmul.msk.f32.vlgmr.msra.gmra.mxu2 %vm13099_vm1, %v606_v0 }
 0xff0   :  { %990 = vmatpush.msra.mxu2 %v7997_v60 }
 0xff2   :  { %991 = vmatpush.msra.mxu2 %v8002_v61 }
 0xff4   :  { %992 = vmatpush.msra.mxu2 %v8009_v62 }
 0xff6   :  { %v681_v1 = vld [vmem:[#allocation3 + $0x30] sm:$0xff]  ;;  %993 = vmatpush.msra.mxu2 %v8016_v63 }
 0xff7   :  { %6940 = vmatmul.msk.f32.gmra.mxu3 %vm13099_vm1, %v681_v1  ;;  %6946 = vmatmul.msk.f32.vlgmr.msrb.gmra.mxu2 %vm13099_vm1, %v840_v59  ;;  %v741_v59 = vpop.f32.mrf.mxu3 }
 0xff8   :  { %1122 = vmatpush.msrb.mxu2 %v7997_v60  ;;  %v742_v0 = vadd.f32 %v8041_v8, %v741_v59  ;;  %v8162_v59 = vld [vmem:[%s13055_s3 + $0x60] sm:$0xff] }
 0xffa   :  { %1123 = vmatpush.msrb.mxu2 %v8002_v61 }
 0xffc   :  { %1124 = vmatpush.msrb.mxu2 %v8009_v62 }
 0xffe   :  { %1125 = vmatpush.msrb.mxu2 %v8016_v63 }
0x1072   :  { %v8080_v2 = vpop.f32.mrf.mxu2 }
0x107a   :  { %v863_v5 = vpop.f32.mrf.mxu2 }
0x107b   :  { %v866_v6 = vadd.f32 %v863_v5, %v736_v4 }
0x107d   :  { %7285 = vtanh.f32 %v866_v6  ;;  %v6947_v10 = vmul.f32 -1.442695, %v866_v6 }
0x107f   :  { %7287 = vpow2.f32 %v6947_v10 }
0x1083   :  { %v7286_v9 = vpop.eup %7285 }
0x1084   :  { %889 = vrot.lane.b32.xlu1 %v7286_v9, %s7752_s27 }
0x1085   :  { %v7288_v11 = vpop.eup %7287 }
0x1086   :  { %v870_v12 = vadd.f32 1.0, %v7288_v11  ;;  %v124_v11 = vpop.f32.mrf.mxu0 }
0x1088   :  { %7289 = vrcp.f32 %v870_v12  ;;  %v882_v17 = vand.u32 2147483648, %v870_v12  ;;  %vm876_vm6 = vweird.f32 %v870_v12  ;;  %v880_v18 = vand.u32 2147483647, %v870_v12 }
0x108a   :  { %v883_v20 = vor.u32 1.1754944e-38, %v882_v17  ;;  %vm881_vm8 = vcmp.eq.f32.partialorder %v880_v18, 8.507059e+37 }
0x108e   :  { %v7290_v13 = vpop.eup %7289 }
0x108f   :  { %v872_v7 = vmul.f32 %v7290_v13, %v870_v12  ;;  %vm877_vm0 = vweird.f32 %v7290_v13 }
0x1090   :  { %vm878_vm7 = vmor %vm876_vm6, %vm877_vm0  ;;  %vm13098_vm6 = vcmask 254976  }
0x1091   :  { %v873_v14 = vsub.f32 1.0, %v872_v7 }
0x1093   :  { %v874_v15 = vmul.f32 %v7290_v13, %v873_v14 }
0x1095   :  { %v875_v16 = vadd.f32 %v7290_v13, %v874_v15 }
0x1097   :  { %v879_v19 = vsel %vm878_vm7, %v7290_v13, %v875_v16  ;;  %v7625_v13 = vld [vmem:[%s13062_s10] ss:$0 sm:$0xff]  ;;  %vm13097_vm7 = vcmask 130112   ;;  %s7755_s10 = smov 96  }
0x1098   :  { %v884_v22 = vsel %vm881_vm8, %v883_v20, %v879_v19  ;;  %v125_v7 = vadd.f32 %v7625_v13, %v124_v11  ;;  %vm13096_vm8 = vcmask 1041409  }
0x1099   :  { %v887_v24 = vmul.f32 %v884_v22, %v8052_v48 }
0x109a   :  { %v632_v16 = vadd.f32 %v8080_v2, %v125_v7  ;;  %v8189_v7 = vld [vmem:[%s13055_s3 + $0x20] sm:$0xff] }
0x10f6   :  { %v890_v21 = vpop.permute.xlu1 %889 }
0x10f7   :  { %v892_v23 = vmul.f32 %v890_v21, %v884_v22  ;;  %v6933_v21 = vmul.f32 -1.442695, %v632_v16 }
0x10f9   :  { %894 = vrot.lane.b32.xlu2 %v892_v23, %s7753_s30 }
0x1153   :  { %v895_v25 = vpop.permute.xlu2 %894 }
0x1154   :  { %v897_v26 = vadd.f32 %v895_v25, %v887_v24 }
0x1156   :  { %7291 = vtanh.f32 %v897_v26 }
0x115c   :  { %v7292_v27 = vpop.eup %7291 }
0x115d   :  { %900 = vrot.lane.b32.xlu0 %v7292_v27, %s7752_s27 }
0x11cf   :  { %v901_v28 = vpop.permute.xlu0 %900 }
0x11d0   :  { %v903_v29 = vmul.f32 %v901_v28, %v884_v22 }
0x11d2   :  { %905 = vrot.lane.b32.xlu1 %v903_v29, %s7753_s30 }
0x1244   :  { %v906_v30 = vpop.permute.xlu1 %905 }
0x1245   :  { %908 = vst.msk [vmem:[#allocation3 + $0x8] sm:$0xff] %vm13099_vm1, %v906_v30  ;;  %6948 = vmatmul.msk.f32.vlgmr.msrb.gmra.mxu1 %vm13099_vm1, %v906_v30 }
0x1246   :  { %1188 = vmatpush.msrb.mxu1 %v7997_v60 }
0x1248   :  { %1189 = vmatpush.msrb.mxu1 %v8002_v61 }
0x124a   :  { %1190 = vmatpush.msrb.mxu1 %v8009_v62 }
0x124c   :  { %1191 = vmatpush.msrb.mxu1 %v8016_v63 }
0x12c2   :  { %v929_v33 = vpop.f32.mrf.mxu1 }
0x12c3   :  { %v932_v34 = vadd.f32 %v929_v33, %v739_v32 }
0x12c5   :  { %7293 = vtanh.f32 %v932_v34  ;;  %v6949_v36 = vmul.f32 -1.442695, %v932_v34 }
0x12c7   :  { %7295 = vpow2.f32 %v6949_v36  ;;  %v8125_v36 = vld [vmem:[#allocation3] sm:$0xff] }
0x12c8   :  { %v1330_v11 = vperm.slane %v8125_v36, 0 }
0x12cb   :  { %v7294_v35 = vpop.eup %7293 }
0x12cc   :  { %955 = vrot.lane.b32.xlu2 %v7294_v35, %s7752_s27 }
0x12cd   :  { %v7296_v37 = vpop.eup %7295 }
0x12ce   :  { %v936_v38 = vadd.f32 1.0, %v7296_v37  ;;  %v1323_v37 = vrot.slane %v8125_v36, 1 }
0x12d0   :  { %7297 = vrcp.f32 %v936_v38  ;;  %v948_v44 = vand.u32 2147483648, %v936_v38  ;;  %vm942_vm10 = vweird.f32 %v936_v38  ;;  %v946_v45 = vand.u32 2147483647, %v936_v38 }
0x12d2   :  { %v949_v47 = vor.u32 1.1754944e-38, %v948_v44  ;;  %vm947_vm12 = vcmp.eq.f32.partialorder %v946_v45, 8.507059e+37  ;;  %v1325_v44 = vrot.slane %v8125_v36, 3 }
0x12d6   :  { %v7298_v39 = vpop.eup %7297 }
0x12d7   :  { %v938_v40 = vmul.f32 %v7298_v39, %v936_v38  ;;  %vm943_vm9 = vweird.f32 %v7298_v39  ;;  %v1331_v38 = vperm.slane %v1323_v37, 0  ;;  %v8234_v37 = vld [vmem:[%s13055_s3 + $0x40] sm:$0xff] }
0x12d8   :  { %vm944_vm11 = vmor %vm942_vm10, %vm943_vm9  ;;  %vm13095_vm9 = vcmask 1042434   ;;  %vm13094_vm10 = vcmask 1043459  }
0x12d9   :  { %v939_v41 = vsub.f32 1.0, %v938_v40 }
0x12db   :  { %v940_v42 = vmul.f32 %v7298_v39, %v939_v41 }
0x12dd   :  { %v941_v43 = vadd.f32 %v7298_v39, %v940_v42  ;;  %v8138_v42 = vld [vmem:[%s13055_s3 + $0x18] sm:$0x3] }
0x12df   :  { %v945_v46 = vsel %vm944_vm11, %v7298_v39, %v941_v43  ;;  %v8131_v39 = vld [vmem:[%s13055_s3 + $0x10] sm:$0xff]  ;;  %v1349_v43 = vmul.f32 %v1331_v38, %v8138_v42  ;;  %vm13093_vm11 = vcmask 1044484  }
0x12e0   :  { %v950_v49 = vsel %vm947_vm12, %v949_v47, %v945_v46  ;;  %v1348_v40 = vmul.f32 %v1331_v38, %v8131_v39  ;;  %v1333_v46 = vperm.slane %v1325_v44, 0  ;;  %v8146_v47 = vld [vmem:[%s13055_s3 + $0x30] sm:$0xff]  ;;  %vm13092_vm12 = vcmask 1045509  }
0x12e1   :  { %v953_v51 = vmul.f32 %v950_v49, %v897_v26  ;;  %v1372_v45 = vsel %vm13098_vm6, %v1349_v43, 0.0 }
0x12e2   :  { %v1369_v41 = vsel %vm13099_vm1, %v1348_v40, 0.0 }
0x1326   :  { %v956_v48 = vpop.permute.xlu2 %955 }
0x1327   :  { %v958_v50 = vmul.f32 %v956_v48, %v950_v49  ;;  %v1352_v48 = vmul.f32 %v1333_v46, %v8146_v47 }
0x1329   :  { %960 = vrot.lane.b32.xlu0 %v958_v50, %s7753_s30  ;;  %v1381_v50 = vsel %vm13099_vm1, %v1352_v48, 0.0 }
0x139b   :  { %v961_v53 = vpop.permute.xlu0 %960 }
0x139c   :  { %v8097_v54 = vadd.f32 %v961_v53, %v953_v51  ;;  %v8154_v53 = vld [vmem:[%s13055_s3 + $0x48] sm:$0x3] }
0x139e   :  { %7299 = vtanh.f32 %v8097_v54 }
0x13a4   :  { %v7300_v56 = vpop.eup %7299 }
0x13a5   :  { %966 = vrot.lane.b32.xlu1 %v7300_v56, %s7752_s27 }
0x1417   :  { %v967_v57 = vpop.permute.xlu1 %966 }
0x1418   :  { %v969_v58 = vmul.f32 %v967_v57, %v950_v49  ;;  %v1326_v49 = vrot.slane %v8125_v36, 4  ;;  %v1328_v57 = vrot.slane %v8125_v36, 6 }
0x141a   :  { %971 = vrot.lane.b32.xlu2 %v969_v58, %s7753_s30  ;;  %v1334_v51 = vperm.slane %v1326_v49, 0 }
0x141c   :  { %v1355_v56 = vmul.f32 %v1334_v51, %v8154_v53  ;;  %v1354_v38 = vmul.f32 %v1334_v51, %v8234_v37 }
0x141e   :  { %v1390_v58 = vsel %vm13098_vm6, %v1355_v56, 0.0  ;;  %v1387_v40 = vsel %vm13099_vm1, %v1354_v38, 0.0 }
0x1474   :  { %v972_v55 = vpop.permute.xlu2 %971 }
0x1475   :  { %974 = vst.msk [vmem:[#allocation3 + $0x10] sm:$0xff] %vm13099_vm1, %v972_v55  ;;  %6950 = vmatmul.msk.f32.vlgmr.msra.gmra.mxu2 %vm13099_vm1, %v972_v55  ;;  %v1336_v55 = vperm.slane %v1328_v57, 0 }
0x1476   :  { %1254 = vmatpush.msra.mxu2 %v7997_v60 }
0x1478   :  { %1255 = vmatpush.msra.mxu2 %v8002_v61 }
0x147a   :  { %1256 = vmatpush.msra.mxu2 %v8009_v62 }
0x147c   :  { %1257 = vmatpush.msra.mxu2 %v8016_v63 }
0x14f8   :  { %v995_v1 = vpop.f32.mrf.mxu2 }
0x14f9   :  { %v998_v3 = vadd.f32 %v995_v1, %v742_v0  ;;  %v1358_v0 = vmul.f32 %v1336_v55, %v8162_v59  ;;  %v1329_v1 = vrot.slane %v8125_v36, 7 }
0x14fb   :  { %7301 = vtanh.f32 %v998_v3  ;;  %v6951_v5 = vmul.f32 -1.442695, %v998_v3  ;;  %v1399_v3 = vsel %vm13099_vm1, %v1358_v0, 0.0 }
0x14fd   :  { %7303 = vpow2.f32 %v6951_v5  ;;  %v8170_v5 = vld [vmem:[%s13055_s3 + $0x78] sm:$0x3] }
0x1501   :  { %v7302_v4 = vpop.eup %7301 }
0x1502   :  { %1021 = vrot.lane.b32.xlu0 %v7302_v4, %s7752_s27  ;;  %v1337_v4 = vperm.slane %v1329_v1, 0 }
0x1503   :  { %v7304_v6 = vpop.eup %7303 }
0x1504   :  { %v1002_v9 = vadd.f32 1.0, %v7304_v6  ;;  %v1361_v6 = vmul.f32 %v1337_v4, %v8170_v5 }
0x1506   :  { %7305 = vrcp.f32 %v1002_v9  ;;  %v1014_v12 = vand.u32 2147483648, %v1002_v9  ;;  %vm1008_vm14 = vweird.f32 %v1002_v9  ;;  %v1012_v8 = vand.u32 2147483647, %v1002_v9 }
0x1507   :  { %7307 = vtanh.f32 %v632_v16  ;;  %v8196_v16 = vld [vmem:[%s13055_s3 + $0x38] sm:$0x3] }
0x1508   :  { %v1015_v15 = vor.u32 1.1754944e-38, %v1014_v12  ;;  %vm1013_vm2 = vcmp.eq.f32.partialorder %v1012_v8, 8.507059e+37  ;;  %7309 = vpow2.f32 %v6933_v21  ;;  %v1324_v8 = vrot.slane %v8125_v36, 2 }
0x150c   :  { %v7306_v60 = vpop.eup %7305 }
0x150d   :  { %v1004_v61 = vmul.f32 %v7306_v60, %v1002_v9  ;;  %vm1009_vm13 = vweird.f32 %v7306_v60  ;;  %v7308_v20 = vpop.eup %7307  ;;  %v1408_v9 = vsel %vm13098_vm6, %v1361_v6, 0.0  ;;  %v13067_v6 = vlaneseq }
0x150e   :  { %vm1010_vm15 = vmor %vm1008_vm14, %vm1009_vm13  ;;  %v7310_v22 = vpop.eup %7309  ;;  %vm13091_vm13 = vcmask 1046534   ;;  %vm13090_vm14 = vcmask 1047559  }
0x150f   :  { %v1005_v10 = vsub.f32 1.0, %v1004_v61  ;;  %v636_v23 = vadd.f32 1.0, %v7310_v22  ;;  %v8204_v22 = vld [vmem:[%s13055_s3 + $0x50] sm:$0xff] }
0x1511   :  { %v1006_v62 = vmul.f32 %v7306_v60, %v1005_v10  ;;  %7311 = vrcp.f32 %v636_v23  ;;  %v648_v29 = vand.u32 2147483648, %v636_v23  ;;  %vm642_vm4 = vweird.f32 %v636_v23 }
0x1512   :  { %v646_v30 = vand.u32 2147483647, %v636_v23 }
0x1513   :  { %v1007_v63 = vadd.f32 %v7306_v60, %v1006_v62  ;;  %v649_v32 = vor.u32 1.1754944e-38, %v648_v29 }
0x1514   :  { %vm647_vm0 = vcmp.eq.f32.partialorder %v646_v30, 8.507059e+37  ;;  %v8220_v30 = vld [vmem:[%s13055_s3 + $0x8] sm:$0x3] }
0x1515   :  { %v1011_v14 = vsel %vm1010_vm15, %v7306_v60, %v1007_v63  ;;  %v8181_v63 = vld [vmem:[%s13055_s3] sm:$0xff]  ;;  %vm13089_vm15 = vcmask 80896  }
0x1516   :  { %v8114_v18 = vsel %vm1013_vm2, %v1015_v15, %v1011_v14  ;;  %v1346_v12 = vmul.f32 %v1330_v11, %v8181_v63 }
0x1517   :  { %v7312_v24 = vpop.eup %7311 }
0x1518   :  { %v638_v25 = vmul.f32 %v7312_v24, %v636_v23  ;;  %vm643_vm3 = vweird.f32 %v7312_v24  ;;  %v1362_v13 = vsel %vm13099_vm1, %v1346_v12, 0.0 }
0x1519   :  { %vm644_vm5 = vmor %vm642_vm4, %vm643_vm3 }
0x151a   :  { %v639_v26 = vsub.f32 1.0, %v638_v25  ;;  %v8211_v25 = vld [vmem:[%s13055_s3 + $0x68] sm:$0x3] }
0x151c   :  { %v640_v2 = vmul.f32 %v7312_v24, %v639_v26  ;;  %v1359_v26 = vmul.f32 %v1336_v55, %v8211_v25 }
0x151e   :  { %v641_v28 = vadd.f32 %v7312_v24, %v640_v2  ;;  %v1402_v2 = vsel %vm13098_vm6, %v1359_v26, 0.0 }
0x1520   :  { %v645_v31 = vsel %vm644_vm5, %v7312_v24, %v641_v28 }
0x1521   :  { %v8121_v33 = vsel %vm647_vm0, %v649_v32, %v645_v31  ;;  %v1347_v31 = vmul.f32 %v1330_v11, %v8220_v30 }
0x1522   :  { %v653_v60 = vmul.f32 %v8121_v33, %v8057_v52  ;;  %v1332_v52 = vperm.slane %v1324_v8, 0 }
0x1523   :  { %v1366_v32 = vsel %vm13098_vm6, %v1347_v31, 0.0 }
0x1524   :  { %v1350_v14 = vmul.f32 %v1332_v52, %v8189_v7 }
0x1526   :  { %v1375_v15 = vsel %vm13099_vm1, %v1350_v14, 0.0 }
0x1574   :  { %v1022_v17 = vpop.permute.xlu0 %1021 }
0x1575   :  { %v1024_v19 = vmul.f32 %v1022_v17, %v8114_v18  ;;  %v1353_v17 = vmul.f32 %v1333_v46, %v8196_v16 }
0x1577   :  { %1026 = vrot.lane.b32.xlu1 %v1024_v19, %s7753_s30  ;;  %v1327_v19 = vrot.slane %v8125_v36, 5 }
0x1579   :  { %v1335_v21 = vperm.slane %v1327_v19, 0 }
0x157b   :  { %v1356_v23 = vmul.f32 %v1335_v21, %v8204_v22 }
0x157d   :  { %v1393_v24 = vsel %vm13099_vm1, %v1356_v23, 0.0 }
0x157f   :  { %655 = vrot.lane.b32.xlu1 %v7308_v20, %s7752_s27  ;;  %v1384_v20 = vsel %vm13098_vm6, %v1353_v17, 0.0 }
0x15e9   :  { %v8119_v27 = vpop.permute.xlu1 %1026 }
0x15f1   :  { %v656_v34 = vpop.permute.xlu1 %655 }
0x15f2   :  { %v658_v35 = vmul.f32 %v656_v34, %v8121_v33  ;;  %v8227_v34 = vld [vmem:[%s13055_s3 + $0x28] sm:$0x3] }
0x15f4   :  { %660 = vrot.lane.b32.xlu2 %v658_v35, %s7753_s30  ;;  %v1351_v35 = vmul.f32 %v1332_v52, %v8227_v34 }
0x161d   :  { %1370 = vadd.xlane.f32.xlu2 %v1369_v41  ;;  %v8241_v41 = vld [vmem:[%s13055_s3 + $0x58] sm:$0x3] }
0x161e   :  { %v1357_v43 = vmul.f32 %v1335_v21, %v8241_v41 }
0x1620   :  { %v1396_v44 = vsel %vm13098_vm6, %v1357_v43, 0.0 }
0x1625   :  { %1373 = vadd.xlane.f32.xlu2 %v1372_v45  ;;  %v8248_v45 = vld [vmem:[%s13055_s3 + $0x70] sm:$0xff] }
0x1626   :  { %v1360_v46 = vmul.f32 %v1337_v4, %v8248_v45 }
0x1628   :  { %v1405_v48 = vsel %vm13099_vm1, %v1360_v46, 0.0 }
0x162d   :  { %1382 = vadd.xlane.f32.xlu2 %v1381_v50 }
0x1635   :  { %1391 = vadd.xlane.f32.xlu2 %v1390_v58 }
0x163d   :  { %1400 = vadd.xlane.f32.xlu2 %v1399_v3 }
0x1645   :  { %1409 = vadd.xlane.f32.xlu2 %v1408_v9  ;;  %v8273_v9 = vand.u32 127, %v13067_v6 }
0x1647   :  { %13336 = vst [vmem:[#allocation8_spill] sm:$0xff] %v8273_v9 }
0x164e   :  { %v661_v61 = vpop.permute.xlu2 %660 }
0x164f   :  { %v663_v10 = vadd.f32 %v661_v61, %v653_v60  ;;  %v8278_v61 = vadd.s32 4294967288, %v8273_v9 }
0x1651   :  { %7313 = vtanh.f32 %v663_v10 }
0x1657   :  { %v7314_v62 = vpop.eup %7313 }
0x1658   :  { %666 = vrot.lane.b32.xlu0 %v7314_v62, %s7752_s27 }
0x1682   :  { %1363 = vadd.xlane.f32.xlu0 %v1362_v13 }
0x168a   :  { %1376 = vadd.xlane.f32.xlu0 %v1375_v15 }
0x1690   :  { %v8254_v51 = vpop.xlane.xlu2 %1370 }
0x1691   :  { %v1434_v14 = vperm.slane %v8254_v51, %v8273_v9 }
0x1692   :  { %1385 = vadd.xlane.f32.xlu0 %v1384_v20 }
0x1698   :  { %v8258_v57 = vpop.xlane.xlu2 %1373 }
0x1699   :  { %v1435_v8 = vperm.slane %v8258_v57, %v8278_v61 }
0x169a   :  { %1394 = vadd.xlane.f32.xlu0 %v1393_v24 }
0x169b   :  { %v1436_v21 = vsel %vm13097_vm7, %v1435_v8, %v1434_v14 }
0x16a0   :  { %v8262_v55 = vpop.xlane.xlu2 %1382 }
0x16a2   :  { %1403 = vadd.xlane.f32.xlu0 %v1402_v2 }
0x16a8   :  { %v8270_v4 = vpop.xlane.xlu2 %1391 }
0x16a9   :  { %v1444_v26 = vperm.slane %v8270_v4, %v8278_v61 }
0x16b0   :  { %v8284_v11 = vpop.xlane.xlu2 %1400 }
0x16ca   :  { %v667_v28 = vpop.permute.xlu0 %666 }
0x16cb   :  { %v669_v29 = vmul.f32 %v667_v28, %v8121_v33  ;;  %v1378_v33 = vsel %vm13098_vm6, %v1351_v35, 0.0  ;;  %v1440_v28 = vperm.slane %v8262_v55, %v8273_v9 }
0x16cd   :  { %671 = vrot.lane.b32.xlu1 %v669_v29, %s7753_s30 }
0x16f5   :  { %v8256_v56 = vpop.xlane.xlu0 %1363 }
0x16f6   :  { %v1429_v13 = vperm.slane %v8256_v56, %v8273_v9 }
0x16f7   :  { %1367 = vadd.xlane.f32.xlu1 %v1366_v32 }
0x16fd   :  { %v8260_v58 = vpop.xlane.xlu0 %1376 }
0x16fe   :  { %v1437_v52 = vperm.slane %v8260_v58, %v8273_v9 }
0x16ff   :  { %1379 = vadd.xlane.f32.xlu1 %v1378_v33 }
0x1705   :  { %v8266_v1 = vpop.xlane.xlu0 %1385 }
0x1706   :  { %v1441_v23 = vperm.slane %v8266_v1, %v8278_v61 }
0x1707   :  { %1388 = vadd.xlane.f32.xlu1 %v1387_v40  ;;  %v8320_v40 = vpop.xlane.xlu2 %1409 }
0x1708   :  { %v1442_v33 = vsel %vm13097_vm7, %v1441_v23, %v1440_v28 }
0x170d   :  { %v8280_v10 = vpop.xlane.xlu0 %1394 }
0x170e   :  { %v1446_v29 = vperm.slane %v8280_v10, %v8273_v9 }
0x170f   :  { %1397 = vadd.xlane.f32.xlu1 %v1396_v44 }
0x1715   :  { %v8314_v31 = vpop.xlane.xlu0 %1403 }
0x1716   :  { %v1450_v43 = vperm.slane %v8314_v31, %v8278_v61 }
0x1717   :  { %1406 = vadd.xlane.f32.xlu1 %v1405_v48  ;;  %v1449_v48 = vperm.slane %v8284_v11, %v8273_v9 }
0x1719   :  { %v1451_v8 = vsel %vm13097_vm7, %v1450_v43, %v1449_v48 }
0x173f   :  { %v672_v49 = vpop.permute.xlu1 %671 }
0x1740   :  { %674 = vst.msk [vmem:[#allocation3 + $0x38] sm:$0xff] %vm13099_vm1, %v672_v49 }
0x1747   :  { %v682_v50 = vld [vmem:[#allocation3 + $0x38] sm:$0xff] }
0x1748   :  { %6941 = vmatmul.msk.f32.gmra.mxu3 %vm13099_vm1, %v682_v50 }
0x176a   :  { %v8264_v0 = vpop.xlane.xlu1 %1367 }
0x176b   :  { %v1431_v62 = vperm.slane %v8264_v0, %v8278_v61 }
0x176d   :  { %v1433_v15 = vsel %vm13097_vm7, %v1431_v62, %v1429_v13  ;;  %v1453_v62 = vperm.slane %v8320_v40, %v8278_v61 }
0x176e   :  { %v1456_v2 = vsel %vm13096_vm8, %v1436_v21, %v1433_v15 }
0x1772   :  { %v8268_v3 = vpop.xlane.xlu1 %1379 }
0x1773   :  { %v1438_v12 = vperm.slane %v8268_v3, %v8278_v61 }
0x1775   :  { %v1439_v17 = vsel %vm13097_vm7, %v1438_v12, %v1437_v52 }
0x1776   :  { %v1458_v32 = vsel %vm13095_vm9, %v1439_v17, %v1456_v2  ;;  %v7754_v17 = vmov 0  }
0x1777   :  { %v1460_v44 = vsel %vm13094_vm10, %v1442_v33, %v1458_v32  ;;  %7217 = vset.pattern.permute.xlu0 %v7754_v17  ;;  %7216 = vset.pattern.permute.xlu2 %v7754_v17 }
0x1778   :  { %7215 = vset.pattern.permute.xlu1 %v7754_v17 }
0x177a   :  { %v8275_v60 = vpop.xlane.xlu1 %1388 }
0x177b   :  { %v1443_v19 = vperm.slane %v8275_v60, %v8273_v9 }
0x177d   :  { %v1445_v35 = vsel %vm13097_vm7, %v1444_v26, %v1443_v19 }
0x177e   :  { %v1462_v46 = vsel %vm13093_vm11, %v1445_v35, %v1460_v44 }
0x1782   :  { %v8300_v20 = vpop.xlane.xlu1 %1397 }
0x1783   :  { %v1447_v24 = vperm.slane %v8300_v20, %v8278_v61 }
0x1785   :  { %v1448_v38 = vsel %vm13097_vm7, %v1447_v24, %v1446_v29 }
0x1786   :  { %v1464_v50 = vsel %vm13092_vm12, %v1448_v38, %v1462_v46 }
0x1787   :  { %v1466_v52 = vsel %vm13091_vm13, %v1451_v8, %v1464_v50 }
0x178a   :  { %v8328_v49 = vpop.xlane.xlu1 %1406 }
0x178b   :  { %v1452_v12 = vperm.slane %v8328_v49, %v8273_v9 }
0x178d   :  { %v1454_v13 = vsel %vm13097_vm7, %v1453_v62, %v1452_v12 }
0x178e   :  { %v1468_v14 = vsel %vm13090_vm14, %v1454_v13, %v1466_v52 }
0x178f   :  { %v1471_v15 = vsel %vm13089_vm15, %v1468_v14, -inf }
0x1790   :  { %1472 = vmax.xlane.f32.xlu0 %v1471_v15 }
0x1803   :  { %v8340_v19 = vpop.xlane.xlu0 %1472 }
0x1804   :  { %v1476_v21 = vperm.slane %v8340_v19, 1  ;;  %v1475_v23 = vperm.slane %v8340_v19, 0  ;;  %v1479_v28 = vperm.slane %v8340_v19, 4  ;;  %v1477_v29 = vperm.slane %v8340_v19, 2 }
0x1805   :  { %v1478_v46 = vperm.slane %v8340_v19, 3  ;;  %v1482_v13 = vperm.slane %v8340_v19, 7 }
0x1806   :  { %v1493_v24 = vsub.f32 %v8254_v51, %v1476_v21  ;;  %v1492_v26 = vsub.f32 %v8264_v0, %v1475_v23  ;;  %v1491_v2 = vsub.f32 %v8256_v56, %v1475_v23  ;;  %v1500_v38 = vsub.f32 %v8270_v4, %v1479_v28 }
0x1807   :  { %v1495_v43 = vsub.f32 %v8260_v58, %v1477_v29  ;;  %v1494_v51 = vsub.f32 %v8258_v57, %v1476_v21  ;;  %v1481_v0 = vperm.slane %v8340_v19, 6  ;;  %v1497_v58 = vsub.f32 %v8262_v55, %v1478_v46 }
0x1808   :  { %v1511_v32 = vmul.f32 1.442695, %v1493_v24  ;;  %v1509_v35 = vmul.f32 1.442695, %v1492_v26  ;;  %v1507_v33 = vmul.f32 1.442695, %v1491_v2  ;;  %v1496_v12 = vsub.f32 %v8268_v3, %v1477_v29 }
0x1809   :  { %v1525_v44 = vmul.f32 1.442695, %v1500_v38  ;;  %v1515_v56 = vmul.f32 1.442695, %v1495_v43  ;;  %v1513_v50 = vmul.f32 1.442695, %v1494_v51  ;;  %v1503_v57 = vsub.f32 %v8284_v11, %v1481_v0 }
0x180a   :  { %7315 = vpow2.f32 %v1511_v32  ;;  %v1519_v52 = vmul.f32 1.442695, %v1497_v58  ;;  %v1517_v15 = vmul.f32 1.442695, %v1496_v12  ;;  %v1506_v55 = vsub.f32 %v8320_v40, %v1482_v13 }
0x180b   :  { %7317 = vpow2.f32 %v1509_v35  ;;  %v1531_v8 = vmul.f32 1.442695, %v1503_v57  ;;  %v1499_v3 = vsub.f32 %v8275_v60, %v1479_v28  ;;  %v1498_v21 = vsub.f32 %v8266_v1, %v1478_v46 }
0x180c   :  { %7319 = vpow2.f32 %v1507_v33  ;;  %v1537_v23 = vmul.f32 1.442695, %v1506_v55  ;;  %v1480_v26 = vperm.slane %v8340_v19, 5 }
0x180d   :  { %7321 = vpow2.f32 %v1525_v44  ;;  %v1523_v24 = vmul.f32 1.442695, %v1499_v3  ;;  %v1521_v29 = vmul.f32 1.442695, %v1498_v21 }
0x180e   :  { %7323 = vpow2.f32 %v1515_v56  ;;  %v1502_v1 = vsub.f32 %v8300_v20, %v1480_v26  ;;  %v1501_v60 = vsub.f32 %v8280_v10, %v1480_v26  ;;  %v1505_v20 = vsub.f32 %v8328_v49, %v1482_v13 }
0x180f   :  { %7325 = vpow2.f32 %v1513_v50  ;;  %v1504_v10 = vsub.f32 %v8314_v31, %v1481_v0  ;;  %v8416_v31 = vld [vmem:[#allocation3 + $0x8] sm:$0xff] }
0x1810   :  { %v8354_v48 = vpop.eup %7315  ;;  %7327 = vpow2.f32 %v1531_v8  ;;  %v1529_v19 = vmul.f32 1.442695, %v1502_v1  ;;  %v1527_v35 = vmul.f32 1.442695, %v1501_v60  ;;  %v1535_v43 = vmul.f32 1.442695, %v1505_v20 }
0x1811   :  { %v8356_v62 = vpop.eup %7317  ;;  %1562 = vperm.xlu0 %7217, %v8354_v48   ;;  %7329 = vpow2.f32 %v1519_v52  ;;  %v1533_v51 = vmul.f32 1.442695, %v1504_v10  ;;  %v1878_v57 = vrot.slane %v8416_v31, 2  ;;  %v1884_v12 = vperm.slane %v8416_v31, 0 }
0x1812   :  { %v8359_v4 = vpop.eup %7319  ;;  %1559 = vperm.xlu2 %7216, %v8356_v62   ;;  %7331 = vpow2.f32 %v1517_v15  ;;  %v1880_v15 = vrot.slane %v8416_v31, 4  ;;  %v1881_v1 = vrot.slane %v8416_v31, 5 }
0x1813   :  { %1556 = vperm.xlu1 %7215, %v8359_v4   ;;  %v8367_v14 = vpop.eup %7321  ;;  %7333 = vpow2.f32 %v1537_v23  ;;  %v1886_v8 = vperm.slane %v1878_v57, 0  ;;  %v1901_v13 = vmul.f32 %v1884_v12, %v8220_v30 }
0x1814   :  { %v8369_v17 = vpop.eup %7323  ;;  %7335 = vpow2.f32 %v1523_v24  ;;  %v8433_v3 = vperm.slane %v1880_v15, 0  ;;  %v1879_v24 = vrot.slane %v8416_v31, 3  ;;  %v8447_v60 = vperm.slane %v1881_v1, 0 }
0x1815   :  { %v8372_v11 = vpop.eup %7325  ;;  %7337 = vpow2.f32 %v1521_v29  ;;  %v1905_v52 = vmul.f32 %v1886_v8, %v8227_v34  ;;  %v1919_v55 = vsel %vm13098_vm6, %v1901_v13, 0.0  ;;  %v1904_v21 = vmul.f32 %v1886_v8, %v8189_v7 }
0x1816   :  { %v8380_v2 = vpop.eup %7327  ;;  %7339 = vpow2.f32 %v1529_v19  ;;  %v1908_v23 = vmul.f32 %v8433_v3, %v8234_v37  ;;  %v8441_v26 = vperm.slane %v1879_v24, 0  ;;  %v1910_v37 = vmul.f32 %v8447_v60, %v8204_v22 }
0x1817   :  { %v8382_v32 = vpop.eup %7329  ;;  %7341 = vpow2.f32 %v1527_v35  ;;  %v1928_v30 = vsel %vm13099_vm1, %v1904_v21, 0.0 }
0x1818   :  { %v8385_v40 = vpop.eup %7331  ;;  %7343 = vpow2.f32 %v1535_v43  ;;  %v1940_v34 = vsel %vm13099_vm1, %v1908_v23, 0.0  ;;  %v1907_v29 = vmul.f32 %v8441_v26, %v8196_v16  ;;  %v1946_v35 = vsel %vm13099_vm1, %v1910_v37, 0.0 }
0x1819   :  { %1583 = vperm.xlu0 %7217, %v8367_v14   ;;  %v8391_v28 = vpop.eup %7333  ;;  %7345 = vpow2.f32 %v1533_v51  ;;  %v1019_v43 = vmul.f32 %v8114_v18, %v8097_v54 }
0x181a   :  { %1568 = vperm.xlu2 %7216, %v8369_v17   ;;  %v8393_v33 = vpop.eup %7335  ;;  %v1937_v7 = vsel %vm13098_vm6, %v1907_v29, 0.0 }
0x181b   :  { %1565 = vperm.xlu1 %7215, %v8372_v11   ;;  %v8396_v38 = vpop.eup %7337  ;;  %v8455_v16 = vadd.f32 %v8119_v27, %v1019_v43 }
0x181c   :  { %v8402_v44 = vpop.eup %7339 }
0x181d   :  { %v8406_v56 = vpop.eup %7341  ;;  %7347 = vtanh.f32 %v8455_v16 }
0x181e   :  { %v8410_v46 = vpop.eup %7343 }
0x181f   :  { %v8412_v49 = vpop.eup %7345 }
0x1821   :  { %1592 = vperm.xlu0 %7217, %v8380_v2  }
0x1822   :  { %1574 = vperm.xlu2 %7216, %v8382_v32  }
0x1823   :  { %1571 = vperm.xlu1 %7215, %v8385_v40   ;;  %v7348_v57 = vpop.eup %7347 }
0x1829   :  { %1601 = vperm.xlu0 %7217, %v8391_v28  }
0x182a   :  { %1580 = vperm.xlu2 %7216, %v8393_v33  }
0x182b   :  { %1577 = vperm.xlu1 %7215, %v8396_v38  }
0x1831   :  { %1870 = vrot.lane.b32.xlu0 %v8125_v36, %s7753_s30  ;;  %v1877_v36 = vrot.slane %v8416_v31, 1 }
0x1832   :  { %1589 = vperm.xlu2 %7216, %v8402_v44  }
0x1833   :  { %1586 = vperm.xlu1 %7215, %v8406_v56   ;;  %v8419_v0 = vperm.slane %v1877_v36, 0 }
0x1835   :  { %v1902_v50 = vmul.f32 %v8419_v0, %v8131_v39  ;;  %v1931_v39 = vsel %vm13098_vm6, %v1905_v52, 0.0 }
0x1837   :  { %v1922_v58 = vsel %vm13099_vm1, %v1902_v50, 0.0 }
0x183a   :  { %1598 = vperm.xlu2 %7216, %v8410_v46  }
0x183b   :  { %1595 = vperm.xlu1 %7215, %v8412_v49  }
0x185b   :  { %1923 = vadd.xlane.f32.xlu0 %v1922_v58 }
0x1863   :  { %1920 = vadd.xlane.f32.xlu2 %v1919_v55  ;;  %1932 = vadd.xlane.f32.xlu0 %v1931_v39 }
0x186b   :  { %1929 = vadd.xlane.f32.xlu2 %v1928_v30  ;;  %1941 = vadd.xlane.f32.xlu0 %v1940_v34 }
0x186c   :  { %v1560_v19 = vpop.permute.xlu2 %1559 }
0x186d   :  { %v1604_v30 = vperm.slane %v1560_v19, %v8278_v61 }
0x1873   :  { %1938 = vadd.xlane.f32.xlu2 %v1937_v7 }
0x1874   :  { %v1569_v20 = vpop.permute.xlu2 %1568 }
0x1875   :  { %v1609_v24 = vperm.slane %v1569_v20, %v8273_v9 }
0x187b   :  { %1947 = vadd.xlane.f32.xlu2 %v1946_v35 }
0x187c   :  { %v1575_v50 = vpop.permute.xlu2 %1574 }
0x187d   :  { %v1612_v34 = vperm.slane %v1575_v50, %v8273_v9 }
0x1883   :  { %v1563_v51 = vpop.permute.xlu0 %1562 }
0x1884   :  { %v1581_v8 = vpop.permute.xlu2 %1580  ;;  %v1606_v27 = vperm.slane %v1563_v51, %v8273_v9 }
0x1885   :  { %v1557_v10 = vpop.permute.xlu1 %1556 }
0x1886   :  { %v1603_v39 = vperm.slane %v1557_v10, %v8273_v9 }
0x1888   :  { %v1605_v7 = vsel %vm13097_vm7, %v1604_v30, %v1603_v39 }
0x188b   :  { %v1584_v58 = vpop.permute.xlu0 %1583 }
0x188c   :  { %v1590_v15 = vpop.permute.xlu2 %1589  ;;  %v1616_v10 = vperm.slane %v1584_v58, %v8278_v61 }
0x188d   :  { %v1566_v36 = vpop.permute.xlu1 %1565  ;;  %v1619_v20 = vperm.slane %v1590_v15, %v8278_v61 }
0x188e   :  { %v1607_v55 = vperm.slane %v1566_v36, %v8278_v61  ;;  %v1615_v36 = vperm.slane %v1581_v8, %v8273_v9  ;;  %v1882_v8 = vrot.slane %v8416_v31, 6 }
0x1890   :  { %v1608_v29 = vsel %vm13097_vm7, %v1607_v55, %v1606_v27 }
0x1891   :  { %v1627_v43 = vsel %vm13096_vm8, %v1608_v29, %v1605_v7  ;;  %v1890_v29 = vperm.slane %v1882_v8, 0 }
0x1893   :  { %1032 = vrot.lane.b32.xlu2 %v7348_v57, %s7752_s27  ;;  %v1593_v52 = vpop.permute.xlu0 %1592  ;;  %v1913_v7 = vmul.f32 %v1890_v29, %v8211_v25 }
0x1894   :  { %v1599_v50 = vpop.permute.xlu2 %1598  ;;  %v1621_v58 = vperm.slane %v1593_v52, %v8273_v9 }
0x1895   :  { %v1572_v22 = vpop.permute.xlu1 %1571  ;;  %v1624_v15 = vperm.slane %v1599_v50, %v8273_v9 }
0x1896   :  { %v1610_v54 = vperm.slane %v1572_v22, %v8278_v61 }
0x1898   :  { %v1611_v1 = vsel %vm13097_vm7, %v1610_v54, %v1609_v24  ;;  %v1617_v54 = vsel %vm13097_vm7, %v1616_v10, %v1615_v36  ;;  %v1903_v10 = vmul.f32 %v8419_v0, %v8138_v42  ;;  %v1883_v42 = vrot.slane %v8416_v31, 7 }
0x1899   :  { %v1628_v19 = vsel %vm13095_vm9, %v1611_v1, %v1627_v43  ;;  %v1900_v1 = vmul.f32 %v1884_v12, %v8181_v63  ;;  %v1909_v63 = vmul.f32 %v8433_v3, %v8154_v53  ;;  %v1911_v31 = vmul.f32 %v8447_v60, %v8241_v41 }
0x189a   :  { %v1925_v43 = vsel %vm13098_vm6, %v1903_v10, 0.0  ;;  %v1891_v36 = vperm.slane %v1883_v42, 0 }
0x189b   :  { %v1602_v51 = vpop.permute.xlu0 %1601  ;;  %v1943_v25 = vsel %vm13098_vm6, %v1909_v63, 0.0  ;;  %v744_v63 = vpop.f32.mrf.mxu3 }
0x189c   :  { %v1625_v22 = vperm.slane %v1602_v51, %v8278_v61  ;;  %v1906_v51 = vmul.f32 %v8441_v26, %v8146_v47  ;;  %v1915_v26 = vmul.f32 %v1891_v36, %v8170_v5  ;;  %v1914_v5 = vmul.f32 %v1891_v36, %v8248_v45 }
0x189d   :  { %v1578_v13 = vpop.permute.xlu1 %1577 }
0x189e   :  { %v1613_v21 = vperm.slane %v1578_v13, %v8278_v61  ;;  %v1626_v24 = vsel %vm13097_vm7, %v1625_v22, %v1624_v15  ;;  %v1961_v50 = vsel %vm13098_vm6, %v1915_v26, 0.0  ;;  %v1949_v22 = vsel %vm13098_vm6, %v1911_v31, 0.0 }
0x18a0   :  { %v1614_v37 = vsel %vm13097_vm7, %v1613_v21, %v1612_v34 }
0x18a1   :  { %v1629_v57 = vsel %vm13094_vm10, %v1614_v37, %v1628_v19  ;;  %v1916_v37 = vsel %vm13099_vm1, %v1900_v1, 0.0  ;;  %v1912_v19 = vmul.f32 %v1890_v29, %v8162_v59 }
0x18a2   :  { %v1630_v39 = vsel %vm13093_vm11, %v1617_v54, %v1629_v57 }
0x18a3   :  { %v1952_v0 = vsel %vm13099_vm1, %v1912_v19, 0.0 }
0x18a5   :  { %v1587_v23 = vpop.permute.xlu1 %1586 }
0x18a6   :  { %v1618_v35 = vperm.slane %v1587_v23, %v8273_v9 }
0x18a8   :  { %v1620_v13 = vsel %vm13097_vm7, %v1619_v20, %v1618_v35  ;;  %v1955_v35 = vsel %vm13098_vm6, %v1913_v7, 0.0  ;;  %v1934_v20 = vsel %vm13099_vm1, %v1906_v51, 0.0 }
0x18a9   :  { %v1631_v23 = vsel %vm13092_vm12, %v1620_v13, %v1630_v39 }
0x18ad   :  { %v1596_v55 = vpop.permute.xlu1 %1595 }
0x18ae   :  { %v1622_v27 = vperm.slane %v1596_v55, %v8278_v61  ;;  %v1958_v55 = vsel %vm13099_vm1, %v1914_v5, 0.0 }
0x18b0   :  { %v1623_v21 = vsel %vm13097_vm7, %v1622_v27, %v1621_v58 }
0x18b1   :  { %v1632_v30 = vsel %vm13091_vm13, %v1623_v21, %v1631_v23 }
0x18b2   :  { %v1633_v34 = vsel %vm13090_vm14, %v1626_v24, %v1632_v30 }
0x18b3   :  { %v1635_v52 = vsel %vm13089_vm15, %v1633_v34, 0.0  ;;  %v8537_v34 = vpop.permute.xlu0 %1870 }
0x18b4   :  { %1636 = vadd.xlane.f32.xlu1 %v1635_v52 }
0x18bc   :  { %1917 = vadd.xlane.f32.xlu1 %v1916_v37  ;;  %1956 = vadd.xlane.f32.xlu2 %v1955_v35 }
0x18c4   :  { %1926 = vadd.xlane.f32.xlu1 %v1925_v43 }
0x18cc   :  { %1935 = vadd.xlane.f32.xlu1 %v1934_v20 }
0x18ce   :  { %v8543_v1 = vpop.xlane.xlu0 %1923 }
0x18cf   :  { %v1983_v31 = vperm.slane %v8543_v1, %v8273_v9 }
0x18d4   :  { %1944 = vadd.xlane.f32.xlu1 %v1943_v25 }
0x18d6   :  { %v8507_v12 = vpop.xlane.xlu2 %1920 }
0x18d7   :  { %v1981_v5 = vperm.slane %v8507_v12, %v8278_v61 }
0x18dc   :  { %1953 = vadd.xlane.f32.xlu1 %v1952_v0 }
0x18de   :  { %v8512_v47 = vpop.xlane.xlu2 %1929 }
0x18e4   :  { %1962 = vadd.xlane.f32.xlu1 %v1961_v50 }
0x18e6   :  { %v8516_v53 = vpop.xlane.xlu2 %1938 }
0x18ee   :  { %v8518_v3 = vpop.xlane.xlu2 %1947 }
0x18f6   :  { %v1033_v57 = vpop.permute.xlu2 %1032 }
0x18f7   :  { %v1035_v59 = vmul.f32 %v1033_v57, %v8114_v18 }
0x18f9   :  { %1037 = vrot.lane.b32.xlu0 %v1035_v59, %s7753_s30 }
0x1923   :  { %1950 = vadd.xlane.f32.xlu0 %v1949_v22 }
0x1927   :  { %v1637_v13 = vpop.xlane.xlu1 %1636 }
0x1928   :  { %7349 = vrcp.f32 %v1637_v13  ;;  %v1649_v15 = vand.u32 2147483648, %v1637_v13  ;;  %v1647_v39 = vand.u32 2147483647, %v1637_v13  ;;  %vm1643_vm3 = vweird.f32 %v1637_v13 }
0x192a   :  { %v1650_v41 = vor.u32 1.1754944e-38, %v1649_v15  ;;  %vm1648_vm5 = vcmp.eq.f32.partialorder %v1647_v39, 8.507059e+37 }
0x192b   :  { %1959 = vadd.xlane.f32.xlu0 %v1958_v55 }
0x192e   :  { %v7350_v54 = vpop.eup %7349 }
0x192f   :  { %v1639_v58 = vmul.f32 %v7350_v54, %v1637_v13  ;;  %vm1644_vm2 = vweird.f32 %v7350_v54  ;;  %v8567_v20 = vpop.xlane.xlu1 %1917 }
0x1930   :  { %vm1645_vm4 = vmor %vm1643_vm3, %vm1644_vm2  ;;  %v1980_v22 = vperm.slane %v8567_v20, %v8273_v9 }
0x1931   :  { %v1640_v27 = vsub.f32 1.0, %v1639_v58 }
0x1932   :  { %v1982_v15 = vsel %vm13097_vm7, %v1981_v5, %v1980_v22 }
0x1933   :  { %v1641_v18 = vmul.f32 %v7350_v54, %v1640_v27  ;;  %v1990_v27 = vperm.slane %v8516_v53, %v8278_v61 }
0x1935   :  { %v1642_v8 = vadd.f32 %v7350_v54, %v1641_v18 }
0x1937   :  { %v1646_v60 = vsel %vm1645_vm4, %v7350_v54, %v1642_v8  ;;  %v8572_v19 = vpop.xlane.xlu1 %1926  ;;  %v1986_v54 = vperm.slane %v8512_v47, %v8273_v9 }
0x1938   :  { %v8527_v21 = vsel %vm1648_vm5, %v1650_v41, %v1646_v60  ;;  %v1984_v59 = vperm.slane %v8572_v19, %v8278_v61  ;;  %vm13088_vm5 = vcmask 523520  }
0x1939   :  { %v1653_v45 = vperm.slane %v8527_v21, 0  ;;  %v1654_v24 = vperm.slane %v8527_v21, 1  ;;  %v1655_v52 = vperm.slane %v8527_v21, 2  ;;  %v1657_v37 = vperm.slane %v8527_v21, 4 }
0x193a   :  { %v1985_v13 = vsel %vm13097_vm7, %v1984_v59, %v1983_v31 }
0x193b   :  { %v1670_v23 = vmul.f32 %v8356_v62, %v1653_v45  ;;  %v1672_v30 = vmul.f32 %v8372_v11, %v1654_v24  ;;  %v1674_v29 = vmul.f32 %v8385_v40, %v1655_v52  ;;  %v1656_v62 = vperm.slane %v8527_v21, 3  ;;  %v8549_v11 = vpop.xlane.xlu0 %1932 }
0x193c   :  { %v1678_v35 = vmul.f32 %v8367_v14, %v1657_v37  ;;  %v1659_v40 = vperm.slane %v8527_v21, 6  ;;  %v1987_v39 = vperm.slane %v8549_v11, %v8278_v61  ;;  %v2004_v41 = vsel %vm13096_vm8, %v1985_v13, %v1982_v15 }
0x193d   :  { %v1676_v7 = vmul.f32 %v8396_v38, %v1656_v62  ;;  %v1660_v38 = vperm.slane %v8527_v21, 7 }
0x193e   :  { %v1681_v43 = vmul.f32 %v8380_v2, %v1659_v40  ;;  %v7626_v2 = vld [vmem:[%s13065_s13] ss:$0 sm:$0xff] }
0x193f   :  { %1692 = vperm.xlu0 %7217, %v1670_v23   ;;  %v1683_v14 = vmul.f32 %v8410_v46, %v1660_v38  ;;  %v745_v25 = vadd.f32 %v7626_v2, %v744_v63  ;;  %v8574_v26 = vpop.xlane.xlu1 %1935  ;;  %v1995_v23 = vperm.slane %v8518_v3, %v8273_v9 }
0x1940   :  { %v1989_v55 = vperm.slane %v8574_v26, %v8273_v9 }
0x1943   :  { %v8556_v10 = vpop.xlane.xlu0 %1941 }
0x1944   :  { %v1992_v8 = vperm.slane %v8556_v10, %v8273_v9 }
0x1947   :  { %1702 = vperm.xlu0 %7217, %v1672_v30   ;;  %v8577_v46 = vpop.xlane.xlu1 %1944  ;;  %v1991_v30 = vsel %vm13097_vm7, %v1990_v27, %v1989_v55 }
0x1948   :  { %v1993_v58 = vperm.slane %v8577_v46, %v8278_v61 }
0x194f   :  { %1712 = vperm.xlu0 %7217, %v1674_v29   ;;  %v8581_v57 = vpop.xlane.xlu1 %1953  ;;  %v1988_v29 = vsel %vm13097_vm7, %v1987_v39, %v1986_v54 }
0x1957   :  { %1722 = vperm.xlu0 %7217, %v1676_v7   ;;  %v1994_v7 = vsel %vm13097_vm7, %v1993_v58, %v1992_v8  ;;  %v1671_v8 = vmul.f32 %v8354_v48, %v1654_v24 }
0x195f   :  { %1732 = vperm.xlu0 %7217, %v1678_v35   ;;  %v8615_v35 = vpop.xlane.xlu1 %1962 }
0x1967   :  { %1747 = vperm.xlu0 %7217, %v1681_v43   ;;  %v8617_v43 = vpop.xlane.xlu2 %1956 }
0x1968   :  { %v1999_v59 = vperm.slane %v8617_v43, %v8278_v61 }
0x196b   :  { %v1038_v51 = vpop.permute.xlu0 %1037 }
0x196c   :  { %1040 = vst.msk [vmem:[#allocation3 + $0x18] sm:$0xff] %vm13099_vm1, %v1038_v51  ;;  %6952 = vmatmul.msk.f32.vlgmr.msra.gmra.mxu1 %vm13099_vm1, %v1038_v51  ;;  %v2005_v51 = vsel %vm13095_vm9, %v1988_v29, %v2004_v41 }
0x196d   :  { %v2006_v2 = vsel %vm13094_vm10, %v1991_v30, %v2005_v51 }
0x196f   :  { %1757 = vperm.xlu0 %7217, %v1683_v14  }
0x1996   :  { %v8579_v50 = vpop.xlane.xlu0 %1950 }
0x1997   :  { %v1996_v18 = vperm.slane %v8579_v50, %v8278_v61 }
0x1999   :  { %v1997_v14 = vsel %vm13097_vm7, %v1996_v18, %v1995_v23  ;;  %v1669_v18 = vmul.f32 %v8359_v4, %v1653_v45  ;;  %v1675_v45 = vmul.f32 %v8382_v32, %v1656_v62  ;;  %v1682_v62 = vmul.f32 %v8412_v49, %v1659_v40 }
0x199e   :  { %v8608_v60 = vpop.xlane.xlu0 %1959 }
0x199f   :  { %v2001_v63 = vperm.slane %v8608_v60, %v8273_v9 }
0x19e9   :  { %v1061_v42 = vpop.f32.mrf.mxu1 }
0x19ea   :  { %v1064_v0 = vadd.f32 %v1061_v42, %v745_v25  ;;  %v1998_v25 = vperm.slane %v8581_v57, %v8273_v9  ;;  %v2002_v42 = vperm.slane %v8615_v35, %v8278_v61 }
0x19ec   :  { %7351 = vtanh.f32 %v1064_v0  ;;  %v2003_v22 = vsel %vm13097_vm7, %v2002_v42, %v2001_v63  ;;  %v2000_v5 = vsel %vm13097_vm7, %v1999_v59, %v1998_v25  ;;  %v6953_v58 = vmul.f32 -1.442695, %v1064_v0  ;;  %v8666_v25 = vpop.permute.xlu0 %1692 }
0x19ed   :  { %v1673_v0 = vmul.f32 %v8369_v17, %v1655_v52  ;;  %v1677_v52 = vmul.f32 %v8393_v33, %v1657_v37  ;;  %v1658_v63 = vperm.slane %v8527_v21, 5 }
0x19ee   :  { %7353 = vpow2.f32 %v6953_v58 }
0x19ef   :  { %v1680_v32 = vmul.f32 %v8402_v44, %v1658_v63 }
0x19f2   :  { %v7352_v36 = vpop.eup %7351 }
0x19f3   :  { %1087 = vrot.lane.b32.xlu2 %v7352_v36, %s7752_s27  ;;  %v2007_v36 = vsel %vm13093_vm11, %v1994_v7, %v2006_v2  ;;  %v1684_v2 = vmul.f32 %v8391_v28, %v1660_v38 }
0x19f4   :  { %v2008_v31 = vsel %vm13092_vm12, %v1997_v14, %v2007_v36  ;;  %v7354_v27 = vpop.eup %7353  ;;  %v8668_v33 = vpop.permute.xlu0 %1702 }
0x19f5   :  { %v2009_v13 = vsel %vm13091_vm13, %v2000_v5, %v2008_v31  ;;  %v1068_v15 = vadd.f32 1.0, %v7354_v27 }
0x19f6   :  { %v2010_v55 = vsel %vm13090_vm14, %v2003_v22, %v2009_v13 }
0x19f7   :  { %v2012_v54 = vsel %vm13089_vm15, %v2010_v55, -inf  ;;  %7355 = vrcp.f32 %v1068_v15  ;;  %v1080_v7 = vand.u32 2147483648, %v1068_v15  ;;  %vm1074_vm2 = vweird.f32 %v1068_v15 }
0x19f8   :  { %v1078_v4 = vand.u32 2147483647, %v1068_v15 }
0x19f9   :  { %v1081_v24 = vor.u32 1.1754944e-38, %v1080_v7 }
0x19fa   :  { %vm1079_vm4 = vcmp.eq.f32.partialorder %v1078_v4, 8.507059e+37 }
0x19fc   :  { %v8674_v36 = vpop.permute.xlu0 %1712 }
0x19fd   :  { %v7356_v39 = vpop.eup %7355 }
0x19fe   :  { %v1070_v41 = vmul.f32 %v7356_v39, %v1068_v15  ;;  %vm1075_vm0 = vweird.f32 %v7356_v39 }
0x19ff   :  { %vm1076_vm3 = vmor %vm1074_vm2, %vm1075_vm0 }
0x1a00   :  { %v1071_v23 = vsub.f32 1.0, %v1070_v41 }
0x1a02   :  { %v1072_v30 = vmul.f32 %v7356_v39, %v1071_v23 }
0x1a04   :  { %v1073_v29 = vadd.f32 %v7356_v39, %v1072_v30  ;;  %v8687_v58 = vpop.permute.xlu0 %1722 }
0x1a06   :  { %v1077_v48 = vsel %vm1076_vm3, %v7356_v39, %v1073_v29 }
0x1a07   :  { %v8649_v51 = vsel %vm1079_vm4, %v1081_v24, %v1077_v48 }
0x1a08   :  { %13337 = vst [vmem:[#allocation9_spill] sm:$0xff] %v8649_v51 }
0x1a0c   :  { %v8705_v41 = vpop.permute.xlu0 %1732 }
0x1a1c   :  { %2013 = vmax.xlane.f32.xlu2 %v2012_v54 }
0x1a34   :  { %1687 = vperm.xlu2 %7216, %v1669_v18  }
0x1a3c   :  { %1697 = vperm.xlu2 %7216, %v1671_v8  }
0x1a44   :  { %1707 = vperm.xlu2 %7216, %v1673_v0  }
0x1a4c   :  { %1717 = vperm.xlu2 %7216, %v1675_v45   ;;  %v8720_v45 = vpop.permute.xlu0 %1747 }
0x1a4d   :  { %v1088_v14 = vpop.permute.xlu2 %1087 }
0x1a4e   :  { %v1090_v17 = vmul.f32 %v1088_v14, %v8649_v51 }
0x1a50   :  { %1092 = vrot.lane.b32.xlu0 %v1090_v17, %s7753_s30 }
0x1a54   :  { %1727 = vperm.xlu2 %7216, %v1677_v52  }
0x1a5c   :  { %1742 = vperm.xlu2 %7216, %v1680_v32  }
0x1a64   :  { %1752 = vperm.xlu2 %7216, %v1682_v62  }
0x1a6c   :  { %1762 = vperm.xlu2 %7216, %v1684_v2   ;;  %v1085_v2 = vmul.f32 %v8649_v51, %v8455_v16  ;;  %v1679_v16 = vmul.f32 %v8406_v56, %v1658_v63 }
0x1a8f   :  { %v8670_v37 = vpop.xlane.xlu2 %2013 }
0x1a90   :  { %v2017_v42 = vperm.slane %v8670_v37, 1  ;;  %v2016_v44 = vperm.slane %v8670_v37, 0  ;;  %v2019_v28 = vperm.slane %v8670_v37, 3  ;;  %v2020_v13 = vperm.slane %v8670_v37, 4 }
0x1a91   :  { %v2022_v15 = vperm.slane %v8670_v37, 6  ;;  %v2023_v0 = vperm.slane %v8670_v37, 7  ;;  %v2021_v29 = vperm.slane %v8670_v37, 5 }
0x1a92   :  { %v2034_v49 = vsub.f32 %v8543_v1, %v2017_v42  ;;  %v2032_v40 = vsub.f32 %v8567_v20, %v2016_v44  ;;  %v2038_v31 = vsub.f32 %v8574_v26, %v2019_v28  ;;  %v2035_v22 = vsub.f32 %v8572_v19, %v2017_v42 }
0x1a93   :  { %v2018_v1 = vperm.slane %v8670_v37, 2  ;;  %v2041_v19 = vsub.f32 %v8577_v46, %v2020_v13  ;;  %v2044_v46 = vsub.f32 %v8581_v57, %v2022_v15  ;;  %v2047_v57 = vsub.f32 %v8615_v35, %v2023_v0  ;;  %v8729_v35 = vpop.permute.xlu0 %1757 }
0x1a94   :  { %v2052_v38 = vmul.f32 1.442695, %v2034_v49  ;;  %v2048_v59 = vmul.f32 1.442695, %v2032_v40  ;;  %v2060_v5 = vmul.f32 1.442695, %v2038_v31  ;;  %v2045_v52 = vsub.f32 %v8617_v43, %v2022_v15 }
0x1a95   :  { %v2054_v55 = vmul.f32 1.442695, %v2035_v22  ;;  %v2036_v26 = vsub.f32 %v8512_v47, %v2018_v1  ;;  %v2066_v27 = vmul.f32 1.442695, %v2041_v19  ;;  %v2039_v47 = vsub.f32 %v8516_v53, %v2019_v28 }
0x1a96   :  { %7357 = vpow2.f32 %v2052_v38  ;;  %v2072_v23 = vmul.f32 1.442695, %v2044_v46  ;;  %v2042_v53 = vsub.f32 %v8518_v3, %v2021_v29  ;;  %v2078_v48 = vmul.f32 1.442695, %v2047_v57  ;;  %v8786_v46 = vld [vmem:[%s13055_s3 + $0x20] sm:$0xff]  ;;  %v8805_v57 = vld [vmem:[%s13055_s3 + $0x30] sm:$0xff] }
0x1a97   :  { %7359 = vpow2.f32 %v2048_v59  ;;  %v2056_v18 = vmul.f32 1.442695, %v2036_v26  ;;  %v2062_v30 = vmul.f32 1.442695, %v2039_v47  ;;  %v2074_v32 = vmul.f32 1.442695, %v2045_v52 }
0x1a98   :  { %7361 = vpow2.f32 %v2060_v5  ;;  %v2068_v24 = vmul.f32 1.442695, %v2042_v53  ;;  %v2033_v28 = vsub.f32 %v8507_v12, %v2016_v44  ;;  %v2037_v59 = vsub.f32 %v8549_v11, %v2018_v1  ;;  %13339 = vst [vmem:[#allocation11_spill] sm:$0xff] %v8786_v46 }
0x1a99   :  { %7363 = vpow2.f32 %v2054_v55  ;;  %v2040_v12 = vsub.f32 %v8556_v10, %v2020_v13  ;;  %v2043_v56 = vsub.f32 %v8579_v50, %v2021_v29  ;;  %v2046_v5 = vsub.f32 %v8608_v60, %v2023_v0  ;;  %v1688_v55 = vpop.permute.xlu2 %1687  ;;  %v8780_v60 = vld [vmem:[%s13055_s3 + $0x10] sm:$0xff]  ;;  %13340 = vst [vmem:[#allocation12_spill] sm:$0xff] %v8805_v57 }
0x1a9a   :  { %7365 = vpow2.f32 %v2066_v27  ;;  %v2050_v38 = vmul.f32 1.442695, %v2033_v28  ;;  %v2058_v31 = vmul.f32 1.442695, %v2037_v59  ;;  %v8839_v28 = vld [vmem:[%s13055_s3 + $0x48] sm:$0x3] }
0x1a9b   :  { %7367 = vpow2.f32 %v2056_v18  ;;  %v2064_v44 = vmul.f32 1.442695, %v2040_v12  ;;  %v2070_v63 = vmul.f32 1.442695, %v2043_v56  ;;  %v2076_v37 = vmul.f32 1.442695, %v2046_v5 }
0x1a9c   :  { %v8685_v54 = vpop.eup %7357  ;;  %7369 = vpow2.f32 %v2072_v23  ;;  %v8792_v23 = vld [vmem:[%s13055_s3 + $0x18] sm:$0x3]  ;;  %13343 = vst [vmem:[#allocation15_spill] sm:$0xff] %v8839_v28 }
0x1a9d   :  { %v8689_v20 = vpop.eup %7359  ;;  %2103 = vperm.xlu2 %7216, %v8685_v54   ;;  %7371 = vpow2.f32 %v2062_v30  ;;  %v1768_v0 = vmul.f32 %v8792_v23, %v8668_v33  ;;  %v8799_v30 = vld [vmem:[%s13055_s3] sm:$0xff] }
0x1a9e   :  { %2097 = vperm.xlu0 %7217, %v8689_v20   ;;  %v8700_v39 = vpop.eup %7361  ;;  %7373 = vpow2.f32 %v2078_v48  ;;  %v1765_v29 = vmul.f32 %v8799_v30, %v1688_v55  ;;  %v8811_v48 = vld [vmem:[%s13055_s3 + $0x28] sm:$0x3] }
0x1a9f   :  { %v8702_v8 = vpop.eup %7363  ;;  %7375 = vpow2.f32 %v2068_v24  ;;  %v1770_v33 = vmul.f32 %v8811_v48, %v8674_v36  ;;  %v8818_v24 = vld [vmem:[%s13055_s3 + $0x40] sm:$0xff]  ;;  %v1791_v59 = vsel %vm13098_vm6, %v1768_v0, 0.0 }
0x1aa0   :  { %v8712_v7 = vpop.eup %7365  ;;  %7377 = vpow2.f32 %v2074_v32  ;;  %v8824_v32 = vld [vmem:[%s13055_s3 + $0x8] sm:$0x3] }
0x1aa1   :  { %v8714_v4 = vpop.eup %7367  ;;  %v1698_v10 = vpop.permute.xlu2 %1697  ;;  %13341 = vst [vmem:[#allocation13_spill] sm:$0xff] %v8824_v32 }
0x1aa2   :  { %v8722_v14 = vpop.eup %7369  ;;  %v1767_v18 = vmul.f32 %v8780_v60, %v1698_v10 }
0x1aa3   :  { %v8724_v17 = vpop.eup %7371 }
0x1aa4   :  { %v8731_v3 = vpop.eup %7373 }
0x1aa5   :  { %2115 = vperm.xlu2 %7216, %v8700_v39   ;;  %v8733_v62 = vpop.eup %7375 }
0x1aa6   :  { %2106 = vperm.xlu0 %7217, %v8702_v8   ;;  %v8741_v40 = vpop.eup %7377 }
0x1aa9   :  { %v1708_v50 = vpop.permute.xlu2 %1707 }
0x1aaa   :  { %v1769_v47 = vmul.f32 %v8786_v46, %v1708_v50  ;;  %v8862_v50 = vld [vmem:[%s13055_s3 + $0x78] sm:$0x3] }
0x1aab   :  { %13345 = vst [vmem:[#allocation17_spill] sm:$0xff] %v8862_v50 }
0x1aad   :  { %2124 = vperm.xlu2 %7216, %v8712_v7  }
0x1aae   :  { %2109 = vperm.xlu0 %7217, %v8714_v4  }
0x1ab1   :  { %v1718_v19 = vpop.permute.xlu2 %1717 }
0x1ab2   :  { %v1771_v53 = vmul.f32 %v8805_v57, %v1718_v19 }
0x1ab4   :  { %v1808_v12 = vsel %vm13099_vm1, %v1771_v53, 0.0 }
0x1ab5   :  { %2133 = vperm.xlu2 %7216, %v8722_v14  }
0x1ab6   :  { %2118 = vperm.xlu0 %7217, %v8724_v17  }
0x1ab9   :  { %v1728_v26 = vpop.permute.xlu2 %1727 }
0x1aba   :  { %v1773_v52 = vmul.f32 %v8818_v24, %v1728_v26 }
0x1abd   :  { %2142 = vperm.xlu2 %7216, %v8731_v3  }
0x1abe   :  { %2127 = vperm.xlu0 %7217, %v8733_v62  }
0x1ac1   :  { %v8775_v27 = vpop.permute.xlu2 %1742 }
0x1ac2   :  { %v1093_v42 = vpop.permute.xlu0 %1092 }
0x1ac3   :  { %v8739_v49 = vadd.f32 %v1093_v42, %v1085_v2  ;;  %v1766_v2 = vmul.f32 %v8824_v32, %v8666_v25  ;;  %v8831_v42 = vld [vmem:[%s13055_s3 + $0x38] sm:$0x3]  ;;  %v1799_v25 = vsel %vm13099_vm1, %v1769_v47, 0.0 }
0x1ac4   :  { %13342 = vst [vmem:[#allocation14_spill] sm:$0xff] %v8831_v42  ;;  %v1772_v36 = vmul.f32 %v8831_v42, %v8687_v58 }
0x1ac5   :  { %13338 = vst [vmem:[#allocation10_spill] sm:$0xff] %v8739_v49  ;;  %7379 = vtanh.f32 %v8739_v49  ;;  %v1782_v55 = vsel %vm13098_vm6, %v1766_v2, 0.0 }
0x1ac6   :  { %2136 = vperm.xlu0 %7217, %v8741_v40   ;;  %7381 = vpow2.f32 %v2050_v38  ;;  %v1774_v38 = vmul.f32 %v8839_v28, %v8705_v41  ;;  %v8854_v41 = vld [vmem:[%s13055_s3 + $0x68] sm:$0x3] }
0x1ac7   :  { %7383 = vpow2.f32 %v2058_v31  ;;  %v1781_v31 = vsel %vm13099_vm1, %v1765_v29, 0.0  ;;  %13344 = vst [vmem:[#allocation16_spill] sm:$0xff] %v8854_v41  ;;  %v8876_v29 = vld [vmem:[%s13055_s3 + $0x70] sm:$0xff] }
0x1ac8   :  { %7385 = vpow2.f32 %v2064_v44  ;;  %v1800_v44 = vsel %vm13098_vm6, %v1770_v33, 0.0  ;;  %v1818_v26 = vsel %vm13098_vm6, %v1774_v38, 0.0  ;;  %v1783_v47 = vadd.f32 %v1782_v55, %v1781_v31 }
0x1ac9   :  { %7387 = vpow2.f32 %v2070_v63  ;;  %v1753_v15 = vpop.permute.xlu2 %1752  ;;  %v1817_v63 = vsel %vm13099_vm1, %v1773_v52, 0.0  ;;  %v1801_v10 = vadd.f32 %v1800_v44, %v1799_v25  ;;  %v1779_v53 = vmul.f32 %v8876_v29, %v8729_v35 }
0x1aca   :  { %7389 = vpow2.f32 %v2076_v37  ;;  %v1778_v5 = vmul.f32 %v8854_v41, %v1753_v15  ;;  %v1809_v37 = vsel %vm13098_vm6, %v1772_v36, 0.0  ;;  %v1819_v33 = vadd.f32 %v1818_v26, %v1817_v63 }
0x1acb   :  { %v7380_v43 = vpop.eup %7379  ;;  %v1810_v0 = vadd.f32 %v1809_v37, %v1808_v12  ;;  %v1802_v36 = vrot.slane %v1801_v10, 4 }
0x1acc   :  { %1098 = vrot.lane.b32.xlu1 %v7380_v43, %s7752_s27  ;;  %v8755_v22 = vpop.eup %7381  ;;  %v1790_v43 = vsel %vm13099_vm1, %v1767_v18, 0.0  ;;  %v8869_v18 = vld [vmem:[%s13055_s3 + $0x60] sm:$0xff]  ;;  %v1836_v2 = vsel %vm13098_vm6, %v1778_v5, 0.0  ;;  %v1820_v31 = vrot.slane %v1819_v33, 4 }
0x1acd   :  { %v8761_v21 = vpop.eup %7383  ;;  %v1792_v56 = vadd.f32 %v1791_v59, %v1790_v43  ;;  %13346 = vst [vmem:[#allocation18_spill] sm:$0xff] %v8869_v18  ;;  %v1777_v15 = vmul.f32 %v8869_v18, %v8720_v45  ;;  %v1784_v45 = vrot.slane %v1783_v47, 4  ;;  %v1811_v25 = vrot.slane %v1810_v0, 4 }
0x1ace   :  { %v8765_v11 = vpop.eup %7385  ;;  %v1844_v59 = vsel %vm13099_vm1, %v1779_v53, 0.0  ;;  %v1803_v35 = vadd.f32 %v1802_v36, %v1801_v10  ;;  %v1821_v26 = vadd.f32 %v1820_v31, %v1819_v33  ;;  %v8893_v53 = vld [vmem:[%s13055_s3 + $0x58] sm:$0x3]  ;;  %v8900_v33 = vld [vmem:[%s13055_s3 + $0x50] sm:$0xff] }
0x1acf   :  { %v8769_v1 = vpop.eup %7387  ;;  %v1793_v52 = vrot.slane %v1792_v56, 4  ;;  %v1835_v38 = vsel %vm13099_vm1, %v1777_v15, 0.0  ;;  %v1785_v37 = vadd.f32 %v1784_v45, %v1783_v47  ;;  %v1812_v5 = vadd.f32 %v1811_v25, %v1810_v0  ;;  %13348 = vst [vmem:[#allocation20_spill] sm:$0xff] %v8900_v33 }
0x1ad0   :  { %v8772_v13 = vpop.eup %7389  ;;  %v1837_v12 = vadd.f32 %v1836_v2, %v1835_v38  ;;  %v1804_v51 = vrot.slane %v1803_v35, 2  ;;  %v1822_v47 = vrot.slane %v1821_v26, 2 }
0x1ad1   :  { %v1794_v44 = vadd.f32 %v1793_v52, %v1792_v56  ;;  %v1776_v56 = vmul.f32 %v8893_v53, %v8775_v27  ;;  %v1786_v10 = vrot.slane %v1785_v37, 2  ;;  %v1813_v52 = vrot.slane %v1812_v5, 2 }
0x1ad2   :  { %v1838_v6 = vrot.slane %v1837_v12, 4  ;;  %v1805_v45 = vadd.f32 %v1804_v51, %v1803_v35  ;;  %v1823_v41 = vadd.f32 %v1822_v47, %v1821_v26 }
0x1ad3   :  { %v1827_v25 = vsel %vm13098_vm6, %v1776_v56, 0.0  ;;  %v1787_v27 = vadd.f32 %v1786_v10, %v1785_v37  ;;  %v1814_v31 = vadd.f32 %v1813_v52, %v1812_v5 }
0x1ad4   :  { %1737 = vperm.xlu1 %7215, %v1679_v16   ;;  %v1763_v16 = vpop.permute.xlu2 %1762  ;;  %v1839_v0 = vadd.f32 %v1838_v6, %v1837_v12  ;;  %v1824_v51 = vrot.slane %v1823_v41, 1 }
0x1ad5   :  { %v1780_v19 = vmul.f32 %v8862_v50, %v1763_v16  ;;  %v1806_v50 = vrot.slane %v1805_v45, 1  ;;  %v1788_v18 = vrot.slane %v1787_v27, 1  ;;  %v1815_v28 = vrot.slane %v1814_v31, 1 }
0x1ad6   :  { %v1840_v42 = vrot.slane %v1839_v0, 2  ;;  %v1825_v52 = vadd.f32 %v1824_v51, %v1823_v41 }
0x1ad7   :  { %v1845_v43 = vsel %vm13098_vm6, %v1780_v19, 0.0  ;;  %v1795_v19 = vrot.slane %v1794_v44, 2  ;;  %v1807_v37 = vadd.f32 %v1806_v50, %v1805_v45  ;;  %v1789_v5 = vadd.f32 %v1788_v18, %v1787_v27 }
0x1ad8   :  { %v1846_v55 = vadd.f32 %v1845_v43, %v1844_v59  ;;  %v1816_v10 = vadd.f32 %v1815_v28, %v1814_v31 }
0x1ad9   :  { %v1796_v43 = vadd.f32 %v1795_v19, %v1794_v44 }
0x1ada   :  { %v1847_v49 = vrot.slane %v1846_v55, 4 }
0x1adb   :  { %v1797_v12 = vrot.slane %v1796_v43, 1 }
0x1adc   :  { %2100 = vperm.xlu1 %7215, %v8755_v22   ;;  %v1848_v38 = vadd.f32 %v1847_v49, %v1846_v55  ;;  %v1841_v55 = vadd.f32 %v1840_v42, %v1839_v0 }
0x1add   :  { %v1798_v35 = vadd.f32 %v1797_v12, %v1796_v43 }
0x1ade   :  { %v1849_v32 = vrot.slane %v1848_v38, 2  ;;  %v1842_v47 = vrot.slane %v1841_v55, 1 }
0x1ae0   :  { %v1850_v19 = vadd.f32 %v1849_v32, %v1848_v38  ;;  %v1843_v0 = vadd.f32 %v1842_v47, %v1841_v55 }
0x1ae4   :  { %2112 = vperm.xlu1 %7215, %v8761_v21  }
0x1aec   :  { %2121 = vperm.xlu1 %7215, %v8765_v11  }
0x1af4   :  { %2130 = vperm.xlu1 %7215, %v8769_v1  }
0x1af7   :  { %v8888_v15 = vpop.permute.xlu2 %2103 }
0x1af8   :  { %v2147_v55 = vperm.slane %v8888_v15, %v8273_v9 }
0x1afc   :  { %2139 = vperm.xlu1 %7215, %v8772_v13  }
0x1b10   :  { %v8847_v58 = vpop.permute.xlu0 %2097 }
0x1b11   :  { %v2144_v12 = vperm.slane %v8847_v58, %v8273_v9 }
0x1b18   :  { %v8886_v63 = vpop.permute.xlu0 %2106 }
0x1b20   :  { %v2110_v6 = vpop.permute.xlu0 %2109 }
0x1b21   :  { %v2150_v51 = vperm.slane %v2110_v6, %v8273_v9 }
0x1b28   :  { %v2119_v57 = vpop.permute.xlu0 %2118 }
0x1b30   :  { %v2128_v38 = vpop.permute.xlu0 %2127 }
0x1b31   :  { %v2159_v15 = vperm.slane %v2128_v38, %v8273_v9 }
0x1b3e   :  { %v8883_v16 = vpop.permute.xlu1 %1098 }
0x1b3f   :  { %13347 = vst [vmem:[#allocation19_spill] sm:$0xff] %v8883_v16 }
0x1b46   :  { %v1738_v2 = vpop.permute.xlu1 %1737 }
0x1b47   :  { %v1775_v36 = vmul.f32 %v8900_v33, %v1738_v2  ;;  %v2116_v2 = vpop.permute.xlu2 %2115 }
0x1b49   :  { %v1826_v59 = vsel %vm13099_vm1, %v1775_v36, 0.0  ;;  %v1861_v36 = vsel %vm13096_vm8, %v1798_v35, %v1789_v5  ;;  %v2153_v5 = vperm.slane %v2116_v2, %v8273_v9 }
0x1b4a   :  { %v1828_v16 = vadd.f32 %v1827_v25, %v1826_v59  ;;  %v1851_v25 = vrot.slane %v1850_v19, 1  ;;  %v1862_v33 = vsel %vm13095_vm9, %v1807_v37, %v1861_v36  ;;  %v2154_v37 = vperm.slane %v2119_v57, %v8278_v61 }
0x1b4c   :  { %v1829_v46 = vrot.slane %v1828_v16, 4  ;;  %v1852_v50 = vadd.f32 %v1851_v25, %v1850_v19  ;;  %v2155_v47 = vsel %vm13097_vm7, %v2154_v37, %v2153_v5 }
0x1b4e   :  { %v1830_v44 = vadd.f32 %v1829_v46, %v1828_v16  ;;  %v2101_v49 = vpop.permute.xlu1 %2100  ;;  %v1863_v46 = vsel %vm13094_vm10, %v1816_v10, %v1862_v33  ;;  %v2137_v10 = vpop.permute.xlu0 %2136 }
0x1b4f   :  { %v1864_v32 = vsel %vm13093_vm11, %v1825_v52, %v1863_v46  ;;  %v2125_v18 = vpop.permute.xlu2 %2124  ;;  %v2145_v45 = vperm.slane %v2101_v49, %v8278_v61  ;;  %v2163_v25 = vperm.slane %v2137_v10, %v8278_v61 }
0x1b50   :  { %v1831_v56 = vrot.slane %v1830_v44, 2 }
0x1b52   :  { %v1832_v26 = vadd.f32 %v1831_v56, %v1830_v44  ;;  %v2148_v44 = vperm.slane %v8886_v63, %v8278_v61  ;;  %v2157_v63 = vperm.slane %v2125_v18, %v8278_v61 }
0x1b54   :  { %v1833_v59 = vrot.slane %v1832_v26, 1  ;;  %v2149_v56 = vsel %vm13097_vm7, %v2148_v44, %v2147_v55 }
0x1b56   :  { %v1834_v16 = vadd.f32 %v1833_v59, %v1832_v26  ;;  %v2113_v42 = vpop.permute.xlu1 %2112 }
0x1b57   :  { %v2134_v27 = vpop.permute.xlu2 %2133  ;;  %v2151_v31 = vperm.slane %v2113_v42, %v8278_v61 }
0x1b58   :  { %v1865_v28 = vsel %vm13092_vm12, %v1834_v16, %v1864_v32  ;;  %v2162_v2 = vperm.slane %v2134_v27, %v8273_v9 }
0x1b59   :  { %v1866_v41 = vsel %vm13091_vm13, %v1843_v0, %v1865_v28  ;;  %v2152_v35 = vsel %vm13097_vm7, %v2151_v31, %v2150_v51 }
0x1b5a   :  { %v1867_v43 = vsel %vm13090_vm14, %v1852_v50, %v1866_v41  ;;  %v2164_v50 = vsel %vm13097_vm7, %v2163_v25, %v2162_v2 }
0x1b5b   :  { %1869 = vst.msk [vmem:[#allocation4] sm:$0xff] %vm13099_vm1, %v1867_v43 }
0x1b5c   :  { %1874 = vst.msk [vmem:[#allocation4] sm:$0xff] %vm13088_vm5, %v8537_v34  ;;  %v2146_v34 = vsel %vm13097_vm7, %v2145_v45, %v2144_v12 }
0x1b5d   :  { %v2168_v6 = vsel %vm13096_vm8, %v2149_v56, %v2146_v34 }
0x1b5e   :  { %v2122_v33 = vpop.permute.xlu1 %2121  ;;  %v2169_v26 = vsel %vm13095_vm9, %v2152_v35, %v2168_v6 }
0x1b5f   :  { %v2156_v49 = vperm.slane %v2122_v33, %v8273_v9  ;;  %v2143_v57 = vpop.permute.xlu2 %2142  ;;  %v2170_v59 = vsel %vm13094_vm10, %v2155_v47, %v2169_v26 }
0x1b60   :  { %v2166_v0 = vperm.slane %v2143_v57, %v8278_v61 }
0x1b61   :  { %v2158_v52 = vsel %vm13097_vm7, %v2157_v63, %v2156_v49 }
0x1b62   :  { %v2171_v46 = vsel %vm13093_vm11, %v2158_v52, %v2170_v59 }
0x1b66   :  { %v2131_v19 = vpop.permute.xlu1 %2130 }
0x1b67   :  { %v2160_v58 = vperm.slane %v2131_v19, %v8278_v61 }
0x1b69   :  { %v2161_v36 = vsel %vm13097_vm7, %v2160_v58, %v2159_v15  ;;  %v7643_v15 = vld [vmem:[#allocation3 + $0x8] sm:$0xff] }
0x1b6a   :  { %v2172_v42 = vsel %vm13092_vm12, %v2161_v36, %v2171_v46 }
0x1b6b   :  { %v2173_v28 = vsel %vm13091_vm13, %v2164_v50, %v2172_v42 }
0x1b6e   :  { %v2140_v16 = vpop.permute.xlu1 %2139 }
0x1b6f   :  { %v2165_v32 = vperm.slane %v2140_v16, %v8273_v9 }
0x1b71   :  { %v2167_v18 = vsel %vm13097_vm7, %v2166_v0, %v2165_v32 }
0x1b72   :  { %v2174_v41 = vsel %vm13090_vm14, %v2167_v18, %v2173_v28 }
0x1b73   :  { %v2176_v43 = vsel %vm13089_vm15, %v2174_v41, 0.0 }
0x1b74   :  { %2177 = vadd.xlane.f32.xlu0 %v2176_v43 }
0x1be7   :  { %v2178_v33 = vpop.xlane.xlu0 %2177 }
0x1be8   :  { %7391 = vrcp.f32 %v2178_v33  ;;  %v2190_v31 = vand.u32 2147483648, %v2178_v33  ;;  %v2188_v44 = vand.u32 2147483647, %v2178_v33  ;;  %vm2184_vm2 = vweird.f32 %v2178_v33 }
0x1bea   :  { %v2191_v55 = vor.u32 1.1754944e-38, %v2190_v31  ;;  %vm2189_vm4 = vcmp.eq.f32.partialorder %v2188_v44, 8.507059e+37 }
0x1bee   :  { %v7392_v38 = vpop.eup %7391 }
0x1bef   :  { %v2180_v45 = vmul.f32 %v7392_v38, %v2178_v33  ;;  %vm2185_vm0 = vweird.f32 %v7392_v38 }
0x1bf0   :  { %vm2186_vm3 = vmor %vm2184_vm2, %vm2185_vm0 }
0x1bf1   :  { %v2181_v27 = vsub.f32 1.0, %v2180_v45 }
0x1bf3   :  { %v2182_v12 = vmul.f32 %v7392_v38, %v2181_v27 }
0x1bf5   :  { %v2183_v51 = vadd.f32 %v7392_v38, %v2182_v12 }
0x1bf7   :  { %v2187_v34 = vsel %vm2186_vm3, %v7392_v38, %v2183_v51 }
0x1bf8   :  { %v2192_v35 = vsel %vm2189_vm4, %v2191_v55, %v2187_v34 }
0x1bf9   :  { %v2199_v49 = vperm.slane %v2192_v35, 5  ;;  %v2194_v19 = vperm.slane %v2192_v35, 0  ;;  %v2195_v63 = vperm.slane %v2192_v35, 1  ;;  %v2196_v10 = vperm.slane %v2192_v35, 2 }
0x1bfa   :  { %v2200_v36 = vperm.slane %v2192_v35, 6  ;;  %v2201_v25 = vperm.slane %v2192_v35, 7 }
0x1bfb   :  { %v2221_v56 = vmul.f32 %v8769_v1, %v2199_v49  ;;  %v2211_v37 = vmul.f32 %v8755_v22, %v2194_v19  ;;  %v2210_v58 = vmul.f32 %v8689_v20, %v2194_v19  ;;  %v2213_v6 = vmul.f32 %v8702_v8, %v2195_v63 }
0x1bfc   :  { %v2212_v5 = vmul.f32 %v8685_v54, %v2195_v63  ;;  %v2215_v1 = vmul.f32 %v8761_v21, %v2196_v10  ;;  %v2214_v22 = vmul.f32 %v8714_v4, %v2196_v10  ;;  %v2197_v20 = vperm.slane %v2192_v35, 3  ;;  %v8962_v21 = vld [vmem:[#allocation3 + $0x10] sm:$0xff] }
0x1bfd   :  { %2283 = vperm.xlu0 %7217, %v2221_v56   ;;  %2233 = vperm.xlu2 %7216, %v2211_v37   ;;  %v2198_v54 = vperm.slane %v2192_v35, 4  ;;  %v2421_v4 = vrot.slane %v8962_v21, 1  ;;  %v2222_v57 = vmul.f32 %v8722_v14, %v2200_v36  ;;  %v2223_v46 = vmul.f32 %v8741_v40, %v2200_v36  ;;  %v13349_v35 = vld [vmem:[#allocation12_spill] sm:$0xff] }
0x1bfe   :  { %2228 = vperm.xlu1 %7215, %v2210_v58   ;;  %v2217_v26 = vmul.f32 %v8724_v17, %v2197_v20  ;;  %v2216_v8 = vmul.f32 %v8700_v39, %v2197_v20  ;;  %v2220_v17 = vmul.f32 %v8733_v62, %v2199_v49  ;;  %v2424_v62 = vrot.slane %v8962_v21, 4  ;;  %v13350_v58 = vld [vmem:[#allocation15_spill] sm:$0xff] }
0x1bff   :  { %v2219_v52 = vmul.f32 %v8712_v7, %v2198_v54  ;;  %v2218_v47 = vmul.f32 %v8765_v11, %v2198_v54  ;;  %v2429_v39 = vperm.slane %v2421_v4, 0  ;;  %v2422_v7 = vrot.slane %v8962_v21, 2  ;;  %v13352_v54 = vld [vmem:[#allocation17_spill] sm:$0xff] }
0x1c00   :  { %v2224_v11 = vmul.f32 %v8772_v13, %v2201_v25  ;;  %v2225_v42 = vmul.f32 %v8731_v3, %v2201_v25  ;;  %v2432_v13 = vperm.slane %v2424_v62, 0  ;;  %v2425_v32 = vrot.slane %v8962_v21, 5  ;;  %v13353_v25 = vld [vmem:[#allocation11_spill] sm:$0xff] }
0x1c01   :  { %v2446_v59 = vmul.f32 %v8780_v60, %v2429_v39  ;;  %v8972_v16 = vperm.slane %v2422_v7, 0  ;;  %v2427_v41 = vrot.slane %v8962_v21, 7  ;;  %v2428_v45 = vperm.slane %v8962_v21, 0 }
0x1c02   :  { %v2452_v40 = vmul.f32 %v8818_v24, %v2432_v13  ;;  %v8982_v18 = vperm.slane %v2425_v32, 0  ;;  %v2447_v12 = vmul.f32 %v8792_v23, %v2429_v39  ;;  %v2423_v44 = vrot.slane %v8962_v21, 3 }
0x1c03   :  { %v2466_v2 = vsel %vm13099_vm1, %v2446_v59, 0.0  ;;  %v2449_v14 = vmul.f32 %v8811_v48, %v8972_v16  ;;  %v2435_v43 = vperm.slane %v2427_v41, 0  ;;  %v2444_v27 = vmul.f32 %v8799_v30, %v2428_v45 }
0x1c04   :  { %v2484_v50 = vsel %vm13099_vm1, %v2452_v40, 0.0  ;;  %v2455_v28 = vmul.f32 %v8893_v53, %v8982_v18  ;;  %v2469_v51 = vsel %vm13098_vm6, %v2447_v12, 0.0  ;;  %v8998_v55 = vperm.slane %v2423_v44, 0 }
0x1c05   :  { %2414 = vrot.lane.b32.xlu0 %v7643_v15, %s7755_s10  ;;  %2243 = vperm.xlu2 %7216, %v2213_v6   ;;  %v2475_v0 = vsel %vm13098_vm6, %v2449_v14, 0.0  ;;  %v2458_v33 = vmul.f32 %v8876_v29, %v2435_v43  ;;  %v2460_v31 = vsel %vm13099_vm1, %v2444_v27, 0.0  ;;  %v2453_v63 = vmul.f32 %v13350_v58, %v2432_v13  ;;  %v13355_v13 = vld [vmem:[#allocation14_spill] sm:$0xff] }
0x1c06   :  { %2238 = vperm.xlu1 %7215, %v2212_v5   ;;  %v2493_v3 = vsel %vm13098_vm6, %v2455_v28, 0.0  ;;  %v2450_v49 = vmul.f32 %v13349_v35, %v8998_v55  ;;  %v2426_v6 = vrot.slane %v8962_v21, 6 }
0x1c07   :  { %v2502_v38 = vsel %vm13099_vm1, %v2458_v33, 0.0  ;;  %v2487_v5 = vsel %vm13098_vm6, %v2453_v63, 0.0 }
0x1c08   :  { %v2478_v19 = vsel %vm13099_vm1, %v2450_v49, 0.0  ;;  %v9006_v15 = vperm.slane %v2426_v6, 0 }
0x1c0d   :  { %2253 = vperm.xlu2 %7216, %v2215_v1   ;;  %v13351_v1 = vld [vmem:[#allocation18_spill] sm:$0xff] }
0x1c0e   :  { %2248 = vperm.xlu1 %7215, %v2214_v22   ;;  %v2456_v22 = vmul.f32 %v13351_v1, %v9006_v15 }
0x1c15   :  { %2263 = vperm.xlu2 %7216, %v2217_v26   ;;  %v2496_v26 = vsel %vm13099_vm1, %v2456_v22, 0.0 }
0x1c16   :  { %2258 = vperm.xlu1 %7215, %v2216_v8  }
0x1c1d   :  { %2273 = vperm.xlu2 %7216, %v2219_v52   ;;  %v2459_v52 = vmul.f32 %v13352_v54, %v2435_v43 }
0x1c1e   :  { %2268 = vperm.xlu1 %7215, %v2218_v47  }
0x1c1f   :  { %v2505_v36 = vsel %vm13098_vm6, %v2459_v52, 0.0  ;;  %v13357_v52 = vld [vmem:[#allocation16_spill] sm:$0xff] }
0x1c25   :  { %2288 = vperm.xlu2 %7216, %v2222_v57  }
0x1c26   :  { %2278 = vperm.xlu1 %7215, %v2220_v17  }
0x1c2d   :  { %2298 = vperm.xlu2 %7216, %v2224_v11  }
0x1c2e   :  { %2293 = vperm.xlu1 %7215, %v2223_v46  }
0x1c2f   :  { %2467 = vadd.xlane.f32.xlu0 %v2466_v2 }
0x1c36   :  { %2303 = vperm.xlu1 %7215, %v2225_v42   ;;  %v13354_v42 = vld [vmem:[#allocation13_spill] sm:$0xff] }
0x1c37   :  { %2476 = vadd.xlane.f32.xlu0 %v2475_v0 }
0x1c3f   :  { %2485 = vadd.xlane.f32.xlu0 %v2484_v50 }
0x1c47   :  { %2494 = vadd.xlane.f32.xlu0 %v2493_v3 }
0x1c4f   :  { %2503 = vadd.xlane.f32.xlu0 %v2502_v38 }
0x1c57   :  { %v2234_v34 = vpop.permute.xlu2 %2233 }
0x1c58   :  { %v2307_v0 = vmul.f32 %v13354_v42, %v2234_v34 }
0x1c5a   :  { %v2323_v33 = vsel %vm13098_vm6, %v2307_v0, 0.0 }
0x1c5f   :  { %v2244_v37 = vpop.permute.xlu2 %2243 }
0x1c60   :  { %2461 = vadd.xlane.f32.xlu1 %v2460_v31  ;;  %v2309_v7 = vmul.f32 %v8792_v23, %v2244_v37  ;;  %v13356_v31 = vld [vmem:[#allocation20_spill] sm:$0xff] }
0x1c62   :  { %v2332_v23 = vsel %vm13098_vm6, %v2309_v7, 0.0 }
0x1c67   :  { %v2254_v20 = vpop.permute.xlu2 %2253 }
0x1c68   :  { %2470 = vadd.xlane.f32.xlu1 %v2469_v51  ;;  %v2311_v2 = vmul.f32 %v8811_v48, %v2254_v20 }
0x1c6f   :  { %v2264_v47 = vpop.permute.xlu2 %2263  ;;  %v2284_v14 = vpop.permute.xlu0 %2283 }
0x1c70   :  { %2479 = vadd.xlane.f32.xlu1 %v2478_v19  ;;  %v2229_v56 = vpop.permute.xlu1 %2228  ;;  %v2313_v40 = vmul.f32 %v13355_v13, %v2264_v47 }
0x1c71   :  { %v2306_v11 = vmul.f32 %v8799_v30, %v2229_v56  ;;  %v2317_v30 = vmul.f32 %v8893_v53, %v2284_v14 }
0x1c72   :  { %v2350_v38 = vsel %vm13098_vm6, %v2313_v40, 0.0 }
0x1c73   :  { %v2322_v28 = vsel %vm13099_vm1, %v2306_v11, 0.0 }
0x1c74   :  { %v2324_v44 = vadd.f32 %v2323_v33, %v2322_v28 }
0x1c76   :  { %v2325_v63 = vrot.slane %v2324_v44, 4 }
0x1c77   :  { %v2274_v57 = vpop.permute.xlu2 %2273 }
0x1c78   :  { %2488 = vadd.xlane.f32.xlu1 %v2487_v5  ;;  %v2239_v10 = vpop.permute.xlu1 %2238 }
0x1c79   :  { %v2308_v39 = vmul.f32 %v8780_v60, %v2239_v10  ;;  %v2315_v60 = vmul.f32 %v13350_v58, %v2274_v57 }
0x1c7b   :  { %v2331_v32 = vsel %vm13099_vm1, %v2308_v39, 0.0  ;;  %v2359_v53 = vsel %vm13098_vm6, %v2315_v60, 0.0 }
0x1c7c   :  { %v2333_v41 = vadd.f32 %v2332_v23, %v2331_v32 }
0x1c7e   :  { %v2334_v56 = vrot.slane %v2333_v41, 4 }
0x1c7f   :  { %v2289_v51 = vpop.permute.xlu2 %2288 }
0x1c80   :  { %2497 = vadd.xlane.f32.xlu1 %v2496_v26  ;;  %v2249_v8 = vpop.permute.xlu1 %2248  ;;  %v2318_v5 = vmul.f32 %v13351_v1, %v2289_v51  ;;  %v2335_v22 = vadd.f32 %v2334_v56, %v2333_v41 }
0x1c81   :  { %v2310_v59 = vmul.f32 %v13353_v25, %v2249_v8 }
0x1c82   :  { %v2376_v57 = vsel %vm13099_vm1, %v2318_v5, 0.0 }
0x1c83   :  { %v2340_v50 = vsel %vm13099_vm1, %v2310_v59, 0.0  ;;  %v2336_v59 = vrot.slane %v2335_v22, 2 }
0x1c85   :  { %v2337_v32 = vadd.f32 %v2336_v59, %v2335_v22 }
0x1c87   :  { %v2299_v7 = vpop.permute.xlu2 %2298 }
0x1c88   :  { %2506 = vadd.xlane.f32.xlu1 %v2505_v36  ;;  %v2259_v4 = vpop.permute.xlu1 %2258  ;;  %v2326_v36 = vadd.f32 %v2325_v63, %v2324_v44  ;;  %v2320_v0 = vmul.f32 %v8876_v29, %v2299_v7  ;;  %v13358_v7 = vlaneseq }
0x1c89   :  { %v2312_v46 = vmul.f32 %v13349_v35, %v2259_v4  ;;  %v2368_v35 = vsel %vm13098_vm6, %v2317_v30, 0.0 }
0x1c8a   :  { %v2327_v1 = vrot.slane %v2326_v36, 2 }
0x1c8b   :  { %v2349_v48 = vsel %vm13099_vm1, %v2312_v46, 0.0 }
0x1c8c   :  { %v2351_v34 = vadd.f32 %v2350_v38, %v2349_v48  ;;  %v2328_v48 = vadd.f32 %v2327_v1, %v2326_v36  ;;  %v2338_v38 = vrot.slane %v2337_v32, 1 }
0x1c8e   :  { %v2352_v6 = vrot.slane %v2351_v34, 4 }
0x1c90   :  { %v2269_v17 = vpop.permute.xlu1 %2268  ;;  %v2353_v4 = vadd.f32 %v2352_v6, %v2351_v34 }
0x1c91   :  { %v2314_v62 = vmul.f32 %v8818_v24, %v2269_v17  ;;  %v2341_v24 = vsel %vm13098_vm6, %v2311_v2, 0.0 }
0x1c92   :  { %v2342_v27 = vadd.f32 %v2341_v24, %v2340_v50  ;;  %v2354_v14 = vrot.slane %v2353_v4, 2 }
0x1c93   :  { %v2358_v3 = vsel %vm13099_vm1, %v2314_v62, 0.0 }
0x1c94   :  { %v2360_v49 = vadd.f32 %v2359_v53, %v2358_v3  ;;  %v2343_v58 = vrot.slane %v2342_v27, 4  ;;  %v2355_v24 = vadd.f32 %v2354_v14, %v2353_v4  ;;  %v2385_v3 = vsel %vm13099_vm1, %v2320_v0, 0.0 }
0x1c95   :  { %v2329_v53 = vrot.slane %v2328_v48, 1  ;;  %v2445_v14 = vmul.f32 %v13354_v42, %v2428_v45  ;;  %v13109_v0 = vmov 1.0  }
0x1c96   :  { %v2361_v10 = vrot.slane %v2360_v49, 4  ;;  %v2344_v8 = vadd.f32 %v2343_v58, %v2342_v27  ;;  %v2356_v51 = vrot.slane %v2355_v24, 1 }
0x1c97   :  { %v2330_v58 = vadd.f32 %v2329_v53, %v2328_v48 }
0x1c98   :  { %v2279_v43 = vpop.permute.xlu1 %2278  ;;  %v2362_v17 = vadd.f32 %v2361_v10, %v2360_v49  ;;  %v2345_v2 = vrot.slane %v2344_v8, 2  ;;  %v2339_v49 = vadd.f32 %v2338_v38, %v2337_v32  ;;  %v2357_v63 = vadd.f32 %v2356_v51, %v2355_v24 }
0x1c99   :  { %v2316_v12 = vmul.f32 %v13356_v31, %v2279_v43  ;;  %v2448_v32 = vmul.f32 %v13353_v25, %v8972_v16  ;;  %v2451_v16 = vmul.f32 %v13355_v13, %v8998_v55  ;;  %v13365_v25 = vmov 0 }
0x1c9a   :  { %v2363_v40 = vrot.slane %v2362_v17, 2  ;;  %v2346_v30 = vadd.f32 %v2345_v2, %v2344_v8  ;;  %v2402_v10 = vsel %vm13096_vm8, %v2339_v49, %v2330_v58  ;;  %v13371_v55 = vmov 0  ;;  %v13412_v58 = vld [vmem:[#allocation19_spill] sm:$0xff] }
0x1c9b   :  { %v2367_v19 = vsel %vm13099_vm1, %v2316_v12, 0.0  ;;  %v2472_v45 = vsel %vm13099_vm1, %v2448_v32, 0.0  ;;  %v2481_v13 = vsel %vm13098_vm6, %v2451_v16, 0.0  ;;  %v13382_v38 = vmov 0 }
0x1c9c   :  { %v2369_v37 = vadd.f32 %v2368_v35, %v2367_v19  ;;  %v2364_v43 = vadd.f32 %v2363_v40, %v2362_v17  ;;  %v2347_v29 = vrot.slane %v2346_v30, 1  ;;  %v2463_v40 = vsel %vm13098_vm6, %v2445_v14, 0.0 }
0x1c9d   :  { %v13394_v51 = vmov 0 }
0x1c9e   :  { %v2370_v20 = vrot.slane %v2369_v37, 4  ;;  %v2365_v35 = vrot.slane %v2364_v43, 1  ;;  %v2348_v56 = vadd.f32 %v2347_v29, %v2346_v30  ;;  %v13368_v30 = vmov 0 }
0x1ca0   :  { %v2294_v26 = vpop.permute.xlu1 %2293  ;;  %v2371_v11 = vadd.f32 %v2370_v20, %v2369_v37  ;;  %v2366_v5 = vadd.f32 %v2365_v35, %v2364_v43  ;;  %v2403_v8 = vsel %vm13095_vm9, %v2348_v56, %v2402_v10  ;;  %v13398_v35 = vmov 0 }
0x1ca1   :  { %v2319_v47 = vmul.f32 %v13357_v52, %v2294_v26  ;;  %v2404_v36 = vsel %vm13094_vm10, %v2357_v63, %v2403_v8  ;;  %v13408_v56 = vmov 0 }
0x1ca2   :  { %v2372_v60 = vrot.slane %v2371_v11, 2  ;;  %v2405_v4 = vsel %vm13093_vm11, %v2366_v5, %v2404_v36  ;;  %v13416_v5 = vmov 0 }
0x1ca3   :  { %v2377_v39 = vsel %vm13098_vm6, %v2319_v47, 0.0 }
0x1ca4   :  { %v2378_v46 = vadd.f32 %v2377_v39, %v2376_v57  ;;  %v2373_v27 = vadd.f32 %v2372_v60, %v2371_v11  ;;  %v9054_v11 = vshrl.u32 %v13358_v7, 7 }
0x1ca6   :  { %v2379_v62 = vrot.slane %v2378_v46, 4  ;;  %v2374_v19 = vrot.slane %v2373_v27, 1  ;;  %13359 = vst [vmem:[#allocation12_spill] sm:$0xff] %v9054_v11  ;;  %v5681_v2 = vadd.s32 120, %v9054_v11  ;;  %v5680_v42 = vadd.s32 112, %v9054_v11 }
0x1ca7   :  { %v5679_v60 = vadd.s32 104, %v9054_v11  ;;  %v5676_v48 = vadd.s32 80, %v9054_v11  ;;  %v5675_v24 = vadd.s32 72, %v9054_v11  ;;  %v9129_v43 = vadd.s32 48, %v9054_v11 }
0x1ca8   :  { %v2380_v50 = vadd.f32 %v2379_v62, %v2378_v46  ;;  %v2304_v23 = vpop.permute.xlu1 %2303  ;;  %v2375_v22 = vadd.f32 %v2374_v19, %v2373_v27  ;;  %v9057_v46 = vmul.u32 8, %v8273_v9  ;;  %v13362_v62 = vmov 0 }
0x1ca9   :  { %v2321_v28 = vmul.f32 %v13352_v54, %v2304_v23  ;;  %v5677_v23 = vadd.s32 88, %v9054_v11  ;;  %13378 = vst [vmem:[#allocation21_spill] sm:$0xff] %v9129_v43  ;;  %v9153_v27 = vadd.s32 40, %v9054_v11  ;;  %v9167_v29 = vadd.s32 32, %v9054_v11 }
0x1caa   :  { %v2381_v41 = vrot.slane %v2380_v50, 2  ;;  %v2406_v17 = vsel %vm13092_vm12, %v2375_v22, %v2405_v4  ;;  %13360 = vst [vmem:[#allocation15_spill] sm:$0xff] %v9057_v46  ;;  %v9061_v1 = vadd.s32 8, %v9057_v46  ;;  %vm5746_vm0 = vcmp.ge.s32.totalorder %v5681_v2, %v9057_v46  ;;  %v2415_v22 = vpop.permute.xlu0 %2414 }
0x1cab   :  { %v2386_v33 = vsel %vm13098_vm6, %v2321_v28, 0.0  ;;  %vm5745_vm4 = vcmp.ge.s32.totalorder %v5680_v42, %v9057_v46  ;;  %vm5742_vm11 = vcmp.ge.s32.totalorder %v5677_v23, %v9057_v46  ;;  %v13374_v28 = vmov 0  ;;  %13385 = vst [vmem:[#allocation24_spill] sm:$0xff] %v9153_v27 }
0x1cac   :  { %v2387_v12 = vadd.f32 %v2386_v33, %v2385_v3  ;;  %v2382_v44 = vadd.f32 %v2381_v41, %v2380_v50  ;;  %13361 = vst [vmem:[#allocation18_spill] sm:$0xff] %v9061_v1  ;;  %vm5811_vm2 = vcmp.lt.s32.totalorder %v5681_v2, %v9061_v1  ;;  %v5678_v50 = vadd.s32 96, %v9054_v11 }
0x1cad   :  { %vm9068_vm3 = vmand %vm5746_vm0, %vm5811_vm2  ;;  %vm5810_vm0 = vcmp.lt.s32.totalorder %v5680_v42, %v9061_v1  ;;  %vm5744_vm2 = vcmp.ge.s32.totalorder %v5679_v60, %v9057_v46  ;;  %vm5809_vm15 = vcmp.lt.s32.totalorder %v5679_v60, %v9061_v1  ;;  %v5674_v41 = vadd.s32 64, %v9054_v11  ;;  %13389 = vst [vmem:[#allocation26_spill] sm:$0xff] %v9167_v29 }
0x1cae   :  { %v2388_v34 = vrot.slane %v2387_v12, 4  ;;  %v2383_v37 = vrot.slane %v2382_v44, 1  ;;  %v13363_v62 = vsel %vm9068_vm3, 4294967295, %v13362_v62  ;;  %6960 = vmatpush.msk.msrb.mxu0 %vm9068_vm3, %v13109_v0  ;;  %vm9088_vm5 = vmand %vm5745_vm4, %vm5810_vm0  ;;  %vm5807_vm4 = vcmp.lt.s32.totalorder %v5677_v23, %v9061_v1 }
0x1caf   :  { %13364 = vst [vmem:[#allocation17_spill] sm:$0xff] %v13363_v62  ;;  %v13366_v25 = vsel %vm9088_vm5, 4294967295, %v13365_v25  ;;  %vm9098_vm12 = vmand %vm5744_vm2, %vm5809_vm15  ;;  %v9126_v3 = vadd.s32 56, %v9054_v11  ;;  %vm5805_vm15 = vcmp.lt.s32.totalorder %v5675_v24, %v9061_v1  ;;  %v13379_v33 = vmov 0 }
0x1cb0   :  { %v2389_v54 = vadd.f32 %v2388_v34, %v2387_v12  ;;  %v2384_v26 = vadd.f32 %v2383_v37, %v2382_v44  ;;  %13367 = vst [vmem:[#allocation11_spill] sm:$0xff] %v13366_v25  ;;  %6961 = vmatpush.msk.msrb.mxu0 %vm9088_vm5, %v13109_v0  ;;  %v13369_v30 = vsel %vm9098_vm12, 4294967295, %v13368_v30  ;;  %vm9112_vm10 = vmand %vm5742_vm11, %vm5807_vm4  ;;  %vm5741_vm11 = vcmp.ge.s32.totalorder %v5676_v48, %v9057_v46  ;;  %v13411_v37 = vld [vmem:[#allocation9_spill] sm:$0xff] }
0x1cb1   :  { %13370 = vst [vmem:[#allocation13_spill] sm:$0xff] %v13369_v30  ;;  %v13375_v28 = vsel %vm9112_vm10, 4294967295, %v13374_v28  ;;  %vm5739_vm4 = vcmp.ge.s32.totalorder %v5674_v41, %v9057_v46  ;;  %vm5804_vm9 = vcmp.lt.s32.totalorder %v5674_v41, %v9061_v1  ;;  %vm5738_vm7 = vcmp.ge.s32.totalorder %v9126_v3, %v9057_v46 }
0x1cb2   :  { %v2390_v6 = vrot.slane %v2389_v54, 2  ;;  %v2407_v39 = vsel %vm13091_vm13, %v2384_v26, %v2406_v17  ;;  %vm5808_vm13 = vcmp.lt.s32.totalorder %v5678_v50, %v9061_v1  ;;  %6962 = vmatpush.msk.msrb.mxu0 %vm9098_vm12, %v13109_v0  ;;  %13376 = vst [vmem:[#allocation20_spill] sm:$0xff] %v13375_v28  ;;  %v13386_v12 = vmov 0 }
0x1cb3   :  { %13377 = vst [vmem:[#allocation16_spill] sm:$0xff] %v9126_v3  ;;  %v13390_v44 = vmov 0  ;;  %v9181_v53 = vadd.s32 24, %v9054_v11  ;;  %v9195_v34 = vadd.s32 16, %v9054_v11  ;;  %v9209_v49 = vadd.s32 8, %v9054_v11 }
0x1cb4   :  { %v2391_v20 = vadd.f32 %v2390_v6, %v2389_v54  ;;  %v13402_v19 = vmov 0  ;;  %v13405_v54 = vmov 0  ;;  %v1101_v63 = vmul.f32 %v13412_v58, %v13411_v37 }
0x1cb5   :  { %13393 = vst [vmem:[#allocation28_spill] sm:$0xff] %v9181_v53  ;;  %v13413_v6 = vmov 0  ;;  %v2454_v17 = vmul.f32 %v13356_v31, %v8982_v18  ;;  %v2468_v31 = vpop.xlane.xlu0 %2467 }
0x1cb6   :  { %v2392_v47 = vrot.slane %v2391_v20, 1  ;;  %13397 = vst [vmem:[#allocation30_spill] sm:$0xff] %v9195_v34 }
0x1cb7   :  { %13401 = vst [vmem:[#allocation32_spill] sm:$0xff] %v9209_v49 }
0x1cb8   :  { %v2393_v57 = vadd.f32 %v2392_v47, %v2391_v20 }
0x1cba   :  { %v2408_v59 = vsel %vm13090_vm14, %v2393_v57, %v2407_v39  ;;  %vm5743_vm14 = vcmp.ge.s32.totalorder %v5678_v50, %v9057_v46 }
0x1cbb   :  { %2409 = vrot.lane.b32.xlu2 %v2408_v59, %s7752_s27  ;;  %vm9104_vm0 = vmand %vm5743_vm14, %vm5808_vm13  ;;  %vm5806_vm13 = vcmp.lt.s32.totalorder %v5676_v48, %v9061_v1  ;;  %vm5740_vm14 = vcmp.ge.s32.totalorder %v5675_v24, %v9057_v46  ;;  %v2457_v59 = vmul.f32 %v13357_v52, %v9006_v15 }
0x1cbc   :  { %v13372_v55 = vsel %vm9104_vm0, 4294967295, %v13371_v55  ;;  %6963 = vmatpush.msk.msrb.mxu0 %vm9104_vm0, %v13109_v0  ;;  %vm9135_vm2 = vmand %vm5741_vm11, %vm5806_vm13  ;;  %vm5803_vm11 = vcmp.lt.s32.totalorder %v9126_v3, %v9061_v1 }
0x1cbd   :  { %13373 = vst [vmem:[#allocation14_spill] sm:$0xff] %v13372_v55  ;;  %v13380_v33 = vsel %vm9135_vm2, 4294967295, %v13379_v33  ;;  %vm9144_vm8 = vmand %vm5740_vm14, %vm5805_vm15  ;;  %vm5737_vm14 = vcmp.ge.s32.totalorder %v9129_v43, %v9057_v46  ;;  %vm5802_vm15 = vcmp.lt.s32.totalorder %v9129_v43, %v9061_v1  ;;  %v9276_v60 = vpop.xlane.xlu0 %2476 }
0x1cbe   :  { %6964 = vmatpush.msk.msrb.mxu0 %vm9112_vm10, %v13109_v0  ;;  %13381 = vst [vmem:[#allocation22_spill] sm:$0xff] %v13380_v33  ;;  %v13383_v38 = vsel %vm9144_vm8, 4294967295, %v13382_v38  ;;  %vm9155_vm13 = vmand %vm5739_vm4, %vm5804_vm9  ;;  %vm5736_vm9 = vcmp.ge.s32.totalorder %v9153_v27, %v9057_v46  ;;  %vm5801_vm4 = vcmp.lt.s32.totalorder %v9153_v27, %v9061_v1  ;;  %v2531_v58 = vperm.slane %v9276_v60, %v8278_v61 }
0x1cbf   :  { %13384 = vst [vmem:[#allocation23_spill] sm:$0xff] %v13383_v38  ;;  %v13387_v12 = vsel %vm9155_vm13, 4294967295, %v13386_v12  ;;  %vm9169_vm6 = vmand %vm5738_vm7, %vm5803_vm11  ;;  %vm5735_vm7 = vcmp.ge.s32.totalorder %v9167_v29, %v9057_v46  ;;  %vm5800_vm11 = vcmp.lt.s32.totalorder %v9167_v29, %v9061_v1 }
0x1cc0   :  { %6965 = vmatpush.msk.msrb.mxu0 %vm9135_vm2, %v13109_v0  ;;  %13388 = vst [vmem:[#allocation25_spill] sm:$0xff] %v13387_v12  ;;  %v13391_v44 = vsel %vm9169_vm6, 4294967295, %v13390_v44  ;;  %vm9183_vm1 = vmand %vm5737_vm14, %vm5802_vm15  ;;  %vm5734_vm14 = vcmp.ge.s32.totalorder %v9181_v53, %v9057_v46  ;;  %vm5799_vm15 = vcmp.lt.s32.totalorder %v9181_v53, %v9061_v1  ;;  %vm14035_vm2 = vcmask 1047559  }
0x1cc1   :  { %13392 = vst [vmem:[#allocation27_spill] sm:$0xff] %v13391_v44  ;;  %v13395_v51 = vsel %vm9183_vm1, 4294967295, %v13394_v51 }
0x1cc2   :  { %6966 = vmatpush.msk.msrb.mxu0 %vm9144_vm8, %v13109_v0  ;;  %13396 = vst [vmem:[#allocation29_spill] sm:$0xff] %v13395_v51 }
0x1cc4   :  { %6967 = vmatpush.msk.msrb.mxu0 %vm9155_vm13, %v13109_v0  ;;  %vm9197_vm13 = vmand %vm5736_vm9, %vm5801_vm4  ;;  %vm5733_vm9 = vcmp.ge.s32.totalorder %v9195_v34, %v9057_v46  ;;  %vm5798_vm4 = vcmp.lt.s32.totalorder %v9195_v34, %v9061_v1 }
0x1cc5   :  { %v13399_v35 = vsel %vm9197_vm13, 4294967295, %v13398_v35  ;;  %v9280_v15 = vpop.xlane.xlu0 %2485 }
0x1cc6   :  { %6968 = vmatpush.msk.msrb.mxu0 %vm9169_vm6, %v13109_v0  ;;  %13400 = vst [vmem:[#allocation31_spill] sm:$0xff] %v13399_v35  ;;  %vm9211_vm6 = vmand %vm5735_vm7, %vm5800_vm11  ;;  %vm5732_vm7 = vcmp.ge.s32.totalorder %v9209_v49, %v9057_v46  ;;  %vm5797_vm11 = vcmp.lt.s32.totalorder %v9209_v49, %v9061_v1 }
0x1cc7   :  { %v13403_v19 = vsel %vm9211_vm6, 4294967295, %v13402_v19 }
0x1cc8   :  { %6969 = vmatpush.msk.msrb.mxu0 %vm9183_vm1, %v13109_v0  ;;  %13404 = vst [vmem:[#allocation33_spill] sm:$0xff] %v13403_v19  ;;  %vm9222_vm1 = vmand %vm5734_vm14, %vm5799_vm15  ;;  %vm5731_vm14 = vcmp.ge.s32.totalorder %v9054_v11, %v9057_v46  ;;  %vm5796_vm15 = vcmp.lt.s32.totalorder %v9054_v11, %v9061_v1 }
0x1cc9   :  { %v13406_v54 = vsel %vm9222_vm1, 4294967295, %v13405_v54 }
0x1cca   :  { %6970 = vmatpush.msk.msrb.mxu0 %vm9197_vm13, %v13109_v0  ;;  %13407 = vst [vmem:[#allocation34_spill] sm:$0xff] %v13406_v54  ;;  %vm9233_vm13 = vmand %vm5733_vm9, %vm5798_vm4  ;;  %vm13106_vm4 = vcmask 785920  }
0x1ccb   :  { %v13409_v56 = vsel %vm9233_vm13, 4294967295, %v13408_v56  ;;  %vm9254_vm9 = vmand %vm5731_vm14, %vm5796_vm15  ;;  %vm13420_vm14 = vcmask 254976  }
0x1ccc   :  { %6971 = vmatpush.msk.msrb.mxu0 %vm9211_vm6, %v13109_v0  ;;  %13410 = vst [vmem:[#allocation35_spill] sm:$0xff] %v13409_v56  ;;  %vm9246_vm6 = vmand %vm5732_vm7, %vm5797_vm11  ;;  %v13417_v5 = vsel %vm9254_vm9, 4294967295, %v13416_v5  ;;  %vm13105_vm7 = vcmask 1048320   ;;  %vm13419_vm11 = vcmask 261120   ;;  %v2499_v7 = vsel %vm13420_vm14, %v2457_v59, 0.0 }
0x1ccd   :  { %v13414_v6 = vsel %vm9246_vm6, 4294967295, %v13413_v6  ;;  %13418 = vst [vmem:[#allocation19_spill] sm:$0xff] %v13417_v5  ;;  %v2490_v39 = vsel %vm13419_vm11, %v2454_v17, 0.0  ;;  %vm13421_vm15 = vmmov %vm13419_vm11  ;;  %v9284_v23 = vpop.xlane.xlu0 %2494  ;;  %v2536_v59 = vperm.slane %v9280_v15, %v8273_v9 }
0x1cce   :  { %6972 = vmatpush.msk.msrb.mxu0 %vm9222_vm1, %v13109_v0  ;;  %13415 = vst [vmem:[#allocation9_spill] sm:$0xff] %v13414_v6  ;;  %v2540_v17 = vperm.slane %v9284_v23, %v8278_v61 }
0x1cd0   :  { %6973 = vmatpush.msk.msrb.mxu0 %vm9233_vm13, %v13109_v0 }
0x1cd2   :  { %6974 = vmatpush.msk.msrb.mxu0 %vm9246_vm6, %v13109_v0  ;;  %vm13437_vm6 = vcmask 80896  }
0x1cd4   :  { %6975 = vmatpush.msk.msrb.mxu0 %vm9254_vm9, %v13109_v0  ;;  %vm13435_vm9 = vcmask 1046534  }
0x1ce4   :  { %2464 = vadd.xlane.f32.xlu2 %v2463_v40 }
0x1cec   :  { %2473 = vadd.xlane.f32.xlu2 %v2472_v45  ;;  %v2462_v45 = vpop.xlane.xlu1 %2461 }
0x1ced   :  { %v2524_v48 = vperm.slane %v2462_v45, %v8273_v9 }
0x1cf4   :  { %2482 = vadd.xlane.f32.xlu2 %v2481_v13  ;;  %v2471_v18 = vpop.xlane.xlu1 %2470 }
0x1cf5   :  { %v2528_v24 = vperm.slane %v2471_v18, %v8278_v61 }
0x1cfc   :  { %v2480_v42 = vpop.xlane.xlu1 %2479 }
0x1d04   :  { %v9278_v50 = vpop.xlane.xlu1 %2488 }
0x1d0c   :  { %1103 = vrot.lane.b32.xlu2 %v1101_v63, %s7753_s30  ;;  %v9282_v52 = vpop.xlane.xlu1 %2497  ;;  %v2527_v63 = vperm.slane %v2468_v31, %v8273_v9 }
0x1d15   :  { %v2410_v10 = vpop.permute.xlu2 %2409 }
0x1d16   :  { %2413 = vst.msk [vmem:[#allocation4] sm:$0xff] %vm13106_vm4, %v2410_v10  ;;  %v2533_v10 = vperm.slane %v2480_v42, %v8273_v9  ;;  %vm13427_vm4 = vcmask 1041409  }
0x1d17   :  { %2418 = vst.msk [vmem:[#allocation4] sm:$0xff] %vm13105_vm7, %v2415_v22  ;;  %vm13422_vm7 = vmmov %vm13419_vm11 }
0x1d1e   :  { %v6135_v20 = vld [vmem:[#allocation4] sm:$0xff] }
0x1d1f   :  { %v6139_v26 = vrot.slane %v6135_v20, 4 }
0x1d21   :  { %v6140_v8 = vadd.f32 %v6139_v26, %v6135_v20 }
0x1d23   :  { %v6141_v47 = vrot.slane %v6140_v8, 2 }
0x1d25   :  { %v6142_v36 = vadd.f32 %v6141_v47, %v6140_v8 }
0x1d27   :  { %v6143_v4 = vrot.slane %v6142_v36, 1 }
0x1d29   :  { %v6144_v57 = vadd.f32 %v6143_v4, %v6142_v36  ;;  %v2537_v36 = vperm.slane %v9278_v50, %v8278_v61  ;;  %v9306_v4 = vpop.xlane.xlu1 %2506 }
0x1d2b   :  { %6179 = vmatmul.f32.vlgmr.msrb.gmra.mxu0 %v6144_v57 }
0x1d35   :  { %2491 = vadd.xlane.f32.xlu2 %v2490_v39 }
0x1d3d   :  { %2500 = vadd.xlane.f32.xlu2 %v2499_v7  ;;  %v9314_v7 = vpop.xlane.xlu0 %2503 }
0x1d57   :  { %v2465_v2 = vpop.xlane.xlu2 %2464 }
0x1d58   :  { %v2525_v16 = vperm.slane %v2465_v2, %v8278_v61 }
0x1d5f   :  { %v2474_v14 = vpop.xlane.xlu2 %2473 }
0x1d60   :  { %v2530_v13 = vperm.slane %v2474_v14, %v8273_v9 }
0x1d67   :  { %v9272_v40 = vpop.xlane.xlu2 %2482 }
0x1d68   :  { %v2534_v41 = vperm.slane %v9272_v40, %v8278_v61 }
0x1d6f   :  { %v1104_v32 = vpop.permute.xlu2 %1103 }
0x1d70   :  { %1106 = vst.msk [vmem:[#allocation3 + $0x20] sm:$0xff] %vm13421_vm15, %v1104_v32  ;;  %6954 = vmatmul.msk.f32.vlgmr.msrb.gmra.mxu2 %vm13422_vm7, %v1104_v32  ;;  %vm13423_vm7 = vcmask 130112  }
0x1d71   :  { %v2526_v22 = vsel %vm13423_vm7, %v2525_v16, %v2524_v48  ;;  %vm13424_vm11 = vmmov %vm13423_vm7  ;;  %v2546_v16 = vperm.slane %v9306_v4, %v8278_v61 }
0x1d72   :  { %v2532_v20 = vsel %vm13424_vm11, %v2531_v58, %v2530_v13  ;;  %vm13425_vm14 = vmmov %vm13423_vm7  ;;  %vm13429_vm11 = vcmask 1043459  }
0x1d73   :  { %v2529_v26 = vsel %vm13425_vm14, %v2528_v24, %v2527_v63  ;;  %vm13426_vm15 = vmmov %vm13423_vm7  ;;  %vm13428_vm7 = vcmask 1042434   ;;  %v2545_v63 = vperm.slane %v9314_v7, %v8273_v9 }
0x1d74   :  { %v2535_v8 = vsel %vm13426_vm15, %v2534_v41, %v2533_v10  ;;  %v2548_v57 = vsel %vm13427_vm4, %v2529_v26, %v2526_v22  ;;  %vm13430_vm4 = vmmov %vm13425_vm14  ;;  %v2542_v41 = vperm.slane %v9282_v52, %v8273_v9  ;;  %vm13431_vm15 = vcmask 1044484  }
0x1d75   :  { %v2549_v39 = vsel %vm13428_vm7, %v2532_v20, %v2548_v57  ;;  %v2538_v24 = vsel %vm13430_vm4, %v2537_v36, %v2536_v59  ;;  %vm13432_vm7 = vmmov %vm13430_vm4 }
0x1d76   :  { %v2550_v32 = vsel %vm13429_vm11, %v2535_v8, %v2549_v39  ;;  %vm13433_vm11 = vcmask 1045509  }
0x1d77   :  { %v2551_v10 = vsel %vm13431_vm15, %v2538_v24, %v2550_v32  ;;  %vm13440_vm15 = vmmov %vm13432_vm7 }
0x1da8   :  { %v9292_v37 = vpop.xlane.xlu2 %2491 }
0x1da9   :  { %v2539_v47 = vperm.slane %v9292_v37, %v8273_v9 }
0x1dab   :  { %v2541_v13 = vsel %vm13425_vm14, %v2540_v17, %v2539_v47  ;;  %vm13434_vm14 = vmmov %vm13430_vm4  ;;  %vm13436_vm4 = vcmask 1047559  }
0x1dac   :  { %v2552_v20 = vsel %vm13433_vm11, %v2541_v13, %v2551_v10  ;;  %v2547_v26 = vsel %vm13434_vm14, %v2546_v16, %v2545_v63  ;;  %vm13441_vm11 = vmmov %vm13432_vm7  ;;  %vm13442_vm14 = vcmask 1041409  }
0x1db0   :  { %v9320_v48 = vpop.xlane.xlu2 %2500 }
0x1db1   :  { %v2543_v58 = vperm.slane %v9320_v48, %v8278_v61 }
0x1db3   :  { %v2544_v22 = vsel %vm13432_vm7, %v2543_v58, %v2542_v41 }
0x1db4   :  { %v2553_v8 = vsel %vm13435_vm9, %v2544_v22, %v2552_v20 }
0x1db5   :  { %v2554_v47 = vsel %vm13436_vm4, %v2547_v26, %v2553_v8  ;;  %vm13443_vm4 = vcmask 1042434  }
0x1db6   :  { %v2556_v36 = vsel %vm13437_vm6, %v2554_v47, -inf  ;;  %vm13438_vm6 = vcmask 261120  }
0x1db7   :  { %2557 = vmax.xlane.f32.xlu2 %v2556_v36  ;;  %vm13439_vm9 = vmmov %vm13438_vm6 }
0x1e2a   :  { %v9336_v57 = vpop.xlane.xlu2 %2557 }
0x1e2b   :  { %v2560_v17 = vperm.slane %v9336_v57, 0  ;;  %v2561_v39 = vperm.slane %v9336_v57, 1  ;;  %v2562_v13 = vperm.slane %v9336_v57, 2  ;;  %v2563_v16 = vperm.slane %v9336_v57, 3 }
0x1e2c   :  { %v2564_v8 = vperm.slane %v9336_v57, 4 }
0x1e2d   :  { %v2576_v59 = vsub.f32 %v2462_v45, %v2560_v17  ;;  %v2577_v32 = vsub.f32 %v2465_v2, %v2560_v17  ;;  %v2578_v24 = vsub.f32 %v2468_v31, %v2561_v39  ;;  %v2580_v10 = vsub.f32 %v2474_v14, %v2562_v13 }
0x1e2e   :  { %v2582_v22 = vsub.f32 %v2480_v42, %v2563_v16  ;;  %v2579_v20 = vsub.f32 %v2471_v18, %v2561_v39  ;;  %v2583_v14 = vsub.f32 %v9272_v40, %v2563_v16  ;;  %v2585_v18 = vsub.f32 %v9278_v50, %v2564_v8 }
0x1e2f   :  { %v2592_v41 = vmul.f32 1.442695, %v2576_v59  ;;  %v2594_v58 = vmul.f32 1.442695, %v2577_v32  ;;  %v2596_v63 = vmul.f32 1.442695, %v2578_v24  ;;  %v2581_v42 = vsub.f32 %v9276_v60, %v2562_v13 }
0x1e30   :  { %v2600_v26 = vmul.f32 1.442695, %v2580_v10  ;;  %v2604_v47 = vmul.f32 1.442695, %v2582_v22  ;;  %v2598_v2 = vmul.f32 1.442695, %v2579_v20  ;;  %v2584_v13 = vsub.f32 %v9280_v15, %v2564_v8 }
0x1e31   :  { %7393 = vpow2.f32 %v2596_v63  ;;  %v2565_v17 = vperm.slane %v9336_v57, 5  ;;  %v2606_v39 = vmul.f32 1.442695, %v2583_v14  ;;  %v2566_v59 = vperm.slane %v9336_v57, 6 }
0x1e32   :  { %7395 = vpow2.f32 %v2594_v58  ;;  %v2610_v32 = vmul.f32 1.442695, %v2585_v18  ;;  %v2602_v40 = vmul.f32 1.442695, %v2581_v42  ;;  %v2567_v63 = vperm.slane %v9336_v57, 7 }
0x1e33   :  { %7397 = vpow2.f32 %v2592_v41  ;;  %v2586_v41 = vsub.f32 %v9292_v37, %v2565_v17  ;;  %v2588_v60 = vsub.f32 %v9282_v52, %v2566_v59  ;;  %v2608_v20 = vmul.f32 1.442695, %v2584_v13  ;;  %v747_v13 = vpop.f32.mrf.mxu3 }
0x1e34   :  { %7399 = vpow2.f32 %v2600_v26  ;;  %v2589_v52 = vsub.f32 %v9320_v48, %v2566_v59  ;;  %v2591_v15 = vsub.f32 %v9306_v4, %v2567_v63  ;;  %v2587_v57 = vsub.f32 %v9284_v23, %v2565_v17 }
0x1e35   :  { %7401 = vpow2.f32 %v2604_v47  ;;  %v2612_v58 = vmul.f32 1.442695, %v2586_v41  ;;  %v2616_v10 = vmul.f32 1.442695, %v2588_v60  ;;  %v2590_v23 = vsub.f32 %v9314_v7, %v2567_v63  ;;  %v9406_v7 = vld [vmem:[#allocation3 + $0x18] sm:$0xff] }
0x1e36   :  { %7403 = vpow2.f32 %v2598_v2  ;;  %v2618_v8 = vmul.f32 1.442695, %v2589_v52  ;;  %v2622_v47 = vmul.f32 1.442695, %v2591_v15  ;;  %v2614_v14 = vmul.f32 1.442695, %v2587_v57 }
0x1e37   :  { %v9343_v45 = vpop.eup %7393  ;;  %7405 = vpow2.f32 %v2606_v39  ;;  %v2620_v42 = vmul.f32 1.442695, %v2590_v23 }
0x1e38   :  { %v9345_v31 = vpop.eup %7395  ;;  %2647 = vperm.xlu2 %7216, %v9343_v45   ;;  %7407 = vpow2.f32 %v2610_v32  ;;  %v13111_v32 = vperm.slane %v9406_v7, 0 }
0x1e39   :  { %v9348_v36 = vpop.eup %7397  ;;  %2644 = vperm.xlu1 %7215, %v9345_v31   ;;  %7409 = vpow2.f32 %v2602_v40  ;;  %v9412_v40 = vld [vmem:[%s13055_s3] sm:$0xff] }
0x1e3a   :  { %2641 = vperm.xlu0 %7217, %v9348_v36   ;;  %v9357_v24 = vpop.eup %7399  ;;  %7411 = vpow2.f32 %v2612_v58  ;;  %v2984_v41 = vmul.f32 %v9412_v40, %v13111_v32  ;;  %v7645_v58 = vld [vmem:[%s13065_s13] ss:$0 sm:$0xff] }
0x1e3b   :  { %v9359_v16 = vpop.eup %7401  ;;  %7413 = vpow2.f32 %v2616_v10  ;;  %v748_v63 = vadd.f32 %v7645_v58, %v747_v13  ;;  %v9432_v58 = vld [vmem:[%s13055_s3 + $0x20] sm:$0xff] }
0x1e3c   :  { %v9362_v50 = vpop.eup %7403  ;;  %7415 = vpow2.f32 %v2608_v20  ;;  %v3000_v60 = vsel %vm13438_vm6, %v2984_v41, 0.0  ;;  %v2962_v41 = vrot.slane %v9406_v7, 2  ;;  %vm13444_vm6 = vmmov %vm13432_vm7 }
0x1e3d   :  { %v9370_v22 = vpop.eup %7405  ;;  %7417 = vpow2.f32 %v2618_v8 }
0x1e3e   :  { %v9372_v26 = vpop.eup %7407  ;;  %7419 = vpow2.f32 %v2622_v47  ;;  %v9426_v0 = vperm.slane %v2962_v41, 0 }
0x1e3f   :  { %v9375_v37 = vpop.eup %7409  ;;  %7421 = vpow2.f32 %v2614_v14 }
0x1e40   :  { %2653 = vperm.xlu2 %7216, %v9357_v24   ;;  %v9382_v2 = vpop.eup %7411  ;;  %7423 = vpow2.f32 %v2620_v42 }
0x1e41   :  { %2659 = vperm.xlu1 %7215, %v9359_v16   ;;  %v9384_v18 = vpop.eup %7413 }
0x1e42   :  { %2650 = vperm.xlu0 %7217, %v9362_v50   ;;  %v9387_v48 = vpop.eup %7415 }
0x1e43   :  { %v9392_v4 = vpop.eup %7417 }
0x1e44   :  { %v9394_v17 = vpop.eup %7419 }
0x1e45   :  { %v9397_v39 = vpop.eup %7421 }
0x1e46   :  { %v9401_v59 = vpop.eup %7423 }
0x1e48   :  { %2662 = vperm.xlu2 %7216, %v9370_v22  }
0x1e49   :  { %2668 = vperm.xlu1 %7215, %v9372_v26  }
0x1e4a   :  { %2656 = vperm.xlu0 %7217, %v9375_v37  }
0x1e50   :  { %2671 = vperm.xlu2 %7216, %v9382_v2  }
0x1e51   :  { %2677 = vperm.xlu1 %7215, %v9384_v18  }
0x1e52   :  { %2665 = vperm.xlu0 %7217, %v9387_v48  }
0x1e58   :  { %2680 = vperm.xlu2 %7216, %v9392_v4  }
0x1e59   :  { %2686 = vperm.xlu1 %7215, %v9394_v17  }
0x1e5a   :  { %2674 = vperm.xlu0 %7217, %v9397_v39  }
0x1e61   :  { %2955 = vrot.lane.b32.xlu1 %v8962_v21, %s7753_s30  ;;  %v1127_v21 = vpop.f32.mrf.mxu2 }
0x1e62   :  { %2683 = vperm.xlu0 %7217, %v9401_v59   ;;  %v9421_v10 = vadd.f32 %v1127_v21, %v748_v63  ;;  %v2963_v21 = vrot.slane %v9406_v7, 3  ;;  %v2988_v63 = vmul.f32 %v9432_v58, %v9426_v0 }
0x1e64   :  { %7425 = vtanh.f32 %v9421_v10  ;;  %v9438_v53 = vperm.slane %v2963_v21, 0  ;;  %v3012_v43 = vsel %vm13439_vm9, %v2988_v63, 0.0  ;;  %v2965_v21 = vrot.slane %v9406_v7, 5  ;;  %vm13445_vm9 = vmmov %vm13444_vm6 }
0x1e66   :  { %v9468_v56 = vperm.slane %v2965_v21, 0 }
0x1e6a   :  { %v7426_v20 = vpop.eup %7425 }
0x1e8c   :  { %3001 = vadd.xlane.f32.xlu0 %v3000_v60 }
0x1e92   :  { %v2648_v52 = vpop.permute.xlu2 %2647 }
0x1e93   :  { %v2691_v41 = vperm.slane %v2648_v52, %v8273_v9 }
0x1e9a   :  { %v2654_v8 = vpop.permute.xlu2 %2653 }
0x1e9b   :  { %v2694_v3 = vperm.slane %v2654_v8, %v8273_v9  ;;  %v9455_v8 = vld [vmem:[%s13055_s3 + $0x38] sm:$0x3] }
0x1ea0   :  { %1153 = vrot.lane.b32.xlu0 %v7426_v20, %s7752_s27 }
0x1ea2   :  { %v2663_v42 = vpop.permute.xlu2 %2662 }
0x1eaa   :  { %v2672_v20 = vpop.permute.xlu2 %2671 }
0x1eab   :  { %v2645_v15 = vpop.permute.xlu1 %2644 }
0x1eac   :  { %v2642_v57 = vpop.permute.xlu0 %2641  ;;  %v2689_v29 = vperm.slane %v2645_v15, %v8278_v61 }
0x1ead   :  { %v2688_v27 = vperm.slane %v2642_v57, %v8273_v9 }
0x1eaf   :  { %v2690_v52 = vsel %vm13441_vm11, %v2689_v29, %v2688_v27  ;;  %v2703_v27 = vperm.slane %v2672_v20, %v8273_v9  ;;  %vm13448_vm11 = vcmask 1043459  }
0x1eb3   :  { %v2660_v47 = vpop.permute.xlu1 %2659 }
0x1eb4   :  { %v2651_v14 = vpop.permute.xlu0 %2650  ;;  %v2697_v15 = vperm.slane %v2660_v47, %v8273_v9  ;;  %v2681_v47 = vpop.permute.xlu2 %2680 }
0x1eb5   :  { %v2692_v32 = vperm.slane %v2651_v14, %v8278_v61 }
0x1eb7   :  { %v2693_v5 = vsel %vm13440_vm15, %v2692_v32, %v2691_v41  ;;  %v2698_v32 = vperm.slane %v2663_v42, %v8278_v61  ;;  %vm13446_vm15 = vmmov %vm13444_vm6 }
0x1ebb   :  { %v2669_v60 = vpop.permute.xlu1 %2668 }
0x1ebc   :  { %v2657_v23 = vpop.permute.xlu0 %2656 }
0x1ebd   :  { %v2695_v49 = vperm.slane %v2657_v23, %v8278_v61 }
0x1ebf   :  { %v2696_v14 = vsel %vm13432_vm7, %v2695_v49, %v2694_v3  ;;  %v2712_v3 = vsel %vm13442_vm14, %v2693_v5, %v2690_v52  ;;  %v2701_v49 = vperm.slane %v2669_v60, %v8278_v61  ;;  %vm13447_vm7 = vcmask 254976  }
0x1ec0   :  { %v2713_v29 = vsel %vm13443_vm4, %v2696_v14, %v2712_v3  ;;  %vm13449_vm14 = vcmask 1044484   ;;  %v2707_v14 = vperm.slane %v2681_v47, %v8278_v61  ;;  %vm13450_vm4 = vcmask 1045509  }
0x1ec1   :  { %v2961_v3 = vrot.slane %v9406_v7, 1 }
0x1ec3   :  { %v2678_v34 = vpop.permute.xlu1 %2677 }
0x1ec4   :  { %v2666_v13 = vpop.permute.xlu0 %2665  ;;  %v2706_v5 = vperm.slane %v2678_v34, %v8273_v9  ;;  %v9481_v34 = vld [vmem:[%s13055_s3 + $0x50] sm:$0xff] }
0x1ec5   :  { %v2700_v23 = vperm.slane %v2666_v13, %v8273_v9  ;;  %v2699_v13 = vsel %vm13445_vm9, %v2698_v32, %v2697_v15  ;;  %v2966_v15 = vrot.slane %v9406_v7, 6  ;;  %vm13451_vm9 = vmmov %vm13444_vm6 }
0x1ec6   :  { %v2714_v60 = vsel %vm13448_vm11, %v2699_v13, %v2713_v29  ;;  %vm13454_vm11 = vcmask 261120  }
0x1ec7   :  { %v2974_v13 = vperm.slane %v2966_v15, 0 }
0x1eca   :  { %3013 = vadd.xlane.f32.xlu0 %v3012_v43  ;;  %v2991_v43 = vmul.f32 %v9455_v8, %v9438_v53 }
0x1ecb   :  { %v2687_v42 = vpop.permute.xlu1 %2686 }
0x1ecc   :  { %v2675_v6 = vpop.permute.xlu0 %2674  ;;  %v3021_v41 = vsel %vm13447_vm7, %v2991_v43, 0.0  ;;  %v2994_v43 = vmul.f32 %v9481_v34, %v9468_v56  ;;  %vm13453_vm7 = vcmask 1047559  }
0x1ecd   :  { %v2704_v57 = vperm.slane %v2675_v6, %v8278_v61  ;;  %v2702_v6 = vsel %vm13444_vm6, %v2701_v49, %v2700_v23  ;;  %v2708_v49 = vsel %vm13444_vm6, %v2707_v14, %v2706_v5  ;;  %vm13457_vm6 = vmmov %vm13454_vm11 }
0x1ece   :  { %v2715_v20 = vsel %vm13449_vm14, %v2702_v6, %v2714_v60  ;;  %v3030_v6 = vsel %vm13454_vm11, %v2994_v43, 0.0  ;;  %vm13455_vm14 = vcmask 80896   ;;  %v9501_v60 = vld [vmem:[%s13055_s3 + $0x10] sm:$0xff]  ;;  %vm13461_vm11 = vmmov %vm13457_vm6 }
0x1ecf   :  { %v2705_v63 = vsel %vm13446_vm15, %v2704_v57, %v2703_v27  ;;  %v2710_v57 = vperm.slane %v2687_v42, %v8278_v61  ;;  %vm13452_vm15 = vcmask 1046534  }
0x1ed0   :  { %v2716_v52 = vsel %vm13450_vm4, %v2705_v63, %v2715_v20  ;;  %v2969_v63 = vperm.slane %v2961_v3, 0  ;;  %vm13456_vm4 = vcmask 254976  }
0x1ed1   :  { %v2717_v27 = vsel %vm13452_vm15, %v2708_v49, %v2716_v52  ;;  %v9510_v52 = vld [vmem:[%s13055_s3 + $0x18] sm:$0x3]  ;;  %vm13459_vm15 = vmmov %vm13457_vm6 }
0x1ed2   :  { %3022 = vadd.xlane.f32.xlu0 %v3021_v41  ;;  %v9495_v41 = vld [vmem:[%s13055_s3 + $0x68] sm:$0x3]  ;;  %v2986_v42 = vmul.f32 %v9501_v60, %v2969_v63  ;;  %v2987_v15 = vmul.f32 %v9510_v52, %v2969_v63  ;;  %v9533_v63 = vld [vmem:[%s13055_s3 + $0x60] sm:$0xff] }
0x1ed3   :  { %v2997_v5 = vmul.f32 %v9495_v41, %v2974_v13 }
0x1ed4   :  { %v2684_v23 = vpop.permute.xlu0 %2683  ;;  %v3006_v14 = vsel %vm13457_vm6, %v2986_v42, 0.0 }
0x1ed5   :  { %v2709_v21 = vperm.slane %v2684_v23, %v8273_v9  ;;  %v3039_v20 = vsel %vm13456_vm4, %v2997_v5, 0.0  ;;  %v6955_v23 = vmul.f32 -1.442695, %v9421_v10  ;;  %v2964_v10 = vrot.slane %v9406_v7, 4 }
0x1ed6   :  { %v2996_v5 = vmul.f32 %v9533_v63, %v2974_v13 }
0x1ed7   :  { %v2711_v32 = vsel %vm13451_vm9, %v2710_v57, %v2709_v21  ;;  %7427 = vpow2.f32 %v6955_v23  ;;  %vm13458_vm9 = vmmov %vm13456_vm4  ;;  %v9517_v21 = vld [vmem:[%s13055_s3 + $0x30] sm:$0xff] }
0x1ed8   :  { %v2718_v29 = vsel %vm13453_vm7, %v2711_v32, %v2717_v27  ;;  %v3009_v57 = vsel %vm13458_vm9, %v2987_v15, 0.0  ;;  %v2990_v43 = vmul.f32 %v9517_v21, %v9438_v53  ;;  %v2972_v32 = vperm.slane %v2964_v10, 0  ;;  %vm13460_vm7 = vmmov %vm13456_vm4 }
0x1ed9   :  { %v2720_v47 = vsel %vm13455_vm14, %v2718_v29, 0.0  ;;  %v9526_v29 = vld [vmem:[%s13055_s3 + $0x48] sm:$0x3] }
0x1eda   :  { %3031 = vadd.xlane.f32.xlu0 %v3030_v6  ;;  %2721 = vadd.xlane.f32.xlu2 %v2720_v47  ;;  %v3018_v49 = vsel %vm13459_vm15, %v2990_v43, 0.0  ;;  %v2993_v6 = vmul.f32 %v9526_v29, %v2972_v32  ;;  %vm13463_vm15 = vmmov %vm13460_vm7 }
0x1edc   :  { %v3027_v47 = vsel %vm13460_vm7, %v2993_v6, 0.0 }
0x1edd   :  { %v7428_v3 = vpop.eup %7427 }
0x1ede   :  { %v1134_v27 = vadd.f32 1.0, %v7428_v3 }
0x1ee0   :  { %7429 = vrcp.f32 %v1134_v27  ;;  %v1146_v43 = vand.u32 2147483648, %v1134_v27  ;;  %vm1140_vm4 = vweird.f32 %v1134_v27  ;;  %v1144_v10 = vand.u32 2147483647, %v1134_v27 }
0x1ee2   :  { %3040 = vadd.xlane.f32.xlu0 %v3039_v20  ;;  %3007 = vadd.xlane.f32.xlu2 %v3006_v14  ;;  %v3036_v20 = vsel %vm13461_vm11, %v2996_v5, 0.0  ;;  %vm1145_vm9 = vcmp.eq.f32.partialorder %v1144_v10, 8.507059e+37  ;;  %v9546_v5 = vld [vmem:[%s13055_s3 + $0x8] sm:$0x3] }
0x1ee6   :  { %v7430_v53 = vpop.eup %7429 }
0x1ee7   :  { %v1136_v42 = vmul.f32 %v7430_v53, %v1134_v27  ;;  %vm1141_vm14 = vweird.f32 %v7430_v53 }
0x1ee8   :  { %vm1142_vm6 = vmor %vm1140_vm4, %vm1141_vm14 }
0x1ee9   :  { %v1137_v14 = vsub.f32 1.0, %v1136_v42  ;;  %v13462_v42 = vperm.slane %v9406_v7, 0  ;;  %vm13464_vm14 = vmmov %vm13460_vm7 }
0x1eea   :  { %3010 = vadd.xlane.f32.xlu2 %v3009_v57  ;;  %vm13465_vm4 = vmmov %vm13461_vm11 }
0x1eeb   :  { %v1138_v23 = vmul.f32 %v7430_v53, %v1137_v14  ;;  %v2985_v27 = vmul.f32 %v9546_v5, %v13462_v42 }
0x1eed   :  { %v1139_v57 = vadd.f32 %v7430_v53, %v1138_v23 }
0x1eef   :  { %v1143_v3 = vsel %vm1142_vm6, %v7430_v53, %v1139_v57  ;;  %v3003_v53 = vsel %vm13463_vm15, %v2985_v27, 0.0  ;;  %v9563_v57 = vld [vmem:[%s13055_s3 + $0x40] sm:$0xff]  ;;  %v9579_v27 = vld [vmem:[%s13055_s3 + $0x70] sm:$0xff] }
0x1ef2   :  { %3019 = vadd.xlane.f32.xlu2 %v3018_v49  ;;  %v1147_v49 = vor.u32 1.1754944e-38, %v1146_v43  ;;  %v2992_v43 = vmul.f32 %v9563_v57, %v2972_v32 }
0x1ef4   :  { %v9539_v6 = vsel %vm1145_vm9, %v1147_v49, %v1143_v3  ;;  %v3024_v10 = vsel %vm13461_vm11, %v2992_v43, 0.0  ;;  %v9570_v49 = vld [vmem:[%s13055_s3 + $0x58] sm:$0x3]  ;;  %vm13467_vm11 = vmmov %vm13464_vm14 }
0x1efa   :  { %3028 = vadd.xlane.f32.xlu2 %v3027_v47 }
0x1eff   :  { %v9537_v15 = vpop.xlane.xlu0 %3001 }
0x1f02   :  { %3037 = vadd.xlane.f32.xlu2 %v3036_v20  ;;  %v9555_v20 = vld [vmem:[%s13055_s3 + $0x28] sm:$0x3] }
0x1f03   :  { %v2989_v14 = vmul.f32 %v9555_v20, %v9426_v0  ;;  %v2995_v0 = vmul.f32 %v9570_v49, %v9468_v56 }
0x1f05   :  { %v3015_v23 = vsel %vm13460_vm7, %v2989_v14, 0.0 }
0x1f12   :  { %v1154_v13 = vpop.permute.xlu0 %1153 }
0x1f13   :  { %v1156_v47 = vmul.f32 %v1154_v13, %v9539_v6  ;;  %v2967_v13 = vrot.slane %v9406_v7, 7 }
0x1f15   :  { %1158 = vrot.lane.b32.xlu1 %v1156_v47, %s7753_s30  ;;  %v3033_v47 = vsel %vm13464_vm14, %v2995_v0, 0.0  ;;  %v2975_v42 = vperm.slane %v2967_v13, 0  ;;  %vm13468_vm14 = vcmask 130112  }
0x1f3f   :  { %3004 = vadd.xlane.f32.xlu1 %v3003_v53  ;;  %v2998_v53 = vmul.f32 %v9579_v27, %v2975_v42 }
0x1f47   :  { %3016 = vadd.xlane.f32.xlu1 %v3015_v23  ;;  %v3042_v23 = vsel %vm13465_vm4, %v2998_v53, 0.0  ;;  %vm13469_vm4 = vmmov %vm13468_vm14 }
0x1f4d   :  { %v2722_v3 = vpop.xlane.xlu2 %2721 }
0x1f4e   :  { %7431 = vrcp.f32 %v2722_v3  ;;  %vm2728_vm9 = vweird.f32 %v2722_v3  ;;  %v2732_v0 = vand.u32 2147483647, %v2722_v3 }
0x1f4f   :  { %3025 = vadd.xlane.f32.xlu1 %v3024_v10  ;;  %v2734_v10 = vand.u32 2147483648, %v2722_v3 }
0x1f50   :  { %vm2733_vm7 = vcmp.eq.f32.partialorder %v2732_v0, 8.507059e+37 }
0x1f54   :  { %v7432_v32 = vpop.eup %7431 }
0x1f55   :  { %v2724_v14 = vmul.f32 %v7432_v32, %v2722_v3  ;;  %vm2729_vm6 = vweird.f32 %v7432_v32  ;;  %v9593_v3 = vpop.permute.xlu1 %2955 }
0x1f56   :  { %vm2730_vm15 = vmor %vm2728_vm9, %vm2729_vm6  ;;  %vm13471_vm9 = vcmask 1041409  }
0x1f57   :  { %3034 = vadd.xlane.f32.xlu1 %v3033_v47  ;;  %v2725_v56 = vsub.f32 1.0, %v2724_v14  ;;  %v2735_v47 = vor.u32 1.1754944e-38, %v2734_v10  ;;  %vm13470_vm6 = vmmov %vm13469_vm4 }
0x1f59   :  { %v2726_v43 = vmul.f32 %v7432_v32, %v2725_v56  ;;  %v13466_v56 = vld [vmem:[#allocation10_spill] sm:$0xff] }
0x1f5b   :  { %v2727_v7 = vadd.f32 %v7432_v32, %v2726_v43  ;;  %v1151_v43 = vmul.f32 %v9539_v6, %v13466_v56 }
0x1f5d   :  { %v2731_v13 = vsel %vm2730_vm15, %v7432_v32, %v2727_v7  ;;  %vm13472_vm15 = vcmask 1042434  }
0x1f5e   :  { %v9583_v54 = vsel %vm2733_vm7, %v2735_v47, %v2731_v13  ;;  %vm13473_vm7 = vmmov %vm13469_vm4 }
0x1f5f   :  { %3043 = vadd.xlane.f32.xlu1 %v3042_v23  ;;  %v13131_v19 = vperm.slane %v9583_v54, 0  ;;  %v13130_v14 = vperm.slane %v9583_v54, 1  ;;  %v13129_v32 = vperm.slane %v9583_v54, 2  ;;  %v13127_v47 = vperm.slane %v9583_v54, 4 }
0x1f61   :  { %v2755_v53 = vmul.f32 %v9345_v31, %v13131_v19  ;;  %v2757_v23 = vmul.f32 %v9362_v50, %v13130_v14  ;;  %v2759_v7 = vmul.f32 %v9375_v37, %v13129_v32  ;;  %v13128_v50 = vperm.slane %v9583_v54, 3 }
0x1f62   :  { %v2763_v37 = vmul.f32 %v9372_v26, %v13127_v47  ;;  %v3064_v47 = vperm.slane %v9537_v15, %v8273_v9 }
0x1f63   :  { %v2761_v0 = vmul.f32 %v9370_v22, %v13128_v50  ;;  %v13124_v22 = vperm.slane %v9583_v54, 7 }
0x1f65   :  { %v2768_v56 = vmul.f32 %v9401_v59, %v13124_v22 }
0x1f78   :  { %2777 = vperm.xlu1 %7215, %v2755_v53   ;;  %v13126_v53 = vperm.slane %v9583_v54, 5 }
0x1f80   :  { %2787 = vperm.xlu1 %7215, %v2757_v23   ;;  %v2765_v23 = vmul.f32 %v9397_v39, %v13126_v53  ;;  %v13125_v39 = vperm.slane %v9583_v54, 6 }
0x1f87   :  { %v1159_v31 = vpop.permute.xlu1 %1158 }
0x1f88   :  { %v9601_v10 = vadd.f32 %v1159_v31, %v1151_v43  ;;  %2797 = vperm.xlu1 %7215, %v2759_v7   ;;  %v9624_v43 = vld [vmem:[%s13055_s3 + $0x78] sm:$0x3]  ;;  %v2766_v31 = vmul.f32 %v9384_v18, %v13125_v39 }
0x1f89   :  { %v2999_v26 = vmul.f32 %v9624_v43, %v2975_v42 }
0x1f8a   :  { %7433 = vtanh.f32 %v9601_v10 }
0x1f8b   :  { %v3045_v7 = vsel %vm13467_vm11, %v2999_v26, 0.0  ;;  %vm13474_vm11 = vmmov %vm13469_vm4 }
0x1f90   :  { %v7434_v13 = vpop.eup %7433  ;;  %2807 = vperm.xlu1 %7215, %v2761_v0   ;;  %v9632_v0 = vpop.xlane.xlu2 %3007 }
0x1f91   :  { %1164 = vrot.lane.b32.xlu2 %v7434_v13, %s7752_s27  ;;  %v3067_v14 = vperm.slane %v9632_v0, %v8273_v9 }
0x1f98   :  { %2817 = vperm.xlu1 %7215, %v2763_v37   ;;  %v9634_v59 = vpop.xlane.xlu2 %3010 }
0x1f99   :  { %v3068_v50 = vperm.slane %v9634_v59, %v8278_v61 }
0x1f9b   :  { %v3069_v12 = vsel %vm13470_vm6, %v3068_v50, %v3067_v14  ;;  %vm13477_vm6 = vcmask 1044484  }
0x1fa0   :  { %2827 = vperm.xlu1 %7215, %v2765_v23   ;;  %v9638_v37 = vpop.xlane.xlu2 %3019  ;;  %v9640_v23 = vpop.xlane.xlu0 %3013 }
0x1fa1   :  { %v3070_v32 = vperm.slane %v9640_v23, %v8273_v9  ;;  %v3073_v38 = vperm.slane %v9638_v37, %v8273_v9 }
0x1fa8   :  { %2842 = vperm.xlu1 %7215, %v2768_v56   ;;  %v9644_v56 = vpop.xlane.xlu2 %3028  ;;  %v9646_v26 = vpop.xlane.xlu0 %3022 }
0x1fa9   :  { %v3077_v28 = vperm.slane %v9644_v56, %v8278_v61 }
0x1fb0   :  { %v9650_v18 = vpop.xlane.xlu2 %3037 }
0x1fb1   :  { %v3082_v25 = vperm.slane %v9650_v18, %v8273_v9 }
0x1fb2   :  { %v9636_v13 = vpop.xlane.xlu1 %3004 }
0x1fb3   :  { %v3065_v22 = vperm.slane %v9636_v13, %v8278_v61 }
0x1fb5   :  { %v3066_v19 = vsel %vm13468_vm14, %v3065_v22, %v3064_v47  ;;  %vm13475_vm14 = vmmov %vm13469_vm4 }
0x1fb6   :  { %v3088_v47 = vsel %vm13471_vm9, %v3069_v12, %v3066_v19  ;;  %vm13478_vm9 = vcmask 1045509  }
0x1fba   :  { %3046 = vadd.xlane.f32.xlu2 %v3045_v7  ;;  %v9642_v42 = vpop.xlane.xlu1 %3016 }
0x1fbb   :  { %v3071_v39 = vperm.slane %v9642_v42, %v8278_v61 }
0x1fbd   :  { %v3072_v35 = vsel %vm13469_vm4, %v3071_v39, %v3070_v32  ;;  %v3074_v32 = vperm.slane %v9646_v26, %v8278_v61  ;;  %vm13476_vm4 = vcmask 1043459  }
0x1fbe   :  { %v3089_v39 = vsel %vm13472_vm15, %v3072_v35, %v3088_v47  ;;  %vm13479_vm15 = vmmov %vm13473_vm7 }
0x1fbf   :  { %v3075_v55 = vsel %vm13474_vm11, %v3074_v32, %v3073_v38  ;;  %vm13480_vm11 = vcmask 1046534  }
0x1fc0   :  { %v3090_v19 = vsel %vm13476_vm4, %v3075_v55, %v3089_v39  ;;  %vm13482_vm4 = vcmask 80896  }
0x1fc2   :  { %v9648_v7 = vpop.xlane.xlu1 %3025 }
0x1fc3   :  { %v3076_v51 = vperm.slane %v9648_v7, %v8273_v9 }
0x1fc5   :  { %v3078_v14 = vsel %vm13473_vm7, %v3077_v28, %v3076_v51 }
0x1fc6   :  { %v3091_v62 = vsel %vm13477_vm6, %v3078_v14, %v3090_v19  ;;  %v13483_v14 = vperm.slane %v9583_v54, 0  ;;  %vm13491_vm6 = vcmask 261120  }
0x1fca   :  { %v9658_v53 = vpop.xlane.xlu1 %3034 }
0x1fcb   :  { %v3080_v33 = vperm.slane %v9658_v53, %v8278_v61 }
0x1fd2   :  { %2832 = vperm.xlu2 %7216, %v2766_v31   ;;  %v9652_v31 = vpop.xlane.xlu0 %3031  ;;  %v9694_v12 = vpop.xlane.xlu1 %3043 }
0x1fd3   :  { %v3079_v22 = vperm.slane %v9652_v31, %v8273_v9  ;;  %v3085_v38 = vperm.slane %v9694_v12, %v8273_v9 }
0x1fd5   :  { %v3081_v30 = vsel %vm13475_vm14, %v3080_v33, %v3079_v22  ;;  %vm13481_vm14 = vcmask 1047559  }
0x1fd6   :  { %v3092_v28 = vsel %vm13478_vm9, %v3081_v30, %v3091_v62  ;;  %v2754_v62 = vmul.f32 %v9348_v36, %v13483_v14  ;;  %v13484_v30 = vperm.slane %v9583_v54, 1  ;;  %vm13492_vm9 = vmmov %vm13491_vm6 }
0x1fd8   :  { %v2756_v19 = vmul.f32 %v9343_v45, %v13484_v30 }
0x1fda   :  { %v9688_v50 = vpop.xlane.xlu0 %3040 }
0x1fdb   :  { %v3083_v35 = vperm.slane %v9688_v50, %v8278_v61 }
0x1fdd   :  { %v3084_v51 = vsel %vm13479_vm15, %v3083_v35, %v3082_v25  ;;  %v13485_v25 = vperm.slane %v9583_v54, 2  ;;  %vm13493_vm15 = vcmask 254976  }
0x1fde   :  { %v3093_v55 = vsel %vm13480_vm11, %v3084_v51, %v3092_v28  ;;  %v13486_v28 = vperm.slane %v9583_v54, 3  ;;  %v13488_v51 = vperm.slane %v9583_v54, 5  ;;  %vm13495_vm11 = vmmov %vm13491_vm6 }
0x1fdf   :  { %v2758_v35 = vmul.f32 %v9357_v24, %v13485_v25 }
0x1fe0   :  { %v2764_v45 = vmul.f32 %v9382_v2, %v13488_v51 }
0x1fea   :  { %v9743_v30 = vpop.permute.xlu1 %2777 }
0x1feb   :  { %v9672_v44 = vpop.permute.xlu2 %1164 }
0x202d   :  { %v9700_v47 = vpop.xlane.xlu2 %3046 }
0x202e   :  { %v3086_v33 = vperm.slane %v9700_v47, %v8278_v61 }
0x2030   :  { %v3087_v32 = vsel %vm13473_vm7, %v3086_v33, %v3085_v38  ;;  %v2760_v38 = vmul.f32 %v9359_v16, %v13486_v28  ;;  %v13487_v33 = vperm.slane %v9583_v54, 4  ;;  %vm13494_vm7 = vmmov %vm13491_vm6 }
0x2031   :  { %v3094_v22 = vsel %vm13481_vm14, %v3087_v32, %v3093_v55  ;;  %v13489_v32 = vperm.slane %v9583_v54, 6  ;;  %v13490_v55 = vperm.slane %v9583_v54, 7  ;;  %vm13496_vm14 = vmmov %vm13493_vm15 }
0x2032   :  { %v3096_v39 = vsel %vm13482_vm4, %v3094_v22, -inf  ;;  %v2762_v36 = vmul.f32 %v9387_v48, %v13487_v33  ;;  %v9752_v33 = vpop.permute.xlu1 %2787  ;;  %vm13497_vm4 = vmmov %vm13491_vm6 }
0x2033   :  { %3097 = vmax.xlane.f32.xlu0 %v3096_v39  ;;  %v2767_v24 = vmul.f32 %v9392_v4, %v13489_v32  ;;  %v2769_v16 = vmul.f32 %v9394_v17, %v13490_v55 }
0x2047   :  { %2772 = vperm.xlu0 %7217, %v2754_v62  }
0x204f   :  { %2782 = vperm.xlu0 %7217, %v2756_v19  }
0x2057   :  { %2792 = vperm.xlu0 %7217, %v2758_v35  }
0x205f   :  { %2802 = vperm.xlu0 %7217, %v2760_v38  }
0x2067   :  { %2812 = vperm.xlu0 %7217, %v2762_v36  }
0x206f   :  { %2822 = vperm.xlu0 %7217, %v2764_v45  }
0x2077   :  { %2837 = vperm.xlu0 %7217, %v2767_v24  }
0x207f   :  { %2847 = vperm.xlu0 %7217, %v2769_v16  }
0x20a6   :  { %v9736_v22 = vpop.xlane.xlu0 %3097 }
0x20a7   :  { %v3100_v48 = vperm.slane %v9736_v22, 0  ;;  %v3101_v39 = vperm.slane %v9736_v22, 1  ;;  %v3102_v4 = vperm.slane %v9736_v22, 2  ;;  %v3103_v36 = vperm.slane %v9736_v22, 3 }
0x20a8   :  { %v3105_v24 = vperm.slane %v9736_v22, 5 }
0x20a9   :  { %v3116_v14 = vsub.f32 %v9537_v15, %v3100_v48  ;;  %v3117_v2 = vsub.f32 %v9636_v13, %v3100_v48  ;;  %v3118_v62 = vsub.f32 %v9632_v0, %v3101_v39  ;;  %v3120_v25 = vsub.f32 %v9640_v23, %v3102_v4 }
0x20aa   :  { %v3121_v35 = vsub.f32 %v9642_v42, %v3102_v4  ;;  %v3119_v28 = vsub.f32 %v9634_v59, %v3101_v39  ;;  %v3104_v13 = vperm.slane %v9736_v22, 4  ;;  %v3122_v42 = vsub.f32 %v9638_v37, %v3103_v36 }
0x20ab   :  { %v3132_v54 = vmul.f32 1.442695, %v3116_v14  ;;  %v3134_v19 = vmul.f32 1.442695, %v3117_v2  ;;  %v3136_v17 = vmul.f32 1.442695, %v3118_v62  ;;  %v3123_v2 = vsub.f32 %v9646_v26, %v3103_v36 }
0x20ac   :  { %v3140_v15 = vmul.f32 1.442695, %v3120_v25  ;;  %v3142_v0 = vmul.f32 1.442695, %v3121_v35  ;;  %v3138_v51 = vmul.f32 1.442695, %v3119_v28  ;;  %v3124_v59 = vsub.f32 %v9648_v7, %v3104_v13  ;;  %v2798_v7 = vpop.permute.xlu1 %2797 }
0x20ad   :  { %7435 = vpow2.f32 %v3136_v17  ;;  %v3144_v48 = vmul.f32 1.442695, %v3122_v42  ;;  %v3127_v37 = vsub.f32 %v9658_v53, %v3105_v24  ;;  %v3125_v62 = vsub.f32 %v9644_v56, %v3104_v13 }
0x20ae   :  { %7437 = vpow2.f32 %v3134_v19  ;;  %v3148_v55 = vmul.f32 1.442695, %v3124_v59  ;;  %v1167_v19 = vmul.f32 %v9672_v44, %v9539_v6  ;;  %v3107_v17 = vperm.slane %v9736_v22, 7 }
0x20af   :  { %7439 = vpow2.f32 %v3132_v54  ;;  %v3146_v54 = vmul.f32 1.442695, %v3123_v2  ;;  %v3154_v25 = vmul.f32 1.442695, %v3127_v37  ;;  %v3106_v26 = vperm.slane %v9736_v22, 6 }
0x20b0   :  { %7441 = vpow2.f32 %v3140_v15  ;;  %v3150_v35 = vmul.f32 1.442695, %v3125_v62  ;;  %v3126_v56 = vsub.f32 %v9652_v31, %v3105_v24  ;;  %v3130_v15 = vsub.f32 %v9694_v12, %v3107_v17 }
0x20b1   :  { %7443 = vpow2.f32 %v3142_v0  ;;  %v3128_v6 = vsub.f32 %v9650_v18, %v3106_v26  ;;  %v3129_v12 = vsub.f32 %v9688_v50, %v3106_v26  ;;  %v3131_v18 = vsub.f32 %v9700_v47, %v3107_v17 }
0x20b2   :  { %7445 = vpow2.f32 %v3138_v51  ;;  %v3152_v13 = vmul.f32 1.442695, %v3126_v56  ;;  %v3160_v0 = vmul.f32 1.442695, %v3130_v15 }
0x20b3   :  { %v9750_v38 = vpop.eup %7435  ;;  %7447 = vpow2.f32 %v3148_v55  ;;  %v3156_v51 = vmul.f32 1.442695, %v3128_v6  ;;  %v3158_v55 = vmul.f32 1.442695, %v3129_v12  ;;  %v3162_v2 = vmul.f32 1.442695, %v3131_v18 }
0x20b4   :  { %v9755_v45 = vpop.eup %7437  ;;  %3187 = vperm.xlu0 %7217, %v9750_v38   ;;  %7449 = vpow2.f32 %v3144_v48  ;;  %v2808_v44 = vpop.permute.xlu1 %2807 }
0x20b5   :  { %v9758_v23 = vpop.eup %7439  ;;  %3184 = vperm.xlu2 %7216, %v9755_v45   ;;  %7451 = vpow2.f32 %v3146_v54 }
0x20b6   :  { %3181 = vperm.xlu1 %7215, %v9758_v23   ;;  %v9767_v16 = vpop.eup %7441  ;;  %7453 = vpow2.f32 %v3154_v25 }
0x20b7   :  { %v9769_v39 = vpop.eup %7443  ;;  %7455 = vpow2.f32 %v3150_v35  ;;  %v2855_v35 = vmul.f32 %v9555_v20, %v2798_v7 }
0x20b8   :  { %v9772_v14 = vpop.eup %7445  ;;  %7457 = vpow2.f32 %v3152_v13 }
0x20b9   :  { %v9764_v32 = vpop.permute.xlu0 %2772  ;;  %v9783_v28 = vpop.eup %7447  ;;  %7459 = vpow2.f32 %v3160_v0 }
0x20ba   :  { %v9786_v53 = vpop.eup %7449  ;;  %7461 = vpow2.f32 %v3156_v51  ;;  %v2850_v17 = vmul.f32 %v9412_v40, %v9764_v32 }
0x20bb   :  { %v9793_v36 = vpop.eup %7451  ;;  %7463 = vpow2.f32 %v3158_v55 }
0x20bc   :  { %3193 = vperm.xlu0 %7217, %v9767_v16   ;;  %v9795_v59 = vpop.eup %7453  ;;  %v2818_v24 = vpop.permute.xlu1 %2817  ;;  %7465 = vpow2.f32 %v3162_v2 }
0x20bd   :  { %3196 = vperm.xlu2 %7216, %v9769_v39   ;;  %v9798_v31 = vpop.eup %7455  ;;  %v2859_v40 = vmul.f32 %v9526_v29, %v2818_v24 }
0x20be   :  { %3190 = vperm.xlu1 %7215, %v9772_v14   ;;  %v9804_v48 = vpop.eup %7457 }
0x20bf   :  { %v9806_v37 = vpop.eup %7459 }
0x20c0   :  { %v9809_v50 = vpop.eup %7461 }
0x20c1   :  { %v2783_v4 = vpop.permute.xlu0 %2782  ;;  %v9820_v26 = vpop.eup %7463 }
0x20c2   :  { %v2852_v47 = vmul.f32 %v9501_v60, %v2783_v4  ;;  %v2851_v4 = vmul.f32 %v9546_v5, %v9743_v30 }
0x20c4   :  { %1169 = vrot.lane.b32.xlu0 %v1167_v19, %s7753_s30  ;;  %v2853_v19 = vmul.f32 %v9510_v52, %v9752_v33  ;;  %v2828_v56 = vpop.permute.xlu1 %2827  ;;  %v2875_v6 = vsel %vm13491_vm6, %v2852_v47, 0.0  ;;  %v9829_v33 = vpop.eup %7465  ;;  %vm13498_vm6 = vmmov %vm13496_vm14 }
0x20c5   :  { %3205 = vperm.xlu2 %7216, %v9783_v28   ;;  %v2861_v7 = vmul.f32 %v9570_v49, %v2828_v56  ;;  %v2867_v29 = vsel %vm13498_vm6, %v2851_v4, 0.0  ;;  %vm13499_vm13 = vmmov %vm13498_vm6 }
0x20c6   :  { %3199 = vperm.xlu1 %7215, %v9786_v53   ;;  %v2876_v32 = vsel %vm13493_vm15, %v2853_v19, 0.0  ;;  %vm13501_vm15 = vmmov %vm13498_vm6 }
0x20c7   :  { %v2877_v30 = vadd.f32 %v2876_v32, %v2875_v6  ;;  %v2912_v24 = vsel %vm13501_vm15, %v2861_v7, 0.0  ;;  %vm13509_vm15 = vcmask 1043459  }
0x20c9   :  { %v2793_v22 = vpop.permute.xlu0 %2792  ;;  %v2878_v47 = vrot.slane %v2877_v30, 4 }
0x20ca   :  { %v2854_v54 = vmul.f32 %v9432_v58, %v2793_v22  ;;  %v2857_v58 = vmul.f32 %v9455_v8, %v2808_v44  ;;  %v2866_v22 = vsel %vm13494_vm7, %v2850_v17, 0.0  ;;  %v2885_v8 = vsel %vm13496_vm14, %v2855_v35, 0.0  ;;  %vm13502_vm7 = vmmov %vm13497_vm4 }
0x20cb   :  { %v2868_v18 = vadd.f32 %v2867_v29, %v2866_v22  ;;  %vm13505_vm14 = vmmov %vm13497_vm4 }
0x20cc   :  { %3202 = vperm.xlu0 %7217, %v9793_v36   ;;  %v2894_v0 = vsel %vm13499_vm13, %v2857_v58, 0.0  ;;  %vm13503_vm13 = vmmov %vm13497_vm4 }
0x20cd   :  { %3214 = vperm.xlu2 %7216, %v9795_v59   ;;  %v2869_v17 = vrot.slane %v2868_v18, 4 }
0x20ce   :  { %3208 = vperm.xlu1 %7215, %v9798_v31  }
0x20d1   :  { %v2803_v42 = vpop.permute.xlu0 %2802 }
0x20d2   :  { %v2856_v25 = vmul.f32 %v9517_v21, %v2803_v42  ;;  %v2884_v21 = vsel %vm13492_vm9, %v2854_v54, 0.0  ;;  %vm13500_vm9 = vmmov %vm13498_vm6 }
0x20d3   :  { %v2886_v51 = vadd.f32 %v2885_v8, %v2884_v21  ;;  %v2903_v49 = vsel %vm13500_vm9, %v2859_v40, 0.0  ;;  %v2870_v40 = vadd.f32 %v2869_v17, %v2868_v18  ;;  %vm13508_vm9 = vcmask 1042434  }
0x20d4   :  { %3211 = vperm.xlu0 %7217, %v9804_v48   ;;  %v2893_v5 = vsel %vm13495_vm11, %v2856_v25, 0.0  ;;  %vm13504_vm11 = vmmov %vm13498_vm6 }
0x20d5   :  { %3223 = vperm.xlu2 %7216, %v9806_v37   ;;  %v2895_v42 = vadd.f32 %v2894_v0, %v2893_v5  ;;  %v2887_v19 = vrot.slane %v2886_v51, 4  ;;  %v2843_v5 = vpop.permute.xlu1 %2842 }
0x20d6   :  { %3217 = vperm.xlu1 %7215, %v9809_v50  }
0x20d7   :  { %v2896_v25 = vrot.slane %v2895_v42, 4  ;;  %v2888_v58 = vadd.f32 %v2887_v19, %v2886_v51 }
0x20d9   :  { %v2813_v62 = vpop.permute.xlu0 %2812  ;;  %v2897_v21 = vadd.f32 %v2896_v25, %v2895_v42  ;;  %v2889_v29 = vrot.slane %v2888_v58, 2 }
0x20da   :  { %v2858_v15 = vmul.f32 %v9563_v57, %v2813_v62  ;;  %v2833_v62 = vpop.permute.xlu2 %2832 }
0x20db   :  { %v2862_v35 = vmul.f32 %v9533_v63, %v2833_v62  ;;  %v2871_v63 = vrot.slane %v2870_v40, 2  ;;  %v2898_v0 = vrot.slane %v2897_v21, 2 }
0x20dc   :  { %3220 = vperm.xlu0 %7217, %v9820_v26   ;;  %v2902_v44 = vsel %vm13497_vm4, %v2858_v15, 0.0  ;;  %v2879_v15 = vadd.f32 %v2878_v47, %v2877_v30  ;;  %vm13506_vm4 = vmmov %vm13498_vm6  ;;  %vm13507_vm6 = vcmask 1041409  }
0x20dd   :  { %v2904_v55 = vadd.f32 %v2903_v49, %v2902_v44  ;;  %v2920_v32 = vsel %vm13503_vm13, %v2862_v35, 0.0  ;;  %v2899_v62 = vadd.f32 %v2898_v0, %v2897_v21  ;;  %vm13511_vm13 = vcmask 1045509  }
0x20de   :  { %3226 = vperm.xlu1 %7215, %v9829_v33   ;;  %v2880_v8 = vrot.slane %v2879_v15, 2 }
0x20df   :  { %v2905_v56 = vrot.slane %v2904_v55, 4 }
0x20e0   :  { %v2881_v49 = vadd.f32 %v2880_v8, %v2879_v15 }
0x20e1   :  { %v2823_v13 = vpop.permute.xlu0 %2822  ;;  %v2906_v7 = vadd.f32 %v2905_v56, %v2904_v55 }
0x20e2   :  { %v2860_v12 = vmul.f32 %v9481_v34, %v2823_v13  ;;  %v2882_v25 = vrot.slane %v2881_v49, 1 }
0x20e3   :  { %v2907_v51 = vrot.slane %v2906_v7, 2 }
0x20e4   :  { %v2911_v2 = vsel %vm13502_vm7, %v2860_v12, 0.0  ;;  %v2864_v12 = vmul.f32 %v9579_v27, %v2843_v5  ;;  %vm13510_vm7 = vcmask 1044484  }
0x20e5   :  { %v2913_v54 = vadd.f32 %v2912_v24, %v2911_v2  ;;  %v2890_v24 = vadd.f32 %v2889_v29, %v2888_v58  ;;  %v2872_v2 = vadd.f32 %v2871_v63, %v2870_v40  ;;  %v2908_v19 = vadd.f32 %v2907_v51, %v2906_v7 }
0x20e6   :  { %v2883_v58 = vadd.f32 %v2882_v25, %v2881_v49 }
0x20e7   :  { %v2914_v34 = vrot.slane %v2913_v54, 4  ;;  %v2873_v15 = vrot.slane %v2872_v2, 1 }
0x20e9   :  { %v2838_v4 = vpop.permute.xlu0 %2837  ;;  %v2915_v44 = vadd.f32 %v2914_v34, %v2913_v54  ;;  %v2929_v54 = vsel %vm13505_vm14, %v2864_v12, 0.0  ;;  %v2891_v34 = vrot.slane %v2890_v24, 1  ;;  %v2874_v8 = vadd.f32 %v2873_v15, %v2872_v2 }
0x20ea   :  { %v2863_v6 = vmul.f32 %v9495_v41, %v2838_v4  ;;  %vm13513_vm14 = vcmask 1047559  }
0x20eb   :  { %v2916_v41 = vrot.slane %v2915_v44, 2  ;;  %v2892_v40 = vadd.f32 %v2891_v34, %v2890_v24  ;;  %v2946_v63 = vsel %vm13507_vm6, %v2883_v58, %v2874_v8  ;;  %vm13515_vm6 = vcmask 523520  }
0x20ec   :  { %v2921_v22 = vsel %vm13504_vm11, %v2863_v6, 0.0  ;;  %v2900_v6 = vrot.slane %v2899_v62, 1  ;;  %vm13512_vm11 = vcmask 1046534  }
0x20ed   :  { %v2922_v13 = vadd.f32 %v2921_v22, %v2920_v32  ;;  %v2917_v35 = vadd.f32 %v2916_v41, %v2915_v44  ;;  %v2909_v22 = vrot.slane %v2908_v19, 1 }
0x20ef   :  { %v2923_v30 = vrot.slane %v2922_v13, 4  ;;  %v2918_v5 = vrot.slane %v2917_v35, 1  ;;  %v2910_v7 = vadd.f32 %v2909_v22, %v2908_v19 }
0x20f1   :  { %v2924_v18 = vadd.f32 %v2923_v30, %v2922_v13  ;;  %v2848_v42 = vpop.permute.xlu0 %2847  ;;  %v2901_v13 = vadd.f32 %v2900_v6, %v2899_v62  ;;  %v2919_v0 = vadd.f32 %v2918_v5, %v2917_v35  ;;  %v2947_v30 = vsel %vm13508_vm9, %v2892_v40, %v2946_v63 }
0x20f2   :  { %v2865_v55 = vmul.f32 %v9624_v43, %v2848_v42 }
0x20f3   :  { %v2925_v47 = vrot.slane %v2924_v18, 2  ;;  %v2948_v51 = vsel %vm13509_vm15, %v2901_v13, %v2947_v30 }
0x20f4   :  { %v2930_v17 = vsel %vm13506_vm4, %v2865_v55, 0.0  ;;  %v2949_v49 = vsel %vm13510_vm7, %v2910_v7, %v2948_v51  ;;  %vm13514_vm4 = vcmask 261120   ;;  %vm13518_vm7 = vcmask 130112  }
0x20f5   :  { %v2931_v56 = vadd.f32 %v2930_v17, %v2929_v54  ;;  %v2926_v4 = vadd.f32 %v2925_v47, %v2924_v18  ;;  %v2950_v42 = vsel %vm13511_vm13, %v2919_v0, %v2949_v49  ;;  %vm13516_vm9 = vmmov %vm13514_vm4 }
0x20f6   :  { %vm13517_vm15 = vmmov %vm13514_vm4 }
0x20f7   :  { %v2932_v32 = vrot.slane %v2931_v56, 4  ;;  %v2927_v21 = vrot.slane %v2926_v4, 1  ;;  %vm13519_vm13 = vmmov %vm13518_vm7 }
0x20f9   :  { %v2933_v43 = vadd.f32 %v2932_v32, %v2931_v56  ;;  %v2928_v12 = vadd.f32 %v2927_v21, %v2926_v4 }
0x20fb   :  { %v2934_v29 = vrot.slane %v2933_v43, 2  ;;  %v2951_v24 = vsel %vm13512_vm11, %v2928_v12, %v2950_v42  ;;  %vm13520_vm11 = vcmask 1041409  }
0x20fd   :  { %v2935_v44 = vadd.f32 %v2934_v29, %v2933_v43 }
0x20ff   :  { %v2936_v41 = vrot.slane %v2935_v44, 1 }
0x2101   :  { %v2937_v18 = vadd.f32 %v2936_v41, %v2935_v44 }
0x2103   :  { %v2952_v55 = vsel %vm13513_vm14, %v2937_v18, %v2951_v24  ;;  %vm13521_vm14 = vmmov %vm13518_vm7 }
0x2104   :  { %2954 = vst.msk [vmem:[#allocation4 + $0x8] sm:$0xff] %vm13514_vm4, %v2952_v55  ;;  %vm13522_vm4 = vmmov %vm13518_vm7 }
0x2105   :  { %2958 = vst.msk [vmem:[#allocation4 + $0x8] sm:$0xff] %vm13515_vm6, %v9593_v3  ;;  %vm13523_vm6 = vcmask 1042434  }
0x210f   :  { %v3185_v2 = vpop.permute.xlu2 %3184 }
0x2110   :  { %v3229_v58 = vperm.slane %v3185_v2, %v8278_v61 }
0x2117   :  { %v3197_v19 = vpop.permute.xlu2 %3196 }
0x2118   :  { %v3235_v21 = vperm.slane %v3197_v19, %v8278_v61 }
0x211f   :  { %v3206_v56 = vpop.permute.xlu2 %3205 }
0x2120   :  { %v3240_v12 = vperm.slane %v3206_v56, %v8273_v9 }
0x2126   :  { %v3188_v62 = vpop.permute.xlu0 %3187 }
0x2127   :  { %v3215_v6 = vpop.permute.xlu2 %3214  ;;  %v3231_v32 = vperm.slane %v3188_v62, %v8273_v9 }
0x2128   :  { %v3182_v47 = vpop.permute.xlu1 %3181  ;;  %v3244_v51 = vperm.slane %v3215_v6, %v8278_v61 }
0x2129   :  { %v3228_v3 = vperm.slane %v3182_v47, %v8273_v9 }
0x212b   :  { %v3230_v8 = vsel %vm13519_vm13, %v3229_v58, %v3228_v3  ;;  %vm13527_vm13 = vcmask 1044484  }
0x212e   :  { %v3194_v54 = vpop.permute.xlu0 %3193 }
0x212f   :  { %v3234_v22 = vperm.slane %v3194_v54, %v8273_v9  ;;  %v3224_v42 = vpop.permute.xlu2 %3223 }
0x2130   :  { %v3191_v17 = vpop.permute.xlu1 %3190  ;;  %v3249_v19 = vperm.slane %v3224_v42, %v8273_v9 }
0x2131   :  { %v3232_v15 = vperm.slane %v3191_v17, %v8278_v61  ;;  %v3236_v63 = vsel %vm13521_vm14, %v3235_v21, %v3234_v22  ;;  %vm13529_vm14 = vcmask 1045509  }
0x2133   :  { %v3233_v5 = vsel %vm13518_vm7, %v3232_v15, %v3231_v32  ;;  %vm13526_vm7 = vmmov %vm13522_vm4 }
0x2134   :  { %v3252_v7 = vsel %vm13520_vm11, %v3233_v5, %v3230_v8  ;;  %vm13528_vm11 = vmmov %vm13522_vm4 }
0x2135   :  { %v3253_v41 = vsel %vm13523_vm6, %v3236_v63, %v3252_v7  ;;  %vm13531_vm6 = vmmov %vm13526_vm7 }
0x2136   :  { %v1170_v25 = vpop.permute.xlu0 %1169 }
0x2137   :  { %1172 = vst.msk [vmem:[#allocation3 + $0x28] sm:$0xff] %vm13516_vm9, %v1170_v25  ;;  %6956 = vmatmul.msk.f32.vlgmr.msrb.gmra.mxu1 %vm13517_vm15, %v1170_v25  ;;  %vm13524_vm9 = vmmov %vm13522_vm4  ;;  %vm13525_vm15 = vcmask 1043459  }
0x2138   :  { %v3200_v35 = vpop.permute.xlu1 %3199 }
0x2139   :  { %v3237_v13 = vperm.slane %v3200_v35, %v8273_v9 }
0x213e   :  { %v3203_v34 = vpop.permute.xlu0 %3202 }
0x213f   :  { %v3238_v43 = vperm.slane %v3203_v34, %v8278_v61 }
0x2140   :  { %v3209_v4 = vpop.permute.xlu1 %3208 }
0x2141   :  { %v3241_v0 = vperm.slane %v3209_v4, %v8278_v61  ;;  %v3239_v44 = vsel %vm13522_vm4, %v3238_v43, %v3237_v13  ;;  %vm13530_vm4 = vcmask 1046534  }
0x2142   :  { %v3254_v18 = vsel %vm13525_vm15, %v3239_v44, %v3253_v41  ;;  %vm13533_vm15 = vcmask 80896   ;;  %v7661_v41 = vld [vmem:[#allocation3 + $0x18] sm:$0xff] }
0x2143   :  { %v3242_v49 = vsel %vm13524_vm9, %v3241_v0, %v3240_v12  ;;  %vm13532_vm9 = vcmask 1047559  }
0x2144   :  { %v3255_v54 = vsel %vm13527_vm13, %v3242_v49, %v3254_v18 }
0x2146   :  { %v3212_v40 = vpop.permute.xlu0 %3211 }
0x2147   :  { %v3243_v30 = vperm.slane %v3212_v40, %v8273_v9 }
0x2148   :  { %v3218_v29 = vpop.permute.xlu1 %3217 }
0x2149   :  { %v3245_v24 = vsel %vm13526_vm7, %v3244_v51, %v3243_v30  ;;  %v3246_v2 = vperm.slane %v3218_v29, %v8273_v9 }
0x214a   :  { %v3256_v35 = vsel %vm13529_vm14, %v3245_v24, %v3255_v54 }
0x214e   :  { %v3221_v55 = vpop.permute.xlu0 %3220 }
0x214f   :  { %v3247_v62 = vperm.slane %v3221_v55, %v8278_v61 }
0x2150   :  { %v3227_v47 = vpop.permute.xlu1 %3226 }
0x2151   :  { %v3250_v17 = vperm.slane %v3227_v47, %v8278_v61  ;;  %v3248_v25 = vsel %vm13528_vm11, %v3247_v62, %v3246_v2  ;;  %v750_v62 = vpop.f32.mrf.mxu3 }
0x2152   :  { %v3257_v56 = vsel %vm13530_vm4, %v3248_v25, %v3256_v35  ;;  %vm13534_vm4 = vcmask 261120  }
0x2153   :  { %v3251_v34 = vsel %vm13531_vm6, %v3250_v17, %v3249_v19  ;;  %vm13535_vm6 = vcmask 254976  }
0x2154   :  { %v3258_v4 = vsel %vm13532_vm9, %v3251_v34, %v3257_v56  ;;  %vm13536_vm9 = vmmov %vm13534_vm4 }
0x2155   :  { %v3260_v15 = vsel %vm13533_vm15, %v3258_v4, 0.0  ;;  %vm13537_vm15 = vmmov %vm13534_vm4 }
0x2156   :  { %3261 = vadd.xlane.f32.xlu0 %v3260_v15 }
0x21b4   :  { %v1193_v47 = vpop.f32.mrf.mxu1 }
0x21c9   :  { %v3262_v6 = vpop.xlane.xlu0 %3261 }
0x21ca   :  { %7467 = vrcp.f32 %v3262_v6  ;;  %v3274_v58 = vand.u32 2147483648, %v3262_v6  ;;  %v3272_v43 = vand.u32 2147483647, %v3262_v6  ;;  %vm3268_vm13 = vweird.f32 %v3262_v6 }
0x21cc   :  { %v3275_v21 = vor.u32 1.1754944e-38, %v3274_v58  ;;  %vm3273_vm14 = vcmp.eq.f32.partialorder %v3272_v43, 8.507059e+37 }
0x21d0   :  { %v7468_v3 = vpop.eup %7467 }
0x21d1   :  { %v3264_v32 = vmul.f32 %v7468_v3, %v3262_v6  ;;  %vm3269_vm7 = vweird.f32 %v7468_v3 }
0x21d2   :  { %vm3270_vm11 = vmor %vm3268_vm13, %vm3269_vm7 }
0x21d3   :  { %v3265_v22 = vsub.f32 1.0, %v3264_v32  ;;  %vm13538_vm7 = vmmov %vm13535_vm6 }
0x21d4   :  { %vm13539_vm13 = vmmov %vm13534_vm4 }
0x21d5   :  { %v3266_v5 = vmul.f32 %v7468_v3, %v3265_v22 }
0x21d7   :  { %v3267_v40 = vadd.f32 %v7468_v3, %v3266_v5 }
0x21d9   :  { %v3271_v8 = vsel %vm3270_vm11, %v7468_v3, %v3267_v40  ;;  %v9935_v3 = vld [vmem:[#allocation3 + $0x28] sm:$0xff]  ;;  %vm13540_vm11 = vmmov %vm13534_vm4 }
0x21da   :  { %v3276_v13 = vsel %vm3273_vm14, %v3275_v21, %v3271_v8  ;;  %v4043_v58 = vrot.slane %v9935_v3, 1  ;;  %v4045_v21 = vrot.slane %v9935_v3, 3  ;;  %vm13541_vm14 = vmmov %vm13534_vm4 }
0x21db   :  { %v3283_v29 = vperm.slane %v3276_v13, 5  ;;  %v3278_v7 = vperm.slane %v3276_v13, 0  ;;  %v3279_v30 = vperm.slane %v3276_v13, 1  ;;  %v3280_v49 = vperm.slane %v3276_v13, 2 }
0x21dc   :  { %v3284_v55 = vperm.slane %v3276_v13, 6  ;;  %v3285_v54 = vperm.slane %v3276_v13, 7  ;;  %v9947_v43 = vperm.slane %v4043_v58, 0  ;;  %v10026_v58 = vld [vmem:[%s13055_s3 + $0x28] sm:$0x3] }
0x21dd   :  { %v3304_v63 = vmul.f32 %v9804_v48, %v3283_v29  ;;  %v3295_v0 = vmul.f32 %v9755_v45, %v3278_v7  ;;  %v3294_v44 = vmul.f32 %v9758_v23, %v3278_v7  ;;  %v3297_v12 = vmul.f32 %v9772_v14, %v3279_v30 }
0x21de   :  { %v3296_v51 = vmul.f32 %v9750_v38, %v3279_v30  ;;  %v3299_v48 = vmul.f32 %v9769_v39, %v3280_v49  ;;  %v3298_v45 = vmul.f32 %v9767_v16, %v3280_v49  ;;  %v3281_v23 = vperm.slane %v3276_v13, 3  ;;  %v9910_v39 = vld [vmem:[#allocation3 + $0x20] sm:$0xff] }
0x21df   :  { %3362 = vperm.xlu0 %7217, %v3304_v63   ;;  %3317 = vperm.xlu1 %7215, %v3295_v0   ;;  %v3282_v38 = vperm.slane %v3276_v13, 4  ;;  %v3503_v16 = vrot.slane %v9910_v39, 1  ;;  %v3306_v2 = vmul.f32 %v9809_v50, %v3284_v55  ;;  %v3504_v25 = vrot.slane %v9910_v39, 2 }
0x21e0   :  { %3312 = vperm.xlu2 %7216, %v3294_v44   ;;  %v3301_v18 = vmul.f32 %v9793_v36, %v3281_v23  ;;  %v3300_v42 = vmul.f32 %v9786_v53, %v3281_v23  ;;  %v3305_v36 = vmul.f32 %v9795_v59, %v3283_v29  ;;  %v3308_v50 = vmul.f32 %v9806_v37, %v3285_v54  ;;  %v9958_v29 = vld [vmem:[%s13055_s3 + $0x30] sm:$0xff] }
0x21e1   :  { %v3303_v14 = vmul.f32 %v9798_v31, %v3282_v38  ;;  %v3302_v24 = vmul.f32 %v9783_v28, %v3282_v38  ;;  %v3511_v53 = vperm.slane %v3503_v16, 0  ;;  %v7662_v28 = vld [vmem:[%s13065_s13] ss:$0 sm:$0xff]  ;;  %v3307_v59 = vmul.f32 %v9820_v26, %v3284_v55 }
0x21e2   :  { %v751_v31 = vadd.f32 %v7662_v28, %v750_v62  ;;  %v9926_v56 = vperm.slane %v3504_v25, 0  ;;  %v3309_v15 = vmul.f32 %v9829_v33, %v3285_v54  ;;  %v9942_v33 = vld [vmem:[%s13055_s3] sm:$0xff]  ;;  %v4069_v40 = vmul.f32 %v9510_v52, %v9947_v43 }
0x21e3   :  { %v3528_v17 = vmul.f32 %v9501_v60, %v3511_v53  ;;  %v3506_v60 = vrot.slane %v9910_v39, 4  ;;  %v9953_v13 = vperm.slane %v4045_v21, 0  ;;  %v4046_v63 = vrot.slane %v9935_v3, 4 }
0x21e4   :  { %v9918_v19 = vadd.f32 %v1193_v47, %v751_v31  ;;  %v3531_v34 = vmul.f32 %v9555_v20, %v9926_v56  ;;  %v4050_v20 = vperm.slane %v9935_v3, 0  ;;  %v4091_v8 = vsel %vm13538_vm7, %v4069_v40, 0.0 }
0x21e5   :  { %v3548_v35 = vsel %vm13534_vm4, %v3528_v17, 0.0  ;;  %v3514_v26 = vperm.slane %v3506_v60, 0  ;;  %v4072_v7 = vmul.f32 %v9958_v29, %v9953_v13  ;;  %v3510_v52 = vperm.slane %v9910_v39, 0  ;;  %vm13542_vm4 = vmmov %vm13535_vm6  ;;  %v7667_v17 = vld [vmem:[%s13055_s3 + $0x48] sm:$0x3] }
0x21e6   :  { %7469 = vtanh.f32 %v9918_v19  ;;  %v3557_v37 = vsel %vm13535_vm6, %v3531_v34, 0.0  ;;  %v4066_v22 = vmul.f32 %v9942_v33, %v4050_v20  ;;  %v9965_v44 = vperm.slane %v4046_v63, 0  ;;  %vm13543_vm6 = vmmov %vm13542_vm4 }
0x21e7   :  { %3497 = vrot.lane.b32.xlu0 %v7661_v41, %s7755_s10  ;;  %3327 = vperm.xlu1 %7215, %v3297_v12   ;;  %v3534_v6 = vmul.f32 %v9563_v57, %v3514_v26  ;;  %v4100_v0 = vsel %vm13539_vm13, %v4072_v7, 0.0  ;;  %v3526_v12 = vmul.f32 %v9942_v33, %v3510_v52  ;;  %v4048_v41 = vrot.slane %v9935_v3, 6  ;;  %vm13545_vm7 = vmmov %vm13542_vm4 }
0x21e8   :  { %3322 = vperm.xlu2 %7216, %v3296_v51   ;;  %v4082_v5 = vsel %vm13537_vm15, %v4066_v22, 0.0  ;;  %v4074_v51 = vmul.f32 %v9563_v57, %v9965_v44  ;;  %v9983_v57 = vld [vmem:[%s13055_s3 + $0x68] sm:$0x3]  ;;  %vm13544_vm15 = vmmov %vm13536_vm9  ;;  %v3535_v25 = vmul.f32 %v7667_v17, %v3514_v26  ;;  %v4044_v60 = vrot.slane %v9935_v3, 2 }
0x21e9   :  { %v3566_v32 = vsel %vm13536_vm9, %v3534_v6, 0.0  ;;  %v3542_v49 = vsel %vm13540_vm11, %v3526_v12, 0.0  ;;  %vm13546_vm13 = vmmov %vm13542_vm4  ;;  %v10018_v6 = vld [vmem:[%s13055_s3 + $0x20] sm:$0xff] }
0x21ea   :  { %vm13547_vm11 = vmmov %vm13536_vm9 }
0x21ec   :  { %v7470_v4 = vpop.eup %7469 }
0x21ef   :  { %3337 = vperm.xlu1 %7215, %v3299_v48   ;;  %v4106_v48 = vsel %vm13541_vm14, %v4074_v51, 0.0  ;;  %vm13548_vm14 = vmmov %vm13542_vm4 }
0x21f0   :  { %3332 = vperm.xlu2 %7216, %v3298_v45   ;;  %v9975_v45 = vperm.slane %v4048_v41, 0 }
0x21f2   :  { %v4079_v38 = vmul.f32 %v9983_v57, %v9975_v45 }
0x21f4   :  { %v4121_v16 = vsel %vm13543_vm6, %v4079_v38, 0.0  ;;  %vm13549_vm6 = vmmov %vm13536_vm9 }
0x21f5   :  { %vm13555_vm1 = vmmov %vm13549_vm6 }
0x21f7   :  { %3347 = vperm.xlu1 %7215, %v3301_v18   ;;  %v7665_v18 = vld [vmem:[%s13055_s3 + $0x18] sm:$0x3] }
0x21f8   :  { %3342 = vperm.xlu2 %7216, %v3300_v42   ;;  %v3529_v42 = vmul.f32 %v7665_v18, %v3511_v53 }
0x21fa   :  { %v3551_v55 = vsel %vm13542_vm4, %v3529_v42, 0.0 }
0x21ff   :  { %3357 = vperm.xlu1 %7215, %v3303_v14   ;;  %v3505_v14 = vrot.slane %v9910_v39, 3 }
0x2200   :  { %3352 = vperm.xlu2 %7216, %v3302_v24   ;;  %v4049_v24 = vrot.slane %v9935_v3, 7 }
0x2207   :  { %3372 = vperm.xlu1 %7215, %v3306_v2   ;;  %v9991_v2 = vperm.slane %v3505_v14, 0 }
0x2208   :  { %3367 = vperm.xlu2 %7216, %v3305_v36   ;;  %v9993_v36 = vperm.slane %v4049_v24, 0 }
0x2209   :  { %v3532_v53 = vmul.f32 %v9958_v29, %v9991_v2 }
0x220a   :  { %v4080_v47 = vmul.f32 %v9579_v27, %v9993_v36  ;;  %v10008_v27 = vld [vmem:[%s13055_s3 + $0x8] sm:$0x3] }
0x220b   :  { %v3560_v54 = vsel %vm13536_vm9, %v3532_v53, 0.0  ;;  %v4067_v34 = vmul.f32 %v10008_v27, %v4050_v20  ;;  %vm13550_vm9 = vmmov %vm13542_vm4 }
0x220c   :  { %v4124_v28 = vsel %vm13544_vm15, %v4080_v47, 0.0  ;;  %vm13551_vm15 = vmmov %vm13542_vm4  ;;  %v10062_v47 = vld [vmem:[%s13055_s3 + $0x58] sm:$0x3] }
0x220f   :  { %3382 = vperm.xlu1 %7215, %v3308_v50  }
0x2210   :  { %3377 = vperm.xlu2 %7216, %v3307_v59   ;;  %v3569_v59 = vsel %vm13545_vm7, %v3535_v25, 0.0  ;;  %vm13552_vm7 = vmmov %vm13549_vm6 }
0x2211   :  { %3549 = vadd.xlane.f32.xlu0 %v3548_v35 }
0x2217   :  { %1219 = vrot.lane.b32.xlu1 %v7470_v4, %s7752_s27 }
0x2218   :  { %3387 = vperm.xlu2 %7216, %v3309_v15   ;;  %v4085_v15 = vsel %vm13546_vm13, %v4067_v34, 0.0  ;;  %vm13553_vm13 = vmmov %vm13549_vm6 }
0x2219   :  { %3558 = vadd.xlane.f32.xlu0 %v3557_v37  ;;  %v10013_v37 = vperm.slane %v4044_v60, 0 }
0x2221   :  { %3567 = vadd.xlane.f32.xlu0 %v3566_v32  ;;  %v4070_v32 = vmul.f32 %v10018_v6, %v10013_v37 }
0x2223   :  { %v4094_v20 = vsel %vm13547_vm11, %v4070_v32, 0.0  ;;  %vm13554_vm11 = vmmov %vm13542_vm4 }
0x2229   :  { %4083 = vadd.xlane.f32.xlu0 %v4082_v5 }
0x2231   :  { %4092 = vadd.xlane.f32.xlu0 %v4091_v8  ;;  %v10032_v8 = vld [vmem:[%s13055_s3 + $0x10] sm:$0xff] }
0x2239   :  { %4101 = vadd.xlane.f32.xlu0 %v4100_v0  ;;  %v10039_v0 = vld [vmem:[%s13055_s3 + $0x38] sm:$0x3] }
0x223a   :  { %v3313_v30 = vpop.permute.xlu2 %3312 }
0x223b   :  { %v3390_v51 = vmul.f32 %v9942_v33, %v3313_v30 }
0x223d   :  { %v3406_v24 = vsel %vm13552_vm7, %v3390_v51, 0.0  ;;  %vm13560_vm7 = vmmov %vm13555_vm1 }
0x2241   :  { %3543 = vadd.xlane.f32.xlu2 %v3542_v49  ;;  %4107 = vadd.xlane.f32.xlu0 %v4106_v48  ;;  %v4073_v49 = vmul.f32 %v10039_v0, %v9953_v13 }
0x2242   :  { %v3323_v23 = vpop.permute.xlu2 %3322 }
0x2243   :  { %v3392_v7 = vmul.f32 %v10032_v8, %v3323_v23  ;;  %v4103_v13 = vsel %vm13554_vm11, %v4073_v49, 0.0  ;;  %vm13562_vm11 = vmmov %vm13542_vm4 }
0x2245   :  { %v3415_v42 = vsel %vm13549_vm6, %v3392_v7, 0.0  ;;  %vm13557_vm6 = vmmov %vm13555_vm1 }
0x2249   :  { %3552 = vadd.xlane.f32.xlu2 %v3551_v55  ;;  %4122 = vadd.xlane.f32.xlu0 %v4121_v16  ;;  %v7673_v16 = vld [vmem:[%s13055_s3 + $0x40] sm:$0xff] }
0x224a   :  { %v3333_v62 = vpop.permute.xlu2 %3332 }
0x224b   :  { %v3394_v41 = vmul.f32 %v10018_v6, %v3333_v62 }
0x224d   :  { %v3424_v33 = vsel %vm13553_vm13, %v3394_v41, 0.0  ;;  %vm13561_vm13 = vmmov %vm13555_vm1 }
0x2251   :  { %3561 = vadd.xlane.f32.xlu2 %v3560_v54  ;;  %4125 = vadd.xlane.f32.xlu0 %v4124_v28  ;;  %v3318_v31 = vpop.permute.xlu1 %3317  ;;  %v3363_v30 = vpop.permute.xlu0 %3362  ;;  %v6957_v28 = vmul.f32 -1.442695, %v9918_v19 }
0x2252   :  { %v3343_v50 = vpop.permute.xlu2 %3342  ;;  %v3391_v63 = vmul.f32 %v10008_v27, %v3318_v31 }
0x2253   :  { %v3396_v48 = vmul.f32 %v9958_v29, %v3343_v50  ;;  %7471 = vpow2.f32 %v6957_v28 }
0x2254   :  { %v3407_v38 = vsel %vm13550_vm9, %v3391_v63, 0.0  ;;  %vm13558_vm9 = vmmov %vm13542_vm4 }
0x2255   :  { %v3433_v29 = vsel %vm13555_vm1, %v3396_v48, 0.0  ;;  %v3408_v31 = vadd.f32 %v3407_v38, %v3406_v24 }
0x2259   :  { %3570 = vadd.xlane.f32.xlu2 %v3569_v59  ;;  %v3328_v35 = vpop.permute.xlu1 %3327  ;;  %v10069_v59 = vld [vmem:[%s13055_s3 + $0x50] sm:$0xff] }
0x225a   :  { %v3353_v4 = vpop.permute.xlu2 %3352  ;;  %v3393_v22 = vmul.f32 %v7665_v18, %v3328_v35  ;;  %v3400_v35 = vmul.f32 %v10069_v59, %v3363_v30 }
0x225b   :  { %v3398_v62 = vmul.f32 %v7673_v16, %v3353_v4 }
0x225c   :  { %v3416_v23 = vsel %vm13548_vm14, %v3393_v22, 0.0  ;;  %vm13556_vm14 = vmmov %vm13542_vm4  ;;  %v3451_v7 = vsel %vm13557_vm6, %v3400_v35, 0.0  ;;  %vm13565_vm6 = vcmask 1042434  }
0x225d   :  { %v3417_v55 = vadd.f32 %v3416_v23, %v3415_v42  ;;  %v3442_v19 = vsel %vm13555_vm1, %v3398_v62, 0.0  ;;  %v10085_v42 = vld [vmem:[%s13055_s3 + $0x60] sm:$0xff] }
0x225f   :  { %v3418_v60 = vrot.slane %v3417_v55, 4 }
0x2261   :  { %4086 = vadd.xlane.f32.xlu2 %v4085_v15  ;;  %v3338_v26 = vpop.permute.xlu1 %3337  ;;  %v4075_v15 = vmul.f32 %v7667_v17, %v9965_v44  ;;  %v3419_v63 = vadd.f32 %v3418_v60, %v3417_v55  ;;  %v10097_v60 = vld [vmem:[%s13055_s3 + $0x78] sm:$0x3] }
0x2262   :  { %v3395_v5 = vmul.f32 %v10026_v58, %v3338_v26  ;;  %v3368_v40 = vpop.permute.xlu2 %3367  ;;  %v4047_v26 = vrot.slane %v9935_v3, 5 }
0x2263   :  { %v3401_v54 = vmul.f32 %v10062_v47, %v3368_v40  ;;  %v4109_v3 = vsel %vm13558_vm9, %v4075_v15, 0.0  ;;  %v3420_v24 = vrot.slane %v3419_v63, 2  ;;  %vm13566_vm9 = vcmask 1043459  }
0x2264   :  { %v3425_v18 = vsel %vm13542_vm4, %v3395_v5, 0.0  ;;  %v3409_v5 = vrot.slane %v3408_v31, 4 }
0x2265   :  { %v3426_v53 = vadd.f32 %v3425_v18, %v3424_v33  ;;  %v3452_v22 = vsel %vm13556_vm14, %v3401_v54, 0.0  ;;  %vm13563_vm14 = vmmov %vm13542_vm4 }
0x2266   :  { %v3410_v49 = vadd.f32 %v3409_v5, %v3408_v31  ;;  %v10105_v5 = vld [vmem:[%s13055_s3 + $0x70] sm:$0xff] }
0x2267   :  { %v3427_v32 = vrot.slane %v3426_v53, 4 }
0x2268   :  { %v3411_v16 = vrot.slane %v3410_v49, 2 }
0x2269   :  { %4095 = vadd.xlane.f32.xlu2 %v4094_v20  ;;  %v3348_v21 = vpop.permute.xlu1 %3347  ;;  %v3428_v41 = vadd.f32 %v3427_v32, %v3426_v53 }
0x226a   :  { %v3397_v12 = vmul.f32 %v10039_v0, %v3348_v21  ;;  %v3378_v4 = vpop.permute.xlu2 %3377 }
0x226b   :  { %v3403_v44 = vmul.f32 %v9983_v57, %v3378_v4  ;;  %v3429_v30 = vrot.slane %v3428_v41, 2 }
0x226c   :  { %v3434_v14 = vsel %vm13551_vm15, %v3397_v12, 0.0  ;;  %v3453_v12 = vadd.f32 %v3452_v22, %v3451_v7  ;;  %vm13559_vm15 = vmmov %vm13542_vm4 }
0x226d   :  { %v3435_v25 = vadd.f32 %v3434_v14, %v3433_v29  ;;  %v7472_v14 = vpop.eup %7471  ;;  %v3461_v55 = vsel %vm13559_vm15, %v3403_v44, 0.0  ;;  %v4081_v44 = vmul.f32 %v10097_v60, %v9993_v36  ;;  %vm13567_vm15 = vcmask 1044484  }
0x226e   :  { %v3454_v33 = vrot.slane %v3453_v12, 4  ;;  %v10092_v28 = vadd.f32 1.0, %v7472_v14 }
0x226f   :  { %v3436_v40 = vrot.slane %v3435_v25, 4 }
0x2270   :  { %7473 = vrcp.f32 %v10092_v28 }
0x2271   :  { %4104 = vadd.xlane.f32.xlu2 %v4103_v13  ;;  %v3358_v50 = vpop.permute.xlu1 %3357  ;;  %v3437_v48 = vadd.f32 %v3436_v40, %v3435_v25  ;;  %v3421_v25 = vadd.f32 %v3420_v24, %v3419_v63 }
0x2272   :  { %v3399_v34 = vmul.f32 %v7667_v17, %v3358_v50  ;;  %v10080_v17 = vperm.slane %v4047_v26, 0  ;;  %v3388_v53 = vpop.permute.xlu2 %3387  ;;  %v3455_v50 = vadd.f32 %v3454_v33, %v3453_v12  ;;  %v3412_v26 = vadd.f32 %v3411_v16, %v3410_v49 }
0x2273   :  { %v3438_v62 = vrot.slane %v3437_v48, 2  ;;  %v3405_v4 = vmul.f32 %v10097_v60, %v3388_v53 }
0x2274   :  { %v3443_v20 = vsel %vm13542_vm4, %v3399_v34, 0.0  ;;  %v4076_v29 = vmul.f32 %v10069_v59, %v10080_v17  ;;  %v3430_v34 = vadd.f32 %v3429_v30, %v3428_v41  ;;  %v3456_v7 = vrot.slane %v3455_v50, 2 }
0x2275   :  { %v3444_v21 = vadd.f32 %v3443_v20, %v3442_v19  ;;  %v3439_v19 = vadd.f32 %v3438_v62, %v3437_v48  ;;  %vm13564_vm4 = vcmask 1041409  }
0x2276   :  { %v4112_v15 = vsel %vm13561_vm13, %v4076_v29, 0.0  ;;  %v3431_v12 = vrot.slane %v3430_v34, 1  ;;  %v3457_v14 = vadd.f32 %v3456_v7, %v3455_v50  ;;  %v7474_v33 = vpop.eup %7473  ;;  %vm13569_vm13 = vcmask 1046534  }
0x2277   :  { %v3445_v51 = vrot.slane %v3444_v21, 4  ;;  %v3440_v49 = vrot.slane %v3439_v19, 1 }
0x2278   :  { %v3432_v30 = vadd.f32 %v3431_v12, %v3430_v34  ;;  %v1212_v12 = vand.u32 2147483648, %v10092_v28 }
0x2279   :  { %4110 = vadd.xlane.f32.xlu2 %v4109_v3  ;;  %v3373_v23 = vpop.permute.xlu1 %3372  ;;  %v3446_v18 = vadd.f32 %v3445_v51, %v3444_v21  ;;  %v3422_v21 = vrot.slane %v3421_v25, 1  ;;  %v3470_v51 = vsel %vm13562_vm11, %v3405_v4, 0.0  ;;  %v3413_v3 = vrot.slane %v3412_v26, 1 }
0x227a   :  { %v3402_v38 = vmul.f32 %v10085_v42, %v3373_v23  ;;  %v3441_v29 = vadd.f32 %v3440_v49, %v3439_v19  ;;  %vm13570_vm11 = vcmask 1047559  }
0x227b   :  { %v3447_v31 = vrot.slane %v3446_v18, 2 }
0x227c   :  { %v3460_v13 = vsel %vm13560_vm7, %v3402_v38, 0.0  ;;  %v3423_v38 = vadd.f32 %v3422_v21, %v3421_v25  ;;  %vm13568_vm7 = vcmask 1045509  }
0x227d   :  { %v3462_v54 = vadd.f32 %v3461_v55, %v3460_v13  ;;  %v3448_v20 = vadd.f32 %v3447_v31, %v3446_v18  ;;  %v4127_v55 = vsel %vm13563_vm14, %v4081_v44, 0.0  ;;  %v3414_v13 = vadd.f32 %v3413_v3, %v3412_v26 }
0x227e   :  { %vm1206_vm14 = vweird.f32 %v10092_v28  ;;  %v1213_v44 = vor.u32 1.1754944e-38, %v1212_v12  ;;  %v13601_v12 = vmov 0 }
0x227f   :  { %v3463_v35 = vrot.slane %v3462_v54, 4  ;;  %v3449_v23 = vrot.slane %v3448_v20, 1  ;;  %v3486_v36 = vsel %vm13564_vm4, %v3423_v38, %v3414_v13 }
0x2280   :  { %v3487_v25 = vsel %vm13565_vm6, %v3432_v30, %v3486_v36 }
0x2281   :  { %v3464_v32 = vadd.f32 %v3463_v35, %v3462_v54  ;;  %4113 = vadd.xlane.f32.xlu2 %v4112_v15  ;;  %v3383_v22 = vpop.permute.xlu1 %3382  ;;  %v3450_v62 = vadd.f32 %v3449_v23, %v3448_v20  ;;  %v3458_v54 = vrot.slane %v3457_v14, 1  ;;  %v1202_v35 = vmul.f32 %v7474_v33, %v10092_v28 }
0x2282   :  { %v3404_v40 = vmul.f32 %v10105_v5, %v3383_v22  ;;  %v3488_v4 = vsel %vm13566_vm9, %v3441_v29, %v3487_v25  ;;  %vm13571_vm9 = vcmask 254976   ;;  %v3507_v29 = vrot.slane %v9910_v39, 5 }
0x2283   :  { %v3465_v63 = vrot.slane %v3464_v32, 2  ;;  %v3489_v15 = vsel %vm13567_vm15, %v3450_v62, %v3488_v4  ;;  %v3459_v26 = vadd.f32 %v3458_v54, %v3457_v14  ;;  %v1203_v19 = vsub.f32 1.0, %v1202_v35 }
0x2284   :  { %v3469_v41 = vsel %vm13555_vm1, %v3404_v40, 0.0  ;;  %vm1207_vm1 = vweird.f32 %v7474_v33  ;;  %v3509_v14 = vrot.slane %v9910_v39, 7  ;;  %vm13572_vm15 = vcmask 261120  }
0x2285   :  { %v3471_v48 = vadd.f32 %v3470_v51, %v3469_v41  ;;  %v3466_v18 = vadd.f32 %v3465_v63, %v3464_v32  ;;  %v3490_v20 = vsel %vm13568_vm7, %v3459_v26, %v3489_v15  ;;  %v1204_v21 = vmul.f32 %v7474_v33, %v1203_v19  ;;  %vm1208_vm4 = vmor %vm1206_vm14, %vm1207_vm1 }
0x2286   :  { %v1210_v51 = vand.u32 2147483647, %v10092_v28  ;;  %vm13573_vm7 = vmmov %vm13571_vm9  ;;  %v5697_v54 = vadd.s32 248, %v9054_v11  ;;  %v5695_v35 = vadd.s32 232, %v9054_v11  ;;  %v13580_v25 = vmov 1.0  }
0x2287   :  { %v3472_v24 = vrot.slane %v3471_v48, 4  ;;  %v3467_v53 = vrot.slane %v3466_v18, 1  ;;  %v1205_v63 = vadd.f32 %v7474_v33, %v1204_v21  ;;  %v13584_v4 = vmov 0 }
0x2288   :  { %vm1211_vm6 = vcmp.eq.f32.partialorder %v1210_v51, 8.507059e+37  ;;  %vm5762_vm14 = vcmp.ge.s32.totalorder %v5697_v54, %v9057_v46  ;;  %v5693_v15 = vadd.s32 216, %v9054_v11  ;;  %v5692_v26 = vadd.s32 208, %v9054_v11 }
0x2289   :  { %v3473_v16 = vadd.f32 %v3472_v24, %v3471_v48  ;;  %4128 = vadd.xlane.f32.xlu2 %v4127_v55  ;;  %v3468_v34 = vadd.f32 %v3467_v53, %v3466_v18  ;;  %v1209_v41 = vsel %vm1208_vm4, %v7474_v33, %v1205_v63  ;;  %v1220_v3 = vpop.permute.xlu1 %1219  ;;  %v3527_v18 = vmul.f32 %v10008_v27, %v3510_v52 }
0x228a   :  { %v10125_v49 = vsel %vm1211_vm6, %v1213_v44, %v1209_v41  ;;  %v3530_v24 = vmul.f32 %v10018_v6, %v9926_v56  ;;  %v10140_v33 = vperm.slane %v3509_v14, 0  ;;  %v3533_v27 = vmul.f32 %v10039_v0, %v9991_v2 }
0x228b   :  { %v3474_v31 = vrot.slane %v3473_v16, 2  ;;  %v3491_v40 = vsel %vm13569_vm13, %v3468_v34, %v3490_v20  ;;  %v1222_v48 = vmul.f32 %v1220_v3, %v10125_v49  ;;  %v3545_v28 = vsel %vm13571_vm9, %v3527_v18, 0.0  ;;  %vm13574_vm13 = vmmov %vm13573_vm7 }
0x228c   :  { %v3554_v55 = vsel %vm13572_vm15, %v3530_v24, 0.0  ;;  %v3541_v13 = vmul.f32 %v10097_v60, %v10140_v33  ;;  %v3563_v56 = vsel %vm13574_vm13, %v3533_v27, 0.0  ;;  %v10154_v6 = vperm.slane %v3507_v29, 0 }
0x228d   :  { %v3475_v50 = vadd.f32 %v3474_v31, %v3473_v16  ;;  %v4068_v2 = vmul.f32 %v10032_v8, %v9947_v43  ;;  %v5696_v31 = vadd.s32 240, %v9054_v11  ;;  %vm5827_vm4 = vcmp.lt.s32.totalorder %v5697_v54, %v9061_v1 }
0x228e   :  { %v3587_v52 = vsel %vm13573_vm7, %v3541_v13, 0.0  ;;  %v3536_v62 = vmul.f32 %v10069_v59, %v10154_v6  ;;  %v5694_v59 = vadd.s32 224, %v9054_v11  ;;  %v13577_v43 = vmov 0 }
0x228f   :  { %v3476_v32 = vrot.slane %v3475_v50, 1  ;;  %vm5761_vm6 = vcmp.ge.s32.totalorder %v5696_v31, %v9057_v46  ;;  %vm5826_vm9 = vcmp.lt.s32.totalorder %v5696_v31, %v9061_v1  ;;  %vm5760_vm7 = vcmp.ge.s32.totalorder %v5695_v35, %v9057_v46 }
0x2290   :  { %vm5825_vm13 = vcmp.lt.s32.totalorder %v5695_v35, %v9061_v1  ;;  %v4071_v8 = vmul.f32 %v10026_v58, %v10013_v37  ;;  %v13587_v58 = vmov 0  ;;  %v5691_v19 = vadd.s32 200, %v9054_v11 }
0x2291   :  { %v3477_v22 = vadd.f32 %v3476_v32, %v3475_v50  ;;  %v13581_v50 = vmov 0  ;;  %v5690_v32 = vadd.s32 192, %v9054_v11  ;;  %v5689_v20 = vadd.s32 184, %v9054_v11 }
0x2292   :  { %v5688_v51 = vadd.s32 176, %v9054_v11  ;;  %v5687_v41 = vadd.s32 168, %v9054_v11  ;;  %v5686_v44 = vadd.s32 160, %v9054_v11  ;;  %v13604_v3 = vmov 0 }
0x2293   :  { %v3492_v7 = vsel %vm13570_vm11, %v3477_v22, %v3491_v40  ;;  %vm13575_vm11 = vmmov %vm13572_vm15  ;;  %v4077_v22 = vmul.f32 %v10062_v47, %v10080_v17  ;;  %v13591_v40 = vmov 0  ;;  %v13594_v17 = vmov 0 }
0x2294   :  { %3493 = vrot.lane.b32.xlu1 %v3492_v7, %s7752_s27  ;;  %v3572_v53 = vsel %vm13575_vm11, %v3536_v62, 0.0  ;;  %vm13576_vm1 = vmmov %vm13575_vm11  ;;  %v13597_v7 = vmov 0  ;;  %v5685_v18 = vadd.s32 152, %v9054_v11  ;;  %v13610_v24 = vmov 0 }
0x2295   :  { %v4088_v36 = vsel %vm13576_vm1, %v4068_v2, 0.0  ;;  %vm10174_vm15 = vmand %vm5762_vm14, %vm5827_vm4  ;;  %vm5759_vm1 = vcmp.ge.s32.totalorder %v5694_v59, %v9057_v46  ;;  %vm5824_vm14 = vcmp.lt.s32.totalorder %v5694_v59, %v9061_v1  ;;  %v5683_v13 = vadd.s32 136, %v9054_v11  ;;  %v3498_v59 = vpop.permute.xlu0 %3497 }
0x2296   :  { %v13578_v43 = vsel %vm10174_vm15, 4294967295, %v13577_v43  ;;  %6976 = vmatpush.msk.msra.mxu1 %vm10174_vm15, %v13580_v25  ;;  %vm10185_vm11 = vmand %vm5761_vm6, %vm5826_vm9  ;;  %vm13590_vm6 = vcmask 254976   ;;  %vm5758_vm9 = vcmp.ge.s32.totalorder %v5693_v15, %v9057_v46  ;;  %vm13600_vm15 = vcmask 254976  }
0x2297   :  { %13579 = vst [vmem:[#allocation10_spill] sm:$0xff] %v13578_v43  ;;  %v13582_v50 = vsel %vm10185_vm11, 4294967295, %v13581_v50  ;;  %vm10191_vm4 = vmand %vm5760_vm7, %vm5825_vm13  ;;  %v4097_v34 = vsel %vm13590_vm6, %v4071_v8, 0.0  ;;  %vm5823_vm7 = vcmp.lt.s32.totalorder %v5693_v15, %v9061_v1  ;;  %vm5756_vm6 = vcmp.ge.s32.totalorder %v5691_v19, %v9057_v46 }
0x2298   :  { %13583 = vst [vmem:[#allocation36_spill] sm:$0xff] %v13582_v50  ;;  %v13585_v4 = vsel %vm10191_vm4, 4294967295, %v13584_v4  ;;  %6977 = vmatpush.msk.msra.mxu1 %vm10185_vm11, %v13580_v25  ;;  %vm10200_vm8 = vmand %vm5759_vm1, %vm5824_vm14  ;;  %vm5757_vm1 = vcmp.ge.s32.totalorder %v5692_v26, %v9057_v46  ;;  %vm5822_vm14 = vcmp.lt.s32.totalorder %v5692_v26, %v9061_v1  ;;  %v4115_v63 = vsel %vm13600_vm15, %v4077_v22, 0.0 }
0x2299   :  { %13586 = vst [vmem:[#allocation37_spill] sm:$0xff] %v13585_v4  ;;  %v13588_v58 = vsel %vm10200_vm8, 4294967295, %v13587_v58  ;;  %vm10220_vm13 = vmand %vm5758_vm9, %vm5823_vm7  ;;  %vm5755_vm9 = vcmp.ge.s32.totalorder %v5690_v32, %v9057_v46  ;;  %vm5820_vm7 = vcmp.lt.s32.totalorder %v5690_v32, %v9061_v1  ;;  %vm5753_vm15 = vcmp.ge.s32.totalorder %v5688_v51, %v9057_v46 }
0x229a   :  { %13589 = vst [vmem:[#allocation38_spill] sm:$0xff] %v13588_v58  ;;  %6978 = vmatpush.msk.msra.mxu1 %vm10191_vm4, %v13580_v25  ;;  %v13592_v40 = vsel %vm10220_vm13, 4294967295, %v13591_v40  ;;  %vm10231_vm4 = vmand %vm5757_vm1, %vm5822_vm14  ;;  %vm5754_vm1 = vcmp.ge.s32.totalorder %v5689_v20, %v9057_v46  ;;  %vm5819_vm14 = vcmp.lt.s32.totalorder %v5689_v20, %v9061_v1  ;;  %v5682_v27 = vadd.s32 128, %v9054_v11 }
0x229b   :  { %13593 = vst [vmem:[#allocation39_spill] sm:$0xff] %v13592_v40  ;;  %v13595_v17 = vsel %vm10231_vm4, 4294967295, %v13594_v17  ;;  %v13617_v29 = vmov 0  ;;  %v13626_v2 = vmov 0 }
0x229c   :  { %6979 = vmatpush.msk.msra.mxu1 %vm10200_vm8, %v13580_v25  ;;  %vm5821_vm8 = vcmp.lt.s32.totalorder %v5691_v19, %v9061_v1  ;;  %13596 = vst [vmem:[#allocation40_spill] sm:$0xff] %v13595_v17 }
0x229d   :  { %vm10239_vm11 = vmand %vm5756_vm6, %vm5821_vm8  ;;  %vm5818_vm6 = vcmp.lt.s32.totalorder %v5688_v51, %v9061_v1  ;;  %v10351_v20 = vpop.xlane.xlu0 %3549 }
0x229e   :  { %6980 = vmatpush.msk.msra.mxu1 %vm10220_vm13, %v13580_v25  ;;  %v13598_v7 = vsel %vm10239_vm11, 4294967295, %v13597_v7  ;;  %vm10249_vm13 = vmand %vm5755_vm9, %vm5820_vm7  ;;  %vm5752_vm9 = vcmp.ge.s32.totalorder %v5687_v41, %v9057_v46  ;;  %vm5817_vm7 = vcmp.lt.s32.totalorder %v5687_v41, %v9061_v1 }
0x229f   :  { %13599 = vst [vmem:[#allocation41_spill] sm:$0xff] %v13598_v7  ;;  %v13602_v12 = vsel %vm10249_vm13, 4294967295, %v13601_v12  ;;  %vm10259_vm8 = vmand %vm5754_vm1, %vm5819_vm14  ;;  %vm5751_vm14 = vcmp.ge.s32.totalorder %v5686_v44, %v9057_v46  ;;  %v10666_v7 = vld [vmem:[%s13055_s3 + $0x28] sm:$0x3] }
0x22a0   :  { %6981 = vmatpush.msk.msra.mxu1 %vm10231_vm4, %v13580_v25  ;;  %13603 = vst [vmem:[#allocation42_spill] sm:$0xff] %v13602_v12  ;;  %v13605_v3 = vsel %vm10259_vm8, 4294967295, %v13604_v3  ;;  %vm10273_vm1 = vmand %vm5753_vm15, %vm5818_vm6  ;;  %vm13613_vm15 = vcmask 261120   ;;  %vm5750_vm6 = vcmp.ge.s32.totalorder %v5685_v18, %v9057_v46 }
0x22a1   :  { %1224 = vrot.lane.b32.xlu2 %v1222_v48, %s7753_s30  ;;  %13606 = vst [vmem:[#allocation43_spill] sm:$0xff] %v13605_v3  ;;  %v4078_v48 = vmul.f32 %v10085_v42, %v9975_v45  ;;  %v5684_v45 = vadd.s32 144, %v9054_v11  ;;  %v753_v11 = vpop.f32.mrf.mxu3 }
0x22a2   :  { %6982 = vmatpush.msk.msra.mxu1 %vm10239_vm11, %v13580_v25  ;;  %vm5816_vm11 = vcmp.lt.s32.totalorder %v5686_v44, %v9061_v1  ;;  %13700 = vst [vmem:[#allocation83_spill] sm:$0xff] %v10666_v7 }
0x22a3   :  { %vm10296_vm4 = vmand %vm5751_vm14, %vm5816_vm11  ;;  %vm5748_vm11 = vcmp.ge.s32.totalorder %v5683_v13, %v9057_v46  ;;  %vm5813_vm14 = vcmp.lt.s32.totalorder %v5683_v13, %v9061_v1 }
0x22a4   :  { %6983 = vmatpush.msk.msra.mxu1 %vm10249_vm13, %v13580_v25  ;;  %vm10285_vm13 = vmand %vm5752_vm9, %vm5817_vm7  ;;  %vm5749_vm9 = vcmp.ge.s32.totalorder %v5684_v45, %v9057_v46  ;;  %vm5814_vm7 = vcmp.lt.s32.totalorder %v5684_v45, %v9061_v1 }
0x22a5   :  { %v13611_v24 = vsel %vm10285_vm13, 4294967295, %v13610_v24  ;;  %v10354_v41 = vpop.xlane.xlu0 %3558 }
0x22a6   :  { %6984 = vmatpush.msk.msra.mxu1 %vm10259_vm8, %v13580_v25  ;;  %13612 = vst [vmem:[#allocation45_spill] sm:$0xff] %v13611_v24  ;;  %vm5815_vm8 = vcmp.lt.s32.totalorder %v5685_v18, %v9061_v1  ;;  %v3540_v18 = vmul.f32 %v10105_v5, %v10140_v33 }
0x22a8   :  { %6985 = vmatpush.msk.msra.mxu1 %vm10273_vm1, %v13580_v25 }
0x22aa   :  { %6986 = vmatpush.msk.msra.mxu1 %vm10285_vm13, %v13580_v25  ;;  %vm10326_vm13 = vmand %vm5748_vm11, %vm5813_vm14  ;;  %vm13630_vm11 = vcmask 1048320   ;;  %vm13631_vm14 = vcmask 254976  }
0x22ac   :  { %6987 = vmatpush.msk.msra.mxu1 %vm10296_vm4, %v13580_v25 }
0x22ad   :  { %v10360_v45 = vpop.xlane.xlu0 %3567 }
0x22b4   :  { %v10129_v23 = vpop.xlane.xlu2 %3543 }
0x22b5   :  { %v10363_v13 = vpop.xlane.xlu0 %4083 }
0x22bc   :  { %v10134_v38 = vpop.xlane.xlu2 %3552 }
0x22be   :  { %3546 = vadd.xlane.f32.xlu1 %v3545_v28  ;;  %v13607_v28 = vmov 0 }
0x22bf   :  { %v13608_v28 = vsel %vm10273_vm1, 4294967295, %v13607_v28  ;;  %vm10315_vm1 = vmand %vm5749_vm9, %vm5814_vm7  ;;  %vm13629_vm7 = vcmask 785920  }
0x22c0   :  { %13609 = vst [vmem:[#allocation44_spill] sm:$0xff] %v13608_v28 }
0x22c4   :  { %v10142_v30 = vpop.xlane.xlu2 %3561 }
0x22c6   :  { %3555 = vadd.xlane.f32.xlu1 %v3554_v55  ;;  %v4118_v55 = vsel %vm13613_vm15, %v4078_v48, 0.0  ;;  %vm10306_vm15 = vmand %vm5750_vm6, %vm5815_vm8  ;;  %vm5747_vm8 = vcmp.ge.s32.totalorder %v5682_v27, %v9057_v46  ;;  %vm5812_vm6 = vcmp.lt.s32.totalorder %v5682_v27, %v9061_v1  ;;  %v10365_v27 = vpop.xlane.xlu0 %4092  ;;  %v10722_v1 = vld [vmem:[%s13055_s3 + $0x60] sm:$0xff] }
0x22c7   :  { %v13618_v29 = vsel %vm10306_vm15, 4294967295, %v13617_v29  ;;  %6988 = vmatpush.msk.msra.mxu1 %vm10306_vm15, %v13580_v25  ;;  %vm10333_vm9 = vmand %vm5747_vm8, %vm5812_vm6  ;;  %vm13632_vm8 = vcmask 261120   ;;  %vm13633_vm6 = vcmask 130112   ;;  %13715 = vst [vmem:[#allocation90_spill] sm:$0xff] %v10722_v1 }
0x22c8   :  { %13619 = vst [vmem:[#allocation47_spill] sm:$0xff] %v13618_v29  ;;  %v13627_v2 = vsel %vm10333_vm9, 4294967295, %v13626_v2 }
0x22c9   :  { %6989 = vmatpush.msk.msra.mxu1 %vm10315_vm1, %v13580_v25  ;;  %13628 = vst [vmem:[#allocation50_spill] sm:$0xff] %v13627_v2 }
0x22ca   :  { %3588 = vadd.xlane.f32.xlu2 %v3587_v52  ;;  %v13614_v52 = vmov 0 }
0x22cb   :  { %v13615_v52 = vsel %vm10296_vm4, 4294967295, %v13614_v52  ;;  %6990 = vmatpush.msk.msra.mxu1 %vm10326_vm13, %v13580_v25  ;;  %vm13745_vm4 = vcmask 1047559  }
0x22cc   :  { %v10151_v16 = vpop.xlane.xlu2 %3570  ;;  %13616 = vst [vmem:[#allocation46_spill] sm:$0xff] %v13615_v52 }
0x22cd   :  { %6991 = vmatpush.msk.msra.mxu1 %vm10333_vm9, %v13580_v25  ;;  %vm13637_vm9 = vcmask 1042434  }
0x22ce   :  { %3564 = vadd.xlane.f32.xlu1 %v3563_v56  ;;  %v13620_v56 = vmov 0 }
0x22cf   :  { %v13621_v56 = vsel %vm10315_vm1, 4294967295, %v13620_v56 }
0x22d0   :  { %13622 = vst [vmem:[#allocation48_spill] sm:$0xff] %v13621_v56 }
0x22d4   :  { %v10158_v60 = vpop.xlane.xlu2 %4086 }
0x22d6   :  { %3573 = vadd.xlane.f32.xlu1 %v3572_v53  ;;  %v13623_v53 = vmov 0 }
0x22d7   :  { %v13624_v53 = vsel %vm10326_vm13, 4294967295, %v13623_v53  ;;  %vm13644_vm13 = vcmask 1045509  }
0x22d8   :  { %13625 = vst [vmem:[#allocation49_spill] sm:$0xff] %v13624_v53 }
0x22dc   :  { %v10163_v0 = vpop.xlane.xlu2 %4095 }
0x22de   :  { %4089 = vadd.xlane.f32.xlu1 %v4088_v36  ;;  %v1217_v36 = vmul.f32 %v10125_v49, %v9601_v10 }
0x22e4   :  { %v10198_v37 = vpop.xlane.xlu2 %4104 }
0x22e5   :  { %v4156_v2 = vperm.slane %v10198_v37, %v8278_v61 }
0x22e6   :  { %4098 = vadd.xlane.f32.xlu1 %v4097_v34 }
0x22ec   :  { %v10237_v21 = vpop.xlane.xlu2 %4110 }
0x22ee   :  { %4116 = vadd.xlane.f32.xlu1 %v4115_v63  ;;  %v3508_v63 = vrot.slane %v9910_v39, 6  ;;  %v10367_v39 = vpop.xlane.xlu0 %4101 }
0x22f0   :  { %v3516_v51 = vperm.slane %v3508_v63, 0  ;;  %v4150_v63 = vperm.slane %v10365_v27, %v8278_v61 }
0x22f2   :  { %v3539_v44 = vmul.f32 %v9983_v57, %v3516_v51 }
0x22f4   :  { %v10283_v14 = vpop.xlane.xlu2 %4113  ;;  %v3581_v48 = vsel %vm13631_vm14, %v3539_v44, 0.0  ;;  %v3537_v44 = vmul.f32 %v10062_v47, %v10154_v6  ;;  %v4155_v6 = vperm.slane %v10367_v39, %v8273_v9 }
0x22f6   :  { %4119 = vadd.xlane.f32.xlu1 %v4118_v55  ;;  %v3584_v55 = vsel %vm13632_vm8, %v3540_v18, 0.0  ;;  %v4146_v18 = vperm.slane %v10363_v13, %v8273_v9  ;;  %v3575_v56 = vsel %vm13631_vm14, %v3537_v44, 0.0  ;;  %vm13636_vm8 = vcmask 1041409   ;;  %vm13641_vm14 = vmmov %vm13633_vm6 }
0x22f7   :  { %v4161_v44 = vperm.slane %v10283_v14, %v8273_v9 }
0x22fc   :  { %v10324_v62 = vpop.xlane.xlu2 %4128 }
0x2304   :  { %v1225_v54 = vpop.permute.xlu2 %1224 }
0x2305   :  { %v10345_v31 = vadd.f32 %v1225_v54, %v1217_v36  ;;  %v10369_v36 = vpop.xlane.xlu0 %4107 }
0x2306   :  { %v3494_v35 = vpop.permute.xlu1 %3493 }
0x2307   :  { %7475 = vtanh.f32 %v10345_v31  ;;  %3496 = vst.msk [vmem:[#allocation4 + $0x8] sm:$0xff] %vm13629_vm7, %v3494_v35  ;;  %vm13634_vm7 = vmmov %vm13633_vm6 }
0x2308   :  { %3500 = vst.msk [vmem:[#allocation4 + $0x8] sm:$0xff] %vm13630_vm11, %v3498_v59  ;;  %vm13635_vm11 = vmmov %vm13633_vm6 }
0x230d   :  { %v7476_v8 = vpop.eup %7475  ;;  %v10373_v54 = vpop.xlane.xlu0 %4122 }
0x230e   :  { %1230 = vrot.lane.b32.xlu0 %v7476_v8, %s7752_s27 }
0x230f   :  { %v6136_v34 = vld [vmem:[#allocation4 + $0x8] sm:$0xff] }
0x2310   :  { %v6145_v15 = vrot.slane %v6136_v34, 4 }
0x2312   :  { %v6146_v26 = vadd.f32 %v6145_v15, %v6136_v34 }
0x2314   :  { %v6147_v19 = vrot.slane %v6146_v26, 2 }
0x2315   :  { %v10377_v33 = vpop.xlane.xlu0 %4125 }
0x2316   :  { %v6148_v32 = vadd.f32 %v6147_v19, %v6146_v26  ;;  %v4167_v52 = vperm.slane %v10377_v33, %v8273_v9 }
0x2318   :  { %v6149_v10 = vrot.slane %v6148_v32, 1 }
0x231a   :  { %v6150_v22 = vadd.f32 %v6149_v10, %v6148_v32 }
0x231c   :  { %6199 = vmatmul.f32.vlgmr.msra.gmra.mxu1 %v6150_v22 }
0x2331   :  { %v10371_v57 = vpop.xlane.xlu1 %3546 }
0x2338   :  { %3582 = vadd.xlane.f32.xlu0 %v3581_v48  ;;  %v4152_v48 = vperm.slane %v10163_v0, %v8273_v9 }
0x2339   :  { %v10375_v35 = vpop.xlane.xlu1 %3555 }
0x2340   :  { %3585 = vadd.xlane.f32.xlu0 %v3584_v55 }
0x2341   :  { %v10379_v59 = vpop.xlane.xlu1 %3564 }
0x2349   :  { %v10383_v15 = vpop.xlane.xlu1 %3573 }
0x2351   :  { %v10385_v26 = vpop.xlane.xlu1 %4089 }
0x2352   :  { %v4149_v10 = vperm.slane %v10385_v26, %v8273_v9 }
0x2354   :  { %v4151_v55 = vsel %vm13633_vm6, %v4150_v63, %v4149_v10 }
0x2359   :  { %v10387_v19 = vpop.xlane.xlu1 %4098 }
0x235a   :  { %v4153_v22 = vperm.slane %v10387_v19, %v8278_v61 }
0x2361   :  { %v10389_v32 = vpop.xlane.xlu1 %4116 }
0x2362   :  { %v4162_v10 = vperm.slane %v10389_v32, %v8278_v61 }
0x2369   :  { %v10410_v53 = vpop.xlane.xlu1 %4119 }
0x236a   :  { %v4164_v63 = vperm.slane %v10410_v53, %v8273_v9 }
0x2380   :  { %v1231_v8 = vpop.permute.xlu0 %1230 }
0x2381   :  { %v1233_v34 = vmul.f32 %v1231_v8, %v10125_v49  ;;  %v4147_v49 = vperm.slane %v10158_v60, %v8278_v61  ;;  %v4154_v8 = vsel %vm13634_vm7, %v4153_v22, %v4152_v48  ;;  %v4159_v22 = vperm.slane %v10237_v21, %v8278_v61  ;;  %vm13639_vm7 = vmmov %vm13633_vm6 }
0x2382   :  { %v4158_v48 = vperm.slane %v10369_v36, %v8273_v9 }
0x2383   :  { %1235 = vrot.lane.b32.xlu1 %v1233_v34, %s7753_s30  ;;  %v4148_v34 = vsel %vm13635_vm11, %v4147_v49, %v4146_v18  ;;  %v4157_v49 = vsel %vm13633_vm6, %v4156_v2, %v4155_v6  ;;  %v4165_v18 = vperm.slane %v10373_v54, %v8278_v61  ;;  %vm13640_vm11 = vmmov %vm13633_vm6  ;;  %v4168_v2 = vperm.slane %v10324_v62, %v8278_v61 }
0x2384   :  { %v4170_v47 = vsel %vm13636_vm8, %v4151_v55, %v4148_v34  ;;  %v4160_v34 = vsel %vm13640_vm11, %v4159_v22, %v4158_v48  ;;  %vm13642_vm8 = vcmask 261120   ;;  %vm13643_vm6 = vcmask 1044484  }
0x2385   :  { %v4171_v29 = vsel %vm13637_vm9, %v4154_v8, %v4170_v47  ;;  %vm13638_vm9 = vcmask 1043459   ;;  %v4163_v8 = vsel %vm13639_vm7, %v4162_v10, %v4161_v44  ;;  %v4166_v47 = vsel %vm13641_vm14, %v4165_v18, %v4164_v63  ;;  %vm13648_vm1 = vmmov %vm13642_vm8 }
0x2386   :  { %v4172_v55 = vsel %vm13638_vm9, %v4157_v49, %v4171_v29  ;;  %vm13645_vm9 = vcmask 1046534   ;;  %v4169_v10 = vsel %vm13639_vm7, %v4168_v2, %v4167_v52  ;;  %vm13646_vm11 = vcmask 1047559  }
0x2387   :  { %vm13647_vm14 = vcmask 80896   ;;  %v3612_v48 = vperm.slane %v10375_v35, %v8273_v9  ;;  %v3606_v52 = vperm.slane %v10129_v23, %v8273_v9  ;;  %v3610_v18 = vperm.slane %v10134_v38, %v8278_v61 }
0x2388   :  { %v3615_v2 = vperm.slane %v10142_v30, %v8273_v9 }
0x23ab   :  { %v10448_v44 = vpop.xlane.xlu0 %3582 }
0x23ad   :  { %3576 = vadd.xlane.f32.xlu1 %v3575_v56  ;;  %v3538_v56 = vmul.f32 %v10085_v42, %v3516_v51  ;;  %v4173_v42 = vsel %vm13643_vm6, %v4160_v34, %v4172_v55  ;;  %v3616_v55 = vperm.slane %v10379_v59, %v8278_v61  ;;  %v3613_v34 = vperm.slane %v10354_v41, %v8278_v61 }
0x23ae   :  { %v4174_v51 = vsel %vm13644_vm13, %v4163_v8, %v4173_v42  ;;  %vm13650_vm13 = vmmov %vm13639_vm7 }
0x23af   :  { %v3578_v6 = vsel %vm13642_vm8, %v3538_v56, 0.0  ;;  %v4175_v29 = vsel %vm13645_vm9, %v4166_v47, %v4174_v51  ;;  %vm13649_vm8 = vmmov %vm13648_vm1  ;;  %v3607_v56 = vperm.slane %v10371_v57, %v8278_v61  ;;  %v3609_v47 = vperm.slane %v10351_v20, %v8273_v9 }
0x23b0   :  { %v4176_v22 = vsel %vm13646_vm11, %v4169_v10, %v4175_v29  ;;  %vm13655_vm11 = vcmask 1042434  }
0x23b1   :  { %v4178_v63 = vsel %vm13647_vm14, %v4176_v22, -inf  ;;  %v3619_v22 = vperm.slane %v10151_v16, %v8278_v61  ;;  %vm13656_vm14 = vcmask 1043459  }
0x23b5   :  { %3579 = vadd.xlane.f32.xlu1 %v3578_v6  ;;  %v3608_v6 = vsel %vm13650_vm13, %v3607_v56, %v3606_v52  ;;  %v3621_v56 = vperm.slane %v10383_v15, %v8273_v9  ;;  %v10484_v52 = vpop.xlane.xlu2 %3588 }
0x23bd   :  { %4179 = vmax.xlane.f32.xlu1 %v4178_v63 }
0x23f5   :  { %v1236_v49 = vpop.permute.xlu1 %1235 }
0x23f6   :  { %1238 = vst.msk [vmem:[#allocation3 + $0x30] sm:$0xff] %vm13648_vm1, %v1236_v49  ;;  %6958 = vmatmul.msk.f32.vlgmr.msra.gmra.mxu2 %vm13649_vm8, %v1236_v49  ;;  %vm13651_vm1 = vmmov %vm13639_vm7  ;;  %vm13654_vm7 = vcmask 1041409   ;;  %v10477_v49 = vpop.xlane.xlu0 %3585 }
0x23f7   :  { %v3614_v42 = vsel %vm13651_vm1, %v3613_v34, %v3612_v48  ;;  %vm13652_vm6 = vmmov %vm13651_vm1  ;;  %v3618_v48 = vperm.slane %v10360_v45, %v8273_v9 }
0x23f8   :  { %v3611_v51 = vsel %vm13652_vm6, %v3610_v18, %v3609_v47  ;;  %vm13653_vm9 = vmmov %vm13651_vm1 }
0x23f9   :  { %v3617_v29 = vsel %vm13653_vm9, %v3616_v55, %v3615_v2  ;;  %v3630_v63 = vsel %vm13654_vm7, %v3611_v51, %v3608_v6  ;;  %v3627_v55 = vperm.slane %v10477_v49, %v8273_v9  ;;  %vm13657_vm8 = vmmov %vm13651_vm1  ;;  %v3625_v6 = vperm.slane %v10448_v44, %v8278_v61 }
0x23fa   :  { %v3631_v24 = vsel %vm13655_vm11, %v3614_v42, %v3630_v63  ;;  %vm13658_vm13 = vmmov %vm13651_vm1  ;;  %v3628_v51 = vperm.slane %v10484_v52, %v8278_v61  ;;  %vm13659_vm1 = vcmask 1044484   ;;  %vm13660_vm9 = vcmask 1045509  }
0x23fb   :  { %v3632_v18 = vsel %vm13656_vm14, %v3617_v29, %v3631_v24  ;;  %v3620_v2 = vsel %vm13658_vm13, %v3619_v22, %v3618_v48  ;;  %vm13661_vm7 = vmmov %vm13652_vm6  ;;  %vm13662_vm11 = vcmask 1046534   ;;  %vm13663_vm14 = vcmask 1047559  }
0x23fc   :  { %v3633_v24 = vsel %vm13659_vm1, %v3620_v2, %v3632_v18  ;;  %vm13694_vm13 = vcmask 254976   ;;  %vm13697_vm1 = vcmask 261120  }
0x2420   :  { %v10460_v8 = vpop.xlane.xlu1 %3576 }
0x2421   :  { %v3622_v10 = vperm.slane %v10460_v8, %v8278_v61 }
0x2423   :  { %v3623_v34 = vsel %vm13657_vm8, %v3622_v10, %v3621_v56  ;;  %v3629_v10 = vsel %vm13661_vm7, %v3628_v51, %v3627_v55  ;;  %vm13664_vm8 = vcmask 80896   ;;  %vm13703_vm7 = vmmov %vm13694_vm13 }
0x2424   :  { %v3634_v63 = vsel %vm13660_vm9, %v3623_v34, %v3633_v24  ;;  %vm13702_vm9 = vmmov %vm13697_vm1 }
0x2428   :  { %v10490_v47 = vpop.xlane.xlu1 %3579 }
0x2429   :  { %v3624_v42 = vperm.slane %v10490_v47, %v8273_v9 }
0x242b   :  { %v3626_v29 = vsel %vm13652_vm6, %v3625_v6, %v3624_v42  ;;  %vm13698_vm6 = vmmov %vm13697_vm1 }
0x242c   :  { %v3635_v56 = vsel %vm13662_vm11, %v3626_v29, %v3634_v63  ;;  %vm13704_vm11 = vmmov %vm13697_vm1 }
0x242d   :  { %v3636_v22 = vsel %vm13663_vm14, %v3629_v10, %v3635_v56  ;;  %vm13708_vm14 = vmmov %vm13703_vm7 }
0x242e   :  { %v3638_v48 = vsel %vm13664_vm8, %v3636_v22, -inf  ;;  %vm13709_vm8 = vmmov %vm13703_vm7 }
0x242f   :  { %3639 = vmax.xlane.f32.xlu2 %v3638_v48 }
0x2430   :  { %v10506_v28 = vpop.xlane.xlu1 %4179 }
0x2431   :  { %v4182_v3 = vperm.slane %v10506_v28, 0  ;;  %v4183_v12 = vperm.slane %v10506_v28, 1  ;;  %v4185_v34 = vperm.slane %v10506_v28, 3  ;;  %v4184_v29 = vperm.slane %v10506_v28, 2 }
0x2432   :  { %v4186_v10 = vperm.slane %v10506_v28, 4 }
0x2433   :  { %v4198_v18 = vsub.f32 %v10363_v13, %v4182_v3  ;;  %v4200_v2 = vsub.f32 %v10385_v26, %v4183_v12  ;;  %v4199_v42 = vsub.f32 %v10158_v60, %v4182_v3  ;;  %v4204_v51 = vsub.f32 %v10367_v39, %v4185_v34 }
0x2434   :  { %v4201_v24 = vsub.f32 %v10365_v27, %v4183_v12  ;;  %v4203_v48 = vsub.f32 %v10387_v19, %v4184_v29  ;;  %v4206_v60 = vsub.f32 %v10369_v36, %v4186_v10  ;;  %v4202_v12 = vsub.f32 %v10163_v0, %v4184_v29 }
0x2435   :  { %v4214_v55 = vmul.f32 1.442695, %v4198_v18  ;;  %v4218_v6 = vmul.f32 1.442695, %v4200_v2  ;;  %v4216_v63 = vmul.f32 1.442695, %v4199_v42  ;;  %v4205_v42 = vsub.f32 %v10198_v37, %v4185_v34 }
0x2436   :  { %v4226_v13 = vmul.f32 1.442695, %v4204_v51  ;;  %v4220_v56 = vmul.f32 1.442695, %v4201_v24  ;;  %v4187_v3 = vperm.slane %v10506_v28, 5  ;;  %v4188_v39 = vperm.slane %v10506_v28, 6 }
0x2437   :  { %7477 = vpow2.f32 %v4218_v6  ;;  %v4224_v27 = vmul.f32 1.442695, %v4203_v48  ;;  %v4230_v18 = vmul.f32 1.442695, %v4206_v60  ;;  %v4222_v19 = vmul.f32 1.442695, %v4202_v12 }
0x2438   :  { %7479 = vpow2.f32 %v4214_v55  ;;  %v4209_v6 = vsub.f32 %v10389_v32, %v4187_v3  ;;  %v4211_v0 = vsub.f32 %v10373_v54, %v4188_v39  ;;  %v4189_v24 = vperm.slane %v10506_v28, 7 }
0x2439   :  { %7481 = vpow2.f32 %v4216_v63  ;;  %v4210_v54 = vsub.f32 %v10410_v53, %v4188_v39  ;;  %v4207_v28 = vsub.f32 %v10237_v21, %v4186_v10  ;;  %v4208_v21 = vsub.f32 %v10283_v14, %v4187_v3 }
0x243a   :  { %7483 = vpow2.f32 %v4226_v13  ;;  %v4236_v51 = vmul.f32 1.442695, %v4209_v6  ;;  %v4240_v29 = vmul.f32 1.442695, %v4211_v0  ;;  %v4228_v13 = vmul.f32 1.442695, %v4205_v42 }
0x243b   :  { %7485 = vpow2.f32 %v4220_v56  ;;  %v4212_v37 = vsub.f32 %v10377_v33, %v4189_v24  ;;  %v4238_v34 = vmul.f32 1.442695, %v4210_v54  ;;  %v4232_v12 = vmul.f32 1.442695, %v4207_v28 }
0x243c   :  { %7487 = vpow2.f32 %v4224_v27  ;;  %v4234_v10 = vmul.f32 1.442695, %v4208_v21 }
0x243d   :  { %v10518_v26 = vpop.eup %7477  ;;  %7489 = vpow2.f32 %v4230_v18  ;;  %v4242_v48 = vmul.f32 1.442695, %v4212_v37 }
0x243e   :  { %13665 = vst [vmem:[#allocation51_spill] sm:$0xff] %v10518_v26  ;;  %v10520_v22 = vpop.eup %7479  ;;  %4269 = vperm.xlu1 %7215, %v10518_v26   ;;  %7491 = vpow2.f32 %v4222_v19  ;;  %v4213_v19 = vsub.f32 %v10324_v62, %v4189_v24 }
0x243f   :  { %13666 = vst [vmem:[#allocation52_spill] sm:$0xff] %v10520_v22  ;;  %4263 = vperm.xlu0 %7217, %v10520_v22   ;;  %v10529_v2 = vpop.eup %7481  ;;  %7493 = vpow2.f32 %v4236_v51 }
0x2440   :  { %13667 = vst [vmem:[#allocation53_spill] sm:$0xff] %v10529_v2  ;;  %v10531_v55 = vpop.eup %7483  ;;  %7495 = vpow2.f32 %v4240_v29  ;;  %v4244_v6 = vmul.f32 1.442695, %v4213_v19 }
0x2441   :  { %13668 = vst [vmem:[#allocation54_spill] sm:$0xff] %v10531_v55  ;;  %v10534_v36 = vpop.eup %7485  ;;  %7497 = vpow2.f32 %v4228_v13 }
0x2442   :  { %13669 = vst [vmem:[#allocation55_spill] sm:$0xff] %v10534_v36  ;;  %v10542_v63 = vpop.eup %7487  ;;  %7499 = vpow2.f32 %v4238_v34 }
0x2443   :  { %13670 = vst [vmem:[#allocation56_spill] sm:$0xff] %v10542_v63  ;;  %v10544_v56 = vpop.eup %7489  ;;  %7501 = vpow2.f32 %v4242_v48 }
0x2444   :  { %13671 = vst [vmem:[#allocation57_spill] sm:$0xff] %v10544_v56  ;;  %v10547_v32 = vpop.eup %7491  ;;  %7503 = vpow2.f32 %v4232_v12 }
0x2445   :  { %13672 = vst [vmem:[#allocation58_spill] sm:$0xff] %v10547_v32  ;;  %v10554_v60 = vpop.eup %7493  ;;  %7505 = vpow2.f32 %v4234_v10 }
0x2446   :  { %4281 = vperm.xlu1 %7215, %v10531_v55   ;;  %13673 = vst [vmem:[#allocation59_spill] sm:$0xff] %v10554_v60  ;;  %v10556_v27 = vpop.eup %7495  ;;  %7507 = vpow2.f32 %v4244_v6 }
0x2447   :  { %4266 = vperm.xlu2 %7216, %v10529_v2   ;;  %4272 = vperm.xlu0 %7217, %v10534_v36   ;;  %13674 = vst [vmem:[#allocation60_spill] sm:$0xff] %v10556_v27  ;;  %v10559_v53 = vpop.eup %7497 }
0x2448   :  { %13675 = vst [vmem:[#allocation61_spill] sm:$0xff] %v10559_v53  ;;  %v10564_v33 = vpop.eup %7499 }
0x2449   :  { %13676 = vst [vmem:[#allocation62_spill] sm:$0xff] %v10564_v33  ;;  %v10566_v39 = vpop.eup %7501 }
0x244a   :  { %13677 = vst [vmem:[#allocation63_spill] sm:$0xff] %v10566_v39  ;;  %v10569_v18 = vpop.eup %7503 }
0x244b   :  { %13678 = vst [vmem:[#allocation64_spill] sm:$0xff] %v10569_v18  ;;  %v10574_v0 = vpop.eup %7505 }
0x244c   :  { %13679 = vst [vmem:[#allocation65_spill] sm:$0xff] %v10574_v0  ;;  %v10577_v14 = vpop.eup %7507 }
0x244d   :  { %13680 = vst [vmem:[#allocation66_spill] sm:$0xff] %v10577_v14 }
0x244e   :  { %4287 = vperm.xlu1 %7215, %v10544_v56  }
0x244f   :  { %4278 = vperm.xlu2 %7216, %v10542_v63   ;;  %4275 = vperm.xlu0 %7217, %v10547_v32  }
0x2456   :  { %4302 = vperm.xlu1 %7215, %v10556_v27  }
0x2457   :  { %4296 = vperm.xlu2 %7216, %v10554_v60   ;;  %4284 = vperm.xlu0 %7217, %v10559_v53  }
0x245e   :  { %4305 = vperm.xlu1 %7215, %v10566_v39  }
0x245f   :  { %4299 = vperm.xlu2 %7216, %v10564_v33   ;;  %4290 = vperm.xlu0 %7217, %v10569_v18  }
0x2467   :  { %4293 = vperm.xlu0 %7217, %v10574_v0  }
0x246f   :  { %4308 = vperm.xlu0 %7217, %v10577_v14  }
0x24a2   :  { %v10580_v3 = vpop.xlane.xlu2 %3639 }
0x24a3   :  { %v3642_v42 = vperm.slane %v10580_v3, 0  ;;  %v3643_v51 = vperm.slane %v10580_v3, 1  ;;  %v3644_v13 = vperm.slane %v10580_v3, 2 }
0x24a5   :  { %v3659_v29 = vsub.f32 %v10371_v57, %v3642_v42  ;;  %v3660_v62 = vsub.f32 %v10351_v20, %v3643_v51  ;;  %v3658_v24 = vsub.f32 %v10129_v23, %v3642_v42  ;;  %v3663_v34 = vsub.f32 %v10354_v41, %v3644_v13 }
0x24a6   :  { %v3662_v48 = vsub.f32 %v10375_v35, %v3644_v13  ;;  %v3661_v12 = vsub.f32 %v10134_v38, %v3643_v51  ;;  %v3647_v57 = vperm.slane %v10580_v3, 5  ;;  %v3645_v20 = vperm.slane %v10580_v3, 3 }
0x24a7   :  { %v3676_v54 = vmul.f32 1.442695, %v3659_v29  ;;  %v3678_v37 = vmul.f32 1.442695, %v3660_v62  ;;  %v3674_v28 = vmul.f32 1.442695, %v3658_v24 }
0x24a8   :  { %v3684_v21 = vmul.f32 1.442695, %v3663_v34  ;;  %v3682_v23 = vmul.f32 1.442695, %v3662_v48  ;;  %v3680_v19 = vmul.f32 1.442695, %v3661_v12  ;;  %v3669_v35 = vsub.f32 %v10460_v8, %v3647_v57 }
0x24a9   :  { %7509 = vpow2.f32 %v3678_v37  ;;  %v3665_v38 = vsub.f32 %v10379_v59, %v3645_v20  ;;  %v3664_v42 = vsub.f32 %v10142_v30, %v3645_v20  ;;  %v3646_v29 = vperm.slane %v10580_v3, 4 }
0x24aa   :  { %7511 = vpow2.f32 %v3676_v54  ;;  %v3696_v51 = vmul.f32 1.442695, %v3669_v35 }
0x24ab   :  { %7513 = vpow2.f32 %v3674_v28  ;;  %v3688_v62 = vmul.f32 1.442695, %v3665_v38  ;;  %v3686_v13 = vmul.f32 1.442695, %v3664_v42  ;;  %v3667_v59 = vsub.f32 %v10151_v16, %v3646_v29 }
0x24ac   :  { %7515 = vpow2.f32 %v3684_v21  ;;  %v3666_v30 = vsub.f32 %v10360_v45, %v3646_v29  ;;  %v3668_v16 = vsub.f32 %v10383_v15, %v3647_v57  ;;  %v10639_v57 = vld [vmem:[%s13055_s3 + $0x8] sm:$0x3] }
0x24ad   :  { %7517 = vpow2.f32 %v3682_v23  ;;  %v3692_v37 = vmul.f32 1.442695, %v3667_v59  ;;  %13693 = vst [vmem:[#allocation79_spill] sm:$0xff] %v10639_v57 }
0x24ae   :  { %7519 = vpow2.f32 %v3680_v19  ;;  %v3690_v34 = vmul.f32 1.442695, %v3666_v30  ;;  %v3694_v45 = vmul.f32 1.442695, %v3668_v16  ;;  %v4583_v19 = vld [vmem:[#allocation3 + $0x30] sm:$0xff] }
0x24af   :  { %v10593_v10 = vpop.eup %7509  ;;  %7521 = vpow2.f32 %v3696_v51  ;;  %v4592_v15 = vperm.slane %v4583_v19, 0  ;;  %v4586_v38 = vrot.slane %v4583_v19, 2  ;;  %v4585_v42 = vrot.slane %v4583_v19, 1 }
0x24b0   :  { %13681 = vst [vmem:[#allocation67_spill] sm:$0xff] %v10593_v10  ;;  %v10595_v6 = vpop.eup %7511  ;;  %3729 = vperm.xlu0 %7217, %v10593_v10   ;;  %7523 = vpow2.f32 %v3688_v62  ;;  %v4587_v30 = vrot.slane %v4583_v19, 3  ;;  %v4591_v4 = vrot.slane %v4583_v19, 7 }
0x24b1   :  { %13682 = vst [vmem:[#allocation68_spill] sm:$0xff] %v10595_v6  ;;  %v10598_v41 = vpop.eup %7513  ;;  %3726 = vperm.xlu1 %7215, %v10595_v6   ;;  %7525 = vpow2.f32 %v3686_v13  ;;  %v4609_v35 = vmul.f32 %v10639_v57, %v4592_v15  ;;  %v4594_v29 = vperm.slane %v4586_v38, 0  ;;  %v4593_v62 = vperm.slane %v4585_v42, 0  ;;  %v10646_v13 = vld [vmem:[%s13055_s3 + $0x20] sm:$0xff]  ;;  %v10660_v38 = vld [vmem:[%s13055_s3 + $0x30] sm:$0xff] }
0x24b2   :  { %13683 = vst [vmem:[#allocation69_spill] sm:$0xff] %v10598_v41  ;;  %3723 = vperm.xlu2 %7216, %v10598_v41   ;;  %v10606_v24 = vpop.eup %7515  ;;  %7527 = vpow2.f32 %v3692_v37  ;;  %v10652_v37 = vld [vmem:[%s13055_s3 + $0x10] sm:$0xff] }
0x24b3   :  { %13684 = vst [vmem:[#allocation70_spill] sm:$0xff] %v10606_v24  ;;  %v10608_v54 = vpop.eup %7517  ;;  %7529 = vpow2.f32 %v3690_v34  ;;  %v4627_v51 = vsel %vm13694_vm13, %v4609_v35, 0.0  ;;  %v4612_v59 = vmul.f32 %v10646_v13, %v4594_v29  ;;  %v4610_v34 = vmul.f32 %v10652_v37, %v4593_v62  ;;  %vm13710_vm13 = vmmov %vm13703_vm7 }
0x24b4   :  { %13685 = vst [vmem:[#allocation71_spill] sm:$0xff] %v10608_v54  ;;  %v10611_v8 = vpop.eup %7519  ;;  %7531 = vpow2.f32 %v3694_v45  ;;  %v4595_v45 = vperm.slane %v4587_v30, 0  ;;  %v10672_v30 = vld [vmem:[%s13055_s3] sm:$0xff] }
0x24b5   :  { %13686 = vst [vmem:[#allocation72_spill] sm:$0xff] %v10611_v8  ;;  %v10617_v28 = vpop.eup %7521  ;;  %v4636_v16 = vsel %vm13697_vm1, %v4612_v59, 0.0  ;;  %v4630_v35 = vsel %vm13698_vm6, %v4610_v34, 0.0  ;;  %v4613_v59 = vmul.f32 %v10666_v7, %v4594_v29  ;;  %v4608_v34 = vmul.f32 %v10672_v30, %v4592_v15  ;;  %v10681_v29 = vld [vmem:[%s13055_s3 + $0x58] sm:$0x3]  ;;  %vm13713_vm6 = vmmov %vm13697_vm1 }
0x24b6   :  { %13687 = vst [vmem:[#allocation73_spill] sm:$0xff] %v10617_v28  ;;  %v10619_v48 = vpop.eup %7523  ;;  %v4614_v42 = vmul.f32 %v10660_v38, %v4595_v45  ;;  %v10687_v15 = vld [vmem:[%s13055_s3 + $0x38] sm:$0x3] }
0x24b7   :  { %13688 = vst [vmem:[#allocation74_spill] sm:$0xff] %v10619_v48  ;;  %v10622_v12 = vpop.eup %7525  ;;  %v4639_v17 = vsel %vm13703_vm7, %v4613_v59, 0.0  ;;  %v4624_v40 = vsel %vm13704_vm11, %v4608_v34, 0.0  ;;  %v4599_v34 = vperm.slane %v4591_v4, 0  ;;  %v10711_v4 = vld [vmem:[%s13055_s3 + $0x48] sm:$0x3]  ;;  %vm13718_vm11 = vmmov %vm13697_vm1 }
0x24b8   :  { %3738 = vperm.xlu0 %7217, %v10606_v24   ;;  %13689 = vst [vmem:[#allocation75_spill] sm:$0xff] %v10622_v12  ;;  %v10627_v21 = vpop.eup %7527 }
0x24b9   :  { %3735 = vperm.xlu1 %7215, %v10608_v54   ;;  %13690 = vst [vmem:[#allocation76_spill] sm:$0xff] %v10627_v21  ;;  %v10629_v20 = vpop.eup %7529  ;;  %v4622_v25 = vmul.f32 %v10105_v5, %v4599_v34 }
0x24ba   :  { %3732 = vperm.xlu2 %7216, %v10611_v8   ;;  %13691 = vst [vmem:[#allocation77_spill] sm:$0xff] %v10629_v20  ;;  %v10633_v23 = vpop.eup %7531 }
0x24bb   :  { %13692 = vst [vmem:[#allocation78_spill] sm:$0xff] %v10633_v23 }
0x24bc   :  { %13695 = vst [vmem:[#allocation80_spill] sm:$0xff] %v10646_v13 }
0x24bd   :  { %13696 = vst [vmem:[#allocation81_spill] sm:$0xff] %v10652_v37 }
0x24be   :  { %13699 = vst [vmem:[#allocation82_spill] sm:$0xff] %v10660_v38 }
0x24bf   :  { %13701 = vst [vmem:[#allocation84_spill] sm:$0xff] %v10672_v30 }
0x24c0   :  { %3756 = vperm.xlu0 %7217, %v10617_v28   ;;  %13705 = vst [vmem:[#allocation85_spill] sm:$0xff] %v10681_v29 }
0x24c1   :  { %3744 = vperm.xlu1 %7215, %v10619_v48   ;;  %13706 = vst [vmem:[#allocation86_spill] sm:$0xff] %v10687_v15 }
0x24c2   :  { %3741 = vperm.xlu2 %7216, %v10622_v12   ;;  %13712 = vst [vmem:[#allocation89_spill] sm:$0xff] %v10711_v4 }
0x24c9   :  { %3750 = vperm.xlu1 %7215, %v10627_v21   ;;  %v7694_v21 = vld [vmem:[%s13065_s13] ss:$0 sm:$0xff]  ;;  %s7759_s13 = smov 16  }
0x24ca   :  { %3747 = vperm.xlu2 %7216, %v10629_v20   ;;  %v754_v20 = vadd.f32 %v7694_v21, %v753_v11 }
0x24d1   :  { %3753 = vperm.xlu1 %7215, %v10633_v23  }
0x24ea   :  { %4628 = vadd.xlane.f32.xlu0 %v4627_v51  ;;  %v4589_v51 = vrot.slane %v4583_v19, 5 }
0x24f2   :  { %4637 = vadd.xlane.f32.xlu0 %v4636_v16  ;;  %v4642_v16 = vsel %vm13702_vm9, %v4614_v42, 0.0  ;;  %v4615_v42 = vmul.f32 %v10687_v15, %v4595_v45  ;;  %v10699_v45 = vpop.permute.xlu0 %4263  ;;  %vm13714_vm9 = vmmov %vm13703_vm7 }
0x24f3   :  { %4631 = vadd.xlane.f32.xlu2 %v4630_v35  ;;  %v4597_v35 = vperm.slane %v4589_v51, 0  ;;  %v4588_v51 = vrot.slane %v4583_v19, 4  ;;  %vm13717_vm7 = vmmov %vm13697_vm1 }
0x24f5   :  { %v4619_v58 = vmul.f32 %v10681_v29, %v4597_v35  ;;  %v4596_v43 = vperm.slane %v4588_v51, 0 }
0x24f7   :  { %v4657_v59 = vsel %vm13708_vm14, %v4619_v58, 0.0  ;;  %vm13721_vm14 = vmmov %vm13709_vm8 }
0x24fa   :  { %4643 = vadd.xlane.f32.xlu0 %v4642_v16  ;;  %v4645_v16 = vsel %vm13709_vm8, %v4615_v42, 0.0  ;;  %v4617_v42 = vmul.f32 %v10711_v4, %v4596_v43 }
0x24fb   :  { %4640 = vadd.xlane.f32.xlu2 %v4639_v17  ;;  %4625 = vadd.xlane.f32.xlu1 %v4624_v40  ;;  %v10693_v17 = vld [vmem:[%s13055_s3 + $0x18] sm:$0x3] }
0x24fc   :  { %13707 = vst [vmem:[#allocation87_spill] sm:$0xff] %v10693_v17  ;;  %v4611_v40 = vmul.f32 %v10693_v17, %v4593_v62  ;;  %v10705_v62 = vld [vmem:[%s13055_s3 + $0x40] sm:$0xff]  ;;  %v4651_v5 = vsel %vm13714_vm9, %v4617_v42, 0.0 }
0x24fd   :  { %13711 = vst [vmem:[#allocation88_spill] sm:$0xff] %v10705_v62  ;;  %v4616_v58 = vmul.f32 %v10705_v62, %v4596_v43 }
0x24fe   :  { %v4633_v50 = vsel %vm13710_vm13, %v4611_v40, 0.0  ;;  %v4590_v40 = vrot.slane %v4583_v19, 6  ;;  %vm13729_vm13 = vcmask 130112  }
0x24ff   :  { %v4648_v51 = vsel %vm13713_vm6, %v4616_v58, 0.0  ;;  %v10731_v58 = vpop.permute.xlu0 %4272  ;;  %vm13732_vm6 = vcmask 1041409  }
0x2502   :  { %4658 = vadd.xlane.f32.xlu0 %v4657_v59  ;;  %v4598_v59 = vperm.slane %v4590_v40, 0 }
0x2503   :  { %4646 = vadd.xlane.f32.xlu2 %v4645_v16  ;;  %4634 = vadd.xlane.f32.xlu1 %v4633_v50  ;;  %v4666_v50 = vsel %vm13697_vm1, %v4622_v25, 0.0  ;;  %v10717_v16 = vpop.permute.xlu1 %4269  ;;  %v10728_v25 = vld [vmem:[%s13055_s3 + $0x50] sm:$0xff]  ;;  %vm13731_vm1 = vmmov %vm13729_vm13 }
0x2504   :  { %v4620_v43 = vmul.f32 %v10722_v1, %v4598_v59  ;;  %13716 = vst [vmem:[#allocation91_spill] sm:$0xff] %v10728_v25  ;;  %v4618_v19 = vmul.f32 %v10728_v25, %v4597_v35  ;;  %vm13733_vm9 = vmmov %vm13731_vm1 }
0x2506   :  { %v4660_v42 = vsel %vm13717_vm7, %v4620_v43, 0.0  ;;  %v4654_v40 = vsel %vm13718_vm11, %v4618_v19, 0.0  ;;  %v10751_v19 = vpop.permute.xlu2 %4266  ;;  %vm13734_vm7 = vcmask 1042434   ;;  %vm13735_vm11 = vmmov %vm13731_vm1 }
0x2507   :  { %v10749_v43 = vpop.permute.xlu0 %4275 }
0x250a   :  { %4667 = vadd.xlane.f32.xlu0 %v4666_v50  ;;  %v10738_v50 = vld [vmem:[%s13055_s3 + $0x78] sm:$0x3] }
0x250b   :  { %4649 = vadd.xlane.f32.xlu2 %v4648_v51  ;;  %4652 = vadd.xlane.f32.xlu1 %v4651_v5  ;;  %13719 = vst [vmem:[#allocation92_spill] sm:$0xff] %v10738_v50  ;;  %v4623_v51 = vmul.f32 %v10738_v50, %v4599_v34  ;;  %v10744_v5 = vld [vmem:[%s13055_s3 + $0x68] sm:$0x3]  ;;  %v10747_v46 = vpop.permute.xlu1 %4281 }
0x250c   :  { %13720 = vst [vmem:[#allocation93_spill] sm:$0xff] %v10744_v5  ;;  %v4621_v35 = vmul.f32 %v10744_v5, %v4598_v59  ;;  %v1259_v59 = vpop.f32.mrf.mxu2 }
0x250d   :  { %v1262_v48 = vadd.f32 %v1259_v59, %v754_v20 }
0x250e   :  { %v10759_v23 = vpop.permute.xlu2 %4278 }
0x250f   :  { %v10757_v28 = vpop.permute.xlu0 %4284  ;;  %7533 = vtanh.f32 %v1262_v48  ;;  %v6959_v60 = vmul.f32 -1.442695, %v1262_v48 }
0x2511   :  { %7535 = vpow2.f32 %v6959_v60 }
0x2513   :  { %4661 = vadd.xlane.f32.xlu2 %v4660_v42  ;;  %4655 = vadd.xlane.f32.xlu1 %v4654_v40  ;;  %v4669_v42 = vsel %vm13721_vm14, %v4623_v51, 0.0  ;;  %v4663_v40 = vsel %vm13709_vm8, %v4621_v35, 0.0  ;;  %v10755_v34 = vpop.permute.xlu1 %4287  ;;  %vm13736_vm14 = vmmov %vm13731_vm1 }
0x2514   :  { %vm13737_vm8 = vmmov %vm13731_vm1 }
0x2517   :  { %v10766_v35 = vpop.permute.xlu0 %4290 }
0x251b   :  { %4670 = vadd.xlane.f32.xlu2 %v4669_v42  ;;  %4664 = vadd.xlane.f32.xlu1 %v4663_v40  ;;  %v10764_v51 = vpop.permute.xlu1 %4302  ;;  %v10768_v42 = vpop.permute.xlu2 %4296 }
0x251c   :  { %v7534_v40 = vpop.eup %7533 }
0x251d   :  { %v7536_v26 = vpop.eup %7535 }
0x251e   :  { %v1266_v53 = vadd.f32 1.0, %v7536_v26 }
0x251f   :  { %v10773_v12 = vpop.permute.xlu0 %4293 }
0x2520   :  { %7537 = vrcp.f32 %v1266_v53 }
0x2523   :  { %v10771_v24 = vpop.permute.xlu1 %4305  ;;  %v10775_v54 = vpop.permute.xlu2 %4299 }
0x2526   :  { %v7538_v60 = vpop.eup %7537 }
0x2527   :  { %v10781_v21 = vpop.permute.xlu0 %4308  ;;  %v1268_v5 = vmul.f32 %v7538_v60, %v1266_v53 }
0x2529   :  { %v1269_v38 = vsub.f32 1.0, %v1268_v5 }
0x252b   :  { %v10777_v10 = vpop.permute.xlu1 %3726  ;;  %v10779_v11 = vpop.permute.xlu2 %3723  ;;  %v1270_v57 = vmul.f32 %v7538_v60, %v1269_v38 }
0x252f   :  { %v10785_v59 = vpop.permute.xlu0 %3729 }
0x2533   :  { %1285 = vrot.lane.b32.xlu2 %v7534_v40, %s7752_s27  ;;  %v10783_v20 = vpop.permute.xlu1 %3735  ;;  %v10787_v8 = vpop.permute.xlu2 %3732 }
0x2534   :  { %13722 = vst [vmem:[#allocation94_spill] sm:$0xff] %v10787_v8 }
0x2537   :  { %v10791_v40 = vpop.permute.xlu0 %3738 }
0x253b   :  { %v10789_v6 = vpop.permute.xlu1 %3744  ;;  %v10793_v14 = vpop.permute.xlu2 %3741 }
0x253c   :  { %13723 = vst [vmem:[#allocation95_spill] sm:$0xff] %v10789_v6 }
0x253d   :  { %13724 = vst [vmem:[#allocation96_spill] sm:$0xff] %v10793_v14 }
0x253f   :  { %v10797_v39 = vpop.permute.xlu0 %3756 }
0x2540   :  { %13726 = vst [vmem:[#allocation98_spill] sm:$0xff] %v10797_v39 }
0x2543   :  { %v10795_v41 = vpop.permute.xlu1 %3750  ;;  %v10799_v0 = vpop.permute.xlu2 %3747 }
0x2544   :  { %13725 = vst [vmem:[#allocation97_spill] sm:$0xff] %v10795_v41 }
0x2545   :  { %13727 = vst [vmem:[#allocation99_spill] sm:$0xff] %v10799_v0 }
0x254b   :  { %v10803_v27 = vpop.permute.xlu1 %3753 }
0x254c   :  { %13728 = vst [vmem:[#allocation100_spill] sm:$0xff] %v10803_v27 }
0x255d   :  { %v10801_v33 = vpop.xlane.xlu0 %4628 }
0x255e   :  { %v4689_v4 = vperm.slane %v10801_v33, %v8278_v61 }
0x2565   :  { %v10811_v55 = vpop.xlane.xlu0 %4637 }
0x2566   :  { %v10805_v18 = vpop.xlane.xlu2 %4631  ;;  %v4694_v7 = vperm.slane %v10811_v55, %v8273_v9 }
0x2567   :  { %v4691_v26 = vperm.slane %v10805_v18, %v8273_v9 }
0x256d   :  { %v10817_v32 = vpop.xlane.xlu0 %4643 }
0x256e   :  { %v10807_v50 = vpop.xlane.xlu2 %4640  ;;  %v10809_v56 = vpop.xlane.xlu1 %4625 }
0x256f   :  { %v4688_v1 = vperm.slane %v10809_v56, %v8273_v9  ;;  %v4695_v15 = vperm.slane %v10807_v50, %v8278_v61 }
0x2571   :  { %v4690_v17 = vsel %vm13731_vm1, %v4689_v4, %v4688_v1  ;;  %v4696_v1 = vsel %vm13733_vm9, %v4695_v15, %v4694_v7  ;;  %v4697_v4 = vperm.slane %v10817_v32, %v8273_v9  ;;  %v1271_v7 = vadd.f32 %v7538_v60, %v1270_v57  ;;  %vm13741_vm9 = vmmov %vm13737_vm8 }
0x2572   :  { %vm13739_vm1 = vcmask 1043459  }
0x2575   :  { %v10825_v25 = vpop.xlane.xlu0 %4658 }
0x2576   :  { %v10813_v63 = vpop.xlane.xlu2 %4646  ;;  %v10815_v2 = vpop.xlane.xlu1 %4634 }
0x2577   :  { %v4692_v48 = vperm.slane %v10815_v2, %v8278_v61 }
0x2579   :  { %v4693_v29 = vsel %vm13729_vm13, %v4692_v48, %v4691_v26  ;;  %v4698_v26 = vperm.slane %v10813_v63, %v8278_v61  ;;  %vm1273_vm13 = vweird.f32 %v7538_v60 }
0x257a   :  { %v4712_v37 = vsel %vm13732_vm6, %v4693_v29, %v4690_v17  ;;  %v4704_v29 = vperm.slane %v10825_v25, %v8278_v61  ;;  %vm13740_vm6 = vcmask 1044484  }
0x257b   :  { %v4713_v17 = vsel %vm13734_vm7, %v4696_v1, %v4712_v37  ;;  %v4699_v0 = vsel %vm13736_vm14, %v4698_v26, %v4697_v4  ;;  %vm13742_vm7 = vcmask 1045509   ;;  %vm13743_vm14 = vmmov %vm13737_vm8 }
0x257d   :  { %v10858_v39 = vpop.xlane.xlu0 %4667 }
0x257e   :  { %v10819_v36 = vpop.xlane.xlu2 %4649  ;;  %v10821_v22 = vpop.xlane.xlu1 %4652 }
0x257f   :  { %v4700_v30 = vperm.slane %v10819_v36, %v8273_v9  ;;  %v4701_v48 = vperm.slane %v10821_v22, %v8278_v61 }
0x2581   :  { %v4702_v27 = vsel %vm13735_vm11, %v4701_v48, %v4700_v30  ;;  %v4714_v30 = vsel %vm13739_vm1, %v4699_v0, %v4713_v17  ;;  %v4709_v48 = vperm.slane %v10858_v39, %v8273_v9  ;;  %vm1272_vm11 = vweird.f32 %v1266_v53 }
0x2582   :  { %v4715_v26 = vsel %vm13740_vm6, %v4702_v27, %v4714_v30  ;;  %vm1274_vm15 = vmor %vm1272_vm11, %vm1273_vm13  ;;  %vm13746_vm1 = vcmask 80896  }
0x2583   :  { %v1275_v0 = vsel %vm1274_vm15, %v7538_v60, %v1271_v7 }
0x2586   :  { %v10834_v62 = vpop.xlane.xlu2 %4661  ;;  %v10836_v13 = vpop.xlane.xlu1 %4655 }
0x2587   :  { %13730 = vst [vmem:[#allocation101_spill] sm:$0xff] %v10834_v62  ;;  %v4703_v5 = vperm.slane %v10836_v13, %v8273_v9  ;;  %v4706_v15 = vperm.slane %v10834_v62, %v8273_v9 }
0x2589   :  { %v4705_v14 = vsel %vm13737_vm8, %v4704_v29, %v4703_v5  ;;  %v1278_v5 = vand.u32 2147483648, %v1266_v53  ;;  %v1276_v29 = vand.u32 2147483647, %v1266_v53  ;;  %vm13744_vm8 = vcmask 1046534  }
0x258a   :  { %v4716_v4 = vsel %vm13742_vm7, %v4705_v14, %v4715_v26  ;;  %vm13756_vm7 = vcmask 1041409  }
0x258b   :  { %v1279_v8 = vor.u32 1.1754944e-38, %v1278_v5  ;;  %vm1277_vm6 = vcmp.eq.f32.partialorder %v1276_v29, 8.507059e+37 }
0x258d   :  { %v10883_v27 = vsel %vm1277_vm6, %v1279_v8, %v1275_v0  ;;  %vm13761_vm6 = vcmask 1044484  }
0x258e   :  { %v10863_v41 = vpop.xlane.xlu2 %4670  ;;  %v10865_v38 = vpop.xlane.xlu1 %4664  ;;  %v1283_v0 = vmul.f32 %v10883_v27, %v10345_v31 }
0x258f   :  { %13738 = vst [vmem:[#allocation102_spill] sm:$0xff] %v10863_v41  ;;  %v4710_v37 = vperm.slane %v10863_v41, %v8278_v61  ;;  %v4707_v1 = vperm.slane %v10865_v38, %v8278_v61 }
0x2591   :  { %v4708_v57 = vsel %vm13741_vm9, %v4707_v1, %v4706_v15  ;;  %v4711_v62 = vsel %vm13743_vm14, %v4710_v37, %v4709_v48  ;;  %vm13758_vm14 = vcmask 1042434  }
0x2592   :  { %v4717_v41 = vsel %vm13744_vm8, %v4708_v57, %v4716_v4 }
0x2593   :  { %v4718_v6 = vsel %vm13745_vm4, %v4711_v62, %v4717_v41  ;;  %vm13752_vm4 = vmmov %vm13741_vm9 }
0x2594   :  { %v4720_v17 = vsel %vm13746_vm1, %v4718_v6, -inf  ;;  %vm13753_vm15 = vmmov %vm13752_vm4  ;;  %vm13760_vm1 = vcmask 1043459  }
0x2595   :  { %4721 = vmax.xlane.f32.xlu1 %v4720_v17  ;;  %v3648_v17 = vperm.slane %v10580_v3, 6  ;;  %vm13754_vm13 = vmmov %vm13752_vm4 }
0x2596   :  { %v1286_v15 = vpop.permute.xlu2 %1285  ;;  %vm13755_vm9 = vmmov %vm13752_vm4 }
0x2597   :  { %v1288_v14 = vmul.f32 %v1286_v15, %v10883_v27  ;;  %v3671_v31 = vsub.f32 %v10448_v44, %v3648_v17  ;;  %vm13757_vm11 = vmmov %vm13752_vm4 }
0x2598   :  { %vm13759_vm8 = vmmov %vm13752_vm4 }
0x2599   :  { %1290 = vrot.lane.b32.xlu0 %v1288_v14, %s7753_s30 }
0x2608   :  { %v10887_v53 = vpop.xlane.xlu1 %4721 }
0x2609   :  { %v4724_v37 = vperm.slane %v10887_v53, 0  ;;  %v4725_v1 = vperm.slane %v10887_v53, 1  ;;  %v4726_v8 = vperm.slane %v10887_v53, 2  ;;  %v4727_v57 = vperm.slane %v10887_v53, 3 }
0x260b   :  { %v4740_v41 = vsub.f32 %v10809_v56, %v4724_v37  ;;  %v4741_v6 = vsub.f32 %v10801_v33, %v4724_v37  ;;  %v4742_v62 = vsub.f32 %v10805_v18, %v4725_v1  ;;  %v4743_v48 = vsub.f32 %v10815_v2, %v4725_v1 }
0x260c   :  { %v4745_v26 = vsub.f32 %v10807_v50, %v4726_v8  ;;  %v4744_v18 = vsub.f32 %v10811_v55, %v4726_v8  ;;  %v4746_v2 = vsub.f32 %v10817_v32, %v4727_v57  ;;  %v1291_v50 = vpop.permute.xlu0 %1290  ;;  %v4747_v32 = vsub.f32 %v10813_v63, %v4727_v57 }
0x260d   :  { %v4756_v60 = vmul.f32 1.442695, %v4740_v41  ;;  %v4758_v7 = vmul.f32 1.442695, %v4741_v6  ;;  %v4760_v30 = vmul.f32 1.442695, %v4742_v62  ;;  %v1293_v55 = vadd.f32 %v1291_v50, %v1283_v0 }
0x260e   :  { %v4762_v5 = vmul.f32 1.442695, %v4743_v48  ;;  %v4766_v56 = vmul.f32 1.442695, %v4745_v26  ;;  %v4764_v15 = vmul.f32 1.442695, %v4744_v18  ;;  %v3670_v41 = vsub.f32 %v10490_v47, %v3648_v17 }
0x260f   :  { %7539 = vpow2.f32 %v4756_v60  ;;  %v4768_v14 = vmul.f32 1.442695, %v4746_v2  ;;  %v4728_v62 = vperm.slane %v10887_v53, 4  ;;  %v4770_v8 = vmul.f32 1.442695, %v4747_v32 }
0x2610   :  { %7541 = vpow2.f32 %v4758_v7  ;;  %v3698_v6 = vmul.f32 1.442695, %v3670_v41  ;;  %v3649_v7 = vperm.slane %v10580_v3, 7  ;;  %v3700_v47 = vmul.f32 1.442695, %v3671_v31 }
0x2611   :  { %7543 = vpow2.f32 %v4760_v30  ;;  %v4748_v63 = vsub.f32 %v10819_v36, %v4728_v62  ;;  %v4749_v44 = vsub.f32 %v10821_v22, %v4728_v62  ;;  %v4730_v17 = vperm.slane %v10887_v53, 6 }
0x2612   :  { %7545 = vpow2.f32 %v4762_v5  ;;  %v3672_v26 = vsub.f32 %v10477_v49, %v3649_v7  ;;  %v4729_v5 = vperm.slane %v10887_v53, 5  ;;  %v3673_v50 = vsub.f32 %v10484_v52, %v3649_v7 }
0x2613   :  { %7547 = vpow2.f32 %v4766_v56  ;;  %v4772_v3 = vmul.f32 1.442695, %v4748_v63  ;;  %v4774_v57 = vmul.f32 1.442695, %v4749_v44  ;;  %v4731_v52 = vperm.slane %v10887_v53, 7  ;;  %v13837_v53 = vld [vmem:[#allocation56_spill] sm:$0xff] }
0x2614   :  { %7549 = vpow2.f32 %v4764_v15  ;;  %v3702_v36 = vmul.f32 1.442695, %v3672_v26  ;;  %v4750_v49 = vsub.f32 %v10836_v13, %v4729_v5  ;;  %v4751_v22 = vsub.f32 %v10825_v25, %v4729_v5 }
0x2615   :  { %v10898_v4 = vpop.eup %7539  ;;  %7551 = vtanh.f32 %v1293_v55  ;;  %v3704_v0 = vmul.f32 1.442695, %v3673_v50  ;;  %v4753_v13 = vsub.f32 %v10865_v38, %v4730_v17  ;;  %v4754_v25 = vsub.f32 %v10858_v39, %v4731_v52 }
0x2616   :  { %v10900_v33 = vpop.eup %7541  ;;  %4805 = vperm.xlu0 %7217, %v10898_v4   ;;  %7553 = vpow2.f32 %v4768_v14  ;;  %v4776_v15 = vmul.f32 1.442695, %v4750_v49  ;;  %v4778_v14 = vmul.f32 1.442695, %v4751_v22  ;;  %v4313_v63 = vperm.slane %v10717_v16, %v8273_v9 }
0x2617   :  { %v10904_v29 = vpop.eup %7543  ;;  %4808 = vperm.xlu2 %7216, %v10900_v33   ;;  %7555 = vpow2.f32 %v3698_v6  ;;  %v4782_v31 = vmul.f32 1.442695, %v4753_v13  ;;  %v4784_v62 = vmul.f32 1.442695, %v4754_v25  ;;  %v4310_v44 = vperm.slane %v10699_v45, %v8273_v9 }
0x2618   :  { %4811 = vperm.xlu1 %7215, %v10904_v29   ;;  %v10912_v37 = vpop.eup %7545  ;;  %7557 = vpow2.f32 %v4770_v8  ;;  %v4320_v26 = vperm.slane %v10757_v28, %v8278_v61  ;;  %v4323_v5 = vperm.slane %v10766_v35, %v8278_v61  ;;  %v4325_v45 = vperm.slane %v10773_v12, %v8273_v9 }
0x2619   :  { %v10914_v1 = vpop.eup %7547  ;;  %7559 = vpow2.f32 %v3700_v47  ;;  %v4314_v47 = vperm.slane %v10731_v58, %v8278_v61  ;;  %v4311_v58 = vperm.slane %v10751_v19, %v8278_v61  ;;  %v4322_v28 = vperm.slane %v10755_v34, %v8273_v9 }
0x261a   :  { %v10922_v60 = vpop.eup %7549  ;;  %7561 = vpow2.f32 %v4772_v3  ;;  %v4317_v3 = vperm.slane %v10759_v23, %v8278_v61  ;;  %v4326_v35 = vperm.slane %v10768_v42, %v8278_v61  ;;  %v4332_v34 = vperm.slane %v10781_v21, %v8278_v61 }
0x261b   :  { %v7552_v30 = vpop.eup %7551  ;;  %7563 = vpow2.f32 %v4774_v57  ;;  %v4315_v16 = vsel %vm13752_vm4, %v4314_v47, %v4313_v63  ;;  %v4312_v23 = vsel %vm13754_vm13, %v4311_v58, %v4310_v44  ;;  %v4329_v49 = vperm.slane %v10764_v51, %v8278_v61  ;;  %vm13764_vm13 = vmmov %vm13759_vm8 }
0x261c   :  { %v10925_v48 = vpop.eup %7553  ;;  %7565 = vpow2.f32 %v3702_v36  ;;  %v4334_v36 = vsel %vm13756_vm7, %v4315_v16, %v4312_v23  ;;  %v4327_v12 = vsel %vm13759_vm8, %v4326_v35, %v4325_v45  ;;  %v4331_v42 = vperm.slane %v10771_v24, %v8273_v9 }
0x261d   :  { %v10934_v56 = vpop.eup %7555  ;;  %7567 = vpow2.f32 %v3704_v0  ;;  %vm13762_vm4 = vcmask 1045509   ;;  %vm13766_vm7 = vcmask 1047559  }
0x261e   :  { %4814 = vperm.xlu0 %7217, %v10912_v37   ;;  %v10936_v18 = vpop.eup %7557  ;;  %7569 = vpow2.f32 %v4776_v15  ;;  %v4328_v15 = vperm.slane %v10775_v54, %v8273_v9 }
0x261f   :  { %4820 = vperm.xlu2 %7216, %v10914_v1   ;;  %v10938_v2 = vpop.eup %7559  ;;  %7571 = vpow2.f32 %v4778_v14 }
0x2620   :  { %1296 = vrot.lane.b32.xlu1 %v7552_v30, %s7752_s27  ;;  %13747 = vst [vmem:[#allocation103_spill] sm:$0xff] %v10938_v2  ;;  %v10947_v55 = vpop.eup %7561  ;;  %7573 = vpow2.f32 %v4782_v31  ;;  %v4316_v30 = vperm.slane %v10749_v43, %v8273_v9  ;;  %v4319_v43 = vperm.slane %v10747_v46, %v8273_v9  ;;  %v4324_v46 = vsel %vm13757_vm11, %v4323_v5, %v4322_v28 }
0x2621   :  { %v10950_v41 = vpop.eup %7563  ;;  %7575 = vpow2.f32 %v4784_v62  ;;  %v4330_v25 = vsel %vm13764_vm13, %v4329_v49, %v4328_v15  ;;  %vm13767_vm11 = vcmask 80896   ;;  %vm13773_vm13 = vcmask 1043459  }
0x2622   :  { %v10952_v32 = vpop.eup %7565  ;;  %v4318_v57 = vsel %vm13753_vm15, %v4317_v3, %v4316_v30  ;;  %v4321_v19 = vsel %vm13755_vm9, %v4320_v26, %v4319_v43  ;;  %vm13763_vm15 = vmmov %vm13759_vm8  ;;  %vm13765_vm9 = vcmask 1046534   ;;  %v3771_v15 = vperm.slane %v10777_v10, %v8278_v61 }
0x2623   :  { %13748 = vst [vmem:[#allocation104_spill] sm:$0xff] %v10952_v32  ;;  %v10963_v6 = vpop.eup %7567  ;;  %v4335_v50 = vsel %vm13758_vm14, %v4318_v57, %v4334_v36  ;;  %v4333_v13 = vsel %vm13763_vm15, %v4332_v34, %v4331_v42  ;;  %vm13768_vm14 = vmmov %vm13759_vm8 }
0x2624   :  { %v10965_v8 = vpop.eup %7569  ;;  %v4336_v22 = vsel %vm13760_vm1, %v4321_v19, %v4335_v50  ;;  %vm13769_vm1 = vcmask 1041409  }
0x2625   :  { %v10967_v7 = vpop.eup %7571  ;;  %v4337_v0 = vsel %vm13761_vm6, %v4324_v46, %v4336_v22  ;;  %vm13770_vm6 = vmmov %vm13759_vm8 }
0x2626   :  { %4817 = vperm.xlu0 %7217, %v10922_v60   ;;  %13749 = vst [vmem:[#allocation105_spill] sm:$0xff] %v10967_v7  ;;  %v10972_v38 = vpop.eup %7573  ;;  %v4338_v14 = vsel %vm13762_vm4, %v4327_v12, %v4337_v0  ;;  %vm13771_vm4 = vcmask 1042434   ;;  %vm13772_vm15 = vmmov %vm13770_vm6  ;;  %v3773_v0 = vperm.slane %v10785_v59, %v8273_v9 }
0x2627   :  { %4823 = vperm.xlu2 %7216, %v10925_v48   ;;  %13750 = vst [vmem:[#allocation106_spill] sm:$0xff] %v10972_v38  ;;  %v10974_v39 = vpop.eup %7575  ;;  %v4339_v21 = vsel %vm13765_vm9, %v4330_v25, %v4338_v14  ;;  %v3777_v14 = vperm.slane %v10791_v40, %v8278_v61  ;;  %v3770_v25 = vperm.slane %v10779_v11, %v8273_v9  ;;  %vm13778_vm9 = vmmov %vm13770_vm6 }
0x2628   :  { %4826 = vperm.xlu1 %7215, %v10936_v18   ;;  %13751 = vst [vmem:[#allocation107_spill] sm:$0xff] %v10974_v39  ;;  %v4340_v51 = vsel %vm13766_vm7, %v4333_v13, %v4339_v21  ;;  %v3776_v13 = vperm.slane %v10783_v20, %v8273_v9  ;;  %v13774_v21 = vld [vmem:[#allocation94_spill] sm:$0xff]  ;;  %v13777_v20 = vld [vmem:[#allocation96_spill] sm:$0xff]  ;;  %vm13779_vm7 = vmmov %vm13770_vm6 }
0x2629   :  { %v4342_v31 = vsel %vm13767_vm11, %v4340_v51, 0.0  ;;  %v3774_v51 = vperm.slane %v13774_v21, %v8278_v61  ;;  %vm13781_vm11 = vmmov %vm13770_vm6 }
0x262b   :  { %v3775_v11 = vsel %vm13778_vm9, %v3774_v51, %v3773_v0 }
0x262e   :  { %3759 = vperm.xlu0 %7217, %v10934_v56  }
0x262f   :  { %3762 = vperm.xlu2 %7216, %v10938_v2  }
0x2630   :  { %4829 = vperm.xlu1 %7215, %v10947_v55  }
0x2636   :  { %4832 = vperm.xlu0 %7217, %v10950_v41  }
0x2637   :  { %3765 = vperm.xlu2 %7216, %v10952_v32  }
0x2638   :  { %3768 = vperm.xlu1 %7215, %v10963_v6  }
0x263e   :  { %4835 = vperm.xlu0 %7217, %v10965_v8  }
0x263f   :  { %4838 = vperm.xlu2 %7216, %v10967_v7  }
0x2646   :  { %4844 = vperm.xlu0 %7217, %v10972_v38  }
0x2647   :  { %4847 = vperm.xlu2 %7216, %v10974_v39  }
0x2670   :  { %4343 = vadd.xlane.f32.xlu0 %v4342_v31  ;;  %v13775_v31 = vld [vmem:[#allocation95_spill] sm:$0xff] }
0x2671   :  { %v4809_v62 = vpop.permute.xlu2 %4808 }
0x2672   :  { %v4853_v30 = vperm.slane %v4809_v62, %v8278_v61  ;;  %v3780_v62 = vperm.slane %v13775_v31, %v8278_v61 }
0x2679   :  { %v4821_v24 = vpop.permute.xlu2 %4820 }
0x267a   :  { %v4859_v57 = vperm.slane %v4821_v24, %v8278_v61 }
0x2681   :  { %v4824_v26 = vpop.permute.xlu2 %4823 }
0x2682   :  { %v4861_v34 = vperm.slane %v4824_v26, %v8273_v9 }
0x2688   :  { %v4806_v47 = vpop.permute.xlu0 %4805 }
0x2689   :  { %v4852_v54 = vperm.slane %v4806_v47, %v8273_v9  ;;  %v3763_v19 = vpop.permute.xlu2 %3762  ;;  %v13776_v47 = vld [vmem:[#allocation97_spill] sm:$0xff] }
0x268a   :  { %v4812_v44 = vpop.permute.xlu1 %4811  ;;  %v3783_v10 = vperm.slane %v13776_v47, %v8278_v61 }
0x268b   :  { %v4854_v63 = vsel %vm13768_vm14, %v4853_v30, %v4852_v54  ;;  %v4855_v5 = vperm.slane %v4812_v44, %v8273_v9  ;;  %v3779_v54 = vperm.slane %v13777_v20, %v8273_v9  ;;  %v13780_v44 = vld [vmem:[#allocation99_spill] sm:$0xff]  ;;  %vm13783_vm14 = vmmov %vm13770_vm6 }
0x268c   :  { %v3782_v26 = vperm.slane %v13780_v44, %v8273_v9 }
0x2690   :  { %v4815_v3 = vpop.permute.xlu0 %4814 }
0x2691   :  { %v4856_v58 = vperm.slane %v4815_v3, %v8278_v61  ;;  %v3766_v42 = vpop.permute.xlu2 %3765  ;;  %v3778_v3 = vsel %vm13781_vm11, %v3777_v14, %v3776_v13 }
0x2692   :  { %v1297_v45 = vpop.permute.xlu1 %1296  ;;  %v3791_v14 = vperm.slane %v3766_v42, %v8273_v9 }
0x2693   :  { %v4857_v43 = vsel %vm13759_vm8, %v4856_v58, %v4855_v5  ;;  %v1299_v23 = vmul.f32 %v1297_v45, %v10883_v27  ;;  %v13782_v5 = vld [vmem:[#allocation100_spill] sm:$0xff]  ;;  %vm13784_vm8 = vmmov %vm13770_vm6 }
0x2694   :  { %v4876_v16 = vsel %vm13769_vm1, %v4857_v43, %v4854_v63  ;;  %v3772_v63 = vsel %vm13779_vm7, %v3771_v15, %v3770_v25  ;;  %v3785_v58 = vperm.slane %v13782_v5, %v8273_v9  ;;  %vm13785_vm1 = vcmask 1044484  }
0x2695   :  { %1301 = vrot.lane.b32.xlu2 %v1299_v23, %s7753_s30  ;;  %v13787_v23 = vld [vmem:[#allocation98_spill] sm:$0xff] }
0x2698   :  { %v4818_v28 = vpop.permute.xlu0 %4817 }
0x2699   :  { %v4858_v35 = vperm.slane %v4818_v28, %v8273_v9 }
0x269a   :  { %v4827_v50 = vpop.permute.xlu1 %4826 }
0x269b   :  { %v4860_v36 = vsel %vm13770_vm6, %v4859_v57, %v4858_v35  ;;  %v4862_v49 = vperm.slane %v4827_v50, %v8278_v61  ;;  %vm13786_vm6 = vcmask 1041409   ;;  %v3786_v35 = vperm.slane %v13787_v23, %v8278_v61 }
0x269c   :  { %v4877_v46 = vsel %vm13771_vm4, %v4860_v36, %v4876_v16  ;;  %v3781_v16 = vsel %vm13784_vm8, %v3780_v62, %v3779_v54  ;;  %v3794_v57 = vsel %vm13786_vm6, %v3775_v11, %v3772_v63  ;;  %vm13788_vm4 = vmmov %vm13779_vm7  ;;  %v3789_v50 = vperm.slane %v3763_v19, %v8278_v61  ;;  %v13801_v63 = vld [vmem:[#allocation79_spill] sm:$0xff] }
0x269d   :  { %v4863_v22 = vsel %vm13772_vm15, %v4862_v49, %v4861_v34  ;;  %v3784_v36 = vsel %vm13788_vm4, %v3783_v10, %v3782_v26  ;;  %vm13789_vm15 = vcmask 1042434   ;;  %v4839_v34 = vpop.permute.xlu2 %4838  ;;  %vm13790_vm9 = vmmov %vm13788_vm4  ;;  %v13802_v26 = vld [vmem:[#allocation84_spill] sm:$0xff] }
0x269e   :  { %v4878_v27 = vsel %vm13773_vm13, %v4863_v22, %v4877_v46  ;;  %v3795_v46 = vsel %vm13789_vm15, %v3778_v3, %v3794_v57  ;;  %v3787_v22 = vsel %vm13790_vm9, %v3786_v35, %v3785_v58  ;;  %vm13791_vm7 = vmmov %vm13785_vm1  ;;  %v4868_v13 = vperm.slane %v4839_v34, %v8278_v61 }
0x269f   :  { %v3796_v49 = vsel %vm13773_vm13, %v3781_v16, %v3795_v46  ;;  %vm13792_vm11 = vmmov %vm13788_vm4  ;;  %vm13799_vm13 = vcmask 80896   ;;  %vm13800_vm9 = vcmask 261120  }
0x26a0   :  { %v3760_v12 = vpop.permute.xlu0 %3759  ;;  %vm13794_vm8 = vmmov %vm13788_vm4 }
0x26a1   :  { %v3788_v45 = vperm.slane %v3760_v12, %v8273_v9  ;;  %v3797_v12 = vsel %vm13791_vm7, %v3784_v36, %v3796_v49  ;;  %vm13796_vm6 = vmmov %vm13788_vm4  ;;  %vm13797_vm4 = vcmask 1047559   ;;  %vm13803_vm7 = vcmask 254976   ;;  %v13807_v36 = vld [vmem:[#allocation83_spill] sm:$0xff] }
0x26a2   :  { %v4830_v24 = vpop.permute.xlu1 %4829 }
0x26a3   :  { %v4864_v30 = vperm.slane %v4830_v24, %v8273_v9 }
0x26a5   :  { %v11097_v47 = vpop.permute.xlu2 %4847 }
0x26a8   :  { %v4833_v59 = vpop.permute.xlu0 %4832 }
0x26a9   :  { %v4865_v40 = vperm.slane %v4833_v59, %v8278_v61 }
0x26aa   :  { %v3769_v0 = vpop.permute.xlu1 %3768 }
0x26ab   :  { %v4866_v43 = vsel %vm13783_vm14, %v4865_v40, %v4864_v30  ;;  %v3792_v25 = vperm.slane %v3769_v0, %v8278_v61  ;;  %vm13793_vm14 = vcmask 1045509  }
0x26ac   :  { %v4879_v28 = vsel %vm13785_vm1, %v4866_v43, %v4878_v27  ;;  %v3790_v27 = vsel %vm13792_vm11, %v3789_v50, %v3788_v45  ;;  %v3798_v19 = vsel %vm13793_vm14, %v3787_v22, %v3797_v12  ;;  %vm13795_vm1 = vcmask 1046534   ;;  %vm13798_vm15 = vmmov %vm13793_vm14  ;;  %v13805_v45 = vld [vmem:[#allocation81_spill] sm:$0xff]  ;;  %v13808_v50 = vld [vmem:[#allocation87_spill] sm:$0xff] }
0x26ad   :  { %v3793_v51 = vsel %vm13794_vm8, %v3792_v25, %v3791_v14  ;;  %v3799_v31 = vsel %vm13795_vm1, %v3790_v27, %v3798_v19  ;;  %vm13804_vm11 = vmmov %vm13800_vm9  ;;  %v13809_v22 = vld [vmem:[#allocation86_spill] sm:$0xff]  ;;  %v13814_v19 = vld [vmem:[#allocation80_spill] sm:$0xff] }
0x26ae   :  { %v3800_v24 = vsel %vm13797_vm4, %v3793_v51, %v3799_v31  ;;  %vm13806_vm14 = vmmov %vm13800_vm9  ;;  %v13813_v25 = vld [vmem:[#allocation82_spill] sm:$0xff] }
0x26af   :  { %v3802_v42 = vsel %vm13799_vm13, %v3800_v24, 0.0  ;;  %vm13810_vm8 = vmmov %vm13803_vm7  ;;  %v13815_v24 = vld [vmem:[#allocation88_spill] sm:$0xff] }
0x26b0   :  { %v4836_v15 = vpop.permute.xlu0 %4835  ;;  %3803 = vadd.xlane.f32.xlu1 %v3802_v42  ;;  %vm13811_vm1 = vmmov %vm13803_vm7 }
0x26b1   :  { %v4867_v21 = vperm.slane %v4836_v15, %v8273_v9  ;;  %vm13816_vm4 = vmmov %vm13800_vm9 }
0x26b2   :  { %vm13818_vm13 = vmmov %vm13816_vm4 }
0x26b3   :  { %v4869_v62 = vsel %vm13796_vm6, %v4868_v13, %v4867_v21  ;;  %vm13812_vm6 = vmmov %vm13811_vm1 }
0x26b4   :  { %v11094_v59 = vsel %vm13798_vm15, %v4869_v62, %v4879_v28  ;;  %vm13817_vm15 = vmmov %vm13816_vm4 }
0x26b8   :  { %v11105_v11 = vpop.permute.xlu0 %4844 }
0x26e3   :  { %v4344_v49 = vpop.xlane.xlu0 %4343 }
0x26e4   :  { %7577 = vrcp.f32 %v4344_v49 }
0x26ea   :  { %v7578_v62 = vpop.eup %7577 }
0x26ef   :  { %v1302_v10 = vpop.permute.xlu2 %1301 }
0x26f0   :  { %1304 = vst.msk [vmem:[#allocation3 + $0x38] sm:$0xff] %vm13800_vm9, %v1302_v10  ;;  %vm13822_vm9 = vmmov %vm13811_vm1 }
0x26f7   :  { %v11100_v30 = vld [vmem:[#allocation3 + $0x38] sm:$0xff] }
0x26f8   :  { %v5132_v40 = vperm.slane %v11100_v30, 0  ;;  %v5125_v20 = vrot.slane %v11100_v30, 1  ;;  %v5126_v54 = vrot.slane %v11100_v30, 2  ;;  %v5127_v58 = vrot.slane %v11100_v30, 3 }
0x26f9   :  { %v5128_v27 = vrot.slane %v11100_v30, 4  ;;  %v5129_v31 = vrot.slane %v11100_v30, 5  ;;  %v5130_v10 = vrot.slane %v11100_v30, 6 }
0x26fa   :  { %v5149_v44 = vmul.f32 %v13801_v63, %v5132_v40  ;;  %v5148_v3 = vmul.f32 %v13802_v26, %v5132_v40  ;;  %v5133_v5 = vperm.slane %v5125_v20, 0  ;;  %v5134_v57 = vperm.slane %v5126_v54, 0 }
0x26fb   :  { %v5135_v35 = vperm.slane %v5127_v58, 0  ;;  %v5136_v13 = vperm.slane %v5128_v27, 0  ;;  %v5137_v54 = vperm.slane %v5129_v31, 0  ;;  %v4346_v63 = vmul.f32 %v7578_v62, %v4344_v49  ;;  %v13829_v31 = vld [vmem:[#allocation52_spill] sm:$0xff] }
0x26fc   :  { %v5167_v43 = vsel %vm13803_vm7, %v5149_v44, 0.0  ;;  %v5164_v16 = vsel %vm13804_vm11, %v5148_v3, 0.0  ;;  %v5150_v28 = vmul.f32 %v13805_v45, %v5133_v5  ;;  %v5153_v46 = vmul.f32 %v13807_v36, %v5134_v57  ;;  %vm13823_vm7 = vmmov %vm13811_vm1 }
0x26fd   :  { %5168 = vadd.xlane.f32.xlu0 %v5167_v43  ;;  %5165 = vadd.xlane.f32.xlu1 %v5164_v16  ;;  %v5151_v34 = vmul.f32 %v13808_v50, %v5133_v5  ;;  %v5155_v12 = vmul.f32 %v13809_v22, %v5135_v35  ;;  %v5154_v21 = vmul.f32 %v13813_v25, %v5135_v35  ;;  %v5138_v3 = vperm.slane %v5130_v10, 0  ;;  %v13819_v5 = vld [vmem:[#allocation85_spill] sm:$0xff]  ;;  %vm13824_vm11 = vmmov %vm13816_vm4  ;;  %v13825_v50 = vld [vmem:[#allocation91_spill] sm:$0xff] }
0x26fe   :  { %v5170_v23 = vsel %vm13806_vm14, %v5150_v28, 0.0  ;;  %v5179_v0 = vsel %vm13810_vm8, %v5153_v46, 0.0  ;;  %v5152_v51 = vmul.f32 %v13814_v19, %v5134_v57  ;;  %v5156_v42 = vmul.f32 %v13815_v24, %v5136_v13  ;;  %v13820_v43 = vld [vmem:[#allocation89_spill] sm:$0xff]  ;;  %v13821_v28 = vld [vmem:[#allocation90_spill] sm:$0xff]  ;;  %v13831_v10 = vld [vmem:[#allocation55_spill] sm:$0xff] }
0x26ff   :  { %5171 = vadd.xlane.f32.xlu2 %v5170_v23  ;;  %v5173_v15 = vsel %vm13811_vm1, %v5151_v34, 0.0  ;;  %v5185_v14 = vsel %vm13812_vm6, %v5155_v12, 0.0  ;;  %v5182_v40 = vsel %vm13816_vm4, %v5154_v21, 0.0  ;;  %v5159_v58 = vmul.f32 %v13819_v5, %v5137_v54  ;;  %vm13826_vm6 = vmmov %vm13816_vm4  ;;  %v13827_v25 = vld [vmem:[#allocation93_spill] sm:$0xff] }
0x2700   :  { %v5176_v20 = vsel %vm13817_vm15, %v5152_v51, 0.0  ;;  %v5188_v44 = vsel %vm13818_vm13, %v5156_v42, 0.0  ;;  %v5157_v16 = vmul.f32 %v13820_v43, %v5136_v13  ;;  %v4347_v45 = vsub.f32 1.0, %v4346_v63  ;;  %vm13828_vm15 = vmmov %vm13823_vm7  ;;  %v13832_v63 = vld [vmem:[#allocation102_spill] sm:$0xff] }
0x2701   :  { %v5160_v57 = vmul.f32 %v13821_v28, %v5138_v3  ;;  %v5197_v23 = vsel %vm13822_vm9, %v5159_v58, 0.0  ;;  %v5158_v34 = vmul.f32 %v13825_v50, %v5137_v54  ;;  %vm4351_vm14 = vweird.f32 %v7578_v62  ;;  %vm13838_vm13 = vmmov %vm13826_vm6 }
0x2702   :  { %v5191_v35 = vsel %vm13823_vm7, %v5157_v16, 0.0  ;;  %v4348_v36 = vmul.f32 %v7578_v62, %v4347_v45  ;;  %v4356_v12 = vand.u32 2147483648, %v4344_v49  ;;  %vm4350_vm8 = vweird.f32 %v4344_v49  ;;  %v13836_v16 = vld [vmem:[#allocation53_spill] sm:$0xff] }
0x2703   :  { %v5200_v46 = vsel %vm13824_vm11, %v5160_v57, 0.0  ;;  %v4354_v27 = vand.u32 2147483647, %v4344_v49  ;;  %vm4352_vm1 = vmor %vm4350_vm8, %vm4351_vm14  ;;  %v5161_v21 = vmul.f32 %v13827_v25, %v5138_v3  ;;  %v13833_v3 = vld [vmem:[#allocation58_spill] sm:$0xff]  ;;  %vm13840_vm9 = vcmask 130112  }
0x2704   :  { %v4349_v22 = vadd.f32 %v7578_v62, %v4348_v36  ;;  %vm13841_vm7 = vcmask 1046534   ;;  %vm13842_vm11 = vmmov %vm13840_vm9  ;;  %vm13843_vm14 = vcmask 1047559   ;;  %vm13844_vm8 = vcmask 80896  }
0x2705   :  { %5180 = vadd.xlane.f32.xlu0 %v5179_v0  ;;  %5174 = vadd.xlane.f32.xlu1 %v5173_v15  ;;  %v5194_v0 = vsel %vm13826_vm6, %v5158_v34, 0.0  ;;  %vm4355_vm4 = vcmp.eq.f32.partialorder %v4354_v27, 8.507059e+37  ;;  %v5203_v51 = vsel %vm13828_vm15, %v5161_v21, 0.0  ;;  %v13839_v34 = vld [vmem:[#allocation61_spill] sm:$0xff] }
0x2706   :  { %v4353_v15 = vsel %vm4352_vm1, %v7578_v62, %v4349_v22  ;;  %v13830_v62 = vld [vmem:[#allocation101_spill] sm:$0xff]  ;;  %vm13845_vm1 = vmmov %vm13826_vm6 }
0x2707   :  { %5186 = vadd.xlane.f32.xlu2 %v5185_v14  ;;  %v4357_v14 = vor.u32 1.1754944e-38, %v4356_v12  ;;  %v4752_v42 = vsub.f32 %v13830_v62, %v4730_v17  ;;  %vm13846_vm6 = vmmov %vm13828_vm15 }
0x2709   :  { %v11137_v13 = vsel %vm4355_vm4, %v4357_v14, %v4353_v15  ;;  %vm13851_vm4 = vmmov %vm13846_vm6 }
0x270a   :  { %v4360_v19 = vperm.slane %v11137_v13, 0  ;;  %v4361_v49 = vperm.slane %v11137_v13, 1  ;;  %v4362_v54 = vperm.slane %v11137_v13, 2  ;;  %v4363_v50 = vperm.slane %v11137_v13, 3  ;;  %vm13852_vm15 = vmmov %vm13851_vm4 }
0x270c   :  { %v4376_v24 = vmul.f32 %v13829_v31, %v4360_v19  ;;  %v4380_v5 = vmul.f32 %v13833_v3, %v4362_v54  ;;  %v4377_v45 = vmul.f32 %v13836_v16, %v4360_v19  ;;  %v4381_v28 = vmul.f32 %v13837_v53, %v4362_v54 }
0x270d   :  { %5183 = vadd.xlane.f32.xlu0 %v5182_v40  ;;  %5177 = vadd.xlane.f32.xlu1 %v5176_v20  ;;  %v4379_v40 = vmul.f32 %v13831_v10, %v4361_v49  ;;  %v4780_v20 = vmul.f32 1.442695, %v4752_v42  ;;  %v4383_v22 = vmul.f32 %v13839_v34, %v4363_v50  ;;  %v4871_v31 = vperm.slane %v11105_v11, %v8278_v61  ;;  %v13849_v34 = vld [vmem:[#allocation57_spill] sm:$0xff] }
0x270f   :  { %5189 = vadd.xlane.f32.xlu2 %v5188_v44  ;;  %v4755_v44 = vsub.f32 %v13832_v63, %v4731_v52  ;;  %7579 = vpow2.f32 %v4780_v20  ;;  %v5131_v52 = vrot.slane %v11100_v30, 7  ;;  %v4873_v20 = vperm.slane %v11097_v47, %v8273_v9 }
0x2711   :  { %v4786_v58 = vmul.f32 1.442695, %v4755_v44  ;;  %v5139_v57 = vperm.slane %v5131_v52, 0 }
0x2713   :  { %7581 = vpow2.f32 %v4786_v58 }
0x2715   :  { %5198 = vadd.xlane.f32.xlu0 %v5197_v23  ;;  %5192 = vadd.xlane.f32.xlu1 %v5191_v35  ;;  %v11153_v43 = vpop.eup %7579  ;;  %v11165_v23 = vld [vmem:[%s13055_s3 + $0x70] sm:$0xff] }
0x2716   :  { %13834 = vst [vmem:[#allocation94_spill] sm:$0xff] %v11153_v43  ;;  %v5162_v35 = vmul.f32 %v11165_v23, %v5139_v57 }
0x2717   :  { %5201 = vadd.xlane.f32.xlu2 %v5200_v46 }
0x2718   :  { %v5206_v36 = vsel %vm13838_vm13, %v5162_v35, 0.0  ;;  %v13848_v35 = vld [vmem:[#allocation54_spill] sm:$0xff]  ;;  %vm13853_vm13 = vmmov %vm13845_vm1 }
0x2719   :  { %v11156_v17 = vpop.eup %7581 }
0x271a   :  { %13835 = vst [vmem:[#allocation95_spill] sm:$0xff] %v11156_v17 }
0x271d   :  { %5195 = vadd.xlane.f32.xlu1 %v5194_v0 }
0x2723   :  { %v11169_v46 = vpop.xlane.xlu1 %3803 }
0x2725   :  { %5204 = vadd.xlane.f32.xlu1 %v5203_v51 }
0x2729   :  { %4394 = vperm.xlu0 %7217, %v4376_v24  }
0x2731   :  { %4409 = vperm.xlu0 %7217, %v4379_v40  }
0x2739   :  { %4414 = vperm.xlu0 %7217, %v4380_v5  }
0x273e   :  { %4841 = vperm.xlu1 %7215, %v11153_v43  }
0x2746   :  { %4850 = vperm.xlu1 %7215, %v11156_v17  }
0x274e   :  { %4399 = vperm.xlu1 %7215, %v4377_v45  }
0x2756   :  { %4419 = vperm.xlu1 %7215, %v4381_v28   ;;  %v13847_v28 = vld [vmem:[#allocation51_spill] sm:$0xff] }
0x2757   :  { %v4378_v52 = vmul.f32 %v13847_v28, %v4361_v49 }
0x2763   :  { %5207 = vadd.xlane.f32.xlu0 %v5206_v36  ;;  %v4382_v36 = vmul.f32 %v13848_v35, %v4363_v50 }
0x2770   :  { %v11173_v12 = vpop.xlane.xlu1 %5165  ;;  %v11181_v15 = vpop.xlane.xlu0 %5168 }
0x2777   :  { %4429 = vperm.xlu0 %7217, %v4383_v22  }
0x2778   :  { %v11175_v30 = vpop.xlane.xlu1 %5174  ;;  %v11185_v25 = vpop.xlane.xlu0 %5180 }
0x2780   :  { %v11177_v27 = vpop.xlane.xlu1 %5177  ;;  %v11189_v19 = vpop.xlane.xlu0 %5183 }
0x2788   :  { %v11179_v0 = vpop.xlane.xlu1 %5192  ;;  %v11195_v42 = vpop.xlane.xlu0 %5198 }
0x2790   :  { %v11183_v14 = vpop.xlane.xlu1 %5195 }
0x2798   :  { %v11187_v21 = vpop.xlane.xlu1 %5204 }
0x279b   :  { %v4395_v44 = vpop.permute.xlu0 %4394 }
0x279c   :  { %v4472_v5 = vmul.f32 %v13802_v26, %v4395_v44  ;;  %v13231_v26 = vperm.slane %v11137_v13, 4  ;;  %v11239_v44 = vld [vmem:[%s13055_s3 + $0x20] sm:$0xff] }
0x279e   :  { %v4488_v16 = vsel %vm13845_vm1, %v4472_v5, 0.0  ;;  %v4384_v22 = vmul.f32 %v13849_v34, %v13231_v26 }
0x27a3   :  { %v4410_v50 = vpop.permute.xlu0 %4409 }
0x27b0   :  { %v4842_v51 = vpop.permute.xlu1 %4841 }
0x27b1   :  { %v4870_v24 = vperm.slane %v4842_v51, %v8273_v9  ;;  %v13850_v51 = vld [vmem:[#allocation92_spill] sm:$0xff] }
0x27b3   :  { %v4872_v62 = vsel %vm13840_vm9, %v4871_v31, %v4870_v24  ;;  %v5163_v31 = vmul.f32 %v13850_v51, %v5139_v57  ;;  %v11221_v24 = vpop.xlane.xlu2 %5171  ;;  %v11257_v51 = vld [vmem:[%s13055_s3 + $0x10] sm:$0xff]  ;;  %vm13854_vm9 = vmmov %vm13851_vm4 }
0x27b4   :  { %v4881_v10 = vsel %vm13841_vm7, %v4872_v62, %v11094_v59  ;;  %v11209_v59 = vld [vmem:[%s13055_s3 + $0x8] sm:$0x3]  ;;  %vm13855_vm7 = vmmov %vm13845_vm1 }
0x27b5   :  { %v5209_v62 = vsel %vm13851_vm4, %v5163_v31, 0.0 }
0x27b8   :  { %v4851_v40 = vpop.permute.xlu1 %4850 }
0x27b9   :  { %v4874_v54 = vperm.slane %v4851_v40, %v8278_v61 }
0x27bb   :  { %v4875_v63 = vsel %vm13842_vm11, %v4874_v54, %v4873_v20  ;;  %v4415_v54 = vpop.permute.xlu0 %4414  ;;  %vm13856_vm11 = vmmov %vm13851_vm4  ;;  %vm13861_vm4 = vcmask 130112  }
0x27bc   :  { %v4882_v11 = vsel %vm13843_vm14, %v4875_v63, %v4881_v10  ;;  %v11224_v10 = vpop.xlane.xlu2 %5186  ;;  %v11233_v63 = vld [vmem:[%s13055_s3 + $0x28] sm:$0x3]  ;;  %vm13857_vm14 = vmmov %vm13845_vm1  ;;  %vm13859_vm1 = vcmask 1042434  }
0x27bd   :  { %v4884_v3 = vsel %vm13844_vm8, %v4882_v11, 0.0  ;;  %v4476_v11 = vmul.f32 %v11239_v44, %v4415_v54  ;;  %vm13858_vm8 = vcmask 1041409  }
0x27be   :  { %4885 = vadd.xlane.f32.xlu2 %v4884_v3 }
0x27bf   :  { %v4506_v5 = vsel %vm13853_vm13, %v4476_v11, 0.0  ;;  %vm13863_vm13 = vmmov %vm13861_vm4 }
0x27c0   :  { %v4400_v58 = vpop.permute.xlu1 %4399 }
0x27c1   :  { %v4473_v47 = vmul.f32 %v11209_v59, %v4400_v58 }
0x27c3   :  { %v4489_v45 = vsel %vm13846_vm6, %v4473_v47, 0.0  ;;  %vm13860_vm6 = vcmask 1043459  }
0x27c4   :  { %v4490_v53 = vadd.f32 %v4489_v45, %v4488_v16  ;;  %v11226_v49 = vpop.xlane.xlu2 %5189 }
0x27c6   :  { %v4491_v16 = vrot.slane %v4490_v53, 4 }
0x27c8   :  { %v4420_v40 = vpop.permute.xlu1 %4419 }
0x27c9   :  { %v4477_v57 = vmul.f32 %v11233_v63, %v4420_v40 }
0x27cb   :  { %v4507_v3 = vsel %vm13852_vm15, %v4477_v57, 0.0  ;;  %vm13862_vm15 = vmmov %vm13861_vm4 }
0x27cc   :  { %v11228_v20 = vpop.xlane.xlu2 %5201  ;;  %v4508_v47 = vadd.f32 %v4507_v3, %v4506_v5 }
0x27ce   :  { %v4509_v28 = vrot.slane %v4508_v47, 4 }
0x27d6   :  { %4404 = vperm.xlu2 %7216, %v4378_v52   ;;  %v11246_v45 = vpop.xlane.xlu0 %5207  ;;  %v11251_v52 = vld [vmem:[%s13055_s3 + $0x18] sm:$0x3] }
0x27d7   :  { %v4475_v35 = vmul.f32 %v11251_v52, %v4410_v50 }
0x27de   :  { %4424 = vperm.xlu2 %7216, %v4382_v36   ;;  %v4492_v36 = vadd.f32 %v4491_v16, %v4490_v53  ;;  %v11265_v53 = vld [vmem:[%s13055_s3 + $0x38] sm:$0x3] }
0x27e0   :  { %v4493_v54 = vrot.slane %v4492_v36, 2 }
0x27e6   :  { %4434 = vperm.xlu2 %7216, %v4384_v22   ;;  %v4510_v22 = vadd.f32 %v4509_v28, %v4508_v47  ;;  %v4494_v47 = vadd.f32 %v4493_v54, %v4492_v36 }
0x27e8   :  { %v4511_v3 = vrot.slane %v4510_v22, 2  ;;  %v4495_v39 = vrot.slane %v4494_v47, 1 }
0x27e9   :  { %v4430_v57 = vpop.permute.xlu0 %4429 }
0x27ea   :  { %v4479_v50 = vmul.f32 %v11265_v53, %v4430_v57 }
0x280f   :  { %5210 = vadd.xlane.f32.xlu2 %v5209_v62  ;;  %v4498_v62 = vsel %vm13854_vm9, %v4475_v35, 0.0  ;;  %v11271_v35 = vld [vmem:[%s13055_s3 + $0x30] sm:$0xff]  ;;  %vm13864_vm9 = vmmov %vm13858_vm8 }
0x2831   :  { %v11244_v58 = vpop.xlane.xlu2 %4885 }
0x2839   :  { %v4405_v34 = vpop.permute.xlu2 %4404 }
0x283a   :  { %v4474_v31 = vmul.f32 %v11257_v51, %v4405_v34  ;;  %v4512_v34 = vadd.f32 %v4511_v3, %v4510_v22 }
0x283c   :  { %v4497_v40 = vsel %vm13855_vm7, %v4474_v31, 0.0  ;;  %v4513_v57 = vrot.slane %v4512_v34, 1  ;;  %vm13865_vm7 = vmmov %vm13861_vm4 }
0x283d   :  { %v4499_v11 = vadd.f32 %v4498_v62, %v4497_v40  ;;  %v4516_v40 = vsel %vm13856_vm11, %v4479_v50, 0.0  ;;  %vm13866_vm11 = vmmov %vm13859_vm1 }
0x283f   :  { %v4500_v5 = vrot.slane %v4499_v11, 4 }
0x2841   :  { %v4501_v16 = vadd.f32 %v4500_v5, %v4499_v11  ;;  %v4425_v28 = vpop.permute.xlu2 %4424  ;;  %v4496_v11 = vadd.f32 %v4495_v39, %v4494_v47  ;;  %v4514_v5 = vadd.f32 %v4513_v57, %v4512_v34  ;;  %v5234_v39 = vperm.slane %v11177_v27, %v8273_v9 }
0x2842   :  { %v4478_v31 = vmul.f32 %v11271_v35, %v4425_v28  ;;  %v5237_v47 = vperm.slane %v11189_v19, %v8273_v9  ;;  %v5241_v34 = vperm.slane %v11179_v0, %v8278_v61  ;;  %v5243_v57 = vperm.slane %v11183_v14, %v8273_v9 }
0x2843   :  { %v4502_v62 = vrot.slane %v4501_v16, 2 }
0x2844   :  { %v4515_v26 = vsel %vm13857_vm14, %v4478_v31, 0.0  ;;  %vm13867_vm14 = vmmov %vm13861_vm4 }
0x2845   :  { %v4503_v7 = vadd.f32 %v4502_v62, %v4501_v16  ;;  %v4517_v17 = vadd.f32 %v4516_v40, %v4515_v26  ;;  %v5232_v26 = vperm.slane %v11175_v30, %v8278_v61  ;;  %v5238_v40 = vperm.slane %v11224_v10, %v8278_v61 }
0x2847   :  { %v4504_v36 = vrot.slane %v4503_v7, 1  ;;  %v4518_v54 = vrot.slane %v4517_v17, 4 }
0x2849   :  { %v4505_v22 = vadd.f32 %v4504_v36, %v4503_v7  ;;  %v4519_v3 = vadd.f32 %v4518_v54, %v4517_v17  ;;  %v5229_v7 = vperm.slane %v11181_v15, %v8278_v61  ;;  %v5228_v17 = vperm.slane %v11173_v12, %v8273_v9 }
0x284a   :  { %v5240_v54 = vperm.slane %v11226_v49, %v8273_v9 }
0x284b   :  { %v4568_v32 = vsel %vm13858_vm8, %v4505_v22, %v4496_v11  ;;  %v4520_v43 = vrot.slane %v4519_v3, 2  ;;  %v5230_v62 = vsel %vm13863_vm13, %v5229_v7, %v5228_v17  ;;  %v5247_v11 = vperm.slane %v11187_v21, %v8278_v61  ;;  %vm13868_vm8 = vmmov %vm13861_vm4 }
0x284c   :  { %v4569_v28 = vsel %vm13859_vm1, %v4514_v5, %v4568_v32  ;;  %v5231_v32 = vperm.slane %v11221_v24, %v8273_v9  ;;  %v5239_v22 = vsel %vm13865_vm7, %v5238_v40, %v5237_v47  ;;  %v5244_v5 = vperm.slane %v11195_v42, %v8278_v61  ;;  %vm13869_vm1 = vmmov %vm13860_vm6 }
0x284d   :  { %v4521_v38 = vadd.f32 %v4520_v43, %v4519_v3  ;;  %vm13875_vm7 = vcmask 1047559  }
0x284e   :  { %v5233_v43 = vsel %vm13861_vm4, %v5232_v26, %v5231_v32  ;;  %v5245_v26 = vsel %vm13868_vm8, %v5244_v5, %v5243_v57  ;;  %vm3810_vm8 = vweird.f32 %v11169_v46 }
0x284f   :  { %v4522_v2 = vrot.slane %v4521_v38, 1  ;;  %v5252_v36 = vsel %vm13864_vm9, %v5233_v43, %v5230_v62  ;;  %vm13874_vm9 = vcmask 1046534  }
0x2851   :  { %v4523_v50 = vadd.f32 %v4522_v2, %v4521_v38  ;;  %v5235_v2 = vperm.slane %v11185_v25, %v8278_v61  ;;  %v11293_v38 = vpop.permute.xlu2 %4434 }
0x2853   :  { %v11279_v31 = vsel %vm13860_vm6, %v4523_v50, %v4569_v28  ;;  %v5236_v16 = vsel %vm13862_vm15, %v5235_v2, %v5234_v39  ;;  %v5242_v28 = vsel %vm13867_vm14, %v5241_v34, %v5240_v54  ;;  %v5246_v50 = vperm.slane %v11228_v20, %v8273_v9  ;;  %vm13870_vm6 = vmmov %vm13861_vm4 }
0x2854   :  { %v5253_v3 = vsel %vm13866_vm11, %v5236_v16, %v5252_v36  ;;  %vm13871_vm4 = vcmask 1044484   ;;  %v5249_v2 = vperm.slane %v11246_v45, %v8273_v9  ;;  %vm13872_vm15 = vcmask 1045509   ;;  %vm13873_vm13 = vmmov %vm13870_vm6 }
0x2855   :  { %v5254_v39 = vsel %vm13869_vm1, %v5239_v22, %v5253_v3  ;;  %v5248_v7 = vsel %vm13870_vm6, %v5247_v11, %v5246_v50  ;;  %vm13876_vm11 = vcmask 80896  }
0x2856   :  { %v5255_v32 = vsel %vm13871_vm4, %v5242_v28, %v5254_v39 }
0x2857   :  { %v5256_v47 = vsel %vm13872_vm15, %v5245_v26, %v5255_v32  ;;  %vm4892_vm15 = vweird.f32 %v11244_v58 }
0x2858   :  { %v5257_v34 = vsel %vm13874_vm9, %v5248_v7, %v5256_v47 }
0x2882   :  { %v11321_v17 = vpop.xlane.xlu2 %5210 }
0x2883   :  { %v5250_v43 = vperm.slane %v11321_v17, %v8278_v61 }
0x2885   :  { %v5251_v16 = vsel %vm13873_vm13, %v5250_v43, %v5249_v2 }
0x2886   :  { %v5258_v62 = vsel %vm13875_vm7, %v5251_v16, %v5257_v34  ;;  %vm13897_vm7 = vcmask 130112  }
0x2887   :  { %v5260_v40 = vsel %vm13876_vm11, %v5258_v62, -inf  ;;  %vm13898_vm11 = vmmov %vm13897_vm7 }
0x2888   :  { %5261 = vmax.xlane.f32.xlu0 %v5260_v40 }
0x28fb   :  { %v11333_v57 = vpop.xlane.xlu0 %5261 }
0x28fc   :  { %v5264_v36 = vperm.slane %v11333_v57, 0  ;;  %v5265_v54 = vperm.slane %v11333_v57, 1  ;;  %v5266_v5 = vperm.slane %v11333_v57, 2  ;;  %v5267_v28 = vperm.slane %v11333_v57, 3 }
0x28fd   :  { %v5269_v40 = vperm.slane %v11333_v57, 5 }
0x28fe   :  { %v5280_v11 = vsub.f32 %v11173_v12, %v5264_v36  ;;  %v5281_v22 = vsub.f32 %v11181_v15, %v5264_v36  ;;  %v5282_v3 = vsub.f32 %v11221_v24, %v5265_v54  ;;  %v5283_v7 = vsub.f32 %v11175_v30, %v5265_v54 }
0x28ff   :  { %v5285_v32 = vsub.f32 %v11185_v25, %v5266_v5  ;;  %v5287_v2 = vsub.f32 %v11224_v10, %v5267_v28  ;;  %v5268_v24 = vperm.slane %v11333_v57, 4  ;;  %v5284_v30 = vsub.f32 %v11177_v27, %v5266_v5 }
0x2900   :  { %v5296_v50 = vmul.f32 1.442695, %v5280_v11  ;;  %v5298_v26 = vmul.f32 1.442695, %v5281_v22  ;;  %v5300_v39 = vmul.f32 1.442695, %v5282_v3  ;;  %v5286_v25 = vsub.f32 %v11189_v19, %v5267_v28 }
0x2901   :  { %v5302_v12 = vmul.f32 1.442695, %v5283_v7  ;;  %v5306_v15 = vmul.f32 1.442695, %v5285_v32  ;;  %v5310_v47 = vmul.f32 1.442695, %v5287_v2  ;;  %v5288_v10 = vsub.f32 %v11226_v49, %v5268_v24 }
0x2902   :  { %7583 = vpow2.f32 %v5296_v50  ;;  %v5304_v62 = vmul.f32 1.442695, %v5284_v30  ;;  %v5308_v36 = vmul.f32 1.442695, %v5286_v25  ;;  %v5270_v11 = vperm.slane %v11333_v57, 6 }
0x2903   :  { %7585 = vpow2.f32 %v5298_v26  ;;  %v5312_v27 = vmul.f32 1.442695, %v5288_v10  ;;  %v5289_v3 = vsub.f32 %v11179_v0, %v5268_v24  ;;  %v5291_v49 = vsub.f32 %v11195_v42, %v5269_v40 }
0x2904   :  { %7587 = vpow2.f32 %v5300_v39  ;;  %v5292_v5 = vsub.f32 %v11228_v20, %v5270_v11  ;;  %v5271_v50 = vperm.slane %v11333_v57, 7  ;;  %v5290_v42 = vsub.f32 %v11183_v14, %v5269_v40 }
0x2905   :  { %7589 = vpow2.f32 %v5302_v12  ;;  %v5314_v28 = vmul.f32 1.442695, %v5289_v3  ;;  %v5318_v26 = vmul.f32 1.442695, %v5291_v49  ;;  %v13877_v3 = vld [vmem:[#allocation59_spill] sm:$0xff] }
0x2906   :  { %7591 = vpow2.f32 %v5306_v15  ;;  %v5320_v7 = vmul.f32 1.442695, %v5292_v5  ;;  %v5294_v20 = vsub.f32 %v11246_v45, %v5271_v50  ;;  %v5295_v57 = vsub.f32 %v11321_v17, %v5271_v50 }
0x2907   :  { %7593 = vpow2.f32 %v5310_v47  ;;  %v5316_v2 = vmul.f32 1.442695, %v5290_v42  ;;  %v5293_v45 = vsub.f32 %v11187_v21, %v5270_v11  ;;  %v13878_v5 = vperm.slane %v11137_v13, 4 }
0x2908   :  { %v11345_v43 = vpop.eup %7583  ;;  %7595 = vpow2.f32 %v5304_v62  ;;  %v5324_v12 = vmul.f32 1.442695, %v5294_v20  ;;  %v5326_v24 = vmul.f32 1.442695, %v5295_v57  ;;  %v4366_v42 = vperm.slane %v11137_v13, 6 }
0x2909   :  { %v11348_v16 = vpop.eup %7585  ;;  %5345 = vperm.xlu2 %7216, %v11345_v43   ;;  %7597 = vpow2.f32 %v5308_v36  ;;  %v5322_v25 = vmul.f32 1.442695, %v5293_v45  ;;  %v4365_v36 = vperm.slane %v11137_v13, 5  ;;  %v3814_v20 = vand.u32 2147483647, %v11169_v46  ;;  %v13881_v45 = vld [vmem:[#allocation62_spill] sm:$0xff] }
0x290a   :  { %v11351_v34 = vpop.eup %7587  ;;  %5348 = vperm.xlu1 %7215, %v11348_v16   ;;  %7599 = vpow2.f32 %v5312_v27 }
0x290b   :  { %5351 = vperm.xlu0 %7217, %v11351_v34   ;;  %v11359_v54 = vpop.eup %7589  ;;  %7601 = vpow2.f32 %v5314_v28  ;;  %v4387_v49 = vmul.f32 %v13877_v3, %v4365_v36  ;;  %v13879_v28 = vld [vmem:[#allocation64_spill] sm:$0xff]  ;;  %vm3815_vm6 = vcmp.eq.f32.partialorder %v3814_v20, 8.507059e+37 }
0x290c   :  { %v11362_v22 = vpop.eup %7591  ;;  %7603 = vpow2.f32 %v5318_v26  ;;  %v4385_v50 = vmul.f32 %v13879_v28, %v13878_v5  ;;  %v13883_v5 = vld [vmem:[#allocation63_spill] sm:$0xff] }
0x290d   :  { %v11365_v19 = vpop.eup %7593  ;;  %7605 = vpow2.f32 %v5320_v7  ;;  %v3816_v7 = vand.u32 2147483648, %v11169_v46 }
0x290e   :  { %v11373_v39 = vpop.eup %7595  ;;  %7607 = vrcp.f32 %v11169_v46 }
0x290f   :  { %v11375_v32 = vpop.eup %7597  ;;  %7609 = vpow2.f32 %v5316_v2  ;;  %v3817_v2 = vor.u32 1.1754944e-38, %v3816_v7  ;;  %v13885_v7 = vld [vmem:[#allocation66_spill] sm:$0xff] }
0x2910   :  { %v11378_v0 = vpop.eup %7599  ;;  %7611 = vpow2.f32 %v5324_v12  ;;  %v13880_v12 = vld [vmem:[#allocation60_spill] sm:$0xff] }
0x2911   :  { %5354 = vperm.xlu2 %7216, %v11359_v54   ;;  %v11386_v15 = vpop.eup %7601  ;;  %7613 = vpow2.f32 %v5326_v24  ;;  %v4389_v24 = vmul.f32 %v13880_v12, %v4366_v42 }
0x2912   :  { %5360 = vperm.xlu1 %7215, %v11362_v22   ;;  %v11388_v47 = vpop.eup %7603  ;;  %7615 = vpow2.f32 %v5322_v25 }
0x2913   :  { %5366 = vperm.xlu0 %7217, %v11365_v19   ;;  %v11391_v14 = vpop.eup %7605  ;;  %7617 = vrcp.f32 %v11244_v58 }
0x2914   :  { %v7608_v17 = vpop.eup %7607 }
0x2915   :  { %v3806_v30 = vmul.f32 %v7608_v17, %v11169_v46  ;;  %v11397_v10 = vpop.eup %7609  ;;  %vm3811_vm14 = vweird.f32 %v7608_v17  ;;  %v4367_v46 = vperm.slane %v11137_v13, 7  ;;  %v13887_v13 = vld [vmem:[#allocation72_spill] sm:$0xff] }
0x2916   :  { %v11399_v62 = vpop.eup %7611  ;;  %vm3812_vm1 = vmor %vm3810_vm8, %vm3811_vm14 }
0x2917   :  { %v11402_v40 = vpop.eup %7613  ;;  %v3807_v21 = vsub.f32 1.0, %v3806_v30  ;;  %v4388_v30 = vmul.f32 %v13881_v45, %v4366_v42  ;;  %v4390_v28 = vmul.f32 %v13883_v5, %v4367_v46  ;;  %v4391_v42 = vmul.f32 %v13885_v7, %v4367_v46  ;;  %v13888_v45 = vld [vmem:[#allocation67_spill] sm:$0xff]  ;;  %vm13899_vm14 = vmmov %vm13897_vm7 }
0x2918   :  { %v11407_v27 = vpop.eup %7615  ;;  %v13890_v7 = vld [vmem:[#allocation75_spill] sm:$0xff]  ;;  %vm13900_vm8 = vmmov %vm13897_vm7 }
0x2919   :  { %5357 = vperm.xlu2 %7216, %v11373_v39   ;;  %v3808_v11 = vmul.f32 %v7608_v17, %v3807_v21  ;;  %v13882_v21 = vld [vmem:[#allocation65_spill] sm:$0xff]  ;;  %v7618_v3 = vpop.eup %7617 }
0x291a   :  { %5363 = vperm.xlu1 %7215, %v11375_v32   ;;  %vm4893_vm4 = vweird.f32 %v7618_v3 }
0x291b   :  { %5369 = vperm.xlu0 %7217, %v11378_v0   ;;  %v3809_v26 = vadd.f32 %v7608_v17, %v3808_v11  ;;  %v4386_v11 = vmul.f32 %v13882_v21, %v4365_v36  ;;  %vm4894_vm13 = vmor %vm4892_vm15, %vm4893_vm4  ;;  %vm13904_vm15 = vcmask 1043459  }
0x291c   :  { %vm13903_vm4 = vmmov %vm13897_vm7 }
0x291d   :  { %v3813_v57 = vsel %vm3812_vm1, %v7608_v17, %v3809_v26  ;;  %v4888_v17 = vmul.f32 %v7618_v3, %v11244_v58  ;;  %vm13901_vm1 = vcmask 1041409  }
0x291e   :  { %v11421_v25 = vsel %vm3815_vm6, %v3817_v2, %v3813_v57  ;;  %v13886_v2 = vld [vmem:[#allocation68_spill] sm:$0xff]  ;;  %vm13902_vm6 = vcmask 1042434  }
0x291f   :  { %v4889_v20 = vsub.f32 1.0, %v4888_v17  ;;  %v3821_v36 = vperm.slane %v11421_v25, 1  ;;  %v3822_v46 = vperm.slane %v11421_v25, 2  ;;  %v4896_v17 = vand.u32 2147483647, %v11244_v58 }
0x2920   :  { %v3823_v5 = vperm.slane %v11421_v25, 3 }
0x2921   :  { %5372 = vperm.xlu2 %7216, %v11386_v15   ;;  %v4890_v57 = vmul.f32 %v7618_v3, %v4889_v20  ;;  %vm4897_vm9 = vcmp.eq.f32.partialorder %v4896_v17, 8.507059e+37 }
0x2922   :  { %5378 = vperm.xlu1 %7215, %v11388_v47  }
0x2923   :  { %5381 = vperm.xlu0 %7217, %v11391_v14   ;;  %v4891_v21 = vadd.f32 %v7618_v3, %v4890_v57 }
0x2929   :  { %5375 = vperm.xlu2 %7216, %v11397_v10  }
0x292a   :  { %5387 = vperm.xlu1 %7215, %v11399_v62  }
0x292b   :  { %5390 = vperm.xlu0 %7217, %v11402_v40  }
0x2931   :  { %5384 = vperm.xlu2 %7216, %v11407_v27  }
0x2932   :  { %4449 = vperm.xlu1 %7215, %v4387_v49   ;;  %v3820_v49 = vperm.slane %v11421_v25, 0 }
0x2933   :  { %4439 = vperm.xlu0 %7217, %v4385_v50   ;;  %v13884_v50 = vld [vmem:[#allocation69_spill] sm:$0xff] }
0x2934   :  { %v3836_v26 = vmul.f32 %v13884_v50, %v3820_v49  ;;  %v3837_v12 = vmul.f32 %v13886_v2, %v3820_v49  ;;  %v4895_v49 = vsel %vm4894_vm13, %v7618_v3, %v4891_v21  ;;  %v13889_v50 = vld [vmem:[#allocation71_spill] sm:$0xff]  ;;  %v13893_v21 = vld [vmem:[#allocation77_spill] sm:$0xff]  ;;  %vm13905_vm13 = vmmov %vm13903_vm4 }
0x2939   :  { %4459 = vperm.xlu2 %7216, %v4389_v24   ;;  %v3839_v24 = vmul.f32 %v13887_v13, %v3821_v36 }
0x293a   :  { %4454 = vperm.xlu1 %7215, %v4388_v30   ;;  %v3838_v30 = vmul.f32 %v13888_v45, %v3821_v36  ;;  %v13891_v36 = vld [vmem:[#allocation70_spill] sm:$0xff]  ;;  %v3824_v45 = vperm.slane %v11421_v25, 4 }
0x293b   :  { %4444 = vperm.xlu0 %7217, %v4386_v11   ;;  %v4898_v11 = vand.u32 2147483648, %v11244_v58  ;;  %v3841_v57 = vmul.f32 %v13891_v36, %v3822_v46  ;;  %v13892_v58 = vld [vmem:[#allocation74_spill] sm:$0xff] }
0x2941   :  { %4464 = vperm.xlu2 %7216, %v4390_v28   ;;  %v4899_v28 = vor.u32 1.1754944e-38, %v4898_v11  ;;  %v3844_v11 = vmul.f32 %v13893_v21, %v3824_v45 }
0x2942   :  { %3854 = vperm.xlu1 %7215, %v3836_v26   ;;  %v3840_v26 = vmul.f32 %v13889_v50, %v3822_v46  ;;  %v3825_v50 = vperm.slane %v11421_v25, 5 }
0x2943   :  { %4469 = vperm.xlu0 %7217, %v4391_v42   ;;  %v3842_v42 = vmul.f32 %v13890_v7, %v3823_v5  ;;  %v11441_v20 = vsel %vm4897_vm9, %v4899_v28, %v4895_v49  ;;  %v13896_v7 = vld [vmem:[#allocation73_spill] sm:$0xff]  ;;  %vm13906_vm9 = vcmask 1044484  }
0x2944   :  { %v4902_v2 = vperm.slane %v11441_v20, 0 }
0x2946   :  { %v4919_v13 = vmul.f32 %v10900_v33, %v4902_v2  ;;  %v4918_v3 = vmul.f32 %v10898_v4, %v4902_v2  ;;  %v4904_v33 = vperm.slane %v11441_v20, 2  ;;  %v13894_v4 = vld [vmem:[#allocation76_spill] sm:$0xff] }
0x2948   :  { %v4923_v49 = vmul.f32 %v10914_v1, %v4904_v33  ;;  %v4922_v28 = vmul.f32 %v10922_v60, %v4904_v33 }
0x2949   :  { %3859 = vperm.xlu2 %7216, %v3837_v12   ;;  %v3843_v12 = vmul.f32 %v13892_v58, %v3823_v5  ;;  %v3845_v5 = vmul.f32 %v13894_v4, %v3824_v45 }
0x294a   :  { %3869 = vperm.xlu1 %7215, %v3839_v24   ;;  %v4903_v24 = vperm.slane %v11441_v20, 1 }
0x294b   :  { %3864 = vperm.xlu0 %7217, %v3838_v30  }
0x294c   :  { %v4920_v30 = vmul.f32 %v10904_v29, %v4903_v24  ;;  %v4921_v46 = vmul.f32 %v10912_v37, %v4903_v24 }
0x2951   :  { %3874 = vperm.xlu2 %7216, %v3840_v26   ;;  %v13895_v26 = vld [vmem:[#allocation78_spill] sm:$0xff] }
0x2952   :  { %3884 = vperm.xlu1 %7215, %v3842_v42   ;;  %v3846_v37 = vmul.f32 %v13895_v26, %v3825_v50  ;;  %v3847_v42 = vmul.f32 %v13896_v7, %v3825_v50 }
0x2953   :  { %3879 = vperm.xlu0 %7217, %v3841_v57  }
0x2959   :  { %3889 = vperm.xlu2 %7216, %v3843_v12  }
0x295a   :  { %4941 = vperm.xlu1 %7215, %v4919_v13  }
0x295b   :  { %4936 = vperm.xlu0 %7217, %v4918_v3  }
0x2961   :  { %4946 = vperm.xlu2 %7216, %v4920_v30  }
0x2962   :  { %3894 = vperm.xlu1 %7215, %v3844_v11  }
0x2963   :  { %4951 = vperm.xlu0 %7217, %v4921_v46   ;;  %v5346_v17 = vpop.permute.xlu2 %5345 }
0x2964   :  { %v5392_v11 = vperm.slane %v5346_v17, %v8273_v9 }
0x2969   :  { %3899 = vperm.xlu2 %7216, %v3845_v5  }
0x296a   :  { %4961 = vperm.xlu1 %7215, %v4923_v49  }
0x296b   :  { %4956 = vperm.xlu0 %7217, %v4922_v28   ;;  %v5355_v29 = vpop.permute.xlu2 %5354 }
0x296c   :  { %v5396_v46 = vperm.slane %v5355_v29, %v8278_v61 }
0x2971   :  { %3904 = vperm.xlu2 %7216, %v3846_v37  }
0x2973   :  { %3909 = vperm.xlu0 %7217, %v3847_v42   ;;  %v5358_v36 = vpop.permute.xlu2 %5357 }
0x2974   :  { %v5398_v4 = vperm.slane %v5358_v36, %v8273_v9 }
0x297b   :  { %v5373_v57 = vpop.permute.xlu2 %5372 }
0x297c   :  { %v5349_v2 = vpop.permute.xlu1 %5348  ;;  %v5405_v36 = vperm.slane %v5373_v57, %v8278_v61 }
0x297d   :  { %v5352_v58 = vpop.permute.xlu0 %5351  ;;  %v5393_v30 = vperm.slane %v5349_v2, %v8278_v61 }
0x297e   :  { %v5395_v45 = vperm.slane %v5352_v58, %v8273_v9 }
0x297f   :  { %v5394_v49 = vsel %vm13898_vm11, %v5393_v30, %v5392_v11  ;;  %vm13908_vm11 = vcmask 1045509  }
0x2980   :  { %v5397_v5 = vsel %vm13897_vm7, %v5396_v46, %v5395_v45  ;;  %vm13907_vm7 = vmmov %vm13903_vm4 }
0x2981   :  { %v5416_v2 = vsel %vm13901_vm1, %v5397_v5, %v5394_v49  ;;  %vm13911_vm1 = vcmask 1047559  }
0x2983   :  { %v5376_v12 = vpop.permute.xlu2 %5375 }
0x2984   :  { %v5361_v1 = vpop.permute.xlu1 %5360 }
0x2985   :  { %v5367_v13 = vpop.permute.xlu0 %5366  ;;  %v5399_v21 = vperm.slane %v5361_v1, %v8278_v61  ;;  %v5407_v1 = vperm.slane %v5376_v12, %v8273_v9 }
0x2986   :  { %v5402_v28 = vperm.slane %v5367_v13, %v8278_v61 }
0x2987   :  { %v5400_v37 = vsel %vm13899_vm14, %v5399_v21, %v5398_v4  ;;  %vm13909_vm14 = vmmov %vm13903_vm4 }
0x2988   :  { %v5417_v58 = vsel %vm13902_vm6, %v5400_v37, %v5416_v2  ;;  %vm13912_vm6 = vcmask 80896   ;;  %v11495_v37 = vld [vmem:[%s13055_s3 + $0x40] sm:$0xff] }
0x298b   :  { %v5385_v60 = vpop.permute.xlu2 %5384 }
0x298c   :  { %v5364_v3 = vpop.permute.xlu1 %5363  ;;  %v5411_v30 = vperm.slane %v5385_v60, %v8278_v61 }
0x298d   :  { %v5370_v24 = vpop.permute.xlu0 %5369  ;;  %v5401_v33 = vperm.slane %v5364_v3, %v8273_v9 }
0x298e   :  { %v5404_v7 = vperm.slane %v5370_v24, %v8273_v9 }
0x298f   :  { %v5403_v17 = vsel %vm13900_vm8, %v5402_v28, %v5401_v33  ;;  %vm13910_vm8 = vcmask 1046534  }
0x2990   :  { %v5406_v13 = vsel %vm13903_vm4, %v5405_v36, %v5404_v7  ;;  %v5418_v3 = vsel %vm13904_vm15, %v5403_v17, %v5417_v58  ;;  %v4480_v7 = vmul.f32 %v11495_v37, %v11293_v38  ;;  %v11502_v17 = vld [vmem:[%s13055_s3 + $0x48] sm:$0x3]  ;;  %vm13913_vm4 = vcmask 261120  }
0x2991   :  { %v5419_v11 = vsel %vm13906_vm9, %v5406_v13, %v5418_v3  ;;  %vm13914_vm15 = vcmask 254976   ;;  %v11510_v13 = vld [vmem:[%s13055_s3 + $0x68] sm:$0x3]  ;;  %vm13920_vm9 = vmmov %vm13913_vm4 }
0x2992   :  { %v4524_v2 = vsel %vm13913_vm4, %v4480_v7, 0.0  ;;  %13915 = vst [vmem:[#allocation97_spill] sm:$0xff] %v11510_v13 }
0x2993   :  { %v4460_v26 = vpop.permute.xlu2 %4459 }
0x2994   :  { %v5379_v50 = vpop.permute.xlu1 %5378  ;;  %v4485_v38 = vmul.f32 %v11510_v13, %v4460_v26  ;;  %v11528_v26 = vld [vmem:[%s13055_s3 + $0x50] sm:$0xff] }
0x2995   :  { %v5382_v42 = vpop.permute.xlu0 %5381  ;;  %v5408_v29 = vperm.slane %v5379_v50, %v8278_v61  ;;  %13918 = vst [vmem:[#allocation100_spill] sm:$0xff] %v11528_v26 }
0x2996   :  { %v5410_v45 = vperm.slane %v5382_v42, %v8273_v9 }
0x2997   :  { %v5409_v24 = vsel %vm13905_vm13, %v5408_v29, %v5407_v1  ;;  %vm13919_vm13 = vmmov %vm13914_vm15 }
0x2998   :  { %v5412_v46 = vsel %vm13907_vm7, %v5411_v30, %v5410_v45  ;;  %v5420_v12 = vsel %vm13908_vm11, %v5409_v24, %v5419_v11  ;;  %v11516_v45 = vld [vmem:[%s13055_s3 + $0x58] sm:$0x3]  ;;  %vm13921_vm7 = vmmov %vm13919_vm13 }
0x2999   :  { %v5421_v28 = vsel %vm13910_vm8, %v5412_v46, %v5420_v12  ;;  %13916 = vst [vmem:[#allocation96_spill] sm:$0xff] %v11516_v45  ;;  %v11522_v46 = vld [vmem:[%s13055_s3 + $0x60] sm:$0xff]  ;;  %v4543_v12 = vsel %vm13919_vm13, %v4485_v38, 0.0  ;;  %vm13922_vm11 = vmmov %vm13913_vm4  ;;  %vm13930_vm13 = vcmask 1045509  }
0x299a   :  { %13917 = vst [vmem:[#allocation99_spill] sm:$0xff] %v11522_v46  ;;  %vm13925_vm8 = vmmov %vm13913_vm4 }
0x299b   :  { %v4465_v5 = vpop.permute.xlu2 %4464 }
0x299c   :  { %v5388_v21 = vpop.permute.xlu1 %5387 }
0x299d   :  { %v5391_v57 = vpop.permute.xlu0 %5390  ;;  %v5413_v33 = vperm.slane %v5388_v21, %v8273_v9 }
0x299e   :  { %v5414_v4 = vperm.slane %v5391_v57, %v8278_v61 }
0x29a0   :  { %v5415_v49 = vsel %vm13909_vm14, %v5414_v4, %v5413_v33  ;;  %vm13924_vm14 = vmmov %vm13921_vm7 }
0x29a1   :  { %v5422_v50 = vsel %vm13911_vm1, %v5415_v49, %v5421_v28  ;;  %vm13926_vm1 = vcmask 1044484  }
0x29a2   :  { %v5424_v60 = vsel %vm13912_vm6, %v5422_v50, 0.0  ;;  %vm13927_vm6 = vmmov %vm13913_vm4 }
0x29a3   :  { %5425 = vadd.xlane.f32.xlu2 %v5424_v60  ;;  %v3860_v58 = vpop.permute.xlu2 %3859  ;;  %vm13928_vm4 = vmmov %vm13921_vm7 }
0x29a4   :  { %v4450_v42 = vpop.permute.xlu1 %4449 }
0x29a5   :  { %v4440_v61 = vpop.permute.xlu0 %4439  ;;  %v4483_v24 = vmul.f32 %v11516_v45, %v4450_v42 }
0x29a6   :  { %v4481_v29 = vmul.f32 %v11502_v17, %v4440_v61 }
0x29a7   :  { %v4534_v28 = vsel %vm13921_vm7, %v4483_v24, 0.0  ;;  %v11540_v24 = vld [vmem:[%s13055_s3] sm:$0xff]  ;;  %vm13932_vm7 = vcmask 1046534  }
0x29a8   :  { %v4525_v36 = vsel %vm13914_vm15, %v4481_v29, 0.0  ;;  %vm13929_vm15 = vmmov %vm13928_vm4 }
0x29a9   :  { %v4526_v1 = vadd.f32 %v4525_v36, %v4524_v2  ;;  %v3933_v36 = vmul.f32 %v11209_v59, %v3860_v58  ;;  %v11546_v58 = vld [vmem:[%s13055_s3 + $0x78] sm:$0x3] }
0x29aa   :  { %13923 = vst [vmem:[#allocation98_spill] sm:$0xff] %v11546_v58 }
0x29ab   :  { %v4527_v3 = vrot.slane %v4526_v1, 4  ;;  %v3875_v29 = vpop.permute.xlu2 %3874 }
0x29ac   :  { %v4455_v30 = vpop.permute.xlu1 %4454 }
0x29ad   :  { %v4528_v21 = vadd.f32 %v4527_v3, %v4526_v1  ;;  %v4445_v11 = vpop.permute.xlu0 %4444  ;;  %v4484_v57 = vmul.f32 %v11522_v46, %v4455_v30  ;;  %v4486_v3 = vmul.f32 %v11165_v23, %v4465_v5  ;;  %v3949_v5 = vsel %vm13924_vm14, %v3933_v36, 0.0  ;;  %vm13934_vm14 = vmmov %vm13927_vm6 }
0x29ae   :  { %v4482_v33 = vmul.f32 %v11528_v26, %v4445_v11 }
0x29af   :  { %v4529_v4 = vrot.slane %v4528_v21, 2  ;;  %v4542_v49 = vsel %vm13920_vm9, %v4484_v57, 0.0  ;;  %vm13931_vm9 = vmmov %vm13927_vm6 }
0x29b0   :  { %v4533_v50 = vsel %vm13922_vm11, %v4482_v33, 0.0  ;;  %v4544_v60 = vadd.f32 %v4543_v12, %v4542_v49  ;;  %vm13933_vm11 = vmmov %vm13928_vm4 }
0x29b1   :  { %v4530_v7 = vadd.f32 %v4529_v4, %v4528_v21  ;;  %v4535_v42 = vadd.f32 %v4534_v28, %v4533_v50  ;;  %v4551_v28 = vsel %vm13927_vm6, %v4486_v3, 0.0 }
0x29b2   :  { %v4545_v61 = vrot.slane %v4544_v60, 4 }
0x29b3   :  { %v4531_v2 = vrot.slane %v4530_v7, 1  ;;  %v4536_v1 = vrot.slane %v4535_v42, 4  ;;  %v3890_v36 = vpop.permute.xlu2 %3889 }
0x29b4   :  { %v4546_v30 = vadd.f32 %v4545_v61, %v4544_v60  ;;  %v3855_v38 = vpop.permute.xlu1 %3854 }
0x29b5   :  { %v4532_v11 = vadd.f32 %v4531_v2, %v4530_v7  ;;  %v4537_v9 = vadd.f32 %v4536_v1, %v4535_v42  ;;  %v4470_v57 = vpop.permute.xlu0 %4469  ;;  %v3932_v21 = vmul.f32 %v11540_v24, %v3855_v38 }
0x29b6   :  { %v4547_v33 = vrot.slane %v4546_v30, 2  ;;  %v4487_v23 = vmul.f32 %v11546_v58, %v4470_v57 }
0x29b7   :  { %v4538_v12 = vrot.slane %v4537_v9, 2  ;;  %v3948_v4 = vsel %vm13925_vm8, %v3932_v21, 0.0  ;;  %v4571_v49 = vsel %vm13926_vm1, %v4532_v11, %v11279_v31  ;;  %vm13935_vm8 = vcmask 1047559   ;;  %vm13936_vm1 = vmmov %vm13927_vm6 }
0x29b8   :  { %v4548_v50 = vadd.f32 %v4547_v33, %v4546_v30  ;;  %v4552_v60 = vsel %vm13928_vm4, %v4487_v23, 0.0  ;;  %v3950_v7 = vadd.f32 %v3949_v5, %v3948_v4  ;;  %vm13937_vm6 = vmmov %vm13928_vm4  ;;  %vm13938_vm4 = vcmask 1041409  }
0x29b9   :  { %v4539_v42 = vadd.f32 %v4538_v12, %v4537_v9  ;;  %v4553_v61 = vadd.f32 %v4552_v60, %v4551_v28 }
0x29ba   :  { %v4549_v2 = vrot.slane %v4548_v50, 1  ;;  %v3951_v1 = vrot.slane %v3950_v7, 4 }
0x29bb   :  { %v4540_v38 = vrot.slane %v4539_v42, 1  ;;  %v4554_v57 = vrot.slane %v4553_v61, 4 }
0x29bc   :  { %v4550_v13 = vadd.f32 %v4549_v2, %v4548_v50  ;;  %v3870_v46 = vpop.permute.xlu1 %3869  ;;  %v3952_v26 = vadd.f32 %v3951_v1, %v3950_v7  ;;  %v3939_v50 = vmul.f32 %v11265_v53, %v3890_v36 }
0x29bd   :  { %v4541_v58 = vadd.f32 %v4540_v38, %v4539_v42  ;;  %v4555_v21 = vadd.f32 %v4554_v57, %v4553_v61  ;;  %v3865_v45 = vpop.permute.xlu0 %3864  ;;  %v3935_v31 = vmul.f32 %v11251_v52, %v3870_v46  ;;  %v3936_v46 = vmul.f32 %v11239_v44, %v3875_v29 }
0x29be   :  { %v3934_v3 = vmul.f32 %v11257_v51, %v3865_v45  ;;  %v3953_v12 = vrot.slane %v3952_v26, 2 }
0x29bf   :  { %v4556_v30 = vrot.slane %v4555_v21, 2  ;;  %v3958_v11 = vsel %vm13929_vm15, %v3935_v31, 0.0  ;;  %v4572_v9 = vsel %vm13930_vm13, %v4541_v58, %v4571_v49  ;;  %v4947_v49 = vpop.permute.xlu2 %4946  ;;  %v3966_v29 = vsel %vm13936_vm1, %v3936_v46, 0.0  ;;  %vm13939_vm15 = vmmov %vm13937_vm6 }
0x29c0   :  { %v3957_v33 = vsel %vm13931_vm9, %v3934_v3, 0.0  ;;  %v4573_v23 = vsel %vm13932_vm7, %v4550_v13, %v4572_v9  ;;  %v3954_v45 = vadd.f32 %v3953_v12, %v3952_v26  ;;  %v3976_v13 = vsel %vm13933_vm11, %v3939_v50, 0.0  ;;  %vm13940_vm13 = vmmov %vm13936_vm1 }
0x29c1   :  { %v4557_v5 = vadd.f32 %v4556_v30, %v4555_v21  ;;  %v3959_v4 = vadd.f32 %v3958_v11, %v3957_v33  ;;  %vm13941_vm9 = vcmask 1042434   ;;  %vm13942_vm7 = vmmov %vm13937_vm6 }
0x29c2   :  { %v3955_v21 = vrot.slane %v3954_v45, 1  ;;  %vm13943_vm11 = vmmov %vm13936_vm1 }
0x29c3   :  { %v4558_v28 = vrot.slane %v4557_v5, 1  ;;  %v3960_v60 = vrot.slane %v3959_v4, 4 }
0x29c4   :  { %v3885_v7 = vpop.permute.xlu1 %3884 }
0x29c5   :  { %v3961_v42 = vadd.f32 %v3960_v60, %v3959_v4  ;;  %v3880_v61 = vpop.permute.xlu0 %3879  ;;  %v3938_v2 = vmul.f32 %v11271_v35, %v3885_v7  ;;  %v4559_v58 = vadd.f32 %v4558_v28, %v4557_v5  ;;  %v3956_v5 = vadd.f32 %v3955_v21, %v3954_v45 }
0x29c6   :  { %v3937_v1 = vmul.f32 %v11233_v63, %v3880_v61 }
0x29c7   :  { %v3962_v38 = vrot.slane %v3961_v42, 2  ;;  %v3975_v57 = vsel %vm13934_vm14, %v3938_v2, 0.0  ;;  %v11568_v53 = vsel %vm13935_vm8, %v4559_v58, %v4573_v23  ;;  %v3900_v2 = vpop.permute.xlu2 %3899  ;;  %vm13944_vm14 = vmmov %vm13936_vm1  ;;  %vm13946_vm1 = vcmask 1043459  }
0x29c8   :  { %v3967_v26 = vsel %vm13937_vm6, %v3937_v1, 0.0  ;;  %v3977_v36 = vadd.f32 %v3976_v13, %v3975_v57  ;;  %v3941_v57 = vmul.f32 %v11502_v17, %v3900_v2  ;;  %vm13945_vm8 = vmmov %vm13937_vm6 }
0x29c9   :  { %v3963_v31 = vadd.f32 %v3962_v38, %v3961_v42  ;;  %v3968_v35 = vadd.f32 %v3967_v26, %v3966_v29 }
0x29ca   :  { %v3978_v3 = vrot.slane %v3977_v36, 4 }
0x29cb   :  { %v3964_v30 = vrot.slane %v3963_v31, 1  ;;  %v3969_v11 = vrot.slane %v3968_v35, 4 }
0x29cc   :  { %v3979_v9 = vadd.f32 %v3978_v3, %v3977_v36  ;;  %v4942_v33 = vpop.permute.xlu1 %4941 }
0x29cd   :  { %v3965_v12 = vadd.f32 %v3964_v30, %v3963_v31  ;;  %v3970_v4 = vadd.f32 %v3969_v11, %v3968_v35  ;;  %v4937_v28 = vpop.permute.xlu0 %4936  ;;  %v5015_v23 = vmul.f32 %v11209_v59, %v4942_v33  ;;  %v5016_v59 = vmul.f32 %v11257_v51, %v4947_v49 }
0x29ce   :  { %v3980_v50 = vrot.slane %v3979_v9, 2  ;;  %v5014_v60 = vmul.f32 %v11540_v24, %v4937_v28 }
0x29cf   :  { %v4028_v46 = vsel %vm13938_vm4, %v3965_v12, %v3956_v5  ;;  %v3971_v7 = vrot.slane %v3970_v4, 2  ;;  %v5031_v42 = vsel %vm13939_vm15, %v5015_v23, 0.0  ;;  %v5039_v5 = vsel %vm13944_vm14, %v5016_v59, 0.0  ;;  %vm13947_vm4 = vmmov %vm13943_vm11 }
0x29d0   :  { %v3981_v61 = vadd.f32 %v3980_v50, %v3979_v9  ;;  %v5030_v58 = vsel %vm13940_vm13, %v5014_v60, 0.0  ;;  %v3985_v9 = vsel %vm13942_vm7, %v3941_v57, 0.0  ;;  %vm13948_vm15 = vcmask 1044484  }
0x29d1   :  { %v3972_v1 = vadd.f32 %v3971_v7, %v3970_v4  ;;  %v5032_v13 = vadd.f32 %v5031_v42, %v5030_v58  ;;  %vm13949_vm13 = vcmask 1041409  }
0x29d2   :  { %v3982_v45 = vrot.slane %v3981_v61, 1 }
0x29d3   :  { %v3973_v38 = vrot.slane %v3972_v1, 1  ;;  %v5033_v29 = vrot.slane %v5032_v13, 4 }
0x29d4   :  { %v3983_v26 = vadd.f32 %v3982_v45, %v3981_v61  ;;  %v3895_v36 = vpop.permute.xlu1 %3894 }
0x29d5   :  { %v3974_v21 = vadd.f32 %v3973_v38, %v3972_v1  ;;  %v5034_v31 = vadd.f32 %v5033_v29, %v5032_v13  ;;  %v4952_v35 = vpop.permute.xlu0 %4951  ;;  %v3940_v3 = vmul.f32 %v11495_v37, %v3895_v36 }
0x29d6   :  { %v5017_v30 = vmul.f32 %v11251_v52, %v4952_v35 }
0x29d7   :  { %v4029_v11 = vsel %vm13941_vm9, %v3974_v21, %v4028_v46  ;;  %v3984_v33 = vsel %vm13943_vm11, %v3940_v3, 0.0  ;;  %v5035_v4 = vrot.slane %v5034_v31, 2 }
0x29d8   :  { %v5040_v12 = vsel %vm13945_vm8, %v5017_v30, 0.0  ;;  %v3986_v51 = vadd.f32 %v3985_v9, %v3984_v33  ;;  %v4030_v49 = vsel %vm13946_vm1, %v3983_v26, %v4029_v11  ;;  %vm13958_vm1 = vmmov %vm13937_vm6 }
0x29d9   :  { %v5041_v28 = vadd.f32 %v5040_v12, %v5039_v5  ;;  %v5036_v52 = vadd.f32 %v5035_v4, %v5034_v31 }
0x29da   :  { %v3987_v23 = vrot.slane %v3986_v51, 4 }
0x29db   :  { %v5042_v50 = vrot.slane %v5041_v28, 4  ;;  %v5037_v57 = vrot.slane %v5036_v52, 1 }
0x29dc   :  { %v3988_v60 = vadd.f32 %v3987_v23, %v3986_v51  ;;  %v4962_v7 = vpop.permute.xlu1 %4961  ;;  %v11598_v51 = vpop.permute.xlu2 %3904 }
0x29dd   :  { %v5043_v42 = vadd.f32 %v5042_v50, %v5041_v28  ;;  %v4957_v46 = vpop.permute.xlu0 %4956  ;;  %v5019_v61 = vmul.f32 %v11233_v63, %v4962_v7  ;;  %v5038_v35 = vadd.f32 %v5037_v57, %v5036_v52 }
0x29de   :  { %v3989_v2 = vrot.slane %v3988_v60, 2  ;;  %v5018_v58 = vmul.f32 %v11239_v44, %v4957_v46 }
0x29df   :  { %v5044_v1 = vrot.slane %v5043_v42, 2  ;;  %v5049_v13 = vsel %vm13937_vm6, %v5019_v61, 0.0  ;;  %vm13960_vm6 = vmmov %vm13947_vm4 }
0x29e0   :  { %v3990_v45 = vadd.f32 %v3989_v2, %v3988_v60  ;;  %v5048_v38 = vsel %vm13947_vm4, %v5018_v58, 0.0 }
0x29e1   :  { %v5045_v29 = vadd.f32 %v5044_v1, %v5043_v42  ;;  %v5050_v59 = vadd.f32 %v5049_v13, %v5048_v38 }
0x29e2   :  { %v3991_v26 = vrot.slane %v3990_v45, 1 }
0x29e3   :  { %v5046_v36 = vrot.slane %v5045_v29, 1  ;;  %v5051_v21 = vrot.slane %v5050_v59, 4 }
0x29e4   :  { %v3992_v31 = vadd.f32 %v3991_v26, %v3990_v45 }
0x29e5   :  { %v5047_v3 = vadd.f32 %v5046_v36, %v5045_v29  ;;  %v5052_v30 = vadd.f32 %v5051_v21, %v5050_v59 }
0x29e6   :  { %v11592_v63 = vsel %vm13948_vm15, %v3992_v31, %v4030_v49  ;;  %vm13961_vm15 = vmmov %vm13958_vm1 }
0x29e7   :  { %v5110_v44 = vsel %vm13949_vm13, %v5047_v3, %v5038_v35  ;;  %v5053_v11 = vrot.slane %v5052_v30, 2  ;;  %v3826_v3 = vperm.slane %v11421_v25, 6  ;;  %vm13962_vm13 = vmmov %vm13947_vm4 }
0x29e9   :  { %v5054_v9 = vadd.f32 %v5053_v11, %v5052_v30 }
0x29eb   :  { %v5055_v33 = vrot.slane %v5054_v9, 1 }
0x29ed   :  { %v5056_v5 = vadd.f32 %v5055_v33, %v5054_v9  ;;  %v13950_v9 = vld [vmem:[#allocation103_spill] sm:$0xff] }
0x29ee   :  { %v3849_v33 = vmul.f32 %v13950_v9, %v3826_v3 }
0x29ef   :  { %v11596_v12 = vsel %vm13941_vm9, %v5056_v5, %v5110_v44  ;;  %v13952_v5 = vld [vmem:[#allocation94_spill] sm:$0xff]  ;;  %vm13963_vm9 = vmmov %vm13958_vm1 }
0x2a16   :  { %v5426_v4 = vpop.xlane.xlu2 %5425 }
0x2a17   :  { %7619 = vrcp.f32 %v5426_v4  ;;  %v5438_v60 = vand.u32 2147483648, %v5426_v4  ;;  %v5436_v49 = vand.u32 2147483647, %v5426_v4  ;;  %vm5432_vm11 = vweird.f32 %v5426_v4 }
0x2a19   :  { %v5439_v42 = vor.u32 1.1754944e-38, %v5438_v60  ;;  %vm5437_vm8 = vcmp.eq.f32.partialorder %v5436_v49, 8.507059e+37  ;;  %v13956_v49 = vld [vmem:[#allocation107_spill] sm:$0xff] }
0x2a1d   :  { %v7620_v28 = vpop.eup %7619 }
0x2a1e   :  { %v5428_v23 = vmul.f32 %v7620_v28, %v5426_v4  ;;  %vm5433_vm7 = vweird.f32 %v7620_v28 }
0x2a1f   :  { %vm5434_vm14 = vmor %vm5432_vm11, %vm5433_vm7 }
0x2a20   :  { %v5429_v50 = vsub.f32 1.0, %v5428_v23  ;;  %vm13964_vm7 = vmmov %vm13958_vm1 }
0x2a21   :  { %vm13965_vm11 = vmmov %vm13947_vm4 }
0x2a22   :  { %v5430_v7 = vmul.f32 %v7620_v28, %v5429_v50  ;;  %v13955_v50 = vld [vmem:[#allocation105_spill] sm:$0xff] }
0x2a24   :  { %v5431_v52 = vadd.f32 %v7620_v28, %v5430_v7  ;;  %v7711_v7 = vld [vmem:[#allocation3 + $0x20] sm:$0xff] }
0x2a26   :  { %v5435_v46 = vsel %vm5434_vm14, %v7620_v28, %v5431_v52  ;;  %v13953_v28 = vld [vmem:[#allocation104_spill] sm:$0xff]  ;;  %vm13966_vm14 = vmmov %vm13958_vm1 }
0x2a27   :  { %v5440_v61 = vsel %vm5437_vm8, %v5439_v42, %v5435_v46  ;;  %v7712_v42 = vld [vmem:[#allocation3 + $0x30] sm:$0xff]  ;;  %v7713_v46 = vld [vmem:[#allocation3 + $0x28] sm:$0xff]  ;;  %vm13967_vm8 = vmmov %vm13947_vm4 }
0x2a28   :  { %v5443_v2 = vperm.slane %v5440_v61, 1  ;;  %v5442_v58 = vperm.slane %v5440_v61, 0  ;;  %v5445_v38 = vperm.slane %v5440_v61, 3  ;;  %v5444_v57 = vperm.slane %v5440_v61, 2 }
0x2a29   :  { %v5446_v36 = vperm.slane %v5440_v61, 4  ;;  %v5448_v21 = vperm.slane %v5440_v61, 6  ;;  %v5447_v31 = vperm.slane %v5440_v61, 5  ;;  %v5449_v35 = vperm.slane %v5440_v61, 7  ;;  %v7714_v61 = vld [vmem:[#allocation3 + $0x38] sm:$0xff] }
0x2a2a   :  { %v5460_v1 = vmul.f32 %v11351_v34, %v5443_v2  ;;  %v5459_v13 = vmul.f32 %v11348_v16, %v5442_v58  ;;  %v5458_v45 = vmul.f32 %v11345_v43, %v5442_v58  ;;  %v5465_v29 = vmul.f32 %v11365_v19, %v5445_v38  ;;  %v3910_v58 = vpop.permute.xlu0 %3909 }
0x2a2b   :  { %v5463_v59 = vmul.f32 %v11362_v22, %v5444_v57  ;;  %v5461_v26 = vmul.f32 %v11359_v54, %v5443_v2  ;;  %v5466_v34 = vmul.f32 %v11378_v0, %v5446_v36  ;;  %v5464_v16 = vmul.f32 %v11375_v32, %v5445_v38 }
0x2a2c   :  { %5486 = vperm.xlu0 %7217, %v5460_v1   ;;  %5481 = vperm.xlu2 %7216, %v5459_v13   ;;  %v5462_v43 = vmul.f32 %v11373_v39, %v5444_v57  ;;  %v5470_v19 = vmul.f32 %v11391_v14, %v5448_v21  ;;  %v5469_v22 = vmul.f32 %v11388_v47, %v5447_v31  ;;  %v4905_v14 = vperm.slane %v11441_v20, 3 }
0x2a2d   :  { %5476 = vperm.xlu1 %7215, %v5458_v45   ;;  %v5467_v54 = vmul.f32 %v11386_v15, %v5446_v36  ;;  %v5473_v0 = vmul.f32 %v11402_v40, %v5449_v35  ;;  %v5472_v32 = vmul.f32 %v11399_v62, %v5449_v35  ;;  %v5468_v39 = vmul.f32 %v11397_v10, %v5447_v31 }
0x2a2e   :  { %v3848_v47 = vmul.f32 %v10934_v56, %v3826_v3  ;;  %v4925_v15 = vmul.f32 %v10936_v18, %v4905_v14  ;;  %v5471_v30 = vmul.f32 %v11407_v27, %v5448_v21  ;;  %v4906_v62 = vperm.slane %v11441_v20, 4  ;;  %v13957_v21 = vld [vmem:[#allocation96_spill] sm:$0xff] }
0x2a2f   :  { %v4924_v44 = vmul.f32 %v10925_v48, %v4905_v14  ;;  %v4907_v56 = vperm.slane %v11441_v20, 5  ;;  %v3827_v18 = vperm.slane %v11421_v25, 7  ;;  %v13954_v25 = vld [vmem:[#allocation95_spill] sm:$0xff]  ;;  %v3943_v31 = vmul.f32 %v13957_v21, %v3910_v58  ;;  %v13959_v14 = vld [vmem:[#allocation100_spill] sm:$0xff] }
0x2a30   :  { %v4927_v10 = vmul.f32 %v10950_v41, %v4906_v62  ;;  %v4926_v40 = vmul.f32 %v10947_v55, %v4906_v62  ;;  %v4908_v55 = vperm.slane %v11441_v20, 6  ;;  %v13951_v41 = vld [vmem:[#allocation106_spill] sm:$0xff] }
0x2a31   :  { %v4928_v27 = vmul.f32 %v10965_v8, %v4907_v56  ;;  %v3851_v11 = vmul.f32 %v10963_v6, %v3827_v18  ;;  %v3850_v23 = vmul.f32 %v13953_v28, %v3827_v18  ;;  %v4909_v8 = vperm.slane %v11441_v20, 7 }
0x2a32   :  { %v4931_v48 = vmul.f32 %v13951_v41, %v4908_v55  ;;  %v4930_v4 = vmul.f32 %v13952_v5, %v4908_v55  ;;  %v4929_v60 = vmul.f32 %v13955_v50, %v4907_v56  ;;  %v3994_v62 = vsel %vm13961_vm15, %v3943_v31, 0.0  ;;  %v11674_v56 = vld [vmem:[%s13055_s3 + $0x38] sm:$0x3]  ;;  %v11682_v41 = vld [vmem:[%s13055_s3 + $0x30] sm:$0xff] }
0x2a33   :  { %v4933_v6 = vmul.f32 %v13954_v25, %v4909_v8  ;;  %v4932_v52 = vmul.f32 %v13956_v49, %v4909_v8 }
0x2a34   :  { %5511 = vperm.xlu0 %7217, %v5465_v29   ;;  %5501 = vperm.xlu2 %7216, %v5463_v59  }
0x2a35   :  { %5491 = vperm.xlu1 %7215, %v5461_v26   ;;  %v7715_v26 = vld [vmem:[%s13055_s3 + $0x18] sm:$0x3] }
0x2a3c   :  { %5516 = vperm.xlu0 %7217, %v5466_v34   ;;  %5506 = vperm.xlu2 %7216, %v5464_v16  }
0x2a3d   :  { %5496 = vperm.xlu1 %7215, %v5462_v43  }
0x2a44   :  { %5536 = vperm.xlu0 %7217, %v5470_v19   ;;  %5531 = vperm.xlu2 %7216, %v5469_v22   ;;  %v7716_v19 = vld [vmem:[%s13055_s3 + $0x10] sm:$0xff] }
0x2a45   :  { %5521 = vperm.xlu1 %7215, %v5467_v54   ;;  %v7717_v54 = vld [vmem:[%s13055_s3 + $0x20] sm:$0xff] }
0x2a4c   :  { %5551 = vperm.xlu0 %7217, %v5473_v0   ;;  %5546 = vperm.xlu2 %7216, %v5472_v32   ;;  %v7718_v0 = vld [vmem:[%s13055_s3 + $0x8] sm:$0x3] }
0x2a4d   :  { %5526 = vperm.xlu1 %7215, %v5468_v39  }
0x2a54   :  { %3914 = vperm.xlu0 %7217, %v3848_v47   ;;  %4971 = vperm.xlu2 %7216, %v4925_v15   ;;  %v3942_v47 = vmul.f32 %v13959_v14, %v11598_v51 }
0x2a55   :  { %5541 = vperm.xlu1 %7215, %v5471_v30  }
0x2a56   :  { %v3993_v55 = vsel %vm13965_vm11, %v3942_v47, 0.0  ;;  %vm13977_vm11 = vmmov %vm13958_vm1 }
0x2a5c   :  { %4981 = vperm.xlu0 %7217, %v4927_v10   ;;  %4976 = vperm.xlu2 %7216, %v4926_v40  }
0x2a5d   :  { %4966 = vperm.xlu1 %7215, %v4924_v44  }
0x2a64   :  { %4986 = vperm.xlu0 %7217, %v4928_v27   ;;  %3929 = vperm.xlu2 %7216, %v3851_v11  }
0x2a65   :  { %3919 = vperm.xlu1 %7215, %v3849_v33  }
0x2a6c   :  { %5001 = vperm.xlu0 %7217, %v4931_v48   ;;  %4996 = vperm.xlu2 %7216, %v4930_v4   ;;  %v3995_v4 = vadd.f32 %v3994_v62, %v3993_v55 }
0x2a6d   :  { %3924 = vperm.xlu1 %7215, %v3850_v23  }
0x2a74   :  { %4037 = vrot.lane.b32.xlu0 %v7711_v7, %s7753_s30  ;;  %5011 = vperm.xlu2 %7216, %v4933_v6  }
0x2a75   :  { %4991 = vperm.xlu1 %7215, %v4929_v60  }
0x2a7c   :  { %5119 = vrot.lane.b32.xlu0 %v7712_v42, %s7753_s30  ;;  %4579 = vrot.lane.b32.xlu2 %v7713_v46, %s7755_s10  ;;  %v3996_v42 = vrot.slane %v3995_v4, 4 }
0x2a7d   :  { %5006 = vperm.xlu1 %7215, %v4932_v52  }
0x2a84   :  { %5661 = vrot.lane.b32.xlu2 %v7714_v61, %s7755_s10 }
0x2a85   :  { %4575 = vrot.lane.b32.xlu1 %v11568_v53, %s7752_s27 }
0x2a86   :  { %v5482_v20 = vpop.permute.xlu2 %5481 }
0x2a87   :  { %v5555_v32 = vmul.f32 %v7718_v0, %v5482_v20  ;;  %v11696_v20 = vld [vmem:[%s13055_s3 + $0x70] sm:$0xff] }
0x2a89   :  { %v5571_v40 = vsel %vm13963_vm9, %v5555_v32, 0.0 }
0x2a8e   :  { %v5502_v2 = vpop.permute.xlu2 %5501 }
0x2a96   :  { %v5507_v1 = vpop.permute.xlu2 %5506 }
0x2a97   :  { %v5560_v48 = vmul.f32 %v11682_v41, %v5507_v1 }
0x2a9e   :  { %v5487_v13 = vpop.permute.xlu0 %5486  ;;  %v5532_v45 = vpop.permute.xlu2 %5531 }
0x2a9f   :  { %v5477_v38 = vpop.permute.xlu1 %5476  ;;  %v5556_v22 = vmul.f32 %v7716_v19, %v5487_v13  ;;  %v5565_v61 = vmul.f32 %v13957_v21, %v5532_v45 }
0x2aa0   :  { %v5554_v53 = vmul.f32 %v11540_v24, %v5477_v38  ;;  %v7719_v24 = vld [vmem:[%s13055_s3 + $0x28] sm:$0x3]  ;;  %s6901_s3 = sshll.u32 %s13066_s14, 4  ;;  %s6902_s3 = int_to_ptr.hbm [resolvable:$true] %s6901_s3 }
0x2aa1   :  { %v5559_v39 = vmul.f32 %v7719_v24, %v5502_v2  ;;  %v5579_v10 = vsel %vm13962_vm13, %v5556_v22, 0.0  ;;  %vm13972_vm13 = vmmov %vm13958_vm1 }
0x2aa2   :  { %v5570_v15 = vsel %vm13960_vm6, %v5554_v53, 0.0  ;;  %vm13968_vm6 = vmmov %vm13947_vm4 }
0x2aa3   :  { %v5589_v44 = vsel %vm13964_vm7, %v5559_v39, 0.0  ;;  %v5572_v27 = vadd.f32 %v5571_v40, %v5570_v15  ;;  %v5597_v49 = vsel %vm13968_vm6, %v5560_v48, 0.0  ;;  %vm13971_vm15 = vmmov %vm13968_vm6 }
0x2aa4   :  { %vm13973_vm9 = vmmov %vm13968_vm6 }
0x2aa5   :  { %v5573_v6 = vrot.slane %v5572_v27, 4  ;;  %vm13976_vm7 = vmmov %vm13968_vm6 }
0x2aa6   :  { %v5512_v57 = vpop.permute.xlu0 %5511  ;;  %v5547_v29 = vpop.permute.xlu2 %5546 }
0x2aa7   :  { %v5492_v59 = vpop.permute.xlu1 %5491  ;;  %v5561_v18 = vmul.f32 %v11674_v56, %v5512_v57  ;;  %v5568_v2 = vmul.f32 %v11696_v20, %v5547_v29  ;;  %v5574_v1 = vadd.f32 %v5573_v6, %v5572_v27 }
0x2aa8   :  { %v5557_v36 = vmul.f32 %v7715_v26, %v5492_v59  ;;  %v13969_v59 = vld [vmem:[#allocation98_spill] sm:$0xff] }
0x2aa9   :  { %v5598_v8 = vsel %vm13966_vm14, %v5561_v18, 0.0  ;;  %v5633_v31 = vsel %vm13971_vm15, %v5568_v2, 0.0  ;;  %v5575_v29 = vrot.slane %v5574_v1, 2  ;;  %vm13978_vm14 = vcmask 1041409   ;;  %vm13982_vm15 = vmmov %vm13976_vm7 }
0x2aaa   :  { %v5580_v3 = vsel %vm13958_vm1, %v5557_v36, 0.0  ;;  %v5599_v46 = vadd.f32 %v5598_v8, %v5597_v49 }
0x2aab   :  { %v5581_v51 = vadd.f32 %v5580_v3, %v5579_v10  ;;  %v5576_v10 = vadd.f32 %v5575_v29, %v5574_v1 }
0x2aac   :  { %v5600_v53 = vrot.slane %v5599_v46, 4 }
0x2aad   :  { %v5582_v25 = vrot.slane %v5581_v51, 4  ;;  %v5577_v6 = vrot.slane %v5576_v10, 1 }
0x2aae   :  { %v5517_v34 = vpop.permute.xlu0 %5516  ;;  %v11646_v16 = vpop.permute.xlu2 %4971  ;;  %v5601_v47 = vadd.f32 %v5600_v53, %v5599_v46 }
0x2aaf   :  { %v5497_v43 = vpop.permute.xlu1 %5496  ;;  %v5562_v11 = vmul.f32 %v11495_v37, %v5517_v34  ;;  %v5583_v58 = vadd.f32 %v5582_v25, %v5581_v51  ;;  %v3997_v34 = vadd.f32 %v3996_v42, %v3995_v4  ;;  %v13975_v4 = vld [vmem:[#allocation97_spill] sm:$0xff] }
0x2ab0   :  { %v5558_v35 = vmul.f32 %v7717_v54, %v5497_v43 }
0x2ab1   :  { %v5606_v50 = vsel %vm13967_vm8, %v5562_v11, 0.0  ;;  %v5584_v19 = vrot.slane %v5583_v58, 2  ;;  %v3998_v3 = vrot.slane %v3997_v34, 2  ;;  %vm13979_vm8 = vmmov %vm13968_vm6 }
0x2ab2   :  { %v5588_v30 = vsel %vm13947_vm4, %v5558_v35, 0.0  ;;  %vm13970_vm4 = vmmov %vm13958_vm1 }
0x2ab3   :  { %v5590_v9 = vadd.f32 %v5589_v44, %v5588_v30  ;;  %v5616_v45 = vsel %vm13970_vm4, %v5565_v61, 0.0  ;;  %v5585_v30 = vadd.f32 %v5584_v19, %v5583_v58  ;;  %v13974_v44 = vld [vmem:[#allocation99_spill] sm:$0xff]  ;;  %v3999_v48 = vadd.f32 %v3998_v3, %v3997_v34  ;;  %vm13980_vm6 = vmmov %vm13958_vm1 }
0x2ab4   :  { %vm13981_vm4 = vcmask 1042434  }
0x2ab5   :  { %v5591_v60 = vrot.slane %v5590_v9, 4  ;;  %v5586_v8 = vrot.slane %v5585_v30, 1  ;;  %v4000_v42 = vrot.slane %v3999_v48, 1 }
0x2ab6   :  { %v5537_v33 = vpop.permute.xlu0 %5536  ;;  %v11685_v28 = vpop.permute.xlu2 %4976 }
0x2ab7   :  { %v5522_v5 = vpop.permute.xlu1 %5521  ;;  %v5592_v13 = vadd.f32 %v5591_v60, %v5590_v9  ;;  %v5566_v18 = vmul.f32 %v13974_v44, %v5537_v33  ;;  %v5587_v58 = vadd.f32 %v5586_v8, %v5585_v30  ;;  %v5022_v1 = vmul.f32 %v11495_v37, %v11685_v28 }
0x2ab8   :  { %v5563_v23 = vmul.f32 %v11502_v17, %v5522_v5  ;;  %v5602_v5 = vrot.slane %v5601_v47, 2  ;;  %v4001_v19 = vadd.f32 %v4000_v42, %v3999_v48  ;;  %v13991_v42 = vmov 0 }
0x2ab9   :  { %v5593_v54 = vrot.slane %v5592_v13, 2  ;;  %v5624_v60 = vsel %vm13976_vm7, %v5566_v18, 0.0  ;;  %v5066_v28 = vsel %vm13979_vm8, %v5022_v1, 0.0  ;;  %vm13986_vm7 = vcmask 1044484  }
0x2aba   :  { %v5607_v7 = vsel %vm13958_vm1, %v5563_v23, 0.0  ;;  %v5603_v46 = vadd.f32 %v5602_v5, %v5601_v47  ;;  %v13996_v1 = vmov 1.0  }
0x2abb   :  { %v5608_v52 = vadd.f32 %v5607_v7, %v5606_v50  ;;  %v5594_v40 = vadd.f32 %v5593_v54, %v5592_v13 }
0x2abd   :  { %v5609_v57 = vrot.slane %v5608_v52, 4  ;;  %v5595_v50 = vrot.slane %v5594_v40, 1 }
0x2abe   :  { %v5552_v38 = vpop.permute.xlu0 %5551  ;;  %v11704_v0 = vpop.permute.xlu2 %3929 }
0x2abf   :  { %v5569_v26 = vmul.f32 %v13969_v59, %v5552_v38  ;;  %v5527_v36 = vpop.permute.xlu1 %5526  ;;  %v5610_v24 = vadd.f32 %v5609_v57, %v5608_v52  ;;  %v5578_v38 = vadd.f32 %v5577_v6, %v5576_v10  ;;  %v5021_v57 = vmul.f32 %v11674_v56, %v11646_v16 }
0x2ac0   :  { %v5564_v43 = vmul.f32 %v13959_v14, %v5527_v36  ;;  %v3947_v10 = vmul.f32 %v13969_v59, %v11704_v0 }
0x2ac1   :  { %v5634_v22 = vsel %vm13972_vm13, %v5569_v26, 0.0  ;;  %v5611_v27 = vrot.slane %v5610_v24, 2  ;;  %v5596_v26 = vadd.f32 %v5595_v50, %v5594_v40  ;;  %v5650_v37 = vsel %vm13978_vm14, %v5587_v58, %v5578_v38 }
0x2ac2   :  { %v5635_v35 = vadd.f32 %v5634_v22, %v5633_v31  ;;  %v5615_v32 = vsel %vm13973_vm9, %v5564_v43, 0.0  ;;  %v5604_v22 = vrot.slane %v5603_v46, 1  ;;  %v5058_v56 = vsel %vm13980_vm6, %v5021_v57, 0.0 }
0x2ac3   :  { %v5617_v39 = vadd.f32 %v5616_v45, %v5615_v32  ;;  %v5612_v49 = vadd.f32 %v5611_v27, %v5610_v24  ;;  %v5651_v32 = vsel %vm13981_vm4, %v5596_v26, %v5650_v37  ;;  %vm13983_vm13 = vcmask 1045509   ;;  %vm13993_vm4 = vmmov %vm13982_vm15 }
0x2ac4   :  { %v5636_v15 = vrot.slane %v5635_v35, 4  ;;  %v5605_v30 = vadd.f32 %v5604_v22, %v5603_v46  ;;  %v11727_v27 = vsel %vm13983_vm13, %v4001_v19, %v11592_v63  ;;  %vm13984_vm9 = vcmask 1043459  }
0x2ac5   :  { %v5618_v62 = vrot.slane %v5617_v39, 4  ;;  %v5613_v34 = vrot.slane %v5612_v49, 1  ;;  %v13998_v26 = vmov 0 }
0x2ac6   :  { %v3915_v51 = vpop.permute.xlu0 %3914  ;;  %v5637_v11 = vadd.f32 %v5636_v15, %v5635_v35  ;;  %v4997_v2 = vpop.permute.xlu2 %4996  ;;  %v5652_v5 = vsel %vm13984_vm9, %v5605_v30, %v5651_v32 }
0x2ac7   :  { %v5619_v9 = vadd.f32 %v5618_v62, %v5617_v39  ;;  %v5542_v55 = vpop.permute.xlu1 %5541  ;;  %v5614_v39 = vadd.f32 %v5613_v34, %v5612_v49  ;;  %v13988_v49 = vld [vmem:[#allocation15_spill] sm:$0xff] }
0x2ac8   :  { %v5567_v23 = vmul.f32 %v13975_v4, %v5542_v55  ;;  %v5638_v52 = vrot.slane %v5637_v11, 2 }
0x2ac9   :  { %v5620_v25 = vrot.slane %v5619_v9, 2 }
0x2aca   :  { %v5625_v7 = vsel %vm13977_vm11, %v5567_v23, 0.0  ;;  %v5639_v53 = vadd.f32 %v5638_v52, %v5637_v11  ;;  %v3944_v11 = vmul.f32 %v13974_v44, %v3915_v51  ;;  %v13985_v23 = vld [vmem:[#allocation12_spill] sm:$0xff]  ;;  %vm13987_vm11 = vmmov %vm13983_vm13  ;;  %v13989_v51 = vld [vmem:[#allocation18_spill] sm:$0xff]  ;;  %vm13995_vm13 = vcmask 1047559  }
0x2acb   :  { %v5626_v33 = vadd.f32 %v5625_v7, %v5624_v60  ;;  %v5621_v61 = vadd.f32 %v5620_v25, %v5619_v9  ;;  %v5026_v9 = vmul.f32 %v13974_v44, %v4997_v2  ;;  %v5713_v8 = vadd.s32 376, %v13985_v23 }
0x2acc   :  { %v5640_v3 = vrot.slane %v5639_v53, 1  ;;  %v5653_v60 = vsel %vm13986_vm7, %v5614_v39, %v5652_v5  ;;  %v5712_v46 = vadd.s32 368, %v13985_v23  ;;  %v5707_v32 = vadd.s32 328, %v13985_v23 }
0x2acd   :  { %v5627_v13 = vrot.slane %v5626_v33, 4  ;;  %v5622_v29 = vrot.slane %v5621_v61, 1  ;;  %vm5778_vm14 = vcmp.ge.s32.totalorder %v5713_v8, %v13988_v49  ;;  %vm5843_vm8 = vcmp.lt.s32.totalorder %v5713_v8, %v13989_v51 }
0x2ace   :  { %v4982_v36 = vpop.permute.xlu0 %4981  ;;  %v5012_v55 = vpop.permute.xlu2 %5011  ;;  %v5641_v0 = vadd.f32 %v5640_v3, %v5639_v53  ;;  %vm11740_vm6 = vmand %vm5778_vm14, %vm5843_vm8  ;;  %vm5777_vm9 = vcmp.ge.s32.totalorder %v5712_v46, %v13988_v49  ;;  %vm5842_vm7 = vcmp.lt.s32.totalorder %v5712_v46, %v13989_v51  ;;  %v5084_v34 = vsel %vm13993_vm4, %v5026_v9, 0.0 }
0x2acf   :  { %v5628_v43 = vadd.f32 %v5627_v13, %v5626_v33  ;;  %v5023_v45 = vmul.f32 %v11502_v17, %v4982_v36  ;;  %v4967_v31 = vpop.permute.xlu1 %4966  ;;  %v5029_v44 = vmul.f32 %v13969_v59, %v5012_v55  ;;  %v13992_v42 = vsel %vm11740_vm6, 4294967295, %v13991_v42  ;;  %6992 = vmatpush.msk.msrb.mxu2 %vm11740_vm6, %v13996_v1  ;;  %vm11756_vm14 = vmand %vm5777_vm9, %vm5842_vm7 }
0x2ad0   :  { %v5020_v54 = vmul.f32 %v11682_v41, %v4967_v31  ;;  %v5623_v41 = vadd.f32 %v5622_v29, %v5621_v61  ;;  %v4002_v61 = vsel %vm13993_vm4, %v3944_v11, 0.0  ;;  %v5711_v59 = vadd.s32 360, %v13985_v23 }
0x2ad1   :  { %v5629_v35 = vrot.slane %v5628_v43, 2  ;;  %v5067_v16 = vsel %vm13958_vm1, %v5023_v45, 0.0  ;;  %vm13990_vm1 = vcmask 1046534   ;;  %v13999_v26 = vsel %vm11756_vm14, 4294967295, %v13998_v26  ;;  %6993 = vmatpush.msk.msrb.mxu2 %vm11756_vm14, %v13996_v1 }
0x2ad2   :  { %v5068_v24 = vadd.f32 %v5067_v16, %v5066_v28  ;;  %v5057_v17 = vsel %vm13982_vm15, %v5020_v54, 0.0  ;;  %v5654_v63 = vsel %vm13987_vm11, %v5623_v41, %v5653_v60  ;;  %vm13994_vm15 = vcmask 254976  }
0x2ad3   :  { %v5630_v47 = vadd.f32 %v5629_v35, %v5628_v43  ;;  %v5059_v15 = vadd.f32 %v5058_v56, %v5057_v17  ;;  %vm13997_vm11 = vmmov %vm13994_vm15  ;;  %vm5776_vm8 = vcmp.ge.s32.totalorder %v5711_v59, %v13988_v49  ;;  %v5710_v36 = vadd.s32 352, %v13985_v23 }
0x2ad4   :  { %v5069_v62 = vrot.slane %v5068_v24, 4  ;;  %v4012_v57 = vsel %vm13997_vm11, %v3947_v10, 0.0  ;;  %v14001_v31 = vmov 0  ;;  %v5709_v29 = vadd.s32 344, %v13985_v23 }
0x2ad5   :  { %v5631_v40 = vrot.slane %v5630_v47, 1  ;;  %v5060_v18 = vrot.slane %v5059_v15, 4  ;;  %vm5775_vm9 = vcmp.ge.s32.totalorder %v5710_v36, %v13988_v49  ;;  %vm5840_vm7 = vcmp.lt.s32.totalorder %v5710_v36, %v13989_v51 }
0x2ad6   :  { %v4987_v48 = vpop.permute.xlu0 %4986  ;;  %v5070_v6 = vadd.f32 %v5069_v62, %v5068_v24  ;;  %v14003_v16 = vmov 0  ;;  %v14006_v39 = vmov 0  ;;  %vm5772_vm14 = vcmp.ge.s32.totalorder %v5707_v32, %v13988_v49 }
0x2ad7   :  { %v5632_v25 = vadd.f32 %v5631_v40, %v5630_v47  ;;  %v3920_v50 = vpop.permute.xlu1 %3919  ;;  %v5061_v52 = vadd.f32 %v5060_v18, %v5059_v15  ;;  %v5024_v19 = vmul.f32 %v13959_v14, %v4987_v48  ;;  %v5708_v14 = vadd.s32 336, %v13985_v23 }
0x2ad8   :  { %v3945_v7 = vmul.f32 %v13975_v4, %v3920_v50  ;;  %v5071_v13 = vrot.slane %v5070_v6, 2  ;;  %v14009_v41 = vmov 0  ;;  %v5706_v62 = vadd.s32 320, %v13985_v23 }
0x2ad9   :  { %v5655_v33 = vsel %vm13990_vm1, %v5632_v25, %v5654_v63  ;;  %vm5841_vm1 = vcmp.lt.s32.totalorder %v5711_v59, %v13989_v51  ;;  %v5062_v43 = vrot.slane %v5061_v52, 2  ;;  %v14011_v40 = vmov 0 }
0x2ada   :  { %v4003_v2 = vsel %vm13994_vm15, %v3945_v7, 0.0  ;;  %v5656_v58 = vsel %vm13995_vm13, %v5641_v0, %v5655_v33  ;;  %vm14000_vm15 = vmmov %vm13997_vm11  ;;  %v11778_v54 = vadd.f32 %v5071_v13, %v5070_v6  ;;  %v5705_v18 = vadd.s32 312, %v13985_v23 }
0x2adb   :  { %v4004_v38 = vadd.f32 %v4003_v2, %v4002_v61  ;;  %5657 = vrot.lane.b32.xlu1 %v5656_v58, %s7752_s27  ;;  %v11765_v53 = vsel %vm14000_vm15, %v5029_v44, 0.0  ;;  %vm11770_vm13 = vmand %vm5776_vm8, %vm5841_vm1  ;;  %vm5774_vm8 = vcmp.ge.s32.totalorder %v5709_v29, %v13988_v49  ;;  %vm5839_vm1 = vcmp.lt.s32.totalorder %v5709_v29, %v13989_v51 }
0x2adc   :  { %v14002_v31 = vsel %vm11770_vm13, 4294967295, %v14001_v31  ;;  %6994 = vmatpush.msk.msrb.mxu2 %vm11770_vm13, %v13996_v1  ;;  %vm11784_vm11 = vmand %vm5775_vm9, %vm5840_vm7  ;;  %vm5773_vm9 = vcmp.ge.s32.totalorder %v5708_v14, %v13988_v49  ;;  %vm14008_vm7 = vcmask 261120   ;;  %vm5838_vm13 = vcmp.lt.s32.totalorder %v5708_v14, %v13989_v51 }
0x2add   :  { %v4005_v45 = vrot.slane %v4004_v38, 4  ;;  %v14004_v16 = vsel %vm11784_vm11, 4294967295, %v14003_v16  ;;  %vm14005_vm4 = vmmov %vm14000_vm15  ;;  %v5704_v11 = vadd.s32 304, %v13985_v23  ;;  %v5703_v9 = vadd.s32 296, %v13985_v23 }
0x2ade   :  { %v5002_v22 = vpop.permute.xlu0 %5001  ;;  %6995 = vmatpush.msk.msrb.mxu2 %vm11784_vm11, %v13996_v1  ;;  %vm11799_vm15 = vmand %vm5774_vm8, %vm5839_vm1  ;;  %vm5837_vm8 = vcmp.lt.s32.totalorder %v5707_v32, %v13989_v51  ;;  %v5075_v55 = vsel %vm14008_vm7, %v5024_v19, 0.0  ;;  %v14013_v25 = vmov 0  ;;  %v5073_v6 = vrot.slane %v11778_v54, 1 }
0x2adf   :  { %v4006_v37 = vadd.f32 %v4005_v45, %v4004_v38  ;;  %v5027_v28 = vmul.f32 %v13975_v4, %v5002_v22  ;;  %v3925_v35 = vpop.permute.xlu1 %3924  ;;  %v11793_v4 = vadd.f32 %v5062_v43, %v5061_v52  ;;  %v14007_v39 = vsel %vm11799_vm15, 4294967295, %v14006_v39  ;;  %vm11816_vm1 = vmand %vm5772_vm14, %vm5837_vm8 }
0x2ae0   :  { %v3946_v56 = vmul.f32 %v11696_v20, %v3925_v35  ;;  %6996 = vmatpush.msk.msrb.mxu2 %vm11799_vm15, %v13996_v1  ;;  %v14012_v40 = vsel %vm11816_vm1, 4294967295, %v14011_v40  ;;  %vm5836_vm14 = vcmp.lt.s32.totalorder %v5706_v62, %v13989_v51  ;;  %vm5770_vm8 = vcmp.ge.s32.totalorder %v5705_v18, %v13988_v49 }
0x2ae1   :  { %v4007_v24 = vrot.slane %v4006_v37, 2  ;;  %v5085_v17 = vsel %vm14005_vm4, %v5027_v28, 0.0  ;;  %vm11810_vm4 = vmand %vm5773_vm9, %vm5838_vm13  ;;  %vm5771_vm13 = vcmp.ge.s32.totalorder %v5706_v62, %v13988_v49  ;;  %vm5834_vm15 = vcmp.lt.s32.totalorder %v5704_v11, %v13989_v51 }
0x2ae2   :  { %v5086_v3 = vadd.f32 %v5085_v17, %v5084_v34  ;;  %v4011_v47 = vsel %vm14008_vm7, %v3946_v56, 0.0  ;;  %v14010_v41 = vsel %vm11810_vm4, 4294967295, %v14009_v41  ;;  %6997 = vmatpush.msk.msrb.mxu2 %vm11810_vm4, %v13996_v1  ;;  %vm11831_vm9 = vmand %vm5771_vm13, %vm5836_vm14  ;;  %vm5835_vm7 = vcmp.lt.s32.totalorder %v5705_v18, %v13989_v51 }
0x2ae3   :  { %v4008_v15 = vadd.f32 %v4007_v24, %v4006_v37  ;;  %v4013_v30 = vadd.f32 %v4012_v57, %v4011_v47  ;;  %v14014_v25 = vsel %vm11831_vm9, 4294967295, %v14013_v25  ;;  %v5064_v60 = vrot.slane %v11793_v4, 1  ;;  %vm11845_vm13 = vmand %vm5770_vm8, %vm5835_vm7 }
0x2ae4   :  { %v5087_v10 = vrot.slane %v5086_v3, 4  ;;  %6998 = vmatpush.msk.msrb.mxu2 %vm11816_vm1, %v13996_v1  ;;  %v14015_v63 = vmov 0  ;;  %v5702_v44 = vadd.s32 288, %v13985_v23  ;;  %vm5833_vm4 = vcmp.lt.s32.totalorder %v5703_v9, %v13989_v51 }
0x2ae5   :  { %v4014_v48 = vrot.slane %v4013_v30, 4  ;;  %v4009_v5 = vrot.slane %v4008_v15, 1  ;;  %v14016_v63 = vsel %vm11845_vm13, 4294967295, %v14015_v63  ;;  %v5701_v33 = vadd.s32 280, %v13985_v23 }
0x2ae6   :  { %v11829_v8 = vadd.f32 %v5087_v10, %v5086_v3  ;;  %6999 = vmatpush.msk.msrb.mxu2 %vm11831_vm9, %v13996_v1  ;;  %v5700_v46 = vadd.s32 272, %v13985_v23  ;;  %vm14017_vm8 = vcmask 254976   ;;  %vm14018_vm7 = vcmp.ge.s32.totalorder %v5704_v11, %v13988_v49  ;;  %v4038_v3 = vpop.permute.xlu0 %4037 }
0x2ae7   :  { %v4015_v50 = vadd.f32 %v4014_v48, %v4013_v30  ;;  %v4992_v0 = vpop.permute.xlu1 %4991  ;;  %vm11861_vm14 = vmand %vm14018_vm7, %vm5834_vm15  ;;  %v14019_v58 = vmov 0  ;;  %vm5832_vm9 = vcmp.lt.s32.totalorder %v5702_v44, %v13989_v51  ;;  %v14022_v38 = vmov 0 }
0x2ae8   :  { %v5025_v7 = vmul.f32 %v13957_v21, %v4992_v0  ;;  %v4010_v21 = vadd.f32 %v4009_v5, %v4008_v15  ;;  %v5089_v61 = vrot.slane %v11829_v8, 2  ;;  %v14020_v58 = vsel %vm11861_vm14, 4294967295, %v14019_v58  ;;  %7000 = vmatpush.msk.msrb.mxu2 %vm11845_vm13, %v13996_v1 }
0x2ae9   :  { %v4016_v52 = vrot.slane %v4015_v50, 2  ;;  %vm5831_vm15 = vcmp.lt.s32.totalorder %v5701_v33, %v13989_v51  ;;  %v5699_v57 = vadd.s32 264, %v13985_v23  ;;  %v5698_v43 = vadd.s32 256, %v13985_v23 }
0x2aea   :  { %v5076_v2 = vsel %vm14017_vm8, %v5025_v7, 0.0  ;;  %vm14021_vm8 = vcmp.ge.s32.totalorder %v5703_v9, %v13988_v49  ;;  %7001 = vmatpush.msk.msrb.mxu2 %vm11861_vm14, %v13996_v1  ;;  %v5729_v45 = vadd.s32 504, %v13985_v23  ;;  %v14026_v22 = vmov 0 }
0x2aeb   :  { %v4017_v59 = vadd.f32 %v4016_v52, %v4015_v50  ;;  %v5077_v13 = vadd.f32 %v5076_v2, %v5075_v55  ;;  %vm11873_vm6 = vmand %vm14021_vm8, %vm5833_vm4  ;;  %vm14024_vm4 = vcmask 1046534   ;;  %vm14025_vm8 = vcmp.ge.s32.totalorder %v5702_v44, %v13988_v49 }
0x2aec   :  { %v14023_v38 = vsel %vm11873_vm6, 4294967295, %v14022_v38  ;;  %v4033_v19 = vsel %vm14024_vm4, %v4010_v21, %v11727_v27  ;;  %vm11890_vm7 = vmand %vm14025_vm8, %vm5832_vm9  ;;  %v5728_v29 = vadd.s32 496, %v13985_v23  ;;  %7002 = vmatpush.msk.msrb.mxu2 %vm11873_vm6, %v13996_v1  ;;  %vm14028_vm9 = vcmp.ge.s32.totalorder %v5701_v33, %v13988_v49 }
0x2aed   :  { %v4018_v36 = vrot.slane %v4017_v59, 1  ;;  %v5078_v34 = vrot.slane %v5077_v13, 4  ;;  %v14027_v22 = vsel %vm11890_vm7, 4294967295, %v14026_v22  ;;  %vm11904_vm4 = vmand %vm14028_vm9, %vm5831_vm15  ;;  %v14029_v27 = vmov 0 }
0x2aee   :  { %v14030_v27 = vsel %vm11904_vm4, 4294967295, %v14029_v27  ;;  %vm14031_vm11 = vcmp.lt.s32.totalorder %v5700_v46, %v13989_v51  ;;  %vm14032_vm14 = vcmp.ge.s32.totalorder %v5700_v46, %v13988_v49  ;;  %v14033_v56 = vmov 0  ;;  %7003 = vmatpush.msk.msrb.mxu2 %vm11890_vm7, %v13996_v1  ;;  %v4580_v46 = vpop.permute.xlu2 %4579 }
0x2aef   :  { %v4019_v37 = vadd.f32 %v4018_v36, %v4017_v59  ;;  %v5079_v28 = vadd.f32 %v5078_v34, %v5077_v13  ;;  %v5007_v35 = vpop.permute.xlu1 %5006  ;;  %vm11915_vm13 = vmand %vm14032_vm14, %vm14031_vm11  ;;  %vm5794_vm6 = vcmp.ge.s32.totalorder %v5729_v45, %v13988_v49  ;;  %vm5859_vm15 = vcmp.lt.s32.totalorder %v5729_v45, %v13989_v51 }
0x2af0   :  { %v5028_v14 = vmul.f32 %v11696_v20, %v5007_v35  ;;  %v14034_v56 = vsel %vm11915_vm13, 4294967295, %v14033_v56  ;;  %vm5793_vm9 = vcmp.ge.s32.totalorder %v5728_v29, %v13988_v49  ;;  %vm11926_vm8 = vmand %vm5794_vm6, %vm5859_vm15  ;;  %v14036_v20 = vmov 0  ;;  %7004 = vmatpush.msk.msrb.mxu2 %vm11904_vm4, %v13996_v1 }
0x2af1   :  { %v4034_v32 = vsel %vm14035_vm2, %v4019_v37, %v4033_v19  ;;  %v5080_v24 = vrot.slane %v5079_v28, 2  ;;  %v14037_v20 = vsel %vm11926_vm8, 4294967295, %v14036_v20  ;;  %vm5858_vm11 = vcmp.lt.s32.totalorder %v5728_v29, %v13989_v51  ;;  %7008 = vmatpush.msk.msra.mxu3 %vm11926_vm8, %v13996_v1 }
0x2af2   :  { %v5727_v17 = vadd.s32 488, %v13985_v23  ;;  %vm14038_vm14 = vcmask 261120   ;;  %vm11937_vm2 = vmand %vm5793_vm9, %vm5858_vm11  ;;  %v14040_v15 = vmov 0  ;;  %v5726_v30 = vadd.s32 480, %v13985_v23  ;;  %7005 = vmatpush.msk.msrb.mxu2 %vm11915_vm13, %v13996_v1 }
0x2af3   :  { %4036 = vst.msk [vmem:[#allocation4 + $0x10] sm:$0xff] %vm14038_vm14, %v4034_v32  ;;  %vm14039_vm1 = vmmov %vm14038_vm14  ;;  %v14041_v15 = vsel %vm11937_vm2, 4294967295, %v14040_v15  ;;  %v5725_v62 = vadd.s32 472, %v13985_v23  ;;  %v5724_v10 = vadd.s32 464, %v13985_v23  ;;  %vm14042_vm6 = vcmask 523520   ;;  %7009 = vmatpush.msk.msra.mxu3 %vm11937_vm2, %v13996_v1 }
0x2af4   :  { %v5093_v47 = vsel %vm14039_vm1, %v5028_v14, 0.0  ;;  %4040 = vst.msk [vmem:[#allocation4 + $0x10] sm:$0xff] %vm14042_vm6, %v4038_v3  ;;  %v5081_v18 = vadd.f32 %v5080_v24, %v5079_v28  ;;  %vm14043_vm1 = vcmp.lt.s32.totalorder %v5699_v57, %v13989_v51  ;;  %vm14044_vm15 = vcmp.ge.s32.totalorder %v5699_v57, %v13988_v49  ;;  %v5120_v3 = vpop.permute.xlu0 %5119  ;;  %v14256_v57 = vld [vmem:[#allocation43_spill] sm:$0xff] }
0x2af5   :  { %v5095_v11 = vadd.f32 %v11765_v53, %v5093_v47  ;;  %vm11953_vm9 = vmand %vm14044_vm15, %vm14043_vm1  ;;  %v14045_v9 = vmov 0  ;;  %vm5792_vm11 = vcmp.ge.s32.totalorder %v5727_v17, %v13988_v49  ;;  %v5723_v55 = vadd.s32 456, %v13985_v23 }
0x2af6   :  { %v14046_v9 = vsel %vm11953_vm9, 4294967295, %v14045_v9  ;;  %vm14047_vm14 = vcmp.lt.s32.totalorder %v5698_v43, %v13989_v51  ;;  %vm14048_vm6 = vcmp.ge.s32.totalorder %v5698_v43, %v13988_v49  ;;  %v14049_v53 = vmov 0  ;;  %7006 = vmatpush.msk.msrb.mxu2 %vm11953_vm9, %v13996_v1 }
0x2af7   :  { %vm11963_vm7 = vmand %vm14048_vm6, %vm14047_vm14  ;;  %vm5857_vm1 = vcmp.lt.s32.totalorder %v5727_v17, %v13989_v51  ;;  %vm5791_vm15 = vcmp.ge.s32.totalorder %v5726_v30, %v13988_v49  ;;  %vm5856_vm4 = vcmp.lt.s32.totalorder %v5726_v30, %v13989_v51  ;;  %v5065_v48 = vadd.f32 %v5064_v60, %v11793_v4  ;;  %v4576_v52 = vpop.permute.xlu1 %4575 }
0x2af8   :  { %v14050_v53 = vsel %vm11963_vm7, 4294967295, %v14049_v53  ;;  %v5082_v5 = vrot.slane %v5081_v18, 1  ;;  %v5096_v50 = vrot.slane %v5095_v11, 4  ;;  %vm11980_vm14 = vmand %vm5792_vm11, %vm5857_vm1  ;;  %v14051_v0 = vmov 0  ;;  %7007 = vmatpush.msk.msrb.mxu2 %vm11963_vm7, %v13996_v1 }
0x2af9   :  { %v14052_v0 = vsel %vm11980_vm14, 4294967295, %v14051_v0  ;;  %vm5855_vm6 = vcmp.lt.s32.totalorder %v5725_v62, %v13989_v51  ;;  %v5090_v7 = vadd.f32 %v5089_v61, %v11829_v8  ;;  %7010 = vmatpush.msk.msra.mxu3 %vm11980_vm14, %v13996_v1  ;;  %vm11991_vm8 = vmand %vm5791_vm15, %vm5856_vm4  ;;  %v14053_v4 = vmov 0 }
0x2afa   :  { %v14054_v4 = vsel %vm11991_vm8, 4294967295, %v14053_v4  ;;  %vm5854_vm11 = vcmp.lt.s32.totalorder %v5724_v10, %v13989_v51  ;;  %v5722_v60 = vadd.s32 448, %v13985_v23  ;;  %v5097_v44 = vadd.f32 %v5096_v50, %v5095_v11 }
0x2afb   :  { %vm14055_vm1 = vcmp.ge.s32.totalorder %v5725_v62, %v13988_v49  ;;  %v14056_v8 = vmov 0  ;;  %v5074_v33 = vadd.f32 %v5073_v6, %v11778_v54  ;;  %vm14058_vm4 = vcmask 785920   ;;  %7011 = vmatpush.msk.msra.mxu3 %vm11991_vm8, %v13996_v1 }
0x2afc   :  { %vm12003_vm2 = vmand %vm14055_vm1, %vm5855_vm6  ;;  %4578 = vst.msk [vmem:[#allocation4 + $0x10] sm:$0xff] %vm14058_vm4, %v4576_v52  ;;  %vm5853_vm13 = vcmp.lt.s32.totalorder %v5723_v55, %v13989_v51  ;;  %v5721_v21 = vadd.s32 440, %v13985_v23  ;;  %vm14059_vm6 = vcmask 1043459   ;;  %v5083_v2 = vadd.f32 %v5082_v5, %v5081_v18  ;;  %v14278_v52 = vld [vmem:[#allocation50_spill] sm:$0xff] }
0x2afd   :  { %v14057_v8 = vsel %vm12003_vm2, 4294967295, %v14056_v8  ;;  %v5112_v61 = vsel %vm14059_vm6, %v5065_v48, %v11596_v12  ;;  %v5098_v59 = vrot.slane %v5097_v44, 2  ;;  %vm14060_vm1 = vcmask 1048320   ;;  %7012 = vmatpush.msk.msra.mxu3 %vm12003_vm2, %v13996_v1 }
0x2afe   :  { %4582 = vst.msk [vmem:[#allocation4 + $0x10] sm:$0xff] %vm14060_vm1, %v4580_v46  ;;  %vm14061_vm4 = vcmp.ge.s32.totalorder %v5724_v10, %v13988_v49  ;;  %v14062_v54 = vmov 0  ;;  %v5091_v6 = vrot.slane %v5090_v7, 1  ;;  %vm5787_vm6 = vcmp.ge.s32.totalorder %v5722_v60, %v13988_v49 }
0x2aff   :  { %vm12027_vm15 = vmand %vm14061_vm4, %vm5854_vm11  ;;  %vm5852_vm1 = vcmp.lt.s32.totalorder %v5722_v60, %v13989_v51  ;;  %v5720_v12 = vadd.s32 432, %v13985_v23  ;;  %v5099_v13 = vadd.f32 %v5098_v59, %v5097_v44  ;;  %vm14064_vm7 = vcmp.ge.s32.totalorder %v5723_v55, %v13988_v49  ;;  %v14096_v59 = vld [vmem:[#allocation22_spill] sm:$0xff]  ;;  %v14276_v44 = vld [vmem:[#allocation49_spill] sm:$0xff] }
0x2b00   :  { %v14063_v54 = vsel %vm12027_vm15, 4294967295, %v14062_v54  ;;  %vm12039_vm9 = vmand %vm14064_vm7, %vm5853_vm13  ;;  %7013 = vmatpush.msk.msra.mxu3 %vm12027_vm15, %v13996_v1  ;;  %vm5786_vm11 = vcmp.ge.s32.totalorder %v5721_v21, %v13988_v49  ;;  %vm5851_vm4 = vcmp.lt.s32.totalorder %v5721_v21, %v13989_v51  ;;  %v5719_v36 = vadd.s32 424, %v13985_v23  ;;  %v14123_v21 = vld [vmem:[#allocation26_spill] sm:$0xff] }
0x2b01   :  { %vm14067_vm2 = vcmask 1044484   ;;  %v5100_v43 = vrot.slane %v5099_v13, 1  ;;  %vm12050_vm8 = vmand %vm5787_vm6, %vm5852_vm1  ;;  %v14068_v45 = vmov 0  ;;  %vm14070_vm13 = vcmask 1045509  }
0x2b02   :  { %v5113_v34 = vsel %vm14067_vm2, %v5074_v33, %v5112_v61  ;;  %v14069_v45 = vsel %vm12050_vm8, 4294967295, %v14068_v45  ;;  %v5092_v29 = vadd.f32 %v5091_v6, %v5090_v7  ;;  %7014 = vmatpush.msk.msra.mxu3 %vm12039_vm9, %v13996_v1  ;;  %vm5785_vm7 = vcmp.ge.s32.totalorder %v5720_v12, %v13988_v49  ;;  %vm12060_vm14 = vmand %vm5786_vm11, %vm5851_vm4  ;;  %v14098_v6 = vld [vmem:[#allocation23_spill] sm:$0xff] }
0x2b03   :  { %v5114_v19 = vsel %vm14070_vm13, %v5083_v2, %v5113_v34  ;;  %vm5850_vm15 = vcmp.lt.s32.totalorder %v5720_v12, %v13989_v51  ;;  %v5101_v37 = vadd.f32 %v5100_v43, %v5099_v13  ;;  %v14071_v28 = vmov 0  ;;  %v14100_v12 = vld [vmem:[#allocation25_spill] sm:$0xff]  ;;  %v14102_v13 = vld [vmem:[#allocation27_spill] sm:$0xff]  ;;  %v5662_v34 = vpop.permute.xlu2 %5661  ;;  %v14124_v2 = vld [vmem:[#allocation28_spill] sm:$0xff] }
0x2b04   :  { %v14072_v28 = vsel %vm12060_vm14, 4294967295, %v14071_v28  ;;  %7015 = vmatpush.msk.msra.mxu3 %vm12050_vm8, %v13996_v1  ;;  %vm5784_vm2 = vcmp.ge.s32.totalorder %v5719_v36, %v13988_v49  ;;  %vm5849_vm6 = vcmp.lt.s32.totalorder %v5719_v36, %v13989_v51  ;;  %vm14073_vm1 = vcmask 1046534   ;;  %vm12073_vm13 = vmand %vm5785_vm7, %vm5850_vm15  ;;  %v14105_v43 = vld [vmem:[#allocation29_spill] sm:$0xff] }
0x2b05   :  { %v12064_v35 = vld [vmem:[#allocation4 + $0x10] sm:$0xff]  ;;  %v5115_v14 = vsel %vm14073_vm1, %v5092_v29, %v5114_v19  ;;  %v14074_v24 = vmov 0  ;;  %vm14076_vm11 = vcmask 1047559   ;;  %vm14077_vm4 = vcmask 261120   ;;  %vm12083_vm8 = vmand %vm5784_vm2, %vm5849_vm6  ;;  %v14108_v19 = vld [vmem:[#allocation31_spill] sm:$0xff] }
0x2b06   :  { %v6151_v32 = vrot.slane %v12064_v35, 4  ;;  %v14075_v24 = vsel %vm12073_vm13, 4294967295, %v14074_v24  ;;  %v5116_v17 = vsel %vm14076_vm11, %v5101_v37, %v5115_v14  ;;  %7016 = vmatpush.msk.msra.mxu3 %vm12060_vm14, %v13996_v1  ;;  %v14078_v30 = vmov 0  ;;  %v14110_v29 = vld [vmem:[#allocation33_spill] sm:$0xff]  ;;  %v14112_v37 = vld [vmem:[#allocation34_spill] sm:$0xff] }
0x2b07   :  { %5118 = vst.msk [vmem:[#allocation4 + $0x18] sm:$0xff] %vm14077_vm4, %v5116_v17  ;;  %v14079_v30 = vsel %vm12083_vm8, 4294967295, %v14078_v30  ;;  %vm14080_vm1 = vcmask 523520   ;;  %v5718_v55 = vadd.s32 416, %v13985_v23  ;;  %v5717_v48 = vadd.s32 408, %v13985_v23 }
0x2b08   :  { %v6152_v47 = vadd.f32 %v6151_v32, %v12064_v35  ;;  %5122 = vst.msk [vmem:[#allocation4 + $0x18] sm:$0xff] %vm14080_vm1, %v5120_v3  ;;  %7017 = vmatpush.msk.msra.mxu3 %vm12073_vm13, %v13996_v1  ;;  %v5716_v5 = vadd.s32 400, %v13985_v23  ;;  %v5715_v50 = vadd.s32 392, %v13985_v23  ;;  %v5714_v7 = vadd.s32 384, %v13985_v23  ;;  %v14114_v32 = vld [vmem:[#allocation35_spill] sm:$0xff]  ;;  %v14116_v3 = vld [vmem:[#allocation9_spill] sm:$0xff] }
0x2b09   :  { %vm5783_vm15 = vcmp.ge.s32.totalorder %v5718_v55, %v13988_v49  ;;  %vm5848_vm7 = vcmp.lt.s32.totalorder %v5718_v55, %v13989_v51  ;;  %vm5782_vm2 = vcmp.ge.s32.totalorder %v5717_v48, %v13988_v49  ;;  %vm5847_vm6 = vcmp.lt.s32.totalorder %v5717_v48, %v13989_v51  ;;  %v14120_v48 = vld [vmem:[#allocation16_spill] sm:$0xff] }
0x2b0a   :  { %v6153_v62 = vrot.slane %v6152_v47, 2  ;;  %7018 = vmatpush.msk.msra.mxu3 %vm12083_vm8, %v13996_v1  ;;  %vm12103_vm11 = vmand %vm5783_vm15, %vm5848_vm7  ;;  %v14081_v60 = vmov 0  ;;  %vm5781_vm4 = vcmp.ge.s32.totalorder %v5716_v5, %v13988_v49  ;;  %vm5846_vm1 = vcmp.lt.s32.totalorder %v5716_v5, %v13989_v51 }
0x2b0b   :  { %v14082_v60 = vsel %vm12103_vm11, 4294967295, %v14081_v60  ;;  %vm12112_vm8 = vmand %vm5782_vm2, %vm5847_vm6  ;;  %vm5780_vm13 = vcmp.ge.s32.totalorder %v5715_v50, %v13988_v49  ;;  %vm5845_vm14 = vcmp.lt.s32.totalorder %v5715_v50, %v13989_v51  ;;  %vm5779_vm7 = vcmp.ge.s32.totalorder %v5714_v7, %v13988_v49  ;;  %v14121_v50 = vld [vmem:[#allocation21_spill] sm:$0xff]  ;;  %v14122_v49 = vld [vmem:[#allocation24_spill] sm:$0xff] }
0x2b0c   :  { %v6154_v10 = vadd.f32 %v6153_v62, %v6152_v47  ;;  %7019 = vmatpush.msk.msra.mxu3 %vm12103_vm11, %v13996_v1  ;;  %vm12118_vm15 = vmand %vm5781_vm4, %vm5846_vm1  ;;  %vm5844_vm11 = vcmp.lt.s32.totalorder %v5714_v7, %v13989_v51  ;;  %v14087_v33 = vmov 0  ;;  %v14089_v46 = vmov 0  ;;  %v14118_v62 = vld [vmem:[#allocation19_spill] sm:$0xff] }
0x2b0d   :  { %vm12127_vm2 = vmand %vm5780_vm13, %vm5845_vm14  ;;  %vm14097_vm14 = vnez %v14096_v59  ;;  %vm14107_vm13 = vcmask 1048320   ;;  %vm14111_vm4 = vnez %v14110_v29  ;;  %vm14113_vm1 = vnez %v14112_v37 }
0x2b0e   :  { %v6155_v18 = vrot.slane %v6154_v10, 1  ;;  %7020 = vmatpush.msk.msra.mxu3 %vm12112_vm8, %v13996_v1  ;;  %v14088_v33 = vsel %vm12127_vm2, 4294967295, %v14087_v33  ;;  %vm12134_vm6 = vmand %vm5779_vm7, %vm5844_vm11  ;;  %vm14109_vm11 = vnez %v14108_v19  ;;  %vm14115_vm7 = vnez %v14114_v32 }
0x2b0f   :  { %v14090_v46 = vsel %vm12134_vm6, 4294967295, %v14089_v46  ;;  %v12199_v5 = vmul.u32 8, %v14120_v48  ;;  %v12202_v7 = vmul.u32 8, %v14121_v50  ;;  %v12205_v51 = vmul.u32 8, %v14122_v49 }
0x2b10   :  { %v6156_v11 = vadd.f32 %v6155_v18, %v6154_v10  ;;  %7021 = vmatpush.msk.msra.mxu3 %vm12118_vm15, %v13996_v1  ;;  %v12208_v61 = vmul.u32 8, %v14123_v21  ;;  %v12211_v59 = vmul.u32 8, %v14124_v2  ;;  %v14127_v32 = vmov 0 }
0x2b11   :  { %v14142_v48 = vmov 0  ;;  %v14144_v49 = vmov 0  ;;  %v12342_v21 = vmul.u32 8, %v13985_v23  ;;  %v14148_v2 = vmov 0 }
0x2b12   :  { %6219 = vmatmul.f32.vlgmr.msrb.gmra.mxu2 %v6156_v11  ;;  %7022 = vmatpush.msk.msra.mxu3 %vm12127_vm2, %v13996_v1  ;;  %v12232_v19 = vadd.s32 8, %v12208_v61  ;;  %v14150_v23 = vmov 0 }
0x2b14   :  { %7023 = vmatpush.msk.msra.mxu3 %vm12134_vm6, %v13996_v1 }
0x2b16   :  { %7060 = vmatpush.msk.msrb.mxu3 %vm9068_vm3, %v13996_v1  ;;  %vm14099_vm3 = vnez %v14098_v6  ;;  %v14125_v6 = vld [vmem:[#allocation30_spill] sm:$0xff] }
0x2b18   :  { %7061 = vmatpush.msk.msrb.mxu3 %vm9088_vm5, %v13996_v1  ;;  %vm14101_vm5 = vnez %v14100_v12  ;;  %v12214_v12 = vmul.u32 8, %v14125_v6  ;;  %v12376_v6 = vadd.s32 8, %v12342_v21 }
0x2b1a   :  { %7062 = vmatpush.msk.msrb.mxu3 %vm9098_vm12, %v13996_v1  ;;  %vm14103_vm12 = vnez %v14102_v13  ;;  %v14126_v13 = vld [vmem:[#allocation8_spill] sm:$0xff] }
0x2b1b   :  { %v12239_v29 = vadd.s32 256, %v14126_v13  ;;  %v12242_v37 = vadd.s32 384, %v14126_v13 }
0x2b1c   :  { %7063 = vmatpush.msk.msrb.mxu3 %vm9104_vm0, %v13996_v1  ;;  %vm14104_vm0 = vcmask 785920  }
0x2b1d   :  { %vm6030_vm6 = vcmp.ge.s32.totalorder %v12242_v37, %v12199_v5 }
0x2b1e   :  { %7064 = vmatpush.msk.msrb.mxu3 %vm9112_vm10, %v13996_v1  ;;  %vm14106_vm10 = vnez %v14105_v43  ;;  %v12229_v43 = vadd.s32 8, %v12205_v51 }
0x2b20   :  { %7065 = vmatpush.msk.msrb.mxu3 %vm14097_vm14, %v13996_v1  ;;  %vm14117_vm14 = vnez %v14116_v3  ;;  %v14130_v3 = vld [vmem:[#allocation32_spill] sm:$0xff] }
0x2b22   :  { %7066 = vmatpush.msk.msrb.mxu3 %vm14099_vm3, %v13996_v1  ;;  %vm14119_vm3 = vnez %v14118_v62  ;;  %v14131_v62 = vmov 0 }
0x2b24   :  { %7067 = vmatpush.msk.msrb.mxu3 %vm14101_vm5, %v13996_v1  ;;  %vm6027_vm5 = vcmp.ge.s32.totalorder %v14126_v13, %v12199_v5 }
0x2b26   :  { %7068 = vmatpush.msk.msrb.mxu3 %vm14103_vm12, %v13996_v1  ;;  %vm6023_vm12 = vcmp.ge.s32.totalorder %v14126_v13, %v12202_v7 }
0x2b28   :  { %7069 = vmatpush.msk.msrb.mxu3 %vm14106_vm10, %v13996_v1 }
0x2b2a   :  { %7070 = vmatpush.msk.msrb.mxu3 %vm14109_vm11, %v13996_v1 }
0x2b2c   :  { %7071 = vmatpush.msk.msrb.mxu3 %vm14111_vm4, %v13996_v1  ;;  %vm6059_vm4 = vcmp.lt.s32.totalorder %v14126_v13, %v12229_v43 }
0x2b2e   :  { %7072 = vmatpush.msk.msrb.mxu3 %vm14113_vm1, %v13996_v1  ;;  %vm6015_vm1 = vcmp.ge.s32.totalorder %v14126_v13, %v12208_v61 }
0x2b30   :  { %7073 = vmatpush.msk.msrb.mxu3 %vm14115_vm7, %v13996_v1  ;;  %vm6055_vm7 = vcmp.lt.s32.totalorder %v14126_v13, %v12232_v19 }
0x2b32   :  { %7074 = vmatpush.msk.msrb.mxu3 %vm14117_vm14, %v13996_v1 }
0x2b34   :  { %7075 = vmatpush.msk.msrb.mxu3 %vm14119_vm3, %v13996_v1  ;;  %vm6029_vm3 = vcmp.ge.s32.totalorder %v12239_v29, %v12199_v5 }
0x2b4d   :  { %v5658_v36 = vpop.permute.xlu1 %5657 }
0x2b4e   :  { %5660 = vst.msk [vmem:[#allocation4 + $0x18] sm:$0xff] %vm14104_vm0, %v5658_v36  ;;  %v12219_v36 = vadd.s32 8, %v12199_v5  ;;  %vm6019_vm0 = vcmp.ge.s32.totalorder %v14126_v13, %v12205_v51 }
0x2b4f   :  { %5664 = vst.msk [vmem:[#allocation4 + $0x18] sm:$0xff] %vm14107_vm13, %v5662_v34  ;;  %v12222_v34 = vadd.s32 8, %v12202_v7 }
0x2b50   :  { %vm6067_vm10 = vcmp.lt.s32.totalorder %v14126_v13, %v12219_v36 }
0x2b51   :  { %vm6063_vm13 = vcmp.lt.s32.totalorder %v14126_v13, %v12222_v34  ;;  %vm12244_vm11 = vmand %vm6027_vm5, %vm6067_vm10  ;;  %vm6069_vm5 = vcmp.lt.s32.totalorder %v12239_v29, %v12219_v36 }
0x2b52   :  { %v14128_v32 = vsel %vm12244_vm11, 4294967295, %v14127_v32  ;;  %7024 = vmatpush.msk.msra.mxu0 %vm12244_vm11, %v13996_v1  ;;  %vm12266_vm14 = vmand %vm6023_vm12, %vm6063_vm13  ;;  %vm6070_vm12 = vcmp.lt.s32.totalorder %v12242_v37, %v12219_v36 }
0x2b53   :  { %14129 = vst [vmem:[#allocation79_spill] sm:$0xff] %v14128_v32  ;;  %v14132_v62 = vsel %vm12266_vm14, 4294967295, %v14131_v62  ;;  %vm12277_vm10 = vmand %vm6019_vm0, %vm6059_vm4  ;;  %vm6011_vm0 = vcmp.ge.s32.totalorder %v14126_v13, %v12211_v59  ;;  %v14166_v32 = vmov 0 }
0x2b54   :  { %14133 = vst [vmem:[#allocation84_spill] sm:$0xff] %v14132_v62  ;;  %7025 = vmatpush.msk.msra.mxu0 %vm12266_vm14, %v13996_v1  ;;  %vm12291_vm13 = vmand %vm6015_vm1, %vm6055_vm7  ;;  %vm6065_vm1 = vcmp.lt.s32.totalorder %v12239_v29, %v12222_v34  ;;  %v14161_v62 = vmov 0 }
0x2b55   :  { %vm12302_vm2 = vmand %vm6029_vm3, %vm6069_vm5  ;;  %vm6026_vm3 = vcmp.ge.s32.totalorder %v12242_v37, %v12202_v7  ;;  %vm6066_vm5 = vcmp.lt.s32.totalorder %v12242_v37, %v12222_v34 }
0x2b56   :  { %v12185_v14 = vld [vmem:[#allocation4 + $0x18] sm:$0xff]  ;;  %7026 = vmatpush.msk.msra.mxu0 %vm12277_vm10, %v13996_v1  ;;  %7042 = vmatpush.msk.msrb.mxu1 %vm12302_vm2, %v13996_v1  ;;  %vm12319_vm7 = vmand %vm6030_vm6, %vm6070_vm12  ;;  %vm6021_vm6 = vcmp.ge.s32.totalorder %v12239_v29, %v12205_v51  ;;  %vm6061_vm12 = vcmp.lt.s32.totalorder %v12239_v29, %v12229_v43 }
0x2b57   :  { %v6157_v17 = vrot.slane %v12185_v14, 4  ;;  %v14143_v48 = vsel %vm12319_vm7, 4294967295, %v14142_v48  ;;  %7051 = vmatpush.msk.msra.mxu2 %vm12319_vm7, %v13996_v1 }
0x2b58   :  { %7027 = vmatpush.msk.msra.mxu0 %vm12291_vm13, %v13996_v1 }
0x2b59   :  { %v6158_v47 = vadd.f32 %v6157_v17, %v12185_v14  ;;  %v12255_v17 = vadd.s32 8, %v12211_v59 }
0x2b5b   :  { %v6159_v10 = vrot.slane %v6158_v47, 2  ;;  %vm6051_vm4 = vcmp.lt.s32.totalorder %v14126_v13, %v12255_v17 }
0x2b5d   :  { %v6160_v18 = vadd.f32 %v6159_v10, %v6158_v47  ;;  %v12258_v47 = vmul.u32 8, %v14130_v3  ;;  %v14134_v10 = vmov 0  ;;  %v14154_v3 = vmov 0 }
0x2b5e   :  { %v14135_v10 = vsel %vm12277_vm10, 4294967295, %v14134_v10 }
0x2b5f   :  { %v6161_v11 = vrot.slane %v6160_v18, 1  ;;  %14136 = vst [vmem:[#allocation81_spill] sm:$0xff] %v14135_v10  ;;  %v12328_v50 = vadd.s32 8, %v12258_v47  ;;  %v14157_v10 = vmov 0 }
0x2b61   :  { %v6162_v55 = vadd.f32 %v6161_v11, %v6160_v18  ;;  %v14137_v18 = vmov 0  ;;  %v12300_v11 = vadd.s32 8, %v12214_v12 }
0x2b62   :  { %v14138_v18 = vsel %vm12291_vm13, 4294967295, %v14137_v18 }
0x2b63   :  { %6239 = vmatmul.f32.vlgmr.msra.gmra.mxu3 %v6162_v55  ;;  %14139 = vst [vmem:[#allocation83_spill] sm:$0xff] %v14138_v18  ;;  %v12402_v18 = vadd.s32 128, %v14126_v13 }
0x2b64   :  { %7124 = vmatpush.msk.msra.mxu3 %vm12244_vm11, %v13996_v1  ;;  %vm12333_vm11 = vmand %vm6011_vm0, %vm6051_vm4  ;;  %vm14147_vm0 = vcmp.ge.s32.totalorder %v12239_v29, %v12202_v7 }
0x2b65   :  { %v14145_v49 = vsel %vm12333_vm11, 4294967295, %v14144_v49  ;;  %vm12356_vm4 = vmand %vm14147_vm0, %vm6065_vm1  ;;  %7028 = vmatpush.msk.msra.mxu0 %vm12333_vm11, %v13996_v1  ;;  %vm6003_vm0 = vcmp.ge.s32.totalorder %v14126_v13, %v12258_v47 }
0x2b66   :  { %7125 = vmatpush.msk.msra.mxu3 %vm12266_vm14, %v13996_v1  ;;  %14146 = vst [vmem:[#allocation87_spill] sm:$0xff] %v14145_v49  ;;  %v14149_v2 = vsel %vm12356_vm4, 4294967295, %v14148_v2  ;;  %7043 = vmatpush.msk.msrb.mxu1 %vm12356_vm4, %v13996_v1  ;;  %vm12404_vm14 = vmand %vm6021_vm6, %vm6061_vm12  ;;  %vm14159_vm6 = vcmp.lt.s32.totalorder %v12242_v37, %v12229_v43  ;;  %vm14160_vm12 = vcmp.ge.s32.totalorder %v12242_v37, %v12205_v51  ;;  %v14163_v49 = vmov 0 }
0x2b67   :  { %v14158_v10 = vsel %vm12404_vm14, 4294967295, %v14157_v10  ;;  %vm6058_vm4 = vcmp.lt.s32.totalorder %v12242_v37, %v12232_v19 }
0x2b68   :  { %7126 = vmatpush.msk.msra.mxu3 %vm12277_vm10, %v13996_v1  ;;  %vm12367_vm10 = vmand %vm6026_vm3, %vm6066_vm5  ;;  %vm14152_vm3 = vcmp.lt.s32.totalorder %v14126_v13, %v12300_v11  ;;  %vm14153_vm5 = vcmp.ge.s32.totalorder %v14126_v13, %v12214_v12  ;;  %7044 = vmatpush.msk.msrb.mxu1 %vm12404_vm14, %v13996_v1 }
0x2b69   :  { %v14151_v23 = vsel %vm12367_vm10, 4294967295, %v14150_v23  ;;  %7052 = vmatpush.msk.msra.mxu2 %vm12367_vm10, %v13996_v1  ;;  %vm12393_vm1 = vmand %vm14153_vm5, %vm14152_vm3  ;;  %vm6017_vm10 = vcmp.ge.s32.totalorder %v12239_v29, %v12208_v61  ;;  %vm6057_vm3 = vcmp.lt.s32.totalorder %v12239_v29, %v12232_v19 }
0x2b6a   :  { %7127 = vmatpush.msk.msra.mxu3 %vm12291_vm13, %v13996_v1  ;;  %v14155_v3 = vsel %vm12393_vm1, 4294967295, %v14154_v3  ;;  %vm6043_vm13 = vcmp.lt.s32.totalorder %v14126_v13, %v12328_v50  ;;  %7029 = vmatpush.msk.msra.mxu0 %vm12393_vm1, %v13996_v1  ;;  %vm12427_vm5 = vmand %vm14160_vm12, %vm14159_vm6  ;;  %vm5999_vm6 = vcmp.ge.s32.totalorder %v14126_v13, %v12342_v21  ;;  %vm6039_vm12 = vcmp.lt.s32.totalorder %v14126_v13, %v12376_v6 }
0x2b6b   :  { %14156 = vst [vmem:[#allocation86_spill] sm:$0xff] %v14155_v3  ;;  %v14162_v62 = vsel %vm12427_vm5, 4294967295, %v14161_v62  ;;  %7053 = vmatpush.msk.msra.mxu2 %vm12427_vm5, %v13996_v1  ;;  %vm12438_vm14 = vmand %vm6003_vm0, %vm6043_vm13  ;;  %vm6028_vm13 = vcmp.ge.s32.totalorder %v12402_v18, %v12199_v5  ;;  %vm6068_vm0 = vcmp.lt.s32.totalorder %v12402_v18, %v12219_v36  ;;  %v14168_v13 = vmov 0 }
0x2b6c   :  { %7128 = vmatpush.msk.msra.mxu3 %vm12333_vm11, %v13996_v1  ;;  %vm6018_vm11 = vcmp.ge.s32.totalorder %v12242_v37, %v12208_v61  ;;  %v14164_v49 = vsel %vm12438_vm14, 4294967295, %v14163_v49  ;;  %7030 = vmatpush.msk.msra.mxu0 %vm12438_vm14, %v13996_v1  ;;  %vm12452_vm7 = vmand %vm6017_vm10, %vm6057_vm3  ;;  %vm6013_vm10 = vcmp.ge.s32.totalorder %v12239_v29, %v12211_v59  ;;  %vm6053_vm3 = vcmp.lt.s32.totalorder %v12239_v29, %v12255_v17 }
0x2b6d   :  { %14165 = vst [vmem:[#allocation82_spill] sm:$0xff] %v14164_v49  ;;  %v14167_v32 = vsel %vm12452_vm7, 4294967295, %v14166_v32  ;;  %7045 = vmatpush.msk.msrb.mxu1 %vm12452_vm7, %v13996_v1  ;;  %vm12463_vm5 = vmand %vm6018_vm11, %vm6058_vm4  ;;  %v14170_v5 = vmov 0  ;;  %vm6014_vm11 = vcmp.ge.s32.totalorder %v12242_v37, %v12211_v59  ;;  %vm6054_vm4 = vcmp.lt.s32.totalorder %v12242_v37, %v12255_v17 }
0x2b6e   :  { %7129 = vmatpush.msk.msra.mxu3 %vm12393_vm1, %v13996_v1  ;;  %v14169_v13 = vsel %vm12463_vm5, 4294967295, %v14168_v13  ;;  %7054 = vmatpush.msk.msra.mxu2 %vm12463_vm5, %v13996_v1  ;;  %vm12477_vm1 = vmand %vm5999_vm6, %vm6039_vm12  ;;  %v14173_v36 = vmov 0  ;;  %v14175_v49 = vmov 0  ;;  %v14177_v3 = vmov 0 }
0x2b6f   :  { %v14171_v5 = vsel %vm12477_vm1, 4294967295, %v14170_v5  ;;  %7031 = vmatpush.msk.msra.mxu0 %vm12477_vm1, %v13996_v1  ;;  %vm12488_vm7 = vmand %vm6028_vm13, %vm6068_vm0  ;;  %vm6024_vm13 = vcmp.ge.s32.totalorder %v12402_v18, %v12202_v7  ;;  %vm6064_vm0 = vcmp.lt.s32.totalorder %v12402_v18, %v12222_v34  ;;  %v14181_v7 = vmov 0 }
0x2b70   :  { %7130 = vmatpush.msk.msra.mxu3 %vm12438_vm14, %v13996_v1  ;;  %14172 = vst [vmem:[#allocation80_spill] sm:$0xff] %v14171_v5  ;;  %v14174_v36 = vsel %vm12488_vm7, 4294967295, %v14173_v36  ;;  %vm12498_vm6 = vmand %vm6013_vm10, %vm6053_vm3  ;;  %vm6009_vm10 = vcmp.ge.s32.totalorder %v12239_v29, %v12214_v12  ;;  %vm6049_vm3 = vcmp.lt.s32.totalorder %v12239_v29, %v12300_v11  ;;  %v14179_v5 = vmov 0 }
0x2b71   :  { %7033 = vmatpush.msk.msrb.mxu0 %vm12488_vm7, %v13996_v1  ;;  %v14176_v49 = vsel %vm12498_vm6, 4294967295, %v14175_v49  ;;  %7046 = vmatpush.msk.msrb.mxu1 %vm12498_vm6, %v13996_v1  ;;  %vm12505_vm12 = vmand %vm6014_vm11, %vm6054_vm4  ;;  %vm6010_vm4 = vcmp.ge.s32.totalorder %v12242_v37, %v12214_v12  ;;  %vm6020_vm14 = vcmp.ge.s32.totalorder %v12402_v18, %v12205_v51  ;;  %vm6060_vm7 = vcmp.lt.s32.totalorder %v12402_v18, %v12229_v43 }
0x2b72   :  { %7131 = vmatpush.msk.msra.mxu3 %vm12477_vm1, %v13996_v1  ;;  %v14178_v3 = vsel %vm12505_vm12, 4294967295, %v14177_v3  ;;  %7055 = vmatpush.msk.msra.mxu2 %vm12505_vm12, %v13996_v1  ;;  %vm12520_vm11 = vmand %vm6024_vm13, %vm6064_vm0  ;;  %vm6050_vm1 = vcmp.lt.s32.totalorder %v12242_v37, %v12300_v11  ;;  %vm6005_vm0 = vcmp.ge.s32.totalorder %v12239_v29, %v12258_v47  ;;  %vm6045_vm12 = vcmp.lt.s32.totalorder %v12239_v29, %v12328_v50 }
0x2b73   :  { %v14180_v5 = vsel %vm12520_vm11, 4294967295, %v14179_v5  ;;  %7034 = vmatpush.msk.msrb.mxu0 %vm12520_vm11, %v13996_v1  ;;  %vm12535_vm13 = vmand %vm6009_vm10, %vm6049_vm3  ;;  %v14183_v51 = vmov 0  ;;  %vm6006_vm10 = vcmp.ge.s32.totalorder %v12242_v37, %v12258_v47  ;;  %vm6046_vm3 = vcmp.lt.s32.totalorder %v12242_v37, %v12328_v50 }
0x2b74   :  { %v14182_v7 = vsel %vm12535_vm13, 4294967295, %v14181_v7  ;;  %7047 = vmatpush.msk.msrb.mxu1 %vm12535_vm13, %v13996_v1  ;;  %vm12546_vm6 = vmand %vm6010_vm4, %vm6050_vm1  ;;  %v7757_v34 = vmov 64.0   ;;  %v14185_v43 = vmov 0  ;;  %vm6016_vm1 = vcmp.ge.s32.totalorder %v12402_v18, %v12208_v61 }
0x2b75   :  { %v14184_v51 = vsel %vm12546_vm6, 4294967295, %v14183_v51  ;;  %7621 = vrcp.f32 %v7757_v34  ;;  %7056 = vmatpush.msk.msra.mxu2 %vm12546_vm6, %v13996_v1  ;;  %vm12557_vm11 = vmand %vm6020_vm14, %vm6060_vm7  ;;  %vm6056_vm4 = vcmp.lt.s32.totalorder %v12402_v18, %v12232_v19  ;;  %v14187_v34 = vmov 0 }
0x2b76   :  { %v14186_v43 = vsel %vm12557_vm11, 4294967295, %v14185_v43  ;;  %7035 = vmatpush.msk.msrb.mxu0 %vm12557_vm11, %v13996_v1  ;;  %vm12568_vm13 = vmand %vm6005_vm0, %vm6045_vm12  ;;  %vm6001_vm14 = vcmp.ge.s32.totalorder %v12239_v29, %v12342_v21  ;;  %vm6041_vm7 = vcmp.lt.s32.totalorder %v12239_v29, %v12376_v6  ;;  %v14189_v61 = vmov 0 }
0x2b77   :  { %v14188_v34 = vsel %vm12568_vm13, 4294967295, %v14187_v34  ;;  %7048 = vmatpush.msk.msrb.mxu1 %vm12568_vm13, %v13996_v1  ;;  %vm12579_vm6 = vmand %vm6006_vm10, %vm6046_vm3  ;;  %vm6002_vm12 = vcmp.ge.s32.totalorder %v12242_v37, %v12342_v21  ;;  %vm6042_vm0 = vcmp.lt.s32.totalorder %v12242_v37, %v12376_v6  ;;  %v14191_v19 = vmov 0 }
0x2b78   :  { %v14190_v61 = vsel %vm12579_vm6, 4294967295, %v14189_v61  ;;  %7057 = vmatpush.msk.msra.mxu2 %vm12579_vm6, %v13996_v1  ;;  %vm12590_vm11 = vmand %vm6016_vm1, %vm6056_vm4  ;;  %vm6012_vm10 = vcmp.ge.s32.totalorder %v12402_v18, %v12211_v59  ;;  %vm6052_vm3 = vcmp.lt.s32.totalorder %v12402_v18, %v12255_v17  ;;  %v14193_v29 = vmov 0 }
0x2b79   :  { %v14192_v19 = vsel %vm12590_vm11, 4294967295, %v14191_v19  ;;  %7036 = vmatpush.msk.msrb.mxu0 %vm12590_vm11, %v13996_v1  ;;  %vm12601_vm13 = vmand %vm6001_vm14, %vm6041_vm7  ;;  %vm6008_vm1 = vcmp.ge.s32.totalorder %v12402_v18, %v12214_v12  ;;  %vm6048_vm4 = vcmp.lt.s32.totalorder %v12402_v18, %v12300_v11  ;;  %v14195_v59 = vmov 0 }
0x2b7a   :  { %v14194_v29 = vsel %vm12601_vm13, 4294967295, %v14193_v29  ;;  %7049 = vmatpush.msk.msrb.mxu1 %vm12601_vm13, %v13996_v1  ;;  %vm12612_vm6 = vmand %vm6002_vm12, %vm6042_vm0  ;;  %vm6004_vm14 = vcmp.ge.s32.totalorder %v12402_v18, %v12258_v47  ;;  %vm6044_vm7 = vcmp.lt.s32.totalorder %v12402_v18, %v12328_v50  ;;  %vm14199_vm12 = vnez %v13992_v42  ;;  %v12884_v50 = vld [vmem:[#allocation4] sm:$0xff]  ;;  %v6657_v42 = vld [vmem:[%s13058_s6 + $0x38] sm:$0xff] }
0x2b7b   :  { %v14196_v59 = vsel %vm12612_vm6, 4294967295, %v14195_v59  ;;  %v7622_v37 = vpop.eup %7621  ;;  %7058 = vmatpush.msk.msra.mxu2 %vm12612_vm6, %v13996_v1  ;;  %vm12623_vm11 = vmand %vm6012_vm10, %vm6052_vm3  ;;  %vm6000_vm13 = vcmp.ge.s32.totalorder %v12402_v18, %v12342_v21  ;;  %vm6040_vm10 = vcmp.lt.s32.totalorder %v12402_v18, %v12376_v6  ;;  %vm14202_vm3 = vnez %v14037_v20 }
0x2b7c   :  { %7092 = vmatpush.msk.msra.mxu1 %vm14199_vm12, %v13996_v1  ;;  %7037 = vmatpush.msk.msrb.mxu0 %vm12623_vm11, %v13996_v1  ;;  %vm12633_vm0 = vmand %vm6008_vm1, %vm6048_vm4  ;;  %vm14205_vm1 = vnez %v13999_v26  ;;  %v6244_v47 = vmul.f32 64.0, %v7622_v37  ;;  %vm14206_vm4 = vnez %v14041_v15  ;;  %v14207_v20 = vmov 0 }
0x2b7d   :  { %7108 = vmatpush.msk.msrb.mxu2 %vm14202_vm3, %v13996_v1  ;;  %vm12644_vm6 = vmand %vm6004_vm14, %vm6044_vm7  ;;  %vm14209_vm14 = vnez %v14002_v31  ;;  %vm14210_vm7 = vnez %v14052_v0  ;;  %vm14211_vm3 = vnez %v14004_v16  ;;  %v6200_v16 = vpop.f32.mrf.mxu1 }
0x2b7e   :  { %7093 = vmatpush.msk.msra.mxu1 %vm14205_vm1, %v13996_v1  ;;  %7038 = vmatpush.msk.msrb.mxu0 %vm12633_vm0, %v13996_v1  ;;  %vm12657_vm12 = vmand %vm6000_vm13, %vm6040_vm10  ;;  %v6245_v26 = vsub.f32 1.0, %v6244_v47  ;;  %vm14212_vm13 = vnez %v14054_v4  ;;  %vm14213_vm10 = vnez %v14007_v39  ;;  %vm14214_vm1 = vnez %v14057_v8  ;;  %v6180_v39 = vpop.f32.mrf.mxu0 }
0x2b7f   :  { %7109 = vmatpush.msk.msrb.mxu2 %vm14206_vm4, %v13996_v1  ;;  %v14208_v20 = vsel %vm12657_vm12, 4294967295, %v14207_v20  ;;  %vm14215_vm4 = vnez %v14010_v41  ;;  %v6201_v0 = vadd.f32 %v6200_v16, %v6180_v39 }
0x2b80   :  { %7094 = vmatpush.msk.msra.mxu1 %vm14209_vm14, %v13996_v1  ;;  %7039 = vmatpush.msk.msrb.mxu0 %vm12644_vm6, %v13996_v1  ;;  %v6246_v31 = vmul.f32 %v7622_v37, %v6245_v26  ;;  %vm14216_vm14 = vnez %v14063_v54  ;;  %v14253_v54 = vld [vmem:[#allocation42_spill] sm:$0xff] }
0x2b81   :  { %7110 = vmatpush.msk.msrb.mxu2 %vm14210_vm7, %v13996_v1  ;;  %vm14217_vm7 = vnez %v14012_v40 }
0x2b82   :  { %7095 = vmatpush.msk.msra.mxu1 %vm14211_vm3, %v13996_v1  ;;  %7040 = vmatpush.msk.msrb.mxu0 %vm12657_vm12, %v13996_v1  ;;  %vm14218_vm3 = vnez %v14014_v25  ;;  %v6247_v15 = vadd.f32 %v7622_v37, %v6246_v31 }
0x2b83   :  { %7111 = vmatpush.msk.msrb.mxu2 %vm14212_vm13, %v13996_v1  ;;  %vm14219_vm13 = vnez %v14069_v45  ;;  %v14260_v45 = vld [vmem:[#allocation44_spill] sm:$0xff] }
0x2b84   :  { %7096 = vmatpush.msk.msra.mxu1 %vm14213_vm10, %v13996_v1  ;;  %vm6248_vm10 = vweird.f32 %v7622_v37 }
0x2b85   :  { %7112 = vmatpush.msk.msrb.mxu2 %vm14214_vm1, %v13996_v1  ;;  %vm14220_vm1 = vnez %v14016_v63  ;;  %v12712_v4 = vsel %vm6248_vm10, %v7622_v37, %v6247_v15  ;;  %vm14226_vm10 = vnez %v14027_v22  ;;  %v14234_v22 = vld [vmem:[#allocation37_spill] sm:$0xff] }
0x2b86   :  { %7097 = vmatpush.msk.msra.mxu1 %vm14215_vm4, %v13996_v1  ;;  %vm14222_vm4 = vnez %v14020_v58  ;;  %v14228_v58 = vld [vmem:[#allocation10_spill] sm:$0xff] }
0x2b87   :  { %7113 = vmatpush.msk.msrb.mxu2 %vm14216_vm14, %v13996_v1  ;;  %vm14223_vm14 = vnez %v14075_v24  ;;  %v14268_v24 = vld [vmem:[#allocation46_spill] sm:$0xff] }
0x2b88   :  { %7098 = vmatpush.msk.msra.mxu1 %vm14217_vm7, %v13996_v1  ;;  %vm14224_vm7 = vnez %v14023_v38  ;;  %v14231_v38 = vld [vmem:[#allocation36_spill] sm:$0xff] }
0x2b89   :  { %7114 = vmatpush.msk.msrb.mxu2 %vm12039_vm9, %v13996_v1  ;;  %vm14221_vm9 = vnez %v14072_v28  ;;  %v14264_v28 = vld [vmem:[#allocation45_spill] sm:$0xff] }
0x2b8a   :  { %7099 = vmatpush.msk.msra.mxu1 %vm14218_vm3, %v13996_v1  ;;  %vm13333_vm3 = vcmask 523264  }
0x2b8b   :  { %7115 = vmatpush.msk.msrb.mxu2 %vm14219_vm13, %v13996_v1  ;;  %vm14225_vm13 = vnez %v14079_v30  ;;  %v14272_v30 = vld [vmem:[#allocation47_spill] sm:$0xff] }
0x2b8c   :  { %7100 = vmatpush.msk.msra.mxu1 %vm14220_vm1, %v13996_v1  ;;  %vm14227_vm1 = vnez %v14082_v60  ;;  %v14274_v60 = vld [vmem:[#allocation48_spill] sm:$0xff] }
0x2b8d   :  { %7116 = vmatpush.msk.msrb.mxu2 %vm14221_vm9, %v13996_v1  ;;  %vm14229_vm9 = vnez %v14228_v58 }
0x2b8e   :  { %7101 = vmatpush.msk.msra.mxu1 %vm14222_vm4, %v13996_v1  ;;  %vm14230_vm4 = vnez %v14030_v27  ;;  %v14238_v27 = vld [vmem:[#allocation38_spill] sm:$0xff] }
0x2b8f   :  { %7117 = vmatpush.msk.msrb.mxu2 %vm14223_vm14, %v13996_v1  ;;  %vm14232_vm14 = vnez %v14231_v38  ;;  %v12889_v38 = vld [vmem:[#allocation4 + $0x8] sm:$0xff] }
0x2b90   :  { %7102 = vmatpush.msk.msra.mxu1 %vm14224_vm7, %v13996_v1  ;;  %vm14233_vm7 = vnez %v14034_v56  ;;  %v14241_v56 = vld [vmem:[#allocation39_spill] sm:$0xff] }
0x2b91   :  { %7118 = vmatpush.msk.msrb.mxu2 %vm14225_vm13, %v13996_v1  ;;  %vm14235_vm13 = vnez %v14234_v22 }
0x2b92   :  { %7103 = vmatpush.msk.msra.mxu1 %vm14226_vm10, %v13996_v1  ;;  %vm14236_vm10 = vnez %v14046_v9  ;;  %v14245_v9 = vld [vmem:[#allocation40_spill] sm:$0xff] }
0x2b93   :  { %7119 = vmatpush.msk.msrb.mxu2 %vm14227_vm1, %v13996_v1  ;;  %vm14239_vm1 = vnez %v14238_v27 }
0x2b94   :  { %7104 = vmatpush.msk.msra.mxu1 %vm14230_vm4, %v13996_v1  ;;  %vm14243_vm4 = vnez %v14090_v46 }
0x2b95   :  { %v6220_v41 = vpop.f32.mrf.mxu2  ;;  %7120 = vmatpush.msk.msrb.mxu2 %vm12112_vm8, %v13996_v1  ;;  %vm14237_vm8 = vnez %v14088_v33 }
0x2b96   :  { %v6221_v40 = vadd.f32 %v6220_v41, %v6201_v0  ;;  %7105 = vmatpush.msk.msra.mxu1 %vm14233_vm7, %v13996_v1  ;;  %vm14246_vm7 = vnez %v14245_v9 }
0x2b97   :  { %7121 = vmatpush.msk.msrb.mxu2 %vm12118_vm15, %v13996_v1  ;;  %vm14240_vm15 = vnez %v14050_v53  ;;  %v14249_v53 = vld [vmem:[#allocation41_spill] sm:$0xff] }
0x2b98   :  { %7106 = vmatpush.msk.msra.mxu1 %vm14236_vm10, %v13996_v1  ;;  %vm14248_vm10 = vnez %v14151_v23 }
0x2b99   :  { %7122 = vmatpush.msk.msrb.mxu2 %vm14237_vm8, %v13996_v1  ;;  %vm14250_vm8 = vnez %v14249_v53 }
0x2b9a   :  { %7107 = vmatpush.msk.msra.mxu1 %vm14240_vm15, %v13996_v1  ;;  %vm14252_vm15 = vnez %v14162_v62 }
0x2b9b   :  { %7123 = vmatpush.msk.msrb.mxu2 %vm14243_vm4, %v13996_v1  ;;  %vm14255_vm4 = vnez %v14167_v32  ;;  %v14296_v32 = vld [vmem:[#allocation86_spill] sm:$0xff] }
0x2be6   :  { %v6240_v25 = vpop.f32.mrf.mxu3 }
0x2be7   :  { %v6241_v8 = vadd.f32 %v6240_v25, %v6221_v40 }
0x2be9   :  { %v12724_v63 = vmul.f32 %v12712_v4, %v6241_v8 }
0x2beb   :  { %7032 = vmatmul.msk.f32.vlgmr.msra.gmra.mxu0 %vm13333_vm3, %v12724_v63  ;;  %7050 = vmatmul.msk.f32.vlgmr.msrb.gmra.mxu1 %vm13333_vm3, %v12724_v63 }
0x2bec   :  { %7059 = vmatmul.msk.f32.vlgmr.msra.gmra.mxu2 %vm13333_vm3, %v12724_v63  ;;  %7076 = vmatpush.msk.msra.mxu0 %vm14229_vm9, %v13996_v1  ;;  %vm14242_vm9 = vnez %v14241_v56 }
0x2bed   :  { %7142 = vmatpush.msk.msrb.mxu1 %vm12302_vm2, %v13996_v1 }
0x2bee   :  { %7077 = vmatpush.msk.msra.mxu0 %vm14232_vm14, %v13996_v1  ;;  %vm14244_vm14 = vnez %v14143_v48  ;;  %v14300_v48 = vld [vmem:[#allocation82_spill] sm:$0xff] }
0x2bef   :  { %7151 = vmatpush.msk.msra.mxu2 %vm14244_vm14, %v13996_v1 }
0x2bf0   :  { %7078 = vmatpush.msk.msra.mxu0 %vm14235_vm13, %v13996_v1  ;;  %vm14247_vm13 = vnez %v14149_v2 }
0x2bf1   :  { %7143 = vmatpush.msk.msrb.mxu1 %vm14247_vm13, %v13996_v1  ;;  %7152 = vmatpush.msk.msra.mxu2 %vm14248_vm10, %v13996_v1 }
0x2bf2   :  { %7079 = vmatpush.msk.msra.mxu0 %vm14239_vm1, %v13996_v1  ;;  %vm14251_vm1 = vnez %v14158_v10  ;;  %v14292_v10 = vld [vmem:[#allocation87_spill] sm:$0xff] }
0x2bf3   :  { %7041 = vmatmul.msk.f32.vlgmr.msrb.gmra.mxu0 %vm13333_vm3, %v12724_v63  ;;  %7144 = vmatpush.msk.msrb.mxu1 %vm14251_vm1, %v13996_v1  ;;  %vm14259_vm3 = vnez %v14178_v3 }
0x2bf4   :  { %7080 = vmatpush.msk.msra.mxu0 %vm14242_vm9, %v13996_v1  ;;  %7153 = vmatpush.msk.msra.mxu2 %vm14252_vm15, %v13996_v1  ;;  %vm14254_vm9 = vnez %v14253_v54  ;;  %vm14262_vm15 = vnez %v14182_v7 }
0x2bf5   :  { %7145 = vmatpush.msk.msrb.mxu1 %vm14255_vm4, %v13996_v1 }
0x2bf6   :  { %7081 = vmatpush.msk.msra.mxu0 %vm14246_vm7, %v13996_v1  ;;  %7154 = vmatpush.msk.msra.mxu2 %vm12463_vm5, %v13996_v1  ;;  %vm14257_vm7 = vnez %v14256_v57  ;;  %vm14263_vm5 = vnez %v14184_v51 }
0x2bf8   :  { %7082 = vmatpush.msk.msra.mxu0 %vm14250_vm8, %v13996_v1  ;;  %vm14258_vm8 = vnez %v14176_v49  ;;  %7155 = vmatpush.msk.msra.mxu2 %vm14259_vm3, %v13996_v1  ;;  %vm14267_vm3 = vnez %v14190_v61 }
0x2bf9   :  { %7146 = vmatpush.msk.msrb.mxu1 %vm14258_vm8, %v13996_v1  ;;  %vm14266_vm8 = vnez %v14188_v34 }
0x2bfa   :  { %7083 = vmatpush.msk.msra.mxu0 %vm14254_vm9, %v13996_v1  ;;  %vm14261_vm9 = vnez %v14260_v45  ;;  %7156 = vmatpush.msk.msra.mxu2 %vm14263_vm5, %v13996_v1  ;;  %vm14271_vm5 = vnez %v14196_v59 }
0x2bfb   :  { %7147 = vmatpush.msk.msrb.mxu1 %vm14262_vm15, %v13996_v1  ;;  %vm14270_vm15 = vnez %v14194_v29 }
0x2bfc   :  { %7084 = vmatpush.msk.msra.mxu0 %vm14257_vm7, %v13996_v1  ;;  %vm14265_vm7 = vnez %v14264_v28  ;;  %7157 = vmatpush.msk.msra.mxu2 %vm14267_vm3, %v13996_v1  ;;  %vm14277_vm3 = vnez %v14276_v44 }
0x2bfd   :  { %7148 = vmatpush.msk.msrb.mxu1 %vm14266_vm8, %v13996_v1  ;;  %vm14275_vm8 = vnez %v14274_v60 }
0x2bfe   :  { %7085 = vmatpush.msk.msra.mxu0 %vm14261_vm9, %v13996_v1  ;;  %vm14269_vm9 = vnez %v14268_v24  ;;  %7158 = vmatpush.msk.msra.mxu2 %vm14271_vm5, %v13996_v1  ;;  %vm14281_vm5 = vnez %v14180_v5 }
0x2bff   :  { %7149 = vmatpush.msk.msrb.mxu1 %vm14270_vm15, %v13996_v1  ;;  %vm14280_vm15 = vnez %v14174_v36 }
0x2c00   :  { %7086 = vmatpush.msk.msra.mxu0 %vm14265_vm7, %v13996_v1  ;;  %vm14273_vm7 = vnez %v14272_v30 }
0x2c02   :  { %7087 = vmatpush.msk.msra.mxu0 %vm14269_vm9, %v13996_v1  ;;  %vm14279_vm9 = vnez %v14278_v52 }
0x2c04   :  { %7088 = vmatpush.msk.msra.mxu0 %vm14273_vm7, %v13996_v1  ;;  %vm14282_vm7 = vnez %v14186_v43 }
0x2c06   :  { %7089 = vmatpush.msk.msra.mxu0 %vm14275_vm8, %v13996_v1  ;;  %vm14283_vm8 = vnez %v14192_v19 }
0x2c08   :  { %7090 = vmatpush.msk.msra.mxu0 %vm14277_vm3, %v13996_v1 }
0x2c0a   :  { %7091 = vmatpush.msk.msra.mxu0 %vm14279_vm9, %v13996_v1 }
0x2c0c   :  { %7133 = vmatpush.msk.msrb.mxu0 %vm14280_vm15, %v13996_v1 }
0x2c0e   :  { %7134 = vmatpush.msk.msrb.mxu0 %vm14281_vm5, %v13996_v1 }
0x2c10   :  { %7135 = vmatpush.msk.msrb.mxu0 %vm14282_vm7, %v13996_v1 }
0x2c12   :  { %7136 = vmatpush.msk.msrb.mxu0 %vm14283_vm8, %v13996_v1 }
0x2c14   :  { %7137 = vmatpush.msk.msrb.mxu0 %vm12623_vm11, %v13996_v1 }
0x2c16   :  { %7138 = vmatpush.msk.msrb.mxu0 %vm12633_vm0, %v13996_v1 }
0x2c18   :  { %7139 = vmatpush.msk.msrb.mxu0 %vm12644_vm6, %v13996_v1 }
0x2c1a   :  { %7140 = vmatpush.msk.msrb.mxu0 %vm12657_vm12, %v13996_v1 }
0x2c68   :  { %v6272_v33 = vpop.f32.mrf.mxu0  ;;  %v6312_v46 = vpop.f32.mrf.mxu1 }
0x2c69   :  { %v6335_v18 = vperm.slane %v6272_v33, 0  ;;  %v6337_v11 = vperm.slane %v6312_v46, 0  ;;  %v14284_v46 = vld [vmem:[#allocation79_spill] sm:$0xff] }
0x2c6a   :  { %vm14285_vm3 = vnez %v14284_v46 }
0x2c6b   :  { %v6339_v21 = vsub.f32 %v12884_v50, %v6335_v18  ;;  %v6341_v6 = vsub.f32 %v12064_v35, %v6337_v11 }
0x2c6d   :  { %v6343_v37 = vmul.f32 %v6339_v21, %v6339_v21  ;;  %v6345_v47 = vmul.f32 %v6341_v6, %v6341_v6  ;;  %v14286_v21 = vld [vmem:[#allocation84_spill] sm:$0xff] }
0x2c6e   :  { %vm14287_vm9 = vnez %v14286_v21 }
0x2c6f   :  { %v6347_v26 = vrot.slane %v6343_v37, 4  ;;  %v6359_v31 = vrot.slane %v6345_v47, 4  ;;  %v6332_v16 = vpop.f32.mrf.mxu2 }
0x2c70   :  { %v6338_v39 = vperm.slane %v6332_v16, 0  ;;  %v6292_v41 = vpop.f32.mrf.mxu0  ;;  %v6655_v16 = vld [vmem:[%s13058_s6 + $0x28] sm:$0xff] }
0x2c71   :  { %v6348_v15 = vadd.f32 %v6347_v26, %v6343_v37  ;;  %v6360_v0 = vadd.f32 %v6359_v31, %v6345_v47  ;;  %v6336_v40 = vperm.slane %v6292_v41, 0  ;;  %v14288_v47 = vld [vmem:[#allocation81_spill] sm:$0xff]  ;;  %v14290_v26 = vld [vmem:[#allocation83_spill] sm:$0xff]  ;;  %v6653_v41 = vld [vmem:[%s13058_s6 + $0x18] sm:$0xff] }
0x2c72   :  { %v6342_v25 = vsub.f32 %v12185_v14, %v6338_v39  ;;  %vm14289_vm12 = vnez %v14288_v47  ;;  %v6465_v31 = vld [vmem:[%s13057_s5] sm:$0x1] }
0x2c73   :  { %v6349_v8 = vrot.slane %v6348_v15, 2  ;;  %v6361_v58 = vrot.slane %v6360_v0, 2  ;;  %v6340_v22 = vsub.f32 %v12889_v38, %v6336_v40  ;;  %v6650_v40 = vld [vmem:[%s13058_s6] sm:$0xff] }
0x2c74   :  { %v6346_v27 = vmul.f32 %v6342_v25, %v6342_v25  ;;  %v7220_v47 = vld [vmem:[%s13059_s7] ss:$0 sm:$0xff]  ;;  %s7758_s7 = smov 48  }
0x2c75   :  { %v6350_v35 = vadd.f32 %v6349_v8, %v6348_v15  ;;  %v6362_v56 = vadd.f32 %v6361_v58, %v6360_v0  ;;  %v6344_v9 = vmul.f32 %v6340_v22, %v6340_v22  ;;  %v6652_v15 = vld [vmem:[%s13058_s6 + $0x10] sm:$0xff]  ;;  %v6651_v0 = vld [vmem:[%s13058_s6 + $0x8] sm:$0xff] }
0x2c76   :  { %v6365_v53 = vrot.slane %v6346_v27, 4 }
0x2c77   :  { %v6351_v54 = vrot.slane %v6350_v35, 1  ;;  %v6363_v57 = vrot.slane %v6362_v56, 1  ;;  %v6353_v45 = vrot.slane %v6344_v9, 4 }
0x2c78   :  { %v6366_v28 = vadd.f32 %v6365_v53, %v6346_v27 }
0x2c79   :  { %v6354_v24 = vadd.f32 %v6353_v45, %v6344_v9  ;;  %v6352_v30 = vadd.f32 %v6351_v54, %v6350_v35  ;;  %v6364_v60 = vadd.f32 %v6363_v57, %v6362_v56 }
0x2c7a   :  { %v6367_v44 = vrot.slane %v6366_v28, 2 }
0x2c7b   :  { %v6355_v52 = vrot.slane %v6354_v24, 2  ;;  %6387 = vmatmul.f32.vlgmr.msrb.gmra.mxu3 %v6352_v30  ;;  %6427 = vmatmul.f32.vlgmr.msra.gmra.mxu1 %v6364_v60 }
0x2c7c   :  { %v6368_v33 = vadd.f32 %v6367_v44, %v6366_v28  ;;  %7160 = vmatpush.msk.msrb.mxu3 %vm14285_vm3, %v13996_v1  ;;  %7178 = vmatpush.msk.msra.mxu1 %vm12302_vm2, %v13996_v1  ;;  %vm14291_vm2 = vnez %v14290_v26 }
0x2c7d   :  { %v6356_v18 = vadd.f32 %v6355_v52, %v6354_v24 }
0x2c7e   :  { %v6369_v11 = vrot.slane %v6368_v33, 1  ;;  %7161 = vmatpush.msk.msrb.mxu3 %vm14287_vm9, %v13996_v1  ;;  %7179 = vmatpush.msk.msra.mxu1 %vm14247_vm13, %v13996_v1  ;;  %vm14295_vm13 = vnez %v14162_v62  ;;  %v14304_v62 = vld [vmem:[#allocation80_spill] sm:$0xff]  ;;  %vm14306_vm9 = vnez %v14194_v29 }
0x2c7f   :  { %v6357_v6 = vrot.slane %v6356_v18, 1  ;;  %vm14305_vm3 = vnez %v14304_v62 }
0x2c80   :  { %v6370_v37 = vadd.f32 %v6369_v11, %v6368_v33  ;;  %7162 = vmatpush.msk.msrb.mxu3 %vm14289_vm12, %v13996_v1  ;;  %7180 = vmatpush.msk.msra.mxu1 %vm14251_vm1, %v13996_v1  ;;  %vm14293_vm12 = vnez %v14292_v10  ;;  %vm14297_vm1 = vnez %v14296_v32 }
0x2c81   :  { %v6358_v55 = vadd.f32 %v6357_v6, %v6356_v18 }
0x2c82   :  { %6447 = vmatmul.f32.vlgmr.msrb.gmra.mxu2 %v6370_v37  ;;  %7163 = vmatpush.msk.msrb.mxu3 %vm14291_vm2, %v13996_v1  ;;  %vm14308_vm2 = vnez %v14190_v61 }
0x2c83   :  { %6407 = vmatmul.f32.vlgmr.msra.gmra.mxu0 %v6358_v55  ;;  %7187 = vmatpush.msk.msrb.mxu2 %vm14244_vm14, %v13996_v1  ;;  %vm14294_vm14 = vnez %v14176_v49 }
0x2c84   :  { %7169 = vmatpush.msk.msra.mxu0 %vm14280_vm15, %v13996_v1  ;;  %7181 = vmatpush.msk.msra.mxu1 %vm14255_vm4, %v13996_v1  ;;  %vm14301_vm15 = vnez %v14300_v48  ;;  %vm14302_vm4 = vnez %v14188_v34 }
0x2c85   :  { %7188 = vmatpush.msk.msrb.mxu2 %vm14248_vm10, %v13996_v1  ;;  %7164 = vmatpush.msk.msrb.mxu3 %vm14293_vm12, %v13996_v1  ;;  %vm14298_vm10 = vnez %v14182_v7  ;;  %vm14310_vm12 = vnez %v14208_v20  ;;  %v6656_v20 = vld [vmem:[%s13058_s6 + $0x30] sm:$0xff] }
0x2c86   :  { %7170 = vmatpush.msk.msra.mxu0 %vm14281_vm5, %v13996_v1  ;;  %7182 = vmatpush.msk.msra.mxu1 %vm14294_vm14, %v13996_v1  ;;  %vm14299_vm5 = vnez %v14169_v13 }
0x2c87   :  { %7189 = vmatpush.msk.msrb.mxu2 %vm14295_vm13, %v13996_v1  ;;  %7165 = vmatpush.msk.msrb.mxu3 %vm14297_vm1, %v13996_v1  ;;  %vm14311_vm13 = vcmask 523264  }
0x2c88   :  { %7171 = vmatpush.msk.msra.mxu0 %vm14282_vm7, %v13996_v1  ;;  %7183 = vmatpush.msk.msra.mxu1 %vm14298_vm10, %v13996_v1  ;;  %vm14303_vm7 = vnez %v14178_v3  ;;  %vm14312_vm1 = vmmov %vm14311_vm13 }
0x2c89   :  { %7190 = vmatpush.msk.msrb.mxu2 %vm14299_vm5, %v13996_v1  ;;  %7166 = vmatpush.msk.msrb.mxu3 %vm14301_vm15, %v13996_v1  ;;  %vm14313_vm10 = vmmov %vm14312_vm1 }
0x2c8a   :  { %7172 = vmatpush.msk.msra.mxu0 %vm14283_vm8, %v13996_v1  ;;  %7184 = vmatpush.msk.msra.mxu1 %vm14302_vm4, %v13996_v1  ;;  %vm14307_vm8 = vnez %v14184_v51  ;;  %vm14314_vm5 = vmmov %vm14312_vm1 }
0x2c8b   :  { %7191 = vmatpush.msk.msrb.mxu2 %vm14303_vm7, %v13996_v1  ;;  %7167 = vmatpush.msk.msrb.mxu3 %vm14305_vm3, %v13996_v1  ;;  %vm14315_vm15 = vmmov %vm14312_vm1 }
0x2c8c   :  { %7173 = vmatpush.msk.msra.mxu0 %vm12623_vm11, %v13996_v1  ;;  %7185 = vmatpush.msk.msra.mxu1 %vm14306_vm9, %v13996_v1  ;;  %vm14309_vm11 = vnez %v14196_v59  ;;  %vm14316_vm4 = vmmov %vm14312_vm1 }
0x2c8d   :  { %7192 = vmatpush.msk.msrb.mxu2 %vm14307_vm8, %v13996_v1  ;;  %vm14317_vm7 = vmmov %vm14312_vm1 }
0x2c8e   :  { %7174 = vmatpush.msk.msra.mxu0 %vm12633_vm0, %v13996_v1  ;;  %vm14318_vm3 = vmmov %vm14312_vm1 }
0x2c8f   :  { %7193 = vmatpush.msk.msrb.mxu2 %vm14308_vm2, %v13996_v1  ;;  %vm14319_vm9 = vmmov %vm14312_vm1 }
0x2c90   :  { %7175 = vmatpush.msk.msra.mxu0 %vm12644_vm6, %v13996_v1  ;;  %vm14320_vm8 = vmmov %vm14312_vm1 }
0x2c91   :  { %7194 = vmatpush.msk.msrb.mxu2 %vm14309_vm11, %v13996_v1  ;;  %vm14321_vm2 = vmmov %vm14312_vm1 }
0x2c92   :  { %7176 = vmatpush.msk.msra.mxu0 %vm14310_vm12, %v13996_v1  ;;  %v6452_v1 = vld [vmem:[%s13056_s4] sm:$0x1]  ;;  %vm14322_vm11 = vmmov %vm14312_vm1 }
0x2c93   :  { %vm14323_vm12 = vmmov %vm14312_vm1 }
0x2cf8   :  { %v6428_v3 = vpop.f32.mrf.mxu1 }
0x2cfe   :  { %v6388_v49 = vpop.f32.mrf.mxu3 }
0x2d00   :  { %v6408_v2 = vpop.f32.mrf.mxu0 }
0x2d01   :  { %v6409_v23 = vadd.f32 %v6408_v2, %v6388_v49 }
0x2d03   :  { %v6429_v13 = vadd.f32 %v6428_v3, %v6409_v23 }
0x2d05   :  { %v6448_v5 = vpop.f32.mrf.mxu2 }
0x2d06   :  { %v6449_v36 = vadd.f32 %v6448_v5, %v6429_v13 }
0x2d08   :  { %v6451_v7 = vmul.f32 %v6449_v36, %v12712_v4 }
0x2d0a   :  { %v6453_v51 = vadd.f32 1e-05, %v6451_v7 }
0x2d0c   :  { %7623 = vrsqrt.f32 %v6453_v51  ;;  %vm6460_vm0 = vweird.f32 %v6453_v51 }
0x2d12   :  { %v7624_v43 = vpop.eup %7623 }
0x2d13   :  { %v6455_v34 = vmul.f32 %v7624_v43, %v6453_v51  ;;  %vm6461_vm6 = vweird.f32 %v7624_v43 }
0x2d14   :  { %vm6462_vm14 = vmor %vm6460_vm0, %vm6461_vm6 }
0x2d15   :  { %v6456_v61 = vmul.f32 %v7624_v43, %v6455_v34  ;;  %vm14324_vm6 = vmmov %vm14312_vm1 }
0x2d16   :  { %vm14325_vm0 = vmmov %vm14312_vm1 }
0x2d17   :  { %v6457_v19 = vmul.f32 0.5, %v6456_v61 }
0x2d19   :  { %v6458_v29 = vsub.f32 1.5, %v6457_v19 }
0x2d1b   :  { %v6459_v59 = vmul.f32 %v7624_v43, %v6458_v29 }
0x2d1d   :  { %v6463_v12 = vsel %vm6462_vm14, %v7624_v43, %v6459_v59  ;;  %vm14326_vm14 = vmmov %vm14325_vm0 }
0x2d1e   :  { %v6464_v17 = vmul.f32 %v6463_v12, %v6452_v1 }
0x2d20   :  { %7132 = vmatmul.msk.f32.vlgmr.msra.gmra.mxu3 %vm14311_vm13, %v6464_v17  ;;  %7141 = vmatmul.msk.f32.vlgmr.msrb.gmra.mxu0 %vm14312_vm1, %v6464_v17  ;;  %v6466_v4 = vmul.f32 %v6464_v17, %v12724_v63  ;;  %v6654_v63 = vld [vmem:[%s13058_s6 + $0x20] sm:$0xff]  ;;  %vm6685_vm13 = vcmask 130048   ;;  %vm6715_vm1 = vcmask 261248  }
0x2d21   :  { %7150 = vmatmul.msk.f32.vlgmr.msrb.gmra.mxu1 %vm14313_vm10, %v6464_v17  ;;  %7159 = vmatmul.msk.f32.vlgmr.msra.gmra.mxu2 %vm14314_vm5, %v6464_v17  ;;  %vm6744_vm10 = vcmask 392448   ;;  %vm6774_vm5 = vcmask 523648  }
0x2d22   :  { %6728 = vmatpush.msrb.mxu1 %v6657_v42  ;;  %6673 = vmatpush.msra.mxu3 %v6657_v42  ;;  %v6467_v39 = vsub.f32 %v6465_v31, %v6466_v4 }
0x2d23   :  { %6758 = vmatpush.msra.mxu2 %v6657_v42  ;;  %6699 = vmatpush.msrb.mxu0 %v6657_v42 }
0x2d24   :  { %6729 = vmatpush.msrb.mxu1 %v6656_v20  ;;  %6674 = vmatpush.msra.mxu3 %v6656_v20 }
0x2d25   :  { %6759 = vmatpush.msra.mxu2 %v6656_v20  ;;  %6700 = vmatpush.msrb.mxu0 %v6656_v20 }
0x2d26   :  { %6730 = vmatpush.msrb.mxu1 %v6655_v16  ;;  %6675 = vmatpush.msra.mxu3 %v6655_v16 }
0x2d27   :  { %6760 = vmatpush.msra.mxu2 %v6655_v16  ;;  %6701 = vmatpush.msrb.mxu0 %v6655_v16 }
0x2d28   :  { %7168 = vmatmul.msk.f32.vlgmr.msrb.gmra.mxu3 %vm14315_vm15, %v6467_v39  ;;  %7177 = vmatmul.msk.f32.vlgmr.msra.gmra.mxu0 %vm14316_vm4, %v6467_v39  ;;  %vm6803_vm15 = vcmask 654848   ;;  %vm6833_vm4 = vcmask 786048  }
0x2d29   :  { %7186 = vmatmul.msk.f32.vlgmr.msra.gmra.mxu1 %vm14317_vm7, %v6467_v39  ;;  %7195 = vmatmul.msk.f32.vlgmr.msrb.gmra.mxu2 %vm14318_vm3, %v6467_v39  ;;  %vm6862_vm7 = vcmask 917248   ;;  %vm6892_vm3 = vcmask 1048448  }
0x2d2a   :  { %6731 = vmatpush.msrb.mxu1 %v6654_v63  ;;  %6676 = vmatpush.msra.mxu3 %v6654_v63 }
0x2d2b   :  { %6761 = vmatpush.msra.mxu2 %v6654_v63  ;;  %6702 = vmatpush.msrb.mxu0 %v6654_v63 }
0x2d2c   :  { %6732 = vmatpush.msrb.mxu1 %v6653_v41  ;;  %6677 = vmatpush.msra.mxu3 %v6653_v41 }
0x2d2d   :  { %6762 = vmatpush.msra.mxu2 %v6653_v41  ;;  %6703 = vmatpush.msrb.mxu0 %v6653_v41 }
0x2d2e   :  { %6733 = vmatpush.msrb.mxu1 %v6652_v15  ;;  %6678 = vmatpush.msra.mxu3 %v6652_v15 }
0x2d2f   :  { %6763 = vmatpush.msra.mxu2 %v6652_v15  ;;  %6704 = vmatpush.msrb.mxu0 %v6652_v15 }
0x2d30   :  { %6734 = vmatpush.msrb.mxu1 %v6651_v0  ;;  %6679 = vmatpush.msra.mxu3 %v6651_v0 }
0x2d31   :  { %6764 = vmatpush.msra.mxu2 %v6651_v0  ;;  %6705 = vmatpush.msrb.mxu0 %v6651_v0 }
0x2d32   :  { %6735 = vmatpush.msrb.mxu1 %v6650_v40  ;;  %6680 = vmatpush.msra.mxu3 %v6650_v40 }
0x2d33   :  { %6765 = vmatpush.msra.mxu2 %v6650_v40  ;;  %6706 = vmatpush.msrb.mxu0 %v6650_v40 }
0x2d34   :  { %6846 = vmatpush.msra.mxu1 %v6657_v42  ;;  %6787 = vmatpush.msrb.mxu3 %v6657_v42 }
0x2d35   :  { %6876 = vmatpush.msrb.mxu2 %v6657_v42  ;;  %6817 = vmatpush.msra.mxu0 %v6657_v42 }
0x2d36   :  { %6847 = vmatpush.msra.mxu1 %v6656_v20  ;;  %6788 = vmatpush.msrb.mxu3 %v6656_v20 }
0x2d37   :  { %6877 = vmatpush.msrb.mxu2 %v6656_v20  ;;  %6818 = vmatpush.msra.mxu0 %v6656_v20 }
0x2d38   :  { %6848 = vmatpush.msra.mxu1 %v6655_v16  ;;  %6789 = vmatpush.msrb.mxu3 %v6655_v16 }
0x2d39   :  { %6878 = vmatpush.msrb.mxu2 %v6655_v16  ;;  %6819 = vmatpush.msra.mxu0 %v6655_v16 }
0x2d3a   :  { %6849 = vmatpush.msra.mxu1 %v6654_v63  ;;  %6790 = vmatpush.msrb.mxu3 %v6654_v63 }
0x2d3b   :  { %6879 = vmatpush.msrb.mxu2 %v6654_v63  ;;  %6820 = vmatpush.msra.mxu0 %v6654_v63 }
0x2d3c   :  { %6850 = vmatpush.msra.mxu1 %v6653_v41  ;;  %6791 = vmatpush.msrb.mxu3 %v6653_v41 }
0x2d3d   :  { %6880 = vmatpush.msrb.mxu2 %v6653_v41  ;;  %6821 = vmatpush.msra.mxu0 %v6653_v41 }
0x2d3e   :  { %6851 = vmatpush.msra.mxu1 %v6652_v15  ;;  %6792 = vmatpush.msrb.mxu3 %v6652_v15 }
0x2d3f   :  { %6881 = vmatpush.msrb.mxu2 %v6652_v15  ;;  %6822 = vmatpush.msra.mxu0 %v6652_v15 }
0x2d40   :  { %6852 = vmatpush.msra.mxu1 %v6651_v0  ;;  %6793 = vmatpush.msrb.mxu3 %v6651_v0 }
0x2d41   :  { %6882 = vmatpush.msrb.mxu2 %v6651_v0  ;;  %6823 = vmatpush.msra.mxu0 %v6651_v0 }
0x2d42   :  { %6853 = vmatpush.msra.mxu1 %v6650_v40  ;;  %6794 = vmatpush.msrb.mxu3 %v6650_v40 }
0x2d43   :  { %6883 = vmatpush.msrb.mxu2 %v6650_v40  ;;  %6824 = vmatpush.msra.mxu0 %v6650_v40 }
0x2d9d   :  { %v6508_v25 = vpop.f32.mrf.mxu0 }
0x2d9e   :  { %v6528_v8 = vpop.f32.mrf.mxu1  ;;  %v6635_v58 = vperm.slane %v6508_v25, 0 }
0x2d9f   :  { %v6636_v28 = vperm.slane %v6528_v8, 0 }
0x2da0   :  { %v6639_v56 = vmul.f32 %v12889_v38, %v6635_v58  ;;  %v7725_v38 = vld [vmem:[#allocation4 + $0x10] sm:$0xff] }
0x2da1   :  { %v6640_v18 = vmul.f32 %v7725_v38, %v6636_v28 }
0x2da3   :  { %v6488_v22 = vpop.f32.mrf.mxu3 }
0x2da4   :  { %v6548_v27 = vpop.f32.mrf.mxu2  ;;  %v6634_v53 = vperm.slane %v6488_v22, 0 }
0x2da5   :  { %v6591_v35 = vpop.f32.mrf.mxu0  ;;  %v6637_v57 = vperm.slane %v6548_v27, 0 }
0x2da6   :  { %v6643_v9 = vperm.slane %v6591_v35, 0  ;;  %v6611_v45 = vpop.f32.mrf.mxu1  ;;  %v6638_v30 = vmul.f32 %v12884_v50, %v6634_v53 }
0x2da7   :  { %v6644_v60 = vperm.slane %v6611_v45, 0  ;;  %v6641_v33 = vmul.f32 %v6637_v57, %v12185_v14 }
0x2da8   :  { %v6647_v54 = vadd.f32 %v6643_v9, %v6639_v56 }
0x2da9   :  { %v6648_v6 = vadd.f32 %v6644_v60, %v6640_v18 }
0x2daa   :  { %6746 = vrot.lane.b32.xlu0 %v6647_v54, %s7752_s27  ;;  %7198 = vmatmul.msk.f32.vlgmr.msrb.gmra.mxu1 %vm14319_vm9, %v6647_v54 }
0x2dab   :  { %v6571_v24 = vpop.f32.mrf.mxu3 }
0x2dac   :  { %v6642_v44 = vperm.slane %v6571_v24, 0  ;;  %v6631_v52 = vpop.f32.mrf.mxu2 }
0x2dad   :  { %v6645_v46 = vperm.slane %v6631_v52, 0 }
0x2dae   :  { %v6646_v11 = vadd.f32 %v6642_v44, %v6638_v30 }
0x2daf   :  { %v6649_v21 = vadd.f32 %v6645_v46, %v6641_v33 }
0x2db0   :  { %6687 = vrot.lane.b32.xlu1 %v6646_v11, %s7752_s27  ;;  %7196 = vmatmul.msk.f32.vlgmr.msra.gmra.mxu3 %vm14320_vm8, %v6646_v11 }
0x2db1   :  { %6864 = vrot.lane.b32.xlu2 %v6649_v21, %s7752_s27 }
0x2db2   :  { %6805 = vrot.lane.b32.xlu0 %v6648_v6, %s7752_s27  ;;  %7202 = vmatmul.msk.f32.vlgmr.msra.gmra.mxu1 %vm14321_vm2, %v6649_v21 }
0x2db8   :  { %7200 = vmatmul.msk.f32.vlgmr.msrb.gmra.mxu3 %vm14322_vm11, %v6648_v6 }
0x2e0b   :  { %v6865_v37 = vpop.permute.xlu2 %6864 }
0x2e1c   :  { %v6747_v50 = vpop.permute.xlu0 %6746 }
0x2e1d   :  { %7199 = vmatmul.msk.f32.vlgmr.msra.gmra.mxu2 %vm14323_vm12, %v6747_v50 }
0x2e22   :  { %v6688_v14 = vpop.permute.xlu1 %6687 }
0x2e23   :  { %7197 = vmatmul.msk.f32.vlgmr.msrb.gmra.mxu0 %vm14324_vm6, %v6688_v14 }
0x2e24   :  { %v6806_v10 = vpop.permute.xlu0 %6805 }
0x2e25   :  { %7203 = vmatmul.msk.f32.vlgmr.msrb.gmra.mxu2 %vm14325_vm0, %v6865_v37 }
0x2e27   :  { %v6737_v55 = vpop.f32.mrf.mxu1 }
0x2e28   :  { %v6738_v26 = vadd.f32 %v7220_v47, %v6737_v55 }
0x2e2a   :  { %6741 = vrot.lane.b32.xlu2 %v6738_v26, %s7753_s30  ;;  %s7760_s30 = smov 80  }
0x2e2b   :  { %7201 = vmatmul.msk.f32.vlgmr.msra.gmra.mxu0 %vm14326_vm14, %v6806_v10 }
0x2e2f   :  { %v6855_v5 = vpop.f32.mrf.mxu1 }
0x2e30   :  { %v6856_v51 = vadd.f32 %v7220_v47, %v6855_v5 }
0x2e33   :  { %v6682_v32 = vpop.f32.mrf.mxu3 }
0x2e34   :  { %v6683_v48 = vadd.f32 %v7220_v47, %v6682_v32 }
0x2e36   :  { %6686 = vst.msk [vmem:[#allocation5] sm:$0xff] %vm6685_vm13, %v6683_v48 }
0x2e3b   :  { %v6796_v62 = vpop.f32.mrf.mxu3 }
0x2e3c   :  { %v6797_v49 = vadd.f32 %v7220_v47, %v6796_v62 }
0x2e3e   :  { %6800 = vrot.lane.b32.xlu1 %v6797_v49, %s7752_s27  ;;  %s7762_s27 = smov [#allocation5]  }
0x2e84   :  { %v6742_v19 = vpop.permute.xlu2 %6741 }
0x2ea0   :  { %v6708_v2 = vpop.f32.mrf.mxu0  ;;  %v6767_v23 = vpop.f32.mrf.mxu2 }
0x2ea1   :  { %v6709_v3 = vadd.f32 %v7220_v47, %v6708_v2  ;;  %v6768_v13 = vadd.f32 %v7220_v47, %v6767_v23 }
0x2ea3   :  { %6771 = vrot.lane.b32.xlu0 %v6768_v13, %s7758_s7  ;;  %6712 = vrot.lane.b32.xlu1 %v6709_v3, %s7759_s13 }
0x2ea8   :  { %v6826_v36 = vpop.f32.mrf.mxu0  ;;  %v6885_v7 = vpop.f32.mrf.mxu2 }
0x2ea9   :  { %v6827_v43 = vadd.f32 %v7220_v47, %v6826_v36  ;;  %v6886_v34 = vadd.f32 %v7220_v47, %v6885_v7 }
0x2eab   :  { %6859 = vrot.lane.b32.xlu0 %v6856_v51, %s7755_s10  ;;  %6830 = vrot.lane.b32.xlu2 %v6827_v43, %s7760_s30  ;;  %s6899_s10 = sshll.u32 %s7762_s27, 4  ;;  %s6900_s10 = int_to_ptr.vmem [resolvable:$true] %s6899_s10 }
0x2eac   :  { %6889 = vrot.lane.b32.xlu1 %v6886_v34, %s7761_s28 }
0x2eb0   :  { %v6801_v61 = vpop.permute.xlu1 %6800 }
0x2f05   :  { %v6831_v59 = vpop.permute.xlu2 %6830 }
0x2f15   :  { %v6772_v29 = vpop.permute.xlu0 %6771  ;;  %v6713_v1 = vpop.permute.xlu1 %6712 }
0x2f16   :  { %6716 = vst.msk [vmem:[#allocation5] sm:$0xff] %vm6715_vm1, %v6713_v1 }
0x2f17   :  { %6745 = vst.msk [vmem:[#allocation5] sm:$0xff] %vm6744_vm10, %v6742_v19 }
0x2f18   :  { %6775 = vst.msk [vmem:[#allocation5] sm:$0xff] %vm6774_vm5, %v6772_v29 }
0x2f19   :  { %6804 = vst.msk [vmem:[#allocation5] sm:$0xff] %vm6803_vm15, %v6801_v61 }
0x2f1a   :  { %6834 = vst.msk [vmem:[#allocation5] sm:$0xff] %vm6833_vm4, %v6831_v59 }
0x2f1d   :  { %v6860_v12 = vpop.permute.xlu0 %6859 }
0x2f1e   :  { %6863 = vst.msk [vmem:[#allocation5] sm:$0xff] %vm6862_vm7, %v6860_v12  ;;  %v6890_v17 = vpop.permute.xlu1 %6889 }
0x2f1f   :  { %6893 = vst.msk [vmem:[#allocation5] sm:$0xff] %vm6892_vm3, %v6890_v17 }
0x2f20   :  { %6904 = dma.vmem_to_hbm [thread:$0]  %s6900_s10, 128, %s6902_s3, [#allocation6]  }
0x2f21   :  { %7750 = dma.done.wait [#allocation6], 128  }
0x2f22   :  { %7751 = vsyncadd [#allocation6], 4294967168 }
0x2f23   :  { %6909 = vsyncpa [#allocation6], 1 }

</bundles_post_ra>
